<compile_context>
chip_gen: v7x
topology: tpu7x:2x2x1
jax: 0.10.0
libtpu: 0.0.40
codegen_flags: <defaults>
</compile_context>

<pallas_src>
import functools
import math

import jax
import jax.numpy as jnp
from jax.experimental import pallas as pl
from jax.experimental.pallas import tpu as pltpu


# ---------------------------------------------------------------------------
# Mask construction (JAX version of EpiXTrans.gen_mask)
# ---------------------------------------------------------------------------
def _gen_mask(v, w, maxdisp=2, neg=-1e30):
    """(v*w, v*w) additive mask: 0 where |ii-i|*maxdisp >= |jj-j|, else `neg` (≡ -inf)."""
    iv = jnp.arange(v)
    jw = jnp.arange(w)
    di = jnp.abs(iv[:, None, None, None] - iv[None, None, :, None])   # (v,1,v,1)
    dj = jnp.abs(jw[None, :, None, None] - jw[None, None, None, :])   # (1,w,1,w)
    allowed = (di * maxdisp) >= dj                                     # (v,w,v,w)
    return jnp.where(allowed, 0.0, neg).reshape(v * w, v * w).astype(jnp.float32)


# ---------------------------------------------------------------------------
# Pallas kernel: full EpiXTrans block for a tile of TB batch elements (R = TB*S rows)
# ---------------------------------------------------------------------------
def _epixt_kernel(x_ref, mask_ref, win_ref, g1_ref, b1_ref,
                  wqk_ref, wv_ref, wo_ref, g2_ref, b2_ref,
                  w1_ref, w2_ref, wout_ref, o_ref,
                  *, TB, S, C, E, H, HD, compute_dtype):
    R = TB * S
    cdt = compute_dtype

    def mm(a, w_ref):
        # Weights already stored in compute dtype; activations cast at the call site.
        return jnp.dot(a.astype(cdt), w_ref[...], preferred_element_type=jnp.float32)

    def layernorm(t, g_ref, b_ref):
        mu = jnp.mean(t, axis=-1, keepdims=True)
        xc = t - mu
        var = jnp.mean(xc * xc, axis=-1, keepdims=True)
        return xc * jax.lax.rsqrt(var + 1e-5) * g_ref[...] + b_ref[...]

    # ---- linear_in (x_ref is already the (R, C) matmul-ready slab) ----
    x = mm(x_ref[...], win_ref)                                          # (R, E)

    # ---- pre-attention LayerNorm (q/k from normed tokens, v from raw tokens) ----
    xn = layernorm(x, g1_ref, b1_ref)

    # ---- fused q/k projection (scale folded into Wq) + v projection ----
    qk = mm(xn, wqk_ref)                                                 # (R, 2E)
    v = mm(x, wv_ref)                                                    # (R, E)

    def split_heads(t):
        # (R, E) -> (H*TB, S, HD), head-major along the batch axis.
        # Only leading-dim reshapes + static lane slices + leading-dim concat.
        t3 = t.reshape(TB, S, E)
        return jnp.concatenate(
            [t3[:, :, h * HD:(h + 1) * HD] for h in range(H)], axis=0)

    q_bh = split_heads(qk[:, :E])                                        # (H*TB, S, HD)
    k_bh = split_heads(qk[:, E:])
    v_bh = split_heads(v)

    # ---- single batched attention pass over all heads ----
    s = jnp.einsum("bqd,bkd->bqk", q_bh.astype(cdt), k_bh.astype(cdt),
                   preferred_element_type=jnp.float32)                  # (H*TB, S, S)
    s = s + mask_ref[...][None, :, :]
    m = jnp.max(s, axis=-1, keepdims=True)
    p = jnp.exp(s - m)
    l = jnp.sum(p, axis=-1, keepdims=True)
    p = p * pl.reciprocal(l, approx=False)
    ctx = jnp.einsum("bqk,bkd->bqd", p.astype(cdt), v_bh.astype(cdt),
                     preferred_element_type=jnp.float32)                 # (H*TB, S, HD)

    # merge heads back to (R, E), head-major along the embedding dim (PyTorch layout)
    ctx_flat = jnp.concatenate(
        [ctx[h * TB:(h + 1) * TB].reshape(R, HD) for h in range(H)], axis=-1)
    x = x + mm(ctx_flat, wo_ref)                                         # residual 1

    # ---- feed-forward: LayerNorm -> Linear -> ReLU -> Linear ----
    y = layernorm(x, g2_ref, b2_ref)
    y = jnp.maximum(mm(y, w1_ref), 0.0)                                  # (R, 2E)
    x = x + mm(y, w2_ref)                                                # residual 2

    # ---- linear_out ----
    o_ref[...] = mm(x, wout_ref).astype(o_ref.dtype)                     # (R, C)


# ---------------------------------------------------------------------------
# Tile selection / VMEM sizing helpers
# ---------------------------------------------------------------------------
def _num_tensorcores():
    try:
        return max(1, int(getattr(jax.devices()[0], "num_cores", 1)))
    except Exception:
        return 1


def _choose_batch_tile(N, S, max_rows=2048, min_grid=1):
    """Largest divisor TB of N with TB*S <= max_rows and TB*S a sublane multiple.

    Grid length >= min_grid is only preferred (not required), so single-TensorCore
    chips get the largest tile (grid may be length 1)."""
    divs = [d for d in range(1, N + 1)
            if N % d == 0 and d * S <= max_rows and ((d * S) % 8 == 0 or d == N)]
    if not divs:
        return N
    pref = [d for d in divs if N // d >= min_grid]
    return max(pref) if pref else max(divs)


def _vmem_limit_bytes(TB, S, C, E, H):
    """Rough per-step VMEM estimate (lane padding + double buffering), 2x margin,
    clamped so it also fits v7x's 64 MiB per-core VMEM."""
    R, BH, f = TB * S, TB * H, 4
    lane = lambda n: max(128, ((n + 127) // 128) * 128)
    io = 2 * 2 * R * lane(C) * f                                   # in/out tiles, dbl-buffered
    wts = 2 * f * (C * lane(E) + E * lane(2 * E) + 2 * E * lane(E)
                   + E * lane(2 * E) + 2 * E * lane(E) + E * lane(C)
                   + 4 * lane(E) + S * lane(S))
    act = f * (6 * R * lane(E) + 2 * R * lane(2 * E)
               + 3 * BH * S * lane(max(1, E // H)) + 3 * BH * S * lane(S))
    est = io + wts + act
    return int(min(max(2 * est, 32 * 2 ** 20), 56 * 2 ** 20))


# ---------------------------------------------------------------------------
# Wrapper: layout plumbing + pallas_call
# ---------------------------------------------------------------------------
def epixtrans_pallas(buffer, weights, num_heads, *, max_tile_rows=2048,
                     compute_dtype=jnp.float32):
    """buffer: (b, c, u, v, h, w) float32. Returns same shape (EpiXTrans.forward)."""
    B, C, U, V, Hs, W = buffer.shape
    S = V * W
    N = B * U * Hs
    E = weights["win"].shape[0]
    H = num_heads
    assert E % H == 0
    HD = E // H
    scale = 1.0 / math.sqrt(HD)

    # tokens batch-major and matmul-ready: (N*S, C), row = flat(b, u, h, v, w)
    tok = jnp.transpose(buffer, (0, 2, 4, 3, 5, 1)).reshape(N * S, C).astype(jnp.float32)

    mask = _gen_mask(V, W, maxdisp=2)                                    # (S, S), f32

    # ---- weight prep (pre-transposed so every kernel matmul is x @ W) ----
    f32 = jnp.float32
    cdt = compute_dtype
    win_t = weights["win"].T.astype(cdt)                                 # (C, E)
    Wq, Wk, Wv = jnp.split(weights["in_proj"].astype(f32), 3, axis=0)    # each (E, E)
    wqk_t = jnp.concatenate([(Wq * scale).T, Wk.T], axis=1).astype(cdt)  # (E, 2E), scale folded
    wv_t = Wv.T.astype(cdt)                                              # (E, E)
    wo_t = weights["wo"].T.astype(cdt)                                   # (E, E)
    w1_t = weights["w1"].T.astype(cdt)                                   # (E, 2E)
    w2_t = weights["w2"].T.astype(cdt)                                   # (2E, E)
    wout_t = weights["wout"].T.astype(cdt)                               # (E, C)
    g1 = weights["g1"].reshape(1, E).astype(f32)
    b1 = weights["b1"].reshape(1, E).astype(f32)
    g2 = weights["g2"].reshape(1, E).astype(f32)
    b2 = weights["b2"].reshape(1, E).astype(f32)

    TB = _choose_batch_tile(N, S, max_tile_rows, min_grid=_num_tensorcores())
    R = TB * S
    grid = (N // TB,)

    kernel = functools.partial(_epixt_kernel, TB=TB, S=S, C=C, E=E, H=H, HD=HD,
                               compute_dtype=cdt)

    out = pl.pallas_call(
        kernel,
        out_shape=jax.ShapeDtypeStruct((N * S, C), jnp.float32),
        grid_spec=pltpu.PrefetchScalarGridSpec(
            num_scalar_prefetch=0,
            grid=grid,
            in_specs=[
                pl.BlockSpec((R, C), lambda i: (i, 0)),         # tokens (tiled, matmul-ready)
                pl.BlockSpec((S, S), lambda i: (0, 0)),         # attn mask (resident)
                pl.BlockSpec((C, E), lambda i: (0, 0)),         # linear_in^T
                pl.BlockSpec((1, E), lambda i: (0, 0)),         # norm gamma
                pl.BlockSpec((1, E), lambda i: (0, 0)),         # norm beta
                pl.BlockSpec((E, 2 * E), lambda i: (0, 0)),     # fused [Wq*scale | Wk]^T
                pl.BlockSpec((E, E), lambda i: (0, 0)),         # Wv^T
                pl.BlockSpec((E, E), lambda i: (0, 0)),         # out_proj^T
                pl.BlockSpec((1, E), lambda i: (0, 0)),         # ffn norm gamma
                pl.BlockSpec((1, E), lambda i: (0, 0)),         # ffn norm beta
                pl.BlockSpec((E, 2 * E), lambda i: (0, 0)),     # ffn W1^T
                pl.BlockSpec((2 * E, E), lambda i: (0, 0)),     # ffn W2^T
                pl.BlockSpec((E, C), lambda i: (0, 0)),         # linear_out^T
            ],
            out_specs=pl.BlockSpec((R, C), lambda i: (i, 0)),
        ),
        compiler_params=pltpu.CompilerParams(
            dimension_semantics=("parallel",),
            vmem_limit_bytes=_vmem_limit_bytes(TB, S, C, E, H),
        ),
    )(tok, mask, win_t, g1, b1, wqk_t, wv_t, wo_t, g2, b2, w1_t, w2_t, wout_t)

    # (N*S, C) -> (b, u, h, v, w, c) -> (b, c, u, v, h, w)
    return out.reshape(B, U, Hs, V, W, C).transpose(0, 5, 1, 3, 2, 4)


# ---------------------------------------------------------------------------
# Pure-JAX reference of the PyTorch forward (eval mode), for verification
# ---------------------------------------------------------------------------
def epixtrans_ref(buffer, weights, num_heads):
    B, C, U, V, Hs, W = buffer.shape
    S = V * W
    N = B * U * Hs
    E = weights["win"].shape[0]
    H = num_heads
    HD = E // H
    mask = _gen_mask(V, W, maxdisp=2)

    tok = jnp.transpose(buffer, (3, 5, 0, 2, 4, 1)).reshape(S, N, C).astype(jnp.float32)

    def ln(t, g, b):
        mu = jnp.mean(t, -1, keepdims=True)
        xc = t - mu
        var = jnp.mean(xc * xc, -1, keepdims=True)
        return xc * jax.lax.rsqrt(var + 1e-5) * g + b

    x = tok @ weights["win"].T                                           # (S, N, E)
    xn = ln(x, weights["g1"], weights["b1"])

    Wq, Wk, Wv = jnp.split(weights["in_proj"], 3, axis=0)
    q = (xn @ Wq.T) * (1.0 / math.sqrt(HD))
    k = xn @ Wk.T
    v = x @ Wv.T                                                         # value = raw tokens

    def heads(t):  # (S, N, E) -> (N*H, S, HD)
        return t.reshape(S, N * H, HD).transpose(1, 0, 2)

    qh, kh, vh = heads(q), heads(k), heads(v)
    sc = jnp.einsum("nqd,nkd->nqk", qh, kh) + mask[None]
    p = jnp.exp(sc - jnp.max(sc, -1, keepdims=True))
    attn = p / jnp.sum(p, -1, keepdims=True)
    ctx = jnp.einsum("nqk,nkd->nqd", attn, vh)                           # (N*H, S, HD)
    ctx = ctx.transpose(1, 0, 2).reshape(S, N, E)
    x = x + ctx @ weights["wo"].T                                        # residual 1

    y = ln(x, weights["g2"], weights["b2"])
    y = jnp.maximum(y @ weights["w1"].T, 0.0)
    y = y @ weights["w2"].T
    x = x + y                                                            # residual 2

    out = x @ weights["wout"].T                                          # (S, N, C)
    return out.reshape(V, W, B, U, Hs, C).transpose(2, 5, 3, 0, 4, 1)


if __name__ == "__main__":
    # Small shapes consistent with the module: buffer (b, c, u, v, h, w)
    B, C, U, V, Hs, W = 2, 4, 2, 4, 4, 4
    E, H = 32, 4
    MHSA_params = {"num_heads": H, "dropout": 0.0}

    key = jax.random.PRNGKey(0)
    keys = jax.random.split(key, 7)

    def uni(k, shape, fan_in):
        bound = 1.0 / math.sqrt(fan_in)
        return jax.random.uniform(k, shape, jnp.float32, -bound, bound)

    buffer = jax.random.normal(keys[0], (B, C, U, V, Hs, W), jnp.float32)
    weights = {
        "win": uni(keys[1], (E, C), C),            # linear_in.weight  (E, C)
        "g1": jnp.ones((E,), jnp.float32),         # norm.weight
        "b1": jnp.zeros((E,), jnp.float32),        # norm.bias
        "in_proj": uni(keys[2], (3 * E, E), E),    # attention.in_proj_weight
        "wo": uni(keys[3], (E, E), E),             # attention.out_proj.weight
        "g2": jnp.ones((E,), jnp.float32),         # feed_forward LayerNorm weight
        "b2": jnp.zeros((E,), jnp.float32),        # feed_forward LayerNorm bias
        "w1": uni(keys[4], (2 * E, E), E),         # feed_forward Linear1 weight
        "w2": uni(keys[5], (E, 2 * E), 2 * E),     # feed_forward Linear2 weight
        "wout": uni(keys[6], (C, E), E),           # linear_out.weight (C, E)
    }

    ref = jax.block_until_ready(epixtrans_ref(buffer, weights, MHSA_params["num_heads"]))

    # f32 matmul operands: strict check vs f32 reference.
    out = jax.block_until_ready(epixtrans_pallas(buffer, weights, MHSA_params["num_heads"]))
    assert out.shape == buffer.shape
    err = float(jnp.max(jnp.abs(out - ref)))
    assert jnp.allclose(out, ref, atol=1e-4, rtol=1e-4), f"f32 mismatch vs reference: {err}"

    # bf16 matmul operands (v6e/v7x MXU throughput path): relaxed tolerance.
    out_bf16 = jax.block_until_ready(
        epixtrans_pallas(buffer, weights, MHSA_params["num_heads"],
                         compute_dtype=jnp.bfloat16))
    err_bf16 = float(jnp.max(jnp.abs(out_bf16 - ref)))
    assert jnp.allclose(out_bf16, ref, atol=5e-2, rtol=5e-2), \
        f"bf16 mismatch vs reference: {err_bf16}"

    print("KERNEL_OK")
</pallas_src>

<mosaic_0001>
module attributes {stable_mosaic.version = 11 : i64} {
  func.func @_epixt_kernel(%arg0: i32, %arg1: memref<256x4xf32, #tpu.memory_space<vmem>>, %arg2: memref<16x16xf32, #tpu.memory_space<vmem>>, %arg3: memref<4x32xf32, #tpu.memory_space<vmem>>, %arg4: memref<1x32xf32, #tpu.memory_space<vmem>>, %arg5: memref<1x32xf32, #tpu.memory_space<vmem>>, %arg6: memref<32x64xf32, #tpu.memory_space<vmem>>, %arg7: memref<32x32xf32, #tpu.memory_space<vmem>>, %arg8: memref<32x32xf32, #tpu.memory_space<vmem>>, %arg9: memref<1x32xf32, #tpu.memory_space<vmem>>, %arg10: memref<1x32xf32, #tpu.memory_space<vmem>>, %arg11: memref<32x64xf32, #tpu.memory_space<vmem>>, %arg12: memref<64x32xf32, #tpu.memory_space<vmem>>, %arg13: memref<32x4xf32, #tpu.memory_space<vmem>>, %arg14: memref<256x4xf32, #tpu.memory_space<vmem>>) attributes {dimension_semantics = [#tpu.dimension_semantics<parallel>], iteration_bounds = array<i64: 1>, scalar_prefetch = 0 : i64, scratch_operands = 0 : i64, tpu.core_type = #tpu.core_type<tc>, window_params = [{transform_indices = @transform_0, window_bounds = array<i64: 256, 4>}, {pipeline_mode = #tpu.pipeline_mode<synchronous>, transform_indices = @transform_1, window_bounds = array<i64: 16, 16>}, {pipeline_mode = #tpu.pipeline_mode<synchronous>, transform_indices = @transform_2, window_bounds = array<i64: 4, 32>}, {pipeline_mode = #tpu.pipeline_mode<synchronous>, transform_indices = @transform_3, window_bounds = array<i64: 1, 32>}, {pipeline_mode = #tpu.pipeline_mode<synchronous>, transform_indices = @transform_4, window_bounds = array<i64: 1, 32>}, {pipeline_mode = #tpu.pipeline_mode<synchronous>, transform_indices = @transform_5, window_bounds = array<i64: 32, 64>}, {pipeline_mode = #tpu.pipeline_mode<synchronous>, transform_indices = @transform_6, window_bounds = array<i64: 32, 32>}, {pipeline_mode = #tpu.pipeline_mode<synchronous>, transform_indices = @transform_7, window_bounds = array<i64: 32, 32>}, {pipeline_mode = #tpu.pipeline_mode<synchronous>, transform_indices = @transform_8, window_bounds = array<i64: 1, 32>}, {pipeline_mode = #tpu.pipeline_mode<synchronous>, transform_indices = @transform_9, window_bounds = array<i64: 1, 32>}, {pipeline_mode = #tpu.pipeline_mode<synchronous>, transform_indices = @transform_10, window_bounds = array<i64: 32, 64>}, {pipeline_mode = #tpu.pipeline_mode<synchronous>, transform_indices = @transform_11, window_bounds = array<i64: 64, 32>}, {pipeline_mode = #tpu.pipeline_mode<synchronous>, transform_indices = @transform_12, window_bounds = array<i64: 32, 4>}, {transform_indices = @transform_13, window_bounds = array<i64: 256, 4>}]} {
    %c0 = arith.constant 0 : index
    %c0_0 = arith.constant 0 : index
    %0 = vector.load %arg1[%c0, %c0_0] : memref<256x4xf32, #tpu.memory_space<vmem>>, vector<256x4xf32>
    %c0_1 = arith.constant 0 : index
    %c0_2 = arith.constant 0 : index
    %1 = vector.load %arg3[%c0_1, %c0_2] : memref<4x32xf32, #tpu.memory_space<vmem>>, vector<4x32xf32>
    %cst = arith.constant dense<0.000000e+00> : vector<256x32xf32>
    %2 = tpu.matmul %0, %1, %cst {dimension_numbers = #tpu.dot_dimension_numbers<[1], [0], [0], [1], [0, 0, 1, 1], [], []>} : vector<256x4xf32>, vector<4x32xf32>, vector<256x32xf32> -> vector<256x32xf32>
    %cst_3 = arith.constant dense<0.000000e+00> : vector<256xf32>
    %3 = vector.multi_reduction <add>, %2, %cst_3 [1] : vector<256x32xf32> to vector<256xf32>
    %4 = vector.shape_cast %3 : vector<256xf32> to vector<256x1xf32>
    %cst_4 = arith.constant 3.200000e+01 : f32
    %5 = vector.broadcast %cst_4 : f32 to vector<256x1xf32>
    %6 = arith.divf %4, %5 : vector<256x1xf32>
    %7 = vector.broadcast %6 : vector<256x1xf32> to vector<256x32xf32>
    %8 = arith.subf %2, %7 : vector<256x32xf32>
    %9 = arith.mulf %8, %8 : vector<256x32xf32>
    %cst_5 = arith.constant dense<0.000000e+00> : vector<256xf32>
    %10 = vector.multi_reduction <add>, %9, %cst_5 [1] : vector<256x32xf32> to vector<256xf32>
    %11 = vector.shape_cast %10 : vector<256xf32> to vector<256x1xf32>
    %cst_6 = arith.constant 3.200000e+01 : f32
    %12 = vector.broadcast %cst_6 : f32 to vector<256x1xf32>
    %13 = arith.divf %11, %12 : vector<256x1xf32>
    %cst_7 = arith.constant 9.99999974E-6 : f32
    %14 = vector.broadcast %cst_7 : f32 to vector<256x1xf32>
    %15 = arith.addf %13, %14 : vector<256x1xf32>
    %16 = math.rsqrt %15 : vector<256x1xf32>
    %17 = vector.broadcast %16 : vector<256x1xf32> to vector<256x32xf32>
    %18 = arith.mulf %8, %17 : vector<256x32xf32>
    %c0_8 = arith.constant 0 : index
    %c0_9 = arith.constant 0 : index
    %19 = vector.load %arg4[%c0_8, %c0_9] : memref<1x32xf32, #tpu.memory_space<vmem>>, vector<1x32xf32>
    %20 = vector.broadcast %19 : vector<1x32xf32> to vector<256x32xf32>
    %21 = arith.mulf %18, %20 : vector<256x32xf32>
    %c0_10 = arith.constant 0 : index
    %c0_11 = arith.constant 0 : index
    %22 = vector.load %arg5[%c0_10, %c0_11] : memref<1x32xf32, #tpu.memory_space<vmem>>, vector<1x32xf32>
    %23 = vector.broadcast %22 : vector<1x32xf32> to vector<256x32xf32>
    %24 = arith.addf %21, %23 : vector<256x32xf32>
    %c0_12 = arith.constant 0 : index
    %c0_13 = arith.constant 0 : index
    %25 = vector.load %arg6[%c0_12, %c0_13] : memref<32x64xf32, #tpu.memory_space<vmem>>, vector<32x64xf32>
    %cst_14 = arith.constant dense<0.000000e+00> : vector<256x64xf32>
    %26 = tpu.matmul %24, %25, %cst_14 {dimension_numbers = #tpu.dot_dimension_numbers<[1], [0], [0], [1], [0, 0, 1, 1], [], []>} : vector<256x32xf32>, vector<32x64xf32>, vector<256x64xf32> -> vector<256x64xf32>
    %c0_15 = arith.constant 0 : index
    %c0_16 = arith.constant 0 : index
    %27 = vector.load %arg7[%c0_15, %c0_16] : memref<32x32xf32, #tpu.memory_space<vmem>>, vector<32x32xf32>
    %cst_17 = arith.constant dense<0.000000e+00> : vector<256x32xf32>
    %28 = tpu.matmul %2, %27, %cst_17 {dimension_numbers = #tpu.dot_dimension_numbers<[1], [0], [0], [1], [0, 0, 1, 1], [], []>} : vector<256x32xf32>, vector<32x32xf32>, vector<256x32xf32> -> vector<256x32xf32>
    %29 = vector.extract_strided_slice %26 {offsets = [0, 0], sizes = [256, 32], strides = [1, 1]} : vector<256x64xf32> to vector<256x32xf32>
    %30 = vector.shape_cast %29 : vector<256x32xf32> to vector<16x16x32xf32>
    %31 = vector.extract_strided_slice %30 {offsets = [0, 0, 0], sizes = [16, 16, 8], strides = [1, 1, 1]} : vector<16x16x32xf32> to vector<16x16x8xf32>
    %32 = vector.extract_strided_slice %30 {offsets = [0, 0, 8], sizes = [16, 16, 8], strides = [1, 1, 1]} : vector<16x16x32xf32> to vector<16x16x8xf32>
    %33 = vector.extract_strided_slice %30 {offsets = [0, 0, 16], sizes = [16, 16, 8], strides = [1, 1, 1]} : vector<16x16x32xf32> to vector<16x16x8xf32>
    %34 = vector.extract_strided_slice %30 {offsets = [0, 0, 24], sizes = [16, 16, 8], strides = [1, 1, 1]} : vector<16x16x32xf32> to vector<16x16x8xf32>
    %35 = tpu.concatenate %31, %32, %33, %34 in 0 : vector<16x16x8xf32>, vector<16x16x8xf32>, vector<16x16x8xf32>, vector<16x16x8xf32> -> vector<64x16x8xf32>
    %36 = vector.extract_strided_slice %26 {offsets = [0, 32], sizes = [256, 32], strides = [1, 1]} : vector<256x64xf32> to vector<256x32xf32>
    %37 = vector.shape_cast %36 : vector<256x32xf32> to vector<16x16x32xf32>
    %38 = vector.extract_strided_slice %37 {offsets = [0, 0, 0], sizes = [16, 16, 8], strides = [1, 1, 1]} : vector<16x16x32xf32> to vector<16x16x8xf32>
    %39 = vector.extract_strided_slice %37 {offsets = [0, 0, 8], sizes = [16, 16, 8], strides = [1, 1, 1]} : vector<16x16x32xf32> to vector<16x16x8xf32>
    %40 = vector.extract_strided_slice %37 {offsets = [0, 0, 16], sizes = [16, 16, 8], strides = [1, 1, 1]} : vector<16x16x32xf32> to vector<16x16x8xf32>
    %41 = vector.extract_strided_slice %37 {offsets = [0, 0, 24], sizes = [16, 16, 8], strides = [1, 1, 1]} : vector<16x16x32xf32> to vector<16x16x8xf32>
    %42 = tpu.concatenate %38, %39, %40, %41 in 0 : vector<16x16x8xf32>, vector<16x16x8xf32>, vector<16x16x8xf32>, vector<16x16x8xf32> -> vector<64x16x8xf32>
    %43 = vector.shape_cast %28 : vector<256x32xf32> to vector<16x16x32xf32>
    %44 = vector.extract_strided_slice %43 {offsets = [0, 0, 0], sizes = [16, 16, 8], strides = [1, 1, 1]} : vector<16x16x32xf32> to vector<16x16x8xf32>
    %45 = vector.extract_strided_slice %43 {offsets = [0, 0, 8], sizes = [16, 16, 8], strides = [1, 1, 1]} : vector<16x16x32xf32> to vector<16x16x8xf32>
    %46 = vector.extract_strided_slice %43 {offsets = [0, 0, 16], sizes = [16, 16, 8], strides = [1, 1, 1]} : vector<16x16x32xf32> to vector<16x16x8xf32>
    %47 = vector.extract_strided_slice %43 {offsets = [0, 0, 24], sizes = [16, 16, 8], strides = [1, 1, 1]} : vector<16x16x32xf32> to vector<16x16x8xf32>
    %48 = tpu.concatenate %44, %45, %46, %47 in 0 : vector<16x16x8xf32>, vector<16x16x8xf32>, vector<16x16x8xf32>, vector<16x16x8xf32> -> vector<64x16x8xf32>
    "tpu.trace_start"() <{level = 10 : i32, message = "bqd,bkd->bqk"}> : () -> ()
    %cst_18 = arith.constant dense<0.000000e+00> : vector<64x16x16xf32>
    %49 = tpu.matmul %35, %42, %cst_18 {dimension_numbers = #tpu.dot_dimension_numbers<[2], [2], [1], [1], [0, 0, 0, 1, 1, 1], [0], [0]>} : vector<64x16x8xf32>, vector<64x16x8xf32>, vector<64x16x16xf32> -> vector<64x16x16xf32>
    "tpu.trace_stop"() : () -> ()
    %c0_19 = arith.constant 0 : index
    %c0_20 = arith.constant 0 : index
    %50 = vector.load %arg2[%c0_19, %c0_20] : memref<16x16xf32, #tpu.memory_space<vmem>>, vector<16x16xf32>
    %51 = vector.shape_cast %50 : vector<16x16xf32> to vector<1x16x16xf32>
    %52 = vector.broadcast %51 : vector<1x16x16xf32> to vector<64x16x16xf32>
    %53 = arith.addf %49, %52 : vector<64x16x16xf32>
    %cst_21 = arith.constant dense<0xFF800000> : vector<64x16xf32>
    %54 = vector.multi_reduction <maximumf>, %53, %cst_21 [2] : vector<64x16x16xf32> to vector<64x16xf32>
    %55 = vector.shape_cast %54 : vector<64x16xf32> to vector<64x16x1xf32>
    %56 = vector.broadcast %55 : vector<64x16x1xf32> to vector<64x16x16xf32>
    %57 = arith.subf %53, %56 : vector<64x16x16xf32>
    %58 = math.exp %57 : vector<64x16x16xf32>
    %cst_22 = arith.constant dense<0.000000e+00> : vector<64x16xf32>
    %59 = vector.multi_reduction <add>, %58, %cst_22 [2] : vector<64x16x16xf32> to vector<64x16xf32>
    %60 = vector.shape_cast %59 : vector<64x16xf32> to vector<64x16x1xf32>
    %61 = tpu.reciprocal %60 : vector<64x16x1xf32> -> vector<64x16x1xf32>
    %62 = vector.broadcast %61 : vector<64x16x1xf32> to vector<64x16x16xf32>
    %63 = arith.mulf %58, %62 : vector<64x16x16xf32>
    "tpu.trace_start"() <{level = 10 : i32, message = "bqk,bkd->bqd"}> : () -> ()
    %cst_23 = arith.constant dense<0.000000e+00> : vector<64x16x8xf32>
    %64 = tpu.matmul %63, %48, %cst_23 {dimension_numbers = #tpu.dot_dimension_numbers<[2], [1], [1], [2], [0, 0, 0, 1, 1, 2], [0], [0]>} : vector<64x16x16xf32>, vector<64x16x8xf32>, vector<64x16x8xf32> -> vector<64x16x8xf32>
    "tpu.trace_stop"() : () -> ()
    %65 = vector.extract_strided_slice %64 {offsets = [0, 0, 0], sizes = [16, 16, 8], strides = [1, 1, 1]} : vector<64x16x8xf32> to vector<16x16x8xf32>
    %66 = vector.shape_cast %65 : vector<16x16x8xf32> to vector<256x8xf32>
    %67 = vector.extract_strided_slice %64 {offsets = [16, 0, 0], sizes = [16, 16, 8], strides = [1, 1, 1]} : vector<64x16x8xf32> to vector<16x16x8xf32>
    %68 = vector.shape_cast %67 : vector<16x16x8xf32> to vector<256x8xf32>
    %69 = vector.extract_strided_slice %64 {offsets = [32, 0, 0], sizes = [16, 16, 8], strides = [1, 1, 1]} : vector<64x16x8xf32> to vector<16x16x8xf32>
    %70 = vector.shape_cast %69 : vector<16x16x8xf32> to vector<256x8xf32>
    %71 = vector.extract_strided_slice %64 {offsets = [48, 0, 0], sizes = [16, 16, 8], strides = [1, 1, 1]} : vector<64x16x8xf32> to vector<16x16x8xf32>
    %72 = vector.shape_cast %71 : vector<16x16x8xf32> to vector<256x8xf32>
    %73 = tpu.concatenate %66, %68, %70, %72 in 1 : vector<256x8xf32>, vector<256x8xf32>, vector<256x8xf32>, vector<256x8xf32> -> vector<256x32xf32>
    %c0_24 = arith.constant 0 : index
    %c0_25 = arith.constant 0 : index
    %74 = vector.load %arg8[%c0_24, %c0_25] : memref<32x32xf32, #tpu.memory_space<vmem>>, vector<32x32xf32>
    %cst_26 = arith.constant dense<0.000000e+00> : vector<256x32xf32>
    %75 = tpu.matmul %73, %74, %cst_26 {dimension_numbers = #tpu.dot_dimension_numbers<[1], [0], [0], [1], [0, 0, 1, 1], [], []>} : vector<256x32xf32>, vector<32x32xf32>, vector<256x32xf32> -> vector<256x32xf32>
    %76 = arith.addf %2, %75 : vector<256x32xf32>
    %cst_27 = arith.constant dense<0.000000e+00> : vector<256xf32>
    %77 = vector.multi_reduction <add>, %76, %cst_27 [1] : vector<256x32xf32> to vector<256xf32>
    %78 = vector.shape_cast %77 : vector<256xf32> to vector<256x1xf32>
    %cst_28 = arith.constant 3.200000e+01 : f32
    %79 = vector.broadcast %cst_28 : f32 to vector<256x1xf32>
    %80 = arith.divf %78, %79 : vector<256x1xf32>
    %81 = vector.broadcast %80 : vector<256x1xf32> to vector<256x32xf32>
    %82 = arith.subf %76, %81 : vector<256x32xf32>
    %83 = arith.mulf %82, %82 : vector<256x32xf32>
    %cst_29 = arith.constant dense<0.000000e+00> : vector<256xf32>
    %84 = vector.multi_reduction <add>, %83, %cst_29 [1] : vector<256x32xf32> to vector<256xf32>
    %85 = vector.shape_cast %84 : vector<256xf32> to vector<256x1xf32>
    %cst_30 = arith.constant 3.200000e+01 : f32
    %86 = vector.broadcast %cst_30 : f32 to vector<256x1xf32>
    %87 = arith.divf %85, %86 : vector<256x1xf32>
    %cst_31 = arith.constant 9.99999974E-6 : f32
    %88 = vector.broadcast %cst_31 : f32 to vector<256x1xf32>
    %89 = arith.addf %87, %88 : vector<256x1xf32>
    %90 = math.rsqrt %89 : vector<256x1xf32>
    %91 = vector.broadcast %90 : vector<256x1xf32> to vector<256x32xf32>
    %92 = arith.mulf %82, %91 : vector<256x32xf32>
    %c0_32 = arith.constant 0 : index
    %c0_33 = arith.constant 0 : index
    %93 = vector.load %arg9[%c0_32, %c0_33] : memref<1x32xf32, #tpu.memory_space<vmem>>, vector<1x32xf32>
    %94 = vector.broadcast %93 : vector<1x32xf32> to vector<256x32xf32>
    %95 = arith.mulf %92, %94 : vector<256x32xf32>
    %c0_34 = arith.constant 0 : index
    %c0_35 = arith.constant 0 : index
    %96 = vector.load %arg10[%c0_34, %c0_35] : memref<1x32xf32, #tpu.memory_space<vmem>>, vector<1x32xf32>
    %97 = vector.broadcast %96 : vector<1x32xf32> to vector<256x32xf32>
    %98 = arith.addf %95, %97 : vector<256x32xf32>
    %c0_36 = arith.constant 0 : index
    %c0_37 = arith.constant 0 : index
    %99 = vector.load %arg11[%c0_36, %c0_37] : memref<32x64xf32, #tpu.memory_space<vmem>>, vector<32x64xf32>
    %cst_38 = arith.constant dense<0.000000e+00> : vector<256x64xf32>
    %100 = tpu.matmul %98, %99, %cst_38 {dimension_numbers = #tpu.dot_dimension_numbers<[1], [0], [0], [1], [0, 0, 1, 1], [], []>} : vector<256x32xf32>, vector<32x64xf32>, vector<256x64xf32> -> vector<256x64xf32>
    %cst_39 = arith.constant 0.000000e+00 : f32
    %101 = vector.broadcast %cst_39 : f32 to vector<256x64xf32>
    %102 = arith.maximumf %100, %101 : vector<256x64xf32>
    %c0_40 = arith.constant 0 : index
    %c0_41 = arith.constant 0 : index
    %103 = vector.load %arg12[%c0_40, %c0_41] : memref<64x32xf32, #tpu.memory_space<vmem>>, vector<64x32xf32>
    %cst_42 = arith.constant dense<0.000000e+00> : vector<256x32xf32>
    %104 = tpu.matmul %102, %103, %cst_42 {dimension_numbers = #tpu.dot_dimension_numbers<[1], [0], [0], [1], [0, 0, 1, 1], [], []>} : vector<256x64xf32>, vector<64x32xf32>, vector<256x32xf32> -> vector<256x32xf32>
    %105 = arith.addf %76, %104 : vector<256x32xf32>
    %c0_43 = arith.constant 0 : index
    %c0_44 = arith.constant 0 : index
    %106 = vector.load %arg13[%c0_43, %c0_44] : memref<32x4xf32, #tpu.memory_space<vmem>>, vector<32x4xf32>
    %cst_45 = arith.constant dense<0.000000e+00> : vector<256x4xf32>
    %107 = tpu.matmul %105, %106, %cst_45 {dimension_numbers = #tpu.dot_dimension_numbers<[1], [0], [0], [1], [0, 0, 1, 1], [], []>} : vector<256x32xf32>, vector<32x4xf32>, vector<256x4xf32> -> vector<256x4xf32>
    %c0_46 = arith.constant 0 : index
    %c0_47 = arith.constant 0 : index
    %108 = vector.load %arg14[%c0_46, %c0_47] : memref<256x4xf32, #tpu.memory_space<vmem>>, vector<256x4xf32>
    tpu.vector_store %arg14[%c0_46, %c0_47], %107 {strides = array<i32>} : memref<256x4xf32, #tpu.memory_space<vmem>>, vector<256x4xf32>,
    return
  }
  func.func @transform_0(%arg0: i32) -> (i32, i32) {
    %c0_i32 = arith.constant 0 : i32
    %c0_i32_0 = arith.constant 0 : i32
    return %arg0, %c0_i32 : i32, i32
  }
  func.func @transform_1(%arg0: i32) -> (i32, i32) {
    %c0_i32 = arith.constant 0 : i32
    %c0_i32_0 = arith.constant 0 : i32
    %c0_i32_1 = arith.constant 0 : i32
    return %c0_i32, %c0_i32_0 : i32, i32
  }
  func.func @transform_2(%arg0: i32) -> (i32, i32) {
    %c0_i32 = arith.constant 0 : i32
    %c0_i32_0 = arith.constant 0 : i32
    %c0_i32_1 = arith.constant 0 : i32
    return %c0_i32, %c0_i32_0 : i32, i32
  }
  func.func @transform_3(%arg0: i32) -> (i32, i32) {
    %c0_i32 = arith.constant 0 : i32
    %c0_i32_0 = arith.constant 0 : i32
    %c0_i32_1 = arith.constant 0 : i32
    return %c0_i32, %c0_i32_0 : i32, i32
  }
  func.func @transform_4(%arg0: i32) -> (i32, i32) {
    %c0_i32 = arith.constant 0 : i32
    %c0_i32_0 = arith.constant 0 : i32
    %c0_i32_1 = arith.constant 0 : i32
    return %c0_i32, %c0_i32_0 : i32, i32
  }
  func.func @transform_5(%arg0: i32) -> (i32, i32) {
    %c0_i32 = arith.constant 0 : i32
    %c0_i32_0 = arith.constant 0 : i32
    %c0_i32_1 = arith.constant 0 : i32
    return %c0_i32, %c0_i32_0 : i32, i32
  }
  func.func @transform_6(%arg0: i32) -> (i32, i32) {
    %c0_i32 = arith.constant 0 : i32
    %c0_i32_0 = arith.constant 0 : i32
    %c0_i32_1 = arith.constant 0 : i32
    return %c0_i32, %c0_i32_0 : i32, i32
  }
  func.func @transform_7(%arg0: i32) -> (i32, i32) {
    %c0_i32 = arith.constant 0 : i32
    %c0_i32_0 = arith.constant 0 : i32
    %c0_i32_1 = arith.constant 0 : i32
    return %c0_i32, %c0_i32_0 : i32, i32
  }
  func.func @transform_8(%arg0: i32) -> (i32, i32) {
    %c0_i32 = arith.constant 0 : i32
    %c0_i32_0 = arith.constant 0 : i32
    %c0_i32_1 = arith.constant 0 : i32
    return %c0_i32, %c0_i32_0 : i32, i32
  }
  func.func @transform_9(%arg0: i32) -> (i32, i32) {
    %c0_i32 = arith.constant 0 : i32
    %c0_i32_0 = arith.constant 0 : i32
    %c0_i32_1 = arith.constant 0 : i32
    return %c0_i32, %c0_i32_0 : i32, i32
  }
  func.func @transform_10(%arg0: i32) -> (i32, i32) {
    %c0_i32 = arith.constant 0 : i32
    %c0_i32_0 = arith.constant 0 : i32
    %c0_i32_1 = arith.constant 0 : i32
    return %c0_i32, %c0_i32_0 : i32, i32
  }
  func.func @transform_11(%arg0: i32) -> (i32, i32) {
    %c0_i32 = arith.constant 0 : i32
    %c0_i32_0 = arith.constant 0 : i32
    %c0_i32_1 = arith.constant 0 : i32
    return %c0_i32, %c0_i32_0 : i32, i32
  }
  func.func @transform_12(%arg0: i32) -> (i32, i32) {
    %c0_i32 = arith.constant 0 : i32
    %c0_i32_0 = arith.constant 0 : i32
    %c0_i32_1 = arith.constant 0 : i32
    return %c0_i32, %c0_i32_0 : i32, i32
  }
  func.func @transform_13(%arg0: i32) -> (i32, i32) {
    %c0_i32 = arith.constant 0 : i32
    %c0_i32_0 = arith.constant 0 : i32
    return %arg0, %c0_i32 : i32, i32
  }
}

</mosaic_0001>

<bundles_post_ra>
// kernel: tpu_custom_call.1
= control target key start
LH: loop header
LB: loop body
LE: loop exit
PB: predicated region body
PF: predicated region fallthrough
CT: control target
= control target key end

     0   :  { %vm174_vm0 = vcmask 1043456   ;;  %vm77_vm1 = vcmask 31744   ;;  %vm403_vm2 = vcmask 261120   ;;  %s21245_s14 = smov 120   ;;  %vm2099_vm3 = vcmask 64512   ;;  %s21249_s28 = smov 16   ;;  %s27075_s2 = inlined_call_operand.vmem [shape: f32[4,32], index: 2, kind: input, shape index: {}]   ;;  %s27076_s0 = inlined_call_operand.vmem [shape: f32[256,4], index: 0, kind: input, shape index: {}]   ;;  %s27077_s6 = inlined_call_operand.vmem [shape: f32[32,32], index: 6, kind: input, shape index: {}]   ;;  %s27078_s5 = inlined_call_operand.vmem [shape: f32[32,64], index: 5, kind: input, shape index: {}]   ;;  %s27079_s3 = inlined_call_operand.vmem [shape: f32[1,32], index: 3, kind: input, shape index: {}]   ;;  %s27080_s4 = inlined_call_operand.vmem [shape: f32[1,32], index: 4, kind: input, shape index: {}]   ;;  %s27081_s1 = inlined_call_operand.vmem [shape: f32[16,16], index: 1, kind: input, shape index: {}]   ;;  %s27082_s7 = inlined_call_operand.vmem [shape: f32[32,32], index: 7, kind: input, shape index: {}]   ;;  %s27083_s10 = inlined_call_operand.vmem [shape: f32[32,64], index: 10, kind: input, shape index: {}]   ;;  %s27084_s8 = inlined_call_operand.vmem [shape: f32[1,32], index: 8, kind: input, shape index: {}]   ;;  %s27085_s9 = inlined_call_operand.vmem [shape: f32[1,32], index: 9, kind: input, shape index: {}]   ;;  %s27086_s11 = inlined_call_operand.vmem [shape: f32[64,32], index: 11, kind: input, shape index: {}]   ;;  %s27087_s12 = inlined_call_operand.vmem [shape: f32[32,4], index: 12, kind: input, shape index: {}]   ;;  %s27088_s13 = inlined_call_operand.vmem [shape: f32[256,4], index: 13, kind: output, shape index: {}]  }
   0x1   :  { %v76_v0 = vld [vmem:[%s27075_s2] sm:$0xf]  ;;  %v45_v2 = vld [vmem:[%s27076_s0 + $0x8] sm:$0xff]  ;;  %v46_v3 = vld [vmem:[%s27076_s0 + $0x10] sm:$0xff]  ;;  %vm7664_vm5 = vcmask 130048   ;;  %s21250_s29 = smov 24  }
   0x2   :  { %v44_v1 = vld [vmem:[%s27076_s0] sm:$0xff]  ;;  %18047 = vmatprep.subr.msk.mxu0 %vm174_vm0, %v76_v0  ;;  %v47_v4 = vld [vmem:[%s27076_s0 + $0x18] sm:$0xff]  ;;  %v49_v6 = vld [vmem:[%s27076_s0 + $0x28] sm:$0xff]  ;;  %vm14705_vm6 = vcmask 195584   ;;  %vm15954_vm7 = vcmask 523264  }
   0x3   :  { %18049 = vmatprep.mubr.msk.f32.mxu0 %vm77_vm1, %v44_v1  ;;  %18048 = vmatpush3.msk.msra.mxu0 %vm174_vm0, %v76_v0  ;;  %v48_v5 = vld [vmem:[%s27076_s0 + $0x20] sm:$0xff]  ;;  %v50_v7 = vld [vmem:[%s27076_s0 + $0x30] sm:$0xff]  ;;  %v1225_v9 = vld [vmem:[%s27077_s6 + $0x8] sm:$0xff] }
   0x4   :  { %18050 = vmatmul.mubr.msk.f32.vlgmr.msra.gmra.mrb[0].mxu0 %vm77_vm1, %v45_v2  ;;  %v1224_v8 = vld [vmem:[%s27077_s6] sm:$0xff]  ;;  %v1226_v10 = vld [vmem:[%s27077_s6 + $0x10] sm:$0xff]  ;;  %v51_v11 = vld [vmem:[%s27076_s0 + $0x38] sm:$0xff] }
   0x5   :  { %18052 = vmatprep.mubr.msk.f32.mxu0 %vm77_vm1, %v46_v3  ;;  %v19345_v12 = vpack.c.bf16 %v1225_v9, %v1224_v8  ;;  %v1227_v13 = vld [vmem:[%s27077_s6 + $0x18] sm:$0xff]  ;;  %v52_v14 = vld [vmem:[%s27076_s0 + $0x40] sm:$0xff]  ;;  %v53_v16 = vld [vmem:[%s27076_s0 + $0x48] sm:$0xff] }
   0x6   :  { %v19349_v15 = vpack.c.bf16 %v1227_v13, %v1226_v10  ;;  %v54_v17 = vld [vmem:[%s27076_s0 + $0x50] sm:$0xff]  ;;  %v55_v18 = vld [vmem:[%s27076_s0 + $0x58] sm:$0xff]  ;;  %v56_v19 = vld [vmem:[%s27076_s0 + $0x60] sm:$0xff] }
   0x7   :  { %19346 = vmatprep.subr.bf16.mxu0 %v19345_v12  ;;  %v57_v20 = vld [vmem:[%s27076_s0 + $0x68] sm:$0xff]  ;;  %v58_v21 = vld [vmem:[%s27076_s0 + $0x70] sm:$0xff]  ;;  %v59_v22 = vld [vmem:[%s27076_s0 + $0x78] sm:$0xff] }
   0x8   :  { %18053 = vmatmul.mubr.msk.f32.gmra.mrb[2].mxu0 %vm77_vm1, %v47_v4  ;;  %v60_v23 = vld [vmem:[%s27076_s0 + $0x80] sm:$0xff]  ;;  %v61_v24 = vld [vmem:[%s27076_s0 + $0x88] sm:$0xff]  ;;  %v62_v25 = vld [vmem:[%s27076_s0 + $0x90] sm:$0xff] }
   0x9   :  { %18055 = vmatprep.mubr.msk.f32.mxu0 %vm77_vm1, %v48_v5  ;;  %19348 = vmatpush3.bf16.msra.mxu0 %v19345_v12  ;;  %v63_v26 = vld [vmem:[%s27076_s0 + $0x98] sm:$0xff]  ;;  %v64_v27 = vld [vmem:[%s27076_s0 + $0xa0] sm:$0xff]  ;;  %v65_v28 = vld [vmem:[%s27076_s0 + $0xa8] sm:$0xff] }
   0xa   :  { %19350 = vmatprep.subr.bf16.mxu0 %v19349_v15  ;;  %v66_v29 = vld [vmem:[%s27076_s0 + $0xb0] sm:$0xff]  ;;  %v67_v30 = vld [vmem:[%s27076_s0 + $0xb8] sm:$0xff]  ;;  %v68_v31 = vld [vmem:[%s27076_s0 + $0xc0] sm:$0xff] }
   0xb   :  { %v69_v32 = vld [vmem:[%s27076_s0 + $0xc8] sm:$0xff]  ;;  %v70_v33 = vld [vmem:[%s27076_s0 + $0xd0] sm:$0xff]  ;;  %v71_v34 = vld [vmem:[%s27076_s0 + $0xd8] sm:$0xff] }
   0xc   :  { %18056 = vmatmul.mubr.msk.f32.gmra.mrb[4].mxu0 %vm77_vm1, %v49_v6  ;;  %v72_v35 = vld [vmem:[%s27076_s0 + $0xe0] sm:$0xff]  ;;  %v73_v36 = vld [vmem:[%s27076_s0 + $0xe8] sm:$0xff]  ;;  %v74_v37 = vld [vmem:[%s27076_s0 + $0xf0] sm:$0xff] }
   0xd   :  { %18058 = vmatprep.mubr.msk.f32.mxu0 %vm77_vm1, %v50_v7  ;;  %19352 = vmatpush3.bf16.msra.mxu0 %v19349_v15  ;;  %v75_v38 = vld [vmem:[%s27076_s0 + $0xf8] sm:$0xff]  ;;  %vm22376_vm4 = vmpackc.low %vm2099_vm3, %vm2099_vm3 }
  0x10   :  { %18059 = vmatmul.mubr.msk.f32.gmra.mrb[6].mxu0 %vm77_vm1, %v51_v11 }
  0x11   :  { %18061 = vmatprep.mubr.msk.f32.mxu0 %vm77_vm1, %v52_v14 }
  0x14   :  { %18062 = vmatmul.mubr.msk.f32.gmra.mrb[8].mxu0 %vm77_vm1, %v53_v16 }
  0x15   :  { %18064 = vmatprep.mubr.msk.f32.mxu0 %vm77_vm1, %v54_v17 }
  0x18   :  { %18065 = vmatmul.mubr.msk.f32.gmra.mrb[10].mxu0 %vm77_vm1, %v55_v18 }
  0x19   :  { %18067 = vmatprep.mubr.msk.f32.mxu0 %vm77_vm1, %v56_v19 }
  0x1c   :  { %18068 = vmatmul.mubr.msk.f32.gmra.mrb[12].mxu0 %vm77_vm1, %v57_v20 }
  0x1d   :  { %18070 = vmatprep.mubr.msk.f32.mxu0 %vm77_vm1, %v58_v21 }
  0x20   :  { %18071 = vmatmul.mubr.msk.f32.gmra.mrb[14].mxu0 %vm77_vm1, %v59_v22 }
  0x21   :  { %18073 = vmatprep.mubr.msk.f32.mxu0 %vm77_vm1, %v60_v23 }
  0x24   :  { %18074 = vmatmul.mubr.msk.f32.gmra.mrb[16].mxu0 %vm77_vm1, %v61_v24 }
  0x25   :  { %18076 = vmatprep.mubr.msk.f32.mxu0 %vm77_vm1, %v62_v25 }
  0x28   :  { %18077 = vmatmul.mubr.msk.f32.gmra.mrb[18].mxu0 %vm77_vm1, %v63_v26 }
  0x29   :  { %18079 = vmatprep.mubr.msk.f32.mxu0 %vm77_vm1, %v64_v27 }
  0x2c   :  { %18080 = vmatmul.mubr.msk.f32.gmra.mrb[20].mxu0 %vm77_vm1, %v65_v28 }
  0x2d   :  { %18082 = vmatprep.mubr.msk.f32.mxu0 %vm77_vm1, %v66_v29 }
  0x30   :  { %18083 = vmatmul.mubr.msk.f32.gmra.mrb[22].mxu0 %vm77_vm1, %v67_v30 }
  0x31   :  { %18085 = vmatprep.mubr.msk.f32.mxu0 %vm77_vm1, %v68_v31 }
  0x34   :  { %18086 = vmatmul.mubr.msk.f32.gmra.mrb[24].mxu0 %vm77_vm1, %v69_v32 }
  0x35   :  { %18088 = vmatprep.mubr.msk.f32.mxu0 %vm77_vm1, %v70_v33 }
  0x38   :  { %18089 = vmatmul.mubr.msk.f32.gmra.mrb[26].mxu0 %vm77_vm1, %v71_v34 }
  0x39   :  { %18091 = vmatprep.mubr.msk.f32.mxu0 %vm77_vm1, %v72_v35 }
  0x3c   :  { %18092 = vmatmul.mubr.msk.f32.gmra.mrb[28].mxu0 %vm77_vm1, %v73_v36 }
  0x3d   :  { %18094 = vmatprep.mubr.msk.f32.mxu0 %vm77_vm1, %v74_v37 }
  0x40   :  { %18095 = vmatmul.mubr.msk.f32.gmra.mrb[30].mxu0 %vm77_vm1, %v75_v38 }
  0xd7   :  { %v21464_v39 = vpop.f32.mrb[0].mxu0 }
  0xd8   :  { %27420 = vst [vmem:[#allocation2_spill] sm:$0xff] %v21464_v39  ;;  %v21466_v40 = vpop.f32.mrb[1].mxu0  ;;  %v407_v41 = vsel %vm403_vm2, %v21464_v39, 0.0 }
  0xd9   :  { %27421 = vst [vmem:[#allocation3_spill] sm:$0xff] %v21466_v40  ;;  %408 = vadd.xlane.f32.xlu0 %v407_v41  ;;  %18161 = vmatprep.mubr.msk.f32.mxu0 %vm403_vm2, %v21466_v40  ;;  %v404_v43 = vsel %vm403_vm2, %v21466_v40, 0.0 }
  0xda   :  { %18162 = vmatmul.mubr.msk.f32.vlgmr.msra.gmra.mrb[32].mxu0 %vm403_vm2, %v21464_v39 }
  0xdb   :  { %v21474_v42 = vpop.f32.mrb[2].mxu0 }
  0xdc   :  { %27422 = vst [vmem:[#allocation4_spill] sm:$0xff] %v21474_v42  ;;  %v413_v44 = vsel %vm403_vm2, %v21474_v42, 0.0  ;;  %v21480_v45 = vpop.f32.mrb[3].mxu0 }
  0xdd   :  { %27423 = vst [vmem:[#allocation5_spill] sm:$0xff] %v21480_v45  ;;  %405 = vadd.xlane.f32.xlu0 %v404_v43  ;;  %414 = vadd.xlane.f32.xlu1 %v413_v44  ;;  %v410_v46 = vsel %vm403_vm2, %v21480_v45, 0.0 }
  0xde   :  { %18164 = vmatprep.mubr.msk.f32.mxu0 %vm403_vm2, %v21480_v45 }
  0xdf   :  { %v21486_v47 = vpop.f32.mrb[4].mxu0  ;;  %18165 = vmatmul.mubr.msk.f32.gmra.mrb[34].mxu0 %vm403_vm2, %v21474_v42 }
  0xe0   :  { %27424 = vst [vmem:[#allocation6_spill] sm:$0xff] %v21486_v47  ;;  %v21490_v48 = vpop.f32.mrb[5].mxu0  ;;  %v419_v50 = vsel %vm403_vm2, %v21486_v47, 0.0 }
  0xe1   :  { %27425 = vst [vmem:[#allocation7_spill] sm:$0xff] %v21490_v48  ;;  %411 = vadd.xlane.f32.xlu1 %v410_v46  ;;  %v416_v49 = vsel %vm403_vm2, %v21490_v48, 0.0  ;;  %18167 = vmatprep.mubr.msk.f32.mxu0 %vm403_vm2, %v21490_v48 }
  0xe2   :  { %417 = vadd.xlane.f32.xlu0 %v416_v49 }
  0xe3   :  { %v21498_v51 = vpop.f32.mrb[6].mxu0  ;;  %18168 = vmatmul.mubr.msk.f32.gmra.mrb[36].mxu0 %vm403_vm2, %v21486_v47 }
  0xe4   :  { %27426 = vst [vmem:[#allocation8_spill] sm:$0xff] %v21498_v51  ;;  %v21502_v52 = vpop.f32.mrb[7].mxu0  ;;  %v425_v54 = vsel %vm403_vm2, %v21498_v51, 0.0 }
  0xe5   :  { %27427 = vst [vmem:[#allocation9_spill] sm:$0xff] %v21502_v52  ;;  %420 = vadd.xlane.f32.xlu1 %v419_v50  ;;  %v422_v53 = vsel %vm403_vm2, %v21502_v52, 0.0  ;;  %18170 = vmatprep.mubr.msk.f32.mxu0 %vm403_vm2, %v21502_v52 }
  0xe6   :  { %423 = vadd.xlane.f32.xlu0 %v422_v53 }
  0xe7   :  { %v21510_v55 = vpop.f32.mrb[8].mxu0  ;;  %18171 = vmatmul.mubr.msk.f32.gmra.mrb[38].mxu0 %vm403_vm2, %v21498_v51 }
  0xe8   :  { %27428 = vst [vmem:[#allocation10_spill] sm:$0xff] %v21510_v55  ;;  %v21514_v56 = vpop.f32.mrb[9].mxu0  ;;  %v431_v58 = vsel %vm403_vm2, %v21510_v55, 0.0 }
  0xe9   :  { %27429 = vst [vmem:[#allocation11_spill] sm:$0xff] %v21514_v56  ;;  %426 = vadd.xlane.f32.xlu1 %v425_v54  ;;  %v428_v57 = vsel %vm403_vm2, %v21514_v56, 0.0  ;;  %18173 = vmatprep.mubr.msk.f32.mxu0 %vm403_vm2, %v21514_v56 }
  0xea   :  { %429 = vadd.xlane.f32.xlu0 %v428_v57 }
  0xeb   :  { %v21522_v59 = vpop.f32.mrb[10].mxu0  ;;  %18174 = vmatmul.mubr.msk.f32.gmra.mrb[40].mxu0 %vm403_vm2, %v21510_v55 }
  0xec   :  { %27430 = vst [vmem:[#allocation12_spill] sm:$0xff] %v21522_v59  ;;  %v21526_v60 = vpop.f32.mrb[11].mxu0  ;;  %v437_v62 = vsel %vm403_vm2, %v21522_v59, 0.0 }
  0xed   :  { %27431 = vst [vmem:[#allocation13_spill] sm:$0xff] %v21526_v60  ;;  %432 = vadd.xlane.f32.xlu1 %v431_v58  ;;  %v434_v61 = vsel %vm403_vm2, %v21526_v60, 0.0  ;;  %18176 = vmatprep.mubr.msk.f32.mxu0 %vm403_vm2, %v21526_v60 }
  0xee   :  { %435 = vadd.xlane.f32.xlu0 %v434_v61 }
  0xef   :  { %v21534_v63 = vpop.f32.mrb[12].mxu0  ;;  %18177 = vmatmul.mubr.msk.f32.gmra.mrb[42].mxu0 %vm403_vm2, %v21522_v59 }
  0xf0   :  { %27432 = vst [vmem:[#allocation14_spill] sm:$0xff] %v21534_v63  ;;  %v21538_v0 = vpop.f32.mrb[13].mxu0  ;;  %v443_v2 = vsel %vm403_vm2, %v21534_v63, 0.0 }
  0xf1   :  { %27433 = vst [vmem:[#allocation15_spill] sm:$0xff] %v21538_v0  ;;  %438 = vadd.xlane.f32.xlu1 %v437_v62  ;;  %v440_v1 = vsel %vm403_vm2, %v21538_v0, 0.0  ;;  %18179 = vmatprep.mubr.msk.f32.mxu0 %vm403_vm2, %v21538_v0 }
  0xf2   :  { %441 = vadd.xlane.f32.xlu0 %v440_v1 }
  0xf3   :  { %v21546_v3 = vpop.f32.mrb[14].mxu0  ;;  %18180 = vmatmul.mubr.msk.f32.gmra.mrb[44].mxu0 %vm403_vm2, %v21534_v63 }
  0xf4   :  { %27434 = vst [vmem:[#allocation16_spill] sm:$0xff] %v21546_v3  ;;  %v21550_v4 = vpop.f32.mrb[15].mxu0  ;;  %v449_v6 = vsel %vm403_vm2, %v21546_v3, 0.0 }
  0xf5   :  { %27435 = vst [vmem:[#allocation17_spill] sm:$0xff] %v21550_v4  ;;  %444 = vadd.xlane.f32.xlu1 %v443_v2  ;;  %v446_v5 = vsel %vm403_vm2, %v21550_v4, 0.0  ;;  %18182 = vmatprep.mubr.msk.f32.mxu0 %vm403_vm2, %v21550_v4 }
  0xf6   :  { %447 = vadd.xlane.f32.xlu0 %v446_v5 }
  0xf7   :  { %v21558_v7 = vpop.f32.mrb[16].mxu0  ;;  %18183 = vmatmul.mubr.msk.f32.gmra.mrb[46].mxu0 %vm403_vm2, %v21546_v3 }
  0xf8   :  { %27436 = vst [vmem:[#allocation18_spill] sm:$0xff] %v21558_v7  ;;  %v21562_v8 = vpop.f32.mrb[17].mxu0  ;;  %v455_v10 = vsel %vm403_vm2, %v21558_v7, 0.0 }
  0xf9   :  { %27437 = vst [vmem:[#allocation19_spill] sm:$0xff] %v21562_v8  ;;  %450 = vadd.xlane.f32.xlu1 %v449_v6  ;;  %v452_v9 = vsel %vm403_vm2, %v21562_v8, 0.0  ;;  %18185 = vmatprep.mubr.msk.f32.mxu0 %vm403_vm2, %v21562_v8 }
  0xfa   :  { %453 = vadd.xlane.f32.xlu0 %v452_v9 }
  0xfb   :  { %v21570_v11 = vpop.f32.mrb[18].mxu0  ;;  %18186 = vmatmul.mubr.msk.f32.gmra.mrb[48].mxu0 %vm403_vm2, %v21558_v7 }
  0xfc   :  { %27438 = vst [vmem:[#allocation20_spill] sm:$0xff] %v21570_v11  ;;  %v21574_v12 = vpop.f32.mrb[19].mxu0  ;;  %v461_v14 = vsel %vm403_vm2, %v21570_v11, 0.0 }
  0xfd   :  { %27439 = vst [vmem:[#allocation21_spill] sm:$0xff] %v21574_v12  ;;  %456 = vadd.xlane.f32.xlu1 %v455_v10  ;;  %v458_v13 = vsel %vm403_vm2, %v21574_v12, 0.0  ;;  %18188 = vmatprep.mubr.msk.f32.mxu0 %vm403_vm2, %v21574_v12 }
  0xfe   :  { %459 = vadd.xlane.f32.xlu0 %v458_v13 }
  0xff   :  { %v21582_v15 = vpop.f32.mrb[20].mxu0  ;;  %18189 = vmatmul.mubr.msk.f32.gmra.mrb[50].mxu0 %vm403_vm2, %v21570_v11 }
 0x100   :  { %27440 = vst [vmem:[#allocation22_spill] sm:$0xff] %v21582_v15  ;;  %v21586_v16 = vpop.f32.mrb[21].mxu0  ;;  %v467_v18 = vsel %vm403_vm2, %v21582_v15, 0.0 }
 0x101   :  { %27441 = vst [vmem:[#allocation23_spill] sm:$0xff] %v21586_v16  ;;  %462 = vadd.xlane.f32.xlu1 %v461_v14  ;;  %v464_v17 = vsel %vm403_vm2, %v21586_v16, 0.0  ;;  %18191 = vmatprep.mubr.msk.f32.mxu0 %vm403_vm2, %v21586_v16 }
 0x102   :  { %465 = vadd.xlane.f32.xlu0 %v464_v17 }
 0x103   :  { %v21594_v19 = vpop.f32.mrb[22].mxu0  ;;  %18192 = vmatmul.mubr.msk.f32.gmra.mrb[52].mxu0 %vm403_vm2, %v21582_v15 }
 0x104   :  { %27442 = vst [vmem:[#allocation24_spill] sm:$0xff] %v21594_v19  ;;  %v21598_v20 = vpop.f32.mrb[23].mxu0  ;;  %v473_v22 = vsel %vm403_vm2, %v21594_v19, 0.0 }
 0x105   :  { %27443 = vst [vmem:[#allocation25_spill] sm:$0xff] %v21598_v20  ;;  %468 = vadd.xlane.f32.xlu1 %v467_v18  ;;  %v470_v21 = vsel %vm403_vm2, %v21598_v20, 0.0  ;;  %18194 = vmatprep.mubr.msk.f32.mxu0 %vm403_vm2, %v21598_v20 }
 0x106   :  { %471 = vadd.xlane.f32.xlu0 %v470_v21 }
 0x107   :  { %v21606_v23 = vpop.f32.mrb[24].mxu0  ;;  %18195 = vmatmul.mubr.msk.f32.gmra.mrb[54].mxu0 %vm403_vm2, %v21594_v19 }
 0x108   :  { %27444 = vst [vmem:[#allocation26_spill] sm:$0xff] %v21606_v23  ;;  %v21610_v24 = vpop.f32.mrb[25].mxu0  ;;  %v479_v26 = vsel %vm403_vm2, %v21606_v23, 0.0 }
 0x109   :  { %27445 = vst [vmem:[#allocation27_spill] sm:$0xff] %v21610_v24  ;;  %474 = vadd.xlane.f32.xlu1 %v473_v22  ;;  %v476_v25 = vsel %vm403_vm2, %v21610_v24, 0.0  ;;  %18197 = vmatprep.mubr.msk.f32.mxu0 %vm403_vm2, %v21610_v24 }
 0x10a   :  { %477 = vadd.xlane.f32.xlu0 %v476_v25 }
 0x10b   :  { %v21618_v27 = vpop.f32.mrb[26].mxu0  ;;  %18198 = vmatmul.mubr.msk.f32.gmra.mrb[56].mxu0 %vm403_vm2, %v21606_v23 }
 0x10c   :  { %27446 = vst [vmem:[#allocation28_spill] sm:$0xff] %v21618_v27  ;;  %v21622_v28 = vpop.f32.mrb[27].mxu0  ;;  %v485_v29 = vsel %vm403_vm2, %v21618_v27, 0.0 }
 0x10d   :  { %27447 = vst [vmem:[#allocation29_spill] sm:$0xff] %v21622_v28  ;;  %480 = vadd.xlane.f32.xlu1 %v479_v26  ;;  %18200 = vmatprep.mubr.msk.f32.mxu0 %vm403_vm2, %v21622_v28  ;;  %v482_v33 = vsel %vm403_vm2, %v21622_v28, 0.0 }
 0x10f   :  { %v21628_v30 = vpop.f32.mrb[28].mxu0  ;;  %18201 = vmatmul.mubr.msk.f32.gmra.mrb[58].mxu0 %vm403_vm2, %v21618_v27 }
 0x110   :  { %27448 = vst [vmem:[#allocation30_spill] sm:$0xff] %v21628_v30  ;;  %v21632_v31 = vpop.f32.mrb[29].mxu0  ;;  %v491_v36 = vsel %vm403_vm2, %v21628_v30, 0.0 }
 0x111   :  { %27449 = vst [vmem:[#allocation31_spill] sm:$0xff] %v21632_v31  ;;  %486 = vadd.xlane.f32.xlu1 %v485_v29  ;;  %v488_v32 = vsel %vm403_vm2, %v21632_v31, 0.0  ;;  %18203 = vmatprep.mubr.msk.f32.mxu0 %vm403_vm2, %v21632_v31 }
 0x112   :  { %489 = vadd.xlane.f32.xlu0 %v488_v32 }
 0x113   :  { %v21640_v34 = vpop.f32.mrb[30].mxu0  ;;  %18204 = vmatmul.mubr.msk.f32.gmra.mrb[60].mxu0 %vm403_vm2, %v21628_v30 }
 0x114   :  { %27450 = vst [vmem:[#allocation32_spill] sm:$0xff] %v21640_v34  ;;  %v21644_v35 = vpop.f32.mrb[31].mxu0  ;;  %v497_v37 = vsel %vm403_vm2, %v21640_v34, 0.0 }
 0x115   :  { %27451 = vst [vmem:[#allocation33_spill] sm:$0xff] %v21644_v35  ;;  %483 = vadd.xlane.f32.xlu1 %v482_v33  ;;  %18206 = vmatprep.mubr.msk.f32.mxu0 %vm403_vm2, %v21644_v35  ;;  %v494_v38 = vsel %vm403_vm2, %v21644_v35, 0.0 }
 0x117   :  { %18207 = vmatmul.mubr.msk.f32.gmra.mrb[62].mxu0 %vm403_vm2, %v21640_v34 }
 0x119   :  { %492 = vadd.xlane.f32.xlu1 %v491_v36 }
 0x11d   :  { %498 = vadd.xlane.f32.xlu1 %v497_v37 }
 0x121   :  { %495 = vadd.xlane.f32.xlu1 %v494_v38 }
 0x166   :  { %v409_v41 = vpop.xlane.xlu0 %408 }
 0x167   :  { %v502_v43 = vmul.f32 0.03125, %v409_v41 }
 0x169   :  { %v21657_v44 = vsub.f32 %v21464_v39, %v502_v43 }
 0x16a   :  { %v406_v46 = vpop.xlane.xlu0 %405  ;;  %v415_v49 = vpop.xlane.xlu1 %414 }
 0x16b   :  { %v501_v50 = vmul.f32 0.03125, %v406_v46  ;;  %v504_v53 = vmul.f32 0.03125, %v415_v49  ;;  %v566_v54 = vmul.f32 %v21657_v44, %v21657_v44 }
 0x16d   :  { %v21662_v57 = vsub.f32 %v21466_v40, %v501_v50  ;;  %v21665_v58 = vsub.f32 %v21474_v42, %v504_v53  ;;  %v600_v61 = vsel %vm403_vm2, %v566_v54, 0.0 }
 0x16e   :  { %v412_v62 = vpop.xlane.xlu1 %411  ;;  %601 = vadd.xlane.f32.xlu0 %v600_v61 }
 0x16f   :  { %v503_v1 = vmul.f32 0.03125, %v412_v62  ;;  %v418_v2 = vpop.xlane.xlu0 %417  ;;  %v565_v5 = vmul.f32 %v21662_v57, %v21662_v57  ;;  %v568_v13 = vmul.f32 %v21665_v58, %v21665_v58 }
 0x170   :  { %v505_v9 = vmul.f32 0.03125, %v418_v2 }
 0x171   :  { %v21671_v6 = vsub.f32 %v21480_v45, %v503_v1  ;;  %v597_v10 = vsel %vm403_vm2, %v565_v5, 0.0  ;;  %v606_v26 = vsel %vm403_vm2, %v568_v13, 0.0 }
 0x172   :  { %v421_v14 = vpop.xlane.xlu1 %420  ;;  %598 = vadd.xlane.f32.xlu0 %v597_v10  ;;  %v21677_v22 = vsub.f32 %v21490_v48, %v505_v9 }
 0x173   :  { %v506_v17 = vmul.f32 0.03125, %v421_v14  ;;  %v424_v18 = vpop.xlane.xlu0 %423  ;;  %v567_v29 = vmul.f32 %v21671_v6, %v21671_v6 }
 0x174   :  { %v507_v21 = vmul.f32 0.03125, %v424_v18  ;;  %v569_v50 = vmul.f32 %v21677_v22, %v21677_v22 }
 0x175   :  { %v21680_v25 = vsub.f32 %v21486_v47, %v506_v17  ;;  %v603_v46 = vsel %vm403_vm2, %v567_v29, 0.0 }
 0x176   :  { %v427_v32 = vpop.xlane.xlu1 %426  ;;  %607 = vadd.xlane.f32.xlu0 %v606_v26  ;;  %v21688_v38 = vsub.f32 %v21502_v52, %v507_v21  ;;  %v609_v10 = vsel %vm403_vm2, %v569_v50, 0.0 }
 0x177   :  { %v508_v33 = vmul.f32 0.03125, %v427_v32  ;;  %v430_v36 = vpop.xlane.xlu0 %429  ;;  %v570_v37 = vmul.f32 %v21680_v25, %v21680_v25 }
 0x178   :  { %v509_v41 = vmul.f32 0.03125, %v430_v36  ;;  %v571_v2 = vmul.f32 %v21688_v38, %v21688_v38 }
 0x179   :  { %v21691_v43 = vsub.f32 %v21498_v51, %v508_v33  ;;  %v612_v49 = vsel %vm403_vm2, %v570_v37, 0.0 }
 0x17a   :  { %v433_v53 = vpop.xlane.xlu1 %432  ;;  %604 = vadd.xlane.f32.xlu0 %v603_v46  ;;  %613 = vadd.xlane.f32.xlu1 %v612_v49  ;;  %v21700_v1 = vsub.f32 %v21514_v56, %v509_v41  ;;  %v615_v26 = vsel %vm403_vm2, %v571_v2, 0.0 }
 0x17b   :  { %v510_v54 = vmul.f32 0.03125, %v433_v53  ;;  %v436_v61 = vpop.xlane.xlu0 %435  ;;  %v572_v62 = vmul.f32 %v21691_v43, %v21691_v43 }
 0x17c   :  { %v511_v9 = vmul.f32 0.03125, %v436_v61  ;;  %v573_v29 = vmul.f32 %v21700_v1, %v21700_v1 }
 0x17d   :  { %v21705_v5 = vsub.f32 %v21510_v55, %v510_v54  ;;  %v618_v13 = vsel %vm403_vm2, %v572_v62, 0.0 }
 0x17e   :  { %v439_v14 = vpop.xlane.xlu1 %438  ;;  %610 = vadd.xlane.f32.xlu0 %v609_v10  ;;  %619 = vadd.xlane.f32.xlu1 %v618_v13  ;;  %v21715_v32 = vsub.f32 %v21526_v60, %v511_v9  ;;  %v621_v54 = vsel %vm403_vm2, %v573_v29, 0.0 }
 0x17f   :  { %v512_v17 = vmul.f32 0.03125, %v439_v14  ;;  %v442_v18 = vpop.xlane.xlu0 %441  ;;  %v574_v21 = vmul.f32 %v21705_v5, %v21705_v5 }
 0x180   :  { %v513_v36 = vmul.f32 0.03125, %v442_v18  ;;  %v575_v9 = vmul.f32 %v21715_v32, %v21715_v32 }
 0x181   :  { %v21718_v33 = vsub.f32 %v21522_v59, %v512_v17  ;;  %v624_v37 = vsel %vm403_vm2, %v574_v21, 0.0 }
 0x182   :  { %v445_v41 = vpop.xlane.xlu1 %444  ;;  %616 = vadd.xlane.f32.xlu0 %v615_v26  ;;  %625 = vadd.xlane.f32.xlu1 %v624_v37  ;;  %v21725_v61 = vsub.f32 %v21538_v0, %v513_v36  ;;  %v627_v29 = vsel %vm403_vm2, %v575_v9, 0.0  ;;  %v899_v9 = vld [vmem:[%s27078_s5] sm:$0xff] }
 0x183   :  { %v514_v46 = vmul.f32 0.03125, %v445_v41  ;;  %v448_v49 = vpop.xlane.xlu0 %447  ;;  %v576_v50 = vmul.f32 %v21718_v33, %v21718_v33 }
 0x184   :  { %v515_v53 = vmul.f32 0.03125, %v448_v49  ;;  %v577_v37 = vmul.f32 %v21725_v61, %v21725_v61 }
 0x185   :  { %v21728_v62 = vsub.f32 %v21534_v63, %v514_v46  ;;  %v630_v2 = vsel %vm403_vm2, %v576_v50, 0.0 }
 0x186   :  { %v451_v10 = vpop.xlane.xlu1 %450  ;;  %622 = vadd.xlane.f32.xlu0 %v621_v54  ;;  %631 = vadd.xlane.f32.xlu1 %v630_v2  ;;  %v21736_v18 = vsub.f32 %v21550_v4, %v515_v53 }
 0x187   :  { %v516_v13 = vmul.f32 0.03125, %v451_v10  ;;  %v454_v14 = vpop.xlane.xlu0 %453  ;;  %v578_v17 = vmul.f32 %v21728_v62, %v21728_v62  ;;  %v900_v10 = vld [vmem:[%s27078_s5 + $0x8] sm:$0xff] }
 0x188   :  { %v517_v21 = vmul.f32 0.03125, %v454_v14  ;;  %v579_v2 = vmul.f32 %v21736_v18, %v21736_v18  ;;  %v633_v14 = vsel %vm403_vm2, %v577_v37, 0.0 }
 0x189   :  { %v21739_v26 = vsub.f32 %v21546_v3, %v516_v13  ;;  %v636_v36 = vsel %vm403_vm2, %v578_v17, 0.0 }
 0x18a   :  { %v457_v41 = vpop.xlane.xlu1 %456  ;;  %628 = vadd.xlane.f32.xlu0 %v627_v29  ;;  %637 = vadd.xlane.f32.xlu1 %v636_v36  ;;  %v21748_v53 = vsub.f32 %v21562_v8, %v517_v21  ;;  %v19337_v21 = vpack.c.bf16 %v900_v10, %v899_v9  ;;  %v902_v9 = vld [vmem:[%s27078_s5 + $0x18] sm:$0xff] }
 0x18b   :  { %v518_v46 = vmul.f32 0.03125, %v457_v41  ;;  %v460_v49 = vpop.xlane.xlu0 %459  ;;  %v580_v50 = vmul.f32 %v21739_v26, %v21739_v26 }
 0x18c   :  { %v519_v54 = vmul.f32 0.03125, %v460_v49  ;;  %19338 = vmatprep.subr.bf16.mxu1 %v19337_v21  ;;  %v581_v37 = vmul.f32 %v21748_v53, %v21748_v53 }
 0x18d   :  { %v21759_v13 = vsub.f32 %v21558_v7, %v518_v46  ;;  %v642_v17 = vsel %vm403_vm2, %v580_v50, 0.0  ;;  %v639_v46 = vsel %vm403_vm2, %v579_v2, 0.0  ;;  %19340 = vmatpush3.bf16.msra.mxu1 %v19337_v21  ;;  %v901_v50 = vld [vmem:[%s27078_s5 + $0x10] sm:$0xff]  ;;  %s21244_s5 = smov 112  }
 0x18e   :  { %v463_v29 = vpop.xlane.xlu1 %462  ;;  %634 = vadd.xlane.f32.xlu0 %v633_v14  ;;  %643 = vadd.xlane.f32.xlu1 %v642_v17  ;;  %v21766_v8 = vsub.f32 %v21574_v12, %v519_v54  ;;  %v19341_v17 = vpack.c.bf16 %v902_v9, %v901_v50 }
 0x18f   :  { %v520_v36 = vmul.f32 0.03125, %v463_v29  ;;  %v466_v41 = vpop.xlane.xlu0 %465  ;;  %v582_v49 = vmul.f32 %v21759_v13, %v21759_v13 }
 0x190   :  { %v521_v14 = vmul.f32 0.03125, %v466_v41  ;;  %19342 = vmatprep.subr.bf16.mxu1 %v19341_v17  ;;  %v583_v4 = vmul.f32 %v21766_v8, %v21766_v8 }
 0x191   :  { %v21778_v10 = vsub.f32 %v21570_v11, %v520_v36  ;;  %v648_v54 = vsel %vm403_vm2, %v582_v49, 0.0  ;;  %19344 = vmatpush3.bf16.msra.mxu1 %v19341_v17  ;;  %v645_v49 = vsel %vm403_vm2, %v581_v37, 0.0 }
 0x192   :  { %v469_v2 = vpop.xlane.xlu1 %468  ;;  %640 = vadd.xlane.f32.xlu0 %v639_v46  ;;  %649 = vadd.xlane.f32.xlu1 %v648_v54  ;;  %v21786_v36 = vsub.f32 %v21586_v16, %v521_v14  ;;  %v651_v14 = vsel %vm403_vm2, %v583_v4, 0.0 }
 0x193   :  { %v522_v29 = vmul.f32 0.03125, %v469_v2  ;;  %v472_v21 = vpop.xlane.xlu0 %471  ;;  %v584_v12 = vmul.f32 %v21778_v10, %v21778_v10 }
 0x194   :  { %v523_v7 = vmul.f32 0.03125, %v472_v21 }
 0x195   :  { %v21789_v41 = vsub.f32 %v21582_v15, %v522_v29  ;;  %v654_v46 = vsel %vm403_vm2, %v584_v12, 0.0  ;;  %v585_v12 = vmul.f32 %v21786_v36, %v21786_v36 }
 0x196   :  { %v475_v50 = vpop.xlane.xlu1 %474  ;;  %646 = vadd.xlane.f32.xlu0 %v645_v49  ;;  %655 = vadd.xlane.f32.xlu1 %v654_v46  ;;  %v21796_v17 = vsub.f32 %v21598_v20, %v523_v7 }
 0x197   :  { %v524_v9 = vmul.f32 0.03125, %v475_v50  ;;  %v478_v54 = vpop.xlane.xlu0 %477  ;;  %v586_v2 = vmul.f32 %v21789_v41, %v21789_v41 }
 0x198   :  { %v525_v21 = vmul.f32 0.03125, %v478_v54  ;;  %v587_v7 = vmul.f32 %v21796_v17, %v21796_v17  ;;  %v657_v54 = vsel %vm403_vm2, %v585_v12, 0.0 }
 0x199   :  { %v21800_v29 = vsub.f32 %v21594_v19, %v524_v9  ;;  %v660_v37 = vsel %vm403_vm2, %v586_v2, 0.0 }
 0x19a   :  { %v481_v49 = vpop.xlane.xlu1 %480  ;;  %652 = vadd.xlane.f32.xlu0 %v651_v14  ;;  %661 = vadd.xlane.f32.xlu1 %v660_v37  ;;  %v21810_v4 = vsub.f32 %v21610_v24, %v525_v21  ;;  %v663_v19 = vsel %vm403_vm2, %v587_v7, 0.0 }
 0x19b   :  { %v526_v46 = vmul.f32 0.03125, %v481_v49  ;;  %v588_v50 = vmul.f32 %v21800_v29, %v21800_v29 }
 0x19c   :  { %v589_v12 = vmul.f32 %v21810_v4, %v21810_v4 }
 0x19d   :  { %v21813_v9 = vsub.f32 %v21606_v23, %v526_v46  ;;  %v666_v2 = vsel %vm403_vm2, %v588_v50, 0.0 }
 0x19e   :  { %v487_v20 = vpop.xlane.xlu1 %486  ;;  %658 = vadd.xlane.f32.xlu0 %v657_v54  ;;  %667 = vadd.xlane.f32.xlu1 %v666_v2 }
 0x19f   :  { %v528_v14 = vmul.f32 0.03125, %v487_v20  ;;  %v490_v37 = vpop.xlane.xlu0 %489  ;;  %v590_v49 = vmul.f32 %v21813_v9, %v21813_v9 }
 0x1a0   :  { %v529_v24 = vmul.f32 0.03125, %v490_v37 }
 0x1a1   :  { %v21821_v21 = vsub.f32 %v21618_v27, %v528_v14  ;;  %v672_v46 = vsel %vm403_vm2, %v590_v49, 0.0  ;;  %v669_v14 = vsel %vm403_vm2, %v589_v12, 0.0 }
 0x1a2   :  { %v484_v50 = vpop.xlane.xlu1 %483  ;;  %664 = vadd.xlane.f32.xlu0 %v663_v19  ;;  %673 = vadd.xlane.f32.xlu1 %v672_v46  ;;  %v21829_v2 = vsub.f32 %v21632_v31, %v529_v24 }
 0x1a3   :  { %v527_v54 = vmul.f32 0.03125, %v484_v50  ;;  %v592_v20 = vmul.f32 %v21821_v21, %v21821_v21 }
 0x1a4   :  { %v593_v50 = vmul.f32 %v21829_v2, %v21829_v2 }
 0x1a5   :  { %v21832_v7 = vsub.f32 %v21622_v28, %v527_v54  ;;  %v678_v37 = vsel %vm403_vm2, %v592_v20, 0.0 }
 0x1a6   :  { %v493_v49 = vpop.xlane.xlu1 %492  ;;  %670 = vadd.xlane.f32.xlu0 %v669_v14  ;;  %679 = vadd.xlane.f32.xlu1 %v678_v37 }
 0x1a7   :  { %v530_v27 = vmul.f32 0.03125, %v493_v49  ;;  %v591_v19 = vmul.f32 %v21832_v7, %v21832_v7  ;;  %v681_v49 = vsel %vm403_vm2, %v593_v50, 0.0 }
 0x1a9   :  { %v21839_v46 = vsub.f32 %v21628_v30, %v530_v27  ;;  %v675_v24 = vsel %vm403_vm2, %v591_v19, 0.0 }
 0x1aa   :  { %676 = vadd.xlane.f32.xlu0 %v675_v24  ;;  %v499_v54 = vpop.xlane.xlu1 %498 }
 0x1ab   :  { %v532_v12 = vmul.f32 0.03125, %v499_v54  ;;  %v594_v20 = vmul.f32 %v21839_v46, %v21839_v46 }
 0x1ad   :  { %v21847_v14 = vsub.f32 %v21640_v34, %v532_v12  ;;  %v18163_v37 = vpop.f32.mrb[32].mxu0  ;;  %v684_v27 = vsel %vm403_vm2, %v594_v20, 0.0 }
 0x1ae   :  { %682 = vadd.xlane.f32.xlu0 %v681_v49  ;;  %v1390_v31 = vpop.f32.mrb[33].mxu0  ;;  %685 = vadd.xlane.f32.xlu1 %v684_v27  ;;  %v496_v19 = vpop.xlane.xlu1 %495 }
 0x1af   :  { %v21851_v30 = vpack.i.bf16 %v18163_v37, %v1390_v31  ;;  %v531_v24 = vmul.f32 0.03125, %v496_v19  ;;  %v596_v54 = vmul.f32 %v21847_v14, %v21847_v14  ;;  %v21855_v28 = vpack.c.bf16 %v18163_v37, %v1390_v31 }
 0x1b1   :  { %27452 = vst [vmem:[#allocation34_spill] sm:$0xff] %v21851_v30  ;;  %27453 = vst [vmem:[#allocation35_spill] sm:$0xff] %v21855_v28  ;;  %v21858_v12 = vsub.f32 %v21644_v35, %v531_v24  ;;  %v690_v34 = vsel %vm403_vm2, %v596_v54, 0.0 }
 0x1b2   :  { %691 = vadd.xlane.f32.xlu1 %v690_v34  ;;  %v18166_v50 = vpop.f32.mrb[34].mxu0 }
 0x1b3   :  { %v1400_v20 = vpop.f32.mrb[35].mxu0  ;;  %v595_v49 = vmul.f32 %v21858_v12, %v21858_v12 }
 0x1b4   :  { %v21863_v27 = vpack.i.bf16 %v18166_v50, %v1400_v20  ;;  %v21865_v23 = vpack.c.bf16 %v18166_v50, %v1400_v20 }
 0x1b5   :  { %v687_v19 = vsel %vm403_vm2, %v595_v49, 0.0 }
 0x1b6   :  { %27454 = vst [vmem:[#allocation36_spill] sm:$0xff] %v21863_v27  ;;  %27455 = vst [vmem:[#allocation37_spill] sm:$0xff] %v21865_v23  ;;  %688 = vadd.xlane.f32.xlu0 %v687_v19  ;;  %v18169_v31 = vpop.f32.mrb[36].mxu0 }
 0x1b7   :  { %v1410_v37 = vpop.f32.mrb[37].mxu0 }
 0x1b8   :  { %v21868_v16 = vpack.i.bf16 %v18169_v31, %v1410_v37  ;;  %v21870_v24 = vpack.c.bf16 %v18169_v31, %v1410_v37 }
 0x1ba   :  { %27456 = vst [vmem:[#allocation38_spill] sm:$0xff] %v21868_v16  ;;  %27457 = vst [vmem:[#allocation39_spill] sm:$0xff] %v21870_v24  ;;  %v18172_v54 = vpop.f32.mrb[38].mxu0 }
 0x1bb   :  { %v1420_v34 = vpop.f32.mrb[39].mxu0 }
 0x1bc   :  { %v21872_v35 = vpack.i.bf16 %v18172_v54, %v1420_v34  ;;  %v21874_v15 = vpack.c.bf16 %v18172_v54, %v1420_v34 }
 0x1be   :  { %27458 = vst [vmem:[#allocation40_spill] sm:$0xff] %v21872_v35  ;;  %27459 = vst [vmem:[#allocation41_spill] sm:$0xff] %v21874_v15  ;;  %v18175_v11 = vpop.f32.mrb[40].mxu0 }
 0x1bf   :  { %v1430_v3 = vpop.f32.mrb[41].mxu0 }
 0x1c0   :  { %v21876_v0 = vpack.i.bf16 %v18175_v11, %v1430_v3  ;;  %v21878_v50 = vpack.c.bf16 %v18175_v11, %v1430_v3 }
 0x1c2   :  { %27460 = vst [vmem:[#allocation42_spill] sm:$0xff] %v21876_v0  ;;  %27461 = vst [vmem:[#allocation43_spill] sm:$0xff] %v21878_v50  ;;  %v18178_v20 = vpop.f32.mrb[42].mxu0 }
 0x1c3   :  { %20056 = vrot.lane.b32.xlu1 %v21863_v27, %s21244_s5  ;;  %v1440_v49 = vpop.f32.mrb[43].mxu0 }
 0x1c4   :  { %v21882_v19 = vpack.i.bf16 %v18178_v20, %v1440_v49  ;;  %v21884_v31 = vpack.c.bf16 %v18178_v20, %v1440_v49 }
 0x1c6   :  { %27462 = vst [vmem:[#allocation44_spill] sm:$0xff] %v21882_v19  ;;  %27463 = vst [vmem:[#allocation45_spill] sm:$0xff] %v21884_v31  ;;  %v18181_v37 = vpop.f32.mrb[44].mxu0 }
 0x1c7   :  { %20061 = vrot.lane.b32.xlu1 %v21868_v16, %s21245_s14  ;;  %v1450_v54 = vpop.f32.mrb[45].mxu0 }
 0x1c8   :  { %v21888_v34 = vpack.i.bf16 %v18181_v37, %v1450_v54  ;;  %v21890_v3 = vpack.c.bf16 %v18181_v37, %v1450_v54 }
 0x1ca   :  { %27464 = vst [vmem:[#allocation46_spill] sm:$0xff] %v21888_v34  ;;  %27465 = vst [vmem:[#allocation47_spill] sm:$0xff] %v21890_v3  ;;  %v18184_v11 = vpop.f32.mrb[46].mxu0 }
 0x1cb   :  { %20076 = vrot.lane.b32.xlu1 %v21872_v35, %s21244_s5  ;;  %v1460_v63 = vpop.f32.mrb[47].mxu0 }
 0x1cc   :  { %20041 = vrot.lane.b32.xlu0 %v21851_v30, %s21245_s14  ;;  %v21896_v20 = vpack.i.bf16 %v18184_v11, %v1460_v63  ;;  %v21898_v49 = vpack.c.bf16 %v18184_v11, %v1460_v63 }
 0x1ce   :  { %27466 = vst [vmem:[#allocation48_spill] sm:$0xff] %v21896_v20  ;;  %27467 = vst [vmem:[#allocation49_spill] sm:$0xff] %v21898_v49  ;;  %v18187_v60 = vpop.f32.mrb[48].mxu0 }
 0x1cf   :  { %20081 = vrot.lane.b32.xlu1 %v21876_v0, %s21245_s14  ;;  %v1470_v59 = vpop.f32.mrb[49].mxu0 }
 0x1d0   :  { %20046 = vrot.lane.b32.xlu0 %v21851_v30, %s21244_s5  ;;  %v21904_v37 = vpack.i.bf16 %v18187_v60, %v1470_v59  ;;  %v21906_v54 = vpack.c.bf16 %v18187_v60, %v1470_v59 }
 0x1d2   :  { %27468 = vst [vmem:[#allocation50_spill] sm:$0xff] %v21904_v37  ;;  %27469 = vst [vmem:[#allocation51_spill] sm:$0xff] %v21906_v54  ;;  %v18190_v56 = vpop.f32.mrb[50].mxu0 }
 0x1d3   :  { %20091 = vrot.lane.b32.xlu1 %v21882_v19, %s21245_s14  ;;  %v1480_v55 = vpop.f32.mrb[51].mxu0 }
 0x1d4   :  { %20051 = vrot.lane.b32.xlu0 %v21863_v27, %s21245_s14  ;;  %v21912_v63 = vpack.i.bf16 %v18190_v56, %v1480_v55  ;;  %v21914_v11 = vpack.c.bf16 %v18190_v56, %v1480_v55 }
 0x1d6   :  { %27470 = vst [vmem:[#allocation52_spill] sm:$0xff] %v21912_v63  ;;  %27471 = vst [vmem:[#allocation53_spill] sm:$0xff] %v21914_v11  ;;  %v18193_v52 = vpop.f32.mrb[52].mxu0 }
 0x1d7   :  { %20096 = vrot.lane.b32.xlu1 %v21882_v19, %s21244_s5  ;;  %v1490_v51 = vpop.f32.mrb[53].mxu0 }
 0x1d8   :  { %20066 = vrot.lane.b32.xlu0 %v21868_v16, %s21244_s5  ;;  %v21920_v59 = vpack.i.bf16 %v18193_v52, %v1490_v51  ;;  %v21922_v60 = vpack.c.bf16 %v18193_v52, %v1490_v51 }
 0x1da   :  { %27472 = vst [vmem:[#allocation54_spill] sm:$0xff] %v21920_v59  ;;  %27473 = vst [vmem:[#allocation55_spill] sm:$0xff] %v21922_v60  ;;  %v18196_v48 = vpop.f32.mrb[54].mxu0 }
 0x1db   :  { %20111 = vrot.lane.b32.xlu1 %v21896_v20, %s21245_s14  ;;  %v1500_v47 = vpop.f32.mrb[55].mxu0 }
 0x1dc   :  { %20071 = vrot.lane.b32.xlu0 %v21872_v35, %s21245_s14  ;;  %v21928_v55 = vpack.i.bf16 %v18196_v48, %v1500_v47  ;;  %v21930_v56 = vpack.c.bf16 %v18196_v48, %v1500_v47 }
 0x1de   :  { %27474 = vst [vmem:[#allocation56_spill] sm:$0xff] %v21928_v55  ;;  %27475 = vst [vmem:[#allocation57_spill] sm:$0xff] %v21930_v56  ;;  %v18199_v45 = vpop.f32.mrb[56].mxu0 }
 0x1df   :  { %20121 = vrot.lane.b32.xlu1 %v21912_v63, %s21245_s14  ;;  %v1510_v42 = vpop.f32.mrb[57].mxu0 }
 0x1e0   :  { %20086 = vrot.lane.b32.xlu0 %v21876_v0, %s21244_s5  ;;  %v21936_v51 = vpack.i.bf16 %v18199_v45, %v1510_v42  ;;  %v21938_v52 = vpack.c.bf16 %v18199_v45, %v1510_v42 }
 0x1e2   :  { %27476 = vst [vmem:[#allocation58_spill] sm:$0xff] %v21936_v51  ;;  %27477 = vst [vmem:[#allocation59_spill] sm:$0xff] %v21938_v52  ;;  %v18202_v40 = vpop.f32.mrb[58].mxu0 }
 0x1e3   :  { %20131 = vrot.lane.b32.xlu1 %v21928_v55, %s21245_s14  ;;  %v1520_v39 = vpop.f32.mrb[59].mxu0 }
 0x1e4   :  { %20101 = vrot.lane.b32.xlu0 %v21888_v34, %s21245_s14  ;;  %v21944_v47 = vpack.i.bf16 %v18202_v40, %v1520_v39  ;;  %v21946_v48 = vpack.c.bf16 %v18202_v40, %v1520_v39 }
 0x1e6   :  { %27478 = vst [vmem:[#allocation60_spill] sm:$0xff] %v21944_v47  ;;  %27479 = vst [vmem:[#allocation61_spill] sm:$0xff] %v21946_v48  ;;  %v18205_v19 = vpop.f32.mrb[60].mxu0 }
 0x1e7   :  { %20141 = vrot.lane.b32.xlu1 %v21944_v47, %s21245_s14  ;;  %v1530_v0 = vpop.f32.mrb[61].mxu0 }
 0x1e8   :  { %20106 = vrot.lane.b32.xlu0 %v21888_v34, %s21244_s5  ;;  %v21952_v42 = vpack.i.bf16 %v18205_v19, %v1530_v0  ;;  %v21954_v45 = vpack.c.bf16 %v18205_v19, %v1530_v0 }
 0x1ea   :  { %27480 = vst [vmem:[#allocation62_spill] sm:$0xff] %v21952_v42  ;;  %27481 = vst [vmem:[#allocation63_spill] sm:$0xff] %v21954_v45  ;;  %v18208_v35 = vpop.f32.mrb[62].mxu0 }
 0x1eb   :  { %v1540_v16 = vpop.f32.mrb[63].mxu0 }
 0x1ec   :  { %20116 = vrot.lane.b32.xlu0 %v21904_v37, %s21245_s14  ;;  %v21958_v27 = vpack.i.bf16 %v18208_v35, %v1540_v16  ;;  %v21960_v39 = vpack.c.bf16 %v18208_v35, %v1540_v16 }
 0x1ee   :  { %27482 = vst [vmem:[#allocation64_spill] sm:$0xff] %v21958_v27  ;;  %27483 = vst [vmem:[#allocation65_spill] sm:$0xff] %v21960_v39  ;;  %20151 = vrot.lane.b32.xlu1 %v21958_v27, %s21245_s14 }
 0x1f0   :  { %20126 = vrot.lane.b32.xlu0 %v21920_v59, %s21245_s14 }
 0x1f4   :  { %20136 = vrot.lane.b32.xlu0 %v21936_v51, %s21245_s14 }
 0x1f8   :  { %20146 = vrot.lane.b32.xlu0 %v21952_v42, %s21245_s14 }
 0x1fb   :  { %v602_v40 = vpop.xlane.xlu0 %601 }
 0x1fc   :  { %v694_v0 = vmul.f32 0.03125, %v602_v40 }
 0x1fe   :  { %v726_v19 = vadd.f32 1e-05, %v694_v0 }
 0x1ff   :  { %v599_v34 = vpop.xlane.xlu0 %598 }
 0x200   :  { %20600 = vrsqrt.f32 %v726_v19  ;;  %v693_v30 = vmul.f32 0.03125, %v599_v34 }
 0x202   :  { %v725_v16 = vadd.f32 1e-05, %v693_v30  ;;  %v21974_v30 = vld [vmem:[%s27079_s3] ss:$0 sm:$0xff]  ;;  %s21246_s3 = smov 104  }
 0x203   :  { %v608_v35 = vpop.xlane.xlu0 %607 }
 0x204   :  { %20602 = vrsqrt.f32 %v725_v16  ;;  %v696_v47 = vmul.f32 0.03125, %v608_v35 }
 0x206   :  { %v728_v27 = vadd.f32 1e-05, %v696_v47 }
 0x207   :  { %v605_v55 = vpop.xlane.xlu0 %604  ;;  %v614_v63 = vpop.xlane.xlu1 %613 }
 0x208   :  { %20604 = vrsqrt.f32 %v728_v27  ;;  %v695_v59 = vmul.f32 0.03125, %v605_v55  ;;  %v698_v37 = vmul.f32 0.03125, %v614_v63 }
 0x20a   :  { %v20601_v51 = vpop.eup %20600  ;;  %v727_v20 = vadd.f32 1e-05, %v695_v59  ;;  %v730_v39 = vadd.f32 1e-05, %v698_v37 }
 0x20b   :  { %v611_v42 = vpop.xlane.xlu0 %610  ;;  %v620_v48 = vpop.xlane.xlu1 %619  ;;  %v790_v34 = vmul.f32 %v20601_v51, %v21657_v44  ;;  %v21982_v51 = vld [vmem:[%s27080_s4] ss:$0 sm:$0xff]  ;;  %s21247_s4 = smov 96  }
 0x20c   :  { %20606 = vrsqrt.f32 %v727_v20  ;;  %v697_v40 = vmul.f32 0.03125, %v611_v42  ;;  %v700_v0 = vmul.f32 0.03125, %v620_v48 }
 0x20d   :  { %20608 = vrsqrt.f32 %v730_v39  ;;  %v829_v48 = vmul.f32 %v21974_v30, %v790_v34 }
 0x20e   :  { %v20603_v47 = vpop.eup %20602  ;;  %v729_v27 = vadd.f32 1e-05, %v697_v40  ;;  %v732_v55 = vadd.f32 1e-05, %v700_v0 }
 0x20f   :  { %v617_v63 = vpop.xlane.xlu0 %616  ;;  %v626_v19 = vpop.xlane.xlu1 %625  ;;  %v789_v37 = vmul.f32 %v20603_v47, %v21662_v57 }
 0x210   :  { %20610 = vrsqrt.f32 %v729_v27  ;;  %v699_v59 = vmul.f32 0.03125, %v617_v63  ;;  %v702_v20 = vmul.f32 0.03125, %v626_v19  ;;  %v868_v27 = vadd.f32 %v21982_v51, %v829_v48 }
 0x211   :  { %20612 = vrsqrt.f32 %v732_v55  ;;  %v828_v44 = vmul.f32 %v21974_v30, %v789_v37 }
 0x212   :  { %v20605_v42 = vpop.eup %20604  ;;  %v731_v39 = vadd.f32 1e-05, %v699_v59  ;;  %v734_v16 = vadd.f32 1e-05, %v702_v20 }
 0x213   :  { %v623_v35 = vpop.xlane.xlu0 %622  ;;  %v632_v40 = vpop.xlane.xlu1 %631  ;;  %v867_v57 = vadd.f32 %v21982_v51, %v828_v44  ;;  %v792_v0 = vmul.f32 %v20605_v42, %v21665_v58 }
 0x214   :  { %20614 = vrsqrt.f32 %v731_v39  ;;  %v701_v47 = vmul.f32 0.03125, %v623_v35  ;;  %v704_v34 = vmul.f32 0.03125, %v632_v40 }
 0x215   :  { %20616 = vrsqrt.f32 %v734_v16  ;;  %18105 = vmatprep.mubr.msk.f32.mxu1 %vm403_vm2, %v867_v57  ;;  %v831_v58 = vmul.f32 %v21974_v30, %v792_v0 }
 0x216   :  { %v20607_v55 = vpop.eup %20606  ;;  %v733_v63 = vadd.f32 1e-05, %v701_v47  ;;  %v736_v19 = vadd.f32 1e-05, %v704_v34  ;;  %18106 = vmatmul.mubr.msk.f32.vlgmr.msra.gmra.mrb[0].mxu1 %vm403_vm2, %v868_v27 }
 0x217   :  { %v20609_v37 = vpop.eup %20608  ;;  %v629_v59 = vpop.xlane.xlu0 %628  ;;  %v791_v44 = vmul.f32 %v20607_v55, %v21671_v6 }
 0x218   :  { %v638_v20 = vpop.xlane.xlu1 %637  ;;  %20618 = vrsqrt.f32 %v733_v63  ;;  %v703_v42 = vmul.f32 0.03125, %v629_v59  ;;  %v794_v48 = vmul.f32 %v20609_v37, %v21680_v25  ;;  %v870_v25 = vadd.f32 %v21982_v51, %v831_v58 }
 0x219   :  { %v706_v39 = vmul.f32 0.03125, %v638_v20  ;;  %20620 = vrsqrt.f32 %v736_v19  ;;  %v830_v16 = vmul.f32 %v21974_v30, %v791_v44 }
 0x21a   :  { %v20611_v35 = vpop.eup %20610  ;;  %v735_v40 = vadd.f32 1e-05, %v703_v42  ;;  %v833_v0 = vmul.f32 %v21974_v30, %v794_v48 }
 0x21b   :  { %v738_v57 = vadd.f32 1e-05, %v706_v39  ;;  %v20613_v47 = vpop.eup %20612  ;;  %v635_v34 = vpop.xlane.xlu0 %634  ;;  %v869_v56 = vadd.f32 %v21982_v51, %v830_v16  ;;  %v793_v6 = vmul.f32 %v20611_v35, %v21677_v22 }
 0x21c   :  { %v644_v27 = vpop.xlane.xlu1 %643  ;;  %20622 = vrsqrt.f32 %v735_v40  ;;  %v705_v55 = vmul.f32 0.03125, %v635_v34  ;;  %v796_v37 = vmul.f32 %v20613_v47, %v21691_v43  ;;  %v872_v16 = vadd.f32 %v21982_v51, %v833_v0 }
 0x21d   :  { %v708_v63 = vmul.f32 0.03125, %v644_v27  ;;  %20624 = vrsqrt.f32 %v738_v57  ;;  %18108 = vmatprep.mubr.msk.f32.mxu1 %vm403_vm2, %v869_v56  ;;  %v832_v19 = vmul.f32 %v21974_v30, %v793_v6 }
 0x21e   :  { %v20615_v59 = vpop.eup %20614  ;;  %v737_v20 = vadd.f32 1e-05, %v705_v55  ;;  %18109 = vmatmul.mubr.msk.f32.gmra.mrb[2].mxu1 %vm403_vm2, %v870_v25  ;;  %v835_v56 = vmul.f32 %v21974_v30, %v796_v37 }
 0x21f   :  { %v740_v44 = vadd.f32 1e-05, %v708_v63  ;;  %v20617_v22 = vpop.eup %20616  ;;  %v641_v42 = vpop.xlane.xlu0 %640  ;;  %v871_v48 = vadd.f32 %v21982_v51, %v832_v19  ;;  %v795_v58 = vmul.f32 %v20615_v59, %v21688_v38 }
 0x220   :  { %v650_v39 = vpop.xlane.xlu1 %649  ;;  %20626 = vrsqrt.f32 %v737_v20  ;;  %v707_v35 = vmul.f32 0.03125, %v641_v42  ;;  %v798_v43 = vmul.f32 %v20617_v22, %v21705_v5  ;;  %v874_v37 = vadd.f32 %v21982_v51, %v835_v56 }
 0x221   :  { %v710_v40 = vmul.f32 0.03125, %v650_v39  ;;  %20628 = vrsqrt.f32 %v740_v44  ;;  %18111 = vmatprep.mubr.msk.f32.mxu1 %vm403_vm2, %v871_v48  ;;  %v834_v57 = vmul.f32 %v21974_v30, %v795_v58 }
 0x222   :  { %v20619_v47 = vpop.eup %20618  ;;  %v739_v34 = vadd.f32 1e-05, %v707_v35  ;;  %18112 = vmatmul.mubr.msk.f32.gmra.mrb[4].mxu1 %vm403_vm2, %v872_v16  ;;  %v837_v25 = vmul.f32 %v21974_v30, %v798_v43 }
 0x223   :  { %v742_v27 = vadd.f32 1e-05, %v710_v40  ;;  %v20621_v6 = vpop.eup %20620  ;;  %v647_v0 = vpop.xlane.xlu0 %646  ;;  %v873_v55 = vadd.f32 %v21982_v51, %v834_v57  ;;  %v797_v63 = vmul.f32 %v20619_v47, %v21700_v1 }
 0x224   :  { %v656_v38 = vpop.xlane.xlu1 %655  ;;  %20630 = vrsqrt.f32 %v739_v34  ;;  %v709_v5 = vmul.f32 0.03125, %v647_v0  ;;  %v800_v20 = vmul.f32 %v20621_v6, %v21718_v33  ;;  %v876_v58 = vadd.f32 %v21982_v51, %v837_v25 }
 0x225   :  { %v712_v19 = vmul.f32 0.03125, %v656_v38  ;;  %20632 = vrsqrt.f32 %v742_v27  ;;  %18114 = vmatprep.mubr.msk.f32.mxu1 %vm403_vm2, %v873_v55  ;;  %v836_v59 = vmul.f32 %v21974_v30, %v797_v63 }
 0x226   :  { %v20623_v44 = vpop.eup %20622  ;;  %v741_v22 = vadd.f32 1e-05, %v709_v5  ;;  %18115 = vmatmul.mubr.msk.f32.gmra.mrb[6].mxu1 %vm403_vm2, %v874_v37  ;;  %v839_v35 = vmul.f32 %v21974_v30, %v800_v20 }
 0x227   :  { %v744_v42 = vadd.f32 1e-05, %v712_v19  ;;  %v20625_v1 = vpop.eup %20624  ;;  %v653_v39 = vpop.xlane.xlu0 %652  ;;  %v875_v16 = vadd.f32 %v21982_v51, %v836_v59  ;;  %v799_v56 = vmul.f32 %v20623_v44, %v21715_v32 }
 0x228   :  { %v662_v48 = vpop.xlane.xlu1 %661  ;;  %20634 = vrsqrt.f32 %v741_v22  ;;  %v711_v40 = vmul.f32 0.03125, %v653_v39  ;;  %v802_v33 = vmul.f32 %v20625_v1, %v21728_v62  ;;  %v878_v5 = vadd.f32 %v21982_v51, %v839_v35 }
 0x229   :  { %v714_v43 = vmul.f32 0.03125, %v662_v48  ;;  %20636 = vrsqrt.f32 %v744_v42  ;;  %18117 = vmatprep.mubr.msk.f32.mxu1 %vm403_vm2, %v875_v16  ;;  %v838_v57 = vmul.f32 %v21974_v30, %v799_v56 }
 0x22a   :  { %v20627_v47 = vpop.eup %20626  ;;  %v743_v34 = vadd.f32 1e-05, %v711_v40  ;;  %18118 = vmatmul.mubr.msk.f32.gmra.mrb[8].mxu1 %vm403_vm2, %v876_v58  ;;  %v841_v63 = vmul.f32 %v21974_v30, %v802_v33 }
 0x22b   :  { %v746_v27 = vadd.f32 1e-05, %v714_v43  ;;  %v20629_v6 = vpop.eup %20628  ;;  %v659_v0 = vpop.xlane.xlu0 %658  ;;  %v877_v38 = vadd.f32 %v21982_v51, %v838_v57  ;;  %v801_v55 = vmul.f32 %v20627_v47, %v21725_v61 }
 0x22c   :  { %v668_v32 = vpop.xlane.xlu1 %667  ;;  %20638 = vrsqrt.f32 %v743_v34  ;;  %v713_v62 = vmul.f32 0.03125, %v659_v0  ;;  %v804_v37 = vmul.f32 %v20629_v6, %v21739_v26  ;;  %v880_v39 = vadd.f32 %v21982_v51, %v841_v63 }
 0x22d   :  { %v716_v25 = vmul.f32 0.03125, %v668_v32  ;;  %20640 = vrsqrt.f32 %v746_v27  ;;  %18120 = vmatprep.mubr.msk.f32.mxu1 %vm403_vm2, %v877_v38  ;;  %v840_v19 = vmul.f32 %v21974_v30, %v801_v55 }
 0x22e   :  { %v20631_v59 = vpop.eup %20630  ;;  %v745_v20 = vadd.f32 1e-05, %v713_v62  ;;  %18121 = vmatmul.mubr.msk.f32.gmra.mrb[10].mxu1 %vm403_vm2, %v878_v5  ;;  %v843_v16 = vmul.f32 %v21974_v30, %v804_v37 }
 0x22f   :  { %v748_v44 = vadd.f32 1e-05, %v716_v25  ;;  %v20633_v61 = vpop.eup %20632  ;;  %v665_v22 = vpop.xlane.xlu0 %664  ;;  %v879_v1 = vadd.f32 %v21982_v51, %v840_v19  ;;  %v803_v48 = vmul.f32 %v20631_v59, %v21736_v18 }
 0x230   :  { %v674_v42 = vpop.xlane.xlu1 %673  ;;  %20642 = vrsqrt.f32 %v745_v20  ;;  %v715_v58 = vmul.f32 0.03125, %v665_v22  ;;  %v806_v26 = vmul.f32 %v20633_v61, %v21759_v13  ;;  %v882_v32 = vadd.f32 %v21982_v51, %v843_v16 }
 0x231   :  { %v718_v56 = vmul.f32 0.03125, %v674_v42  ;;  %20644 = vrsqrt.f32 %v748_v44  ;;  %18123 = vmatprep.mubr.msk.f32.mxu1 %vm403_vm2, %v879_v1  ;;  %v842_v35 = vmul.f32 %v21974_v30, %v803_v48 }
 0x232   :  { %v20635_v40 = vpop.eup %20634  ;;  %v747_v43 = vadd.f32 1e-05, %v715_v58  ;;  %18124 = vmatmul.mubr.msk.f32.gmra.mrb[12].mxu1 %vm403_vm2, %v880_v39  ;;  %v845_v6 = vmul.f32 %v21974_v30, %v806_v26 }
 0x233   :  { %v750_v33 = vadd.f32 1e-05, %v718_v56  ;;  %v20637_v57 = vpop.eup %20636  ;;  %v671_v47 = vpop.xlane.xlu0 %670  ;;  %v881_v34 = vadd.f32 %v21982_v51, %v842_v35  ;;  %v805_v27 = vmul.f32 %v20635_v40, %v21748_v53 }
 0x234   :  { %v680_v18 = vpop.xlane.xlu1 %679  ;;  %20646 = vrsqrt.f32 %v747_v43  ;;  %v717_v13 = vmul.f32 0.03125, %v671_v47  ;;  %v808_v55 = vmul.f32 %v20637_v57, %v21778_v10  ;;  %v884_v37 = vadd.f32 %v21982_v51, %v845_v6 }
 0x235   :  { %v720_v0 = vmul.f32 0.03125, %v680_v18  ;;  %20648 = vrsqrt.f32 %v750_v33  ;;  %18126 = vmatprep.mubr.msk.f32.mxu1 %vm403_vm2, %v881_v34  ;;  %v844_v38 = vmul.f32 %v21974_v30, %v805_v27 }
 0x236   :  { %v20639_v63 = vpop.eup %20638  ;;  %v749_v62 = vadd.f32 1e-05, %v717_v13  ;;  %18127 = vmatmul.mubr.msk.f32.gmra.mrb[14].mxu1 %vm403_vm2, %v882_v32  ;;  %v847_v44 = vmul.f32 %v21974_v30, %v808_v55 }
 0x237   :  { %v752_v25 = vadd.f32 1e-05, %v720_v0  ;;  %v20641_v53 = vpop.eup %20640  ;;  %v677_v5 = vpop.xlane.xlu0 %676  ;;  %v883_v19 = vadd.f32 %v21982_v51, %v844_v38  ;;  %v807_v59 = vmul.f32 %v20639_v63, %v21766_v8 }
 0x238   :  { %20650 = vrsqrt.f32 %v749_v62  ;;  %v719_v20 = vmul.f32 0.03125, %v677_v5  ;;  %v810_v61 = vmul.f32 %v20641_v53, %v21789_v41  ;;  %v886_v26 = vadd.f32 %v21982_v51, %v847_v44 }
 0x239   :  { %20652 = vrsqrt.f32 %v752_v25  ;;  %18129 = vmatprep.mubr.msk.f32.mxu1 %vm403_vm2, %v883_v19  ;;  %v846_v10 = vmul.f32 %v21974_v30, %v807_v59 }
 0x23a   :  { %v20643_v22 = vpop.eup %20642  ;;  %v751_v42 = vadd.f32 1e-05, %v719_v20  ;;  %18130 = vmatmul.mubr.msk.f32.gmra.mrb[16].mxu1 %vm403_vm2, %v884_v37  ;;  %v849_v58 = vmul.f32 %v21974_v30, %v810_v61 }
 0x23b   :  { %v20645_v1 = vpop.eup %20644  ;;  %v683_v39 = vpop.xlane.xlu0 %682  ;;  %v885_v8 = vadd.f32 %v21982_v51, %v846_v10  ;;  %v809_v16 = vmul.f32 %v20643_v22, %v21786_v36 }
 0x23c   :  { %v686_v48 = vpop.xlane.xlu1 %685  ;;  %20654 = vrsqrt.f32 %v751_v42  ;;  %v721_v41 = vmul.f32 0.03125, %v683_v39  ;;  %v812_v40 = vmul.f32 %v20645_v1, %v21800_v29  ;;  %v888_v34 = vadd.f32 %v21982_v51, %v849_v58 }
 0x23d   :  { %v722_v56 = vmul.f32 0.03125, %v686_v48  ;;  %18132 = vmatprep.mubr.msk.f32.mxu1 %vm403_vm2, %v885_v8  ;;  %v848_v35 = vmul.f32 %v21974_v30, %v809_v16 }
 0x23e   :  { %v20647_v43 = vpop.eup %20646  ;;  %v753_v33 = vadd.f32 1e-05, %v721_v41  ;;  %18133 = vmatmul.mubr.msk.f32.gmra.mrb[18].mxu1 %vm403_vm2, %v886_v26  ;;  %v851_v13 = vmul.f32 %v21974_v30, %v812_v40 }
 0x23f   :  { %v754_v57 = vadd.f32 1e-05, %v722_v56  ;;  %v20649_v47 = vpop.eup %20648  ;;  %v887_v18 = vadd.f32 %v21982_v51, %v848_v35  ;;  %v811_v27 = vmul.f32 %v20647_v43, %v21796_v17 }
 0x240   :  { %v692_v36 = vpop.xlane.xlu1 %691  ;;  %20656 = vrsqrt.f32 %v753_v33  ;;  %v814_v0 = vmul.f32 %v20649_v47, %v21813_v9  ;;  %v890_v53 = vadd.f32 %v21982_v51, %v851_v13 }
 0x241   :  { %v724_v6 = vmul.f32 0.03125, %v692_v36  ;;  %20658 = vrsqrt.f32 %v754_v57  ;;  %18135 = vmatprep.mubr.msk.f32.mxu1 %vm403_vm2, %v887_v18  ;;  %v850_v29 = vmul.f32 %v21974_v30, %v811_v27 }
 0x242   :  { %v20651_v32 = vpop.eup %20650  ;;  %18136 = vmatmul.mubr.msk.f32.gmra.mrb[20].mxu1 %vm403_vm2, %v888_v34  ;;  %v853_v9 = vmul.f32 %v21974_v30, %v814_v0 }
 0x243   :  { %v756_v38 = vadd.f32 1e-05, %v724_v6  ;;  %v20653_v55 = vpop.eup %20652  ;;  %v689_v63 = vpop.xlane.xlu0 %688  ;;  %v889_v62 = vadd.f32 %v21982_v51, %v850_v29  ;;  %v813_v17 = vmul.f32 %v20651_v32, %v21810_v4 }
 0x244   :  { %v723_v25 = vmul.f32 0.03125, %v689_v63  ;;  %v816_v19 = vmul.f32 %v20653_v55, %v21821_v21  ;;  %v892_v44 = vadd.f32 %v21982_v51, %v853_v9 }
 0x245   :  { %20660 = vrsqrt.f32 %v756_v38  ;;  %18138 = vmatprep.mubr.msk.f32.mxu1 %vm403_vm2, %v889_v62  ;;  %v852_v5 = vmul.f32 %v21974_v30, %v813_v17 }
 0x246   :  { %v20655_v37 = vpop.eup %20654  ;;  %v755_v59 = vadd.f32 1e-05, %v723_v25  ;;  %18139 = vmatmul.mubr.msk.f32.gmra.mrb[22].mxu1 %vm403_vm2, %v890_v53  ;;  %v855_v61 = vmul.f32 %v21974_v30, %v816_v19 }
 0x247   :  { %v891_v20 = vadd.f32 %v21982_v51, %v852_v5  ;;  %v815_v4 = vmul.f32 %v20655_v37, %v21832_v7 }
 0x248   :  { %20662 = vrsqrt.f32 %v755_v59  ;;  %v894_v39 = vadd.f32 %v21982_v51, %v855_v61 }
 0x249   :  { %18141 = vmatprep.mubr.msk.f32.mxu1 %vm403_vm2, %v891_v20  ;;  %v854_v10 = vmul.f32 %v21974_v30, %v815_v4 }
 0x24a   :  { %v20657_v22 = vpop.eup %20656  ;;  %18142 = vmatmul.mubr.msk.f32.gmra.mrb[24].mxu1 %vm403_vm2, %v892_v44 }
 0x24b   :  { %v20659_v21 = vpop.eup %20658  ;;  %v893_v42 = vadd.f32 %v21982_v51, %v854_v10  ;;  %v817_v1 = vmul.f32 %v20657_v22, %v21829_v2 }
 0x24c   :  { %v818_v48 = vmul.f32 %v20659_v21, %v21839_v46 }
 0x24d   :  { %18144 = vmatprep.mubr.msk.f32.mxu1 %vm403_vm2, %v893_v42  ;;  %v856_v7 = vmul.f32 %v21974_v30, %v817_v1 }
 0x24e   :  { %18145 = vmatmul.mubr.msk.f32.gmra.mrb[26].mxu1 %vm403_vm2, %v894_v39  ;;  %v857_v58 = vmul.f32 %v21974_v30, %v818_v48  ;;  %v22235_v48 = vpop.permute.xlu0 %20041 }
 0x24f   :  { %v20661_v8 = vpop.eup %20660  ;;  %v895_v16 = vadd.f32 %v21982_v51, %v856_v7  ;;  %27485 = vst [vmem:[#allocation67_spill] sm:$0xff] %v22235_v48 }
 0x250   :  { %v820_v41 = vmul.f32 %v20661_v8, %v21847_v14  ;;  %v896_v2 = vadd.f32 %v21982_v51, %v857_v58 }
 0x251   :  { %18147 = vmatprep.mubr.msk.f32.mxu1 %vm403_vm2, %v895_v16 }
 0x252   :  { %v20663_v56 = vpop.eup %20662  ;;  %18148 = vmatmul.mubr.msk.f32.gmra.mrb[28].mxu1 %vm403_vm2, %v896_v2  ;;  %v859_v46 = vmul.f32 %v21974_v30, %v820_v41  ;;  %v22246_v41 = vpop.permute.xlu0 %20046 }
 0x253   :  { %v819_v26 = vmul.f32 %v20663_v56, %v21858_v12  ;;  %27488 = vst [vmem:[#allocation70_spill] sm:$0xff] %v22246_v41 }
 0x254   :  { %v898_v43 = vadd.f32 %v21982_v51, %v859_v46  ;;  %v22262_v46 = vpop.permute.xlu1 %20056 }
 0x255   :  { %v858_v35 = vmul.f32 %v21974_v30, %v819_v26  ;;  %27491 = vst [vmem:[#allocation73_spill] sm:$0xff] %v22262_v46 }
 0x257   :  { %v897_v40 = vadd.f32 %v21982_v51, %v858_v35  ;;  %v22264_v35 = vpop.permute.xlu0 %20051 }
 0x258   :  { %27492 = vst [vmem:[#allocation74_spill] sm:$0xff] %v22264_v35 }
 0x259   :  { %18150 = vmatprep.mubr.msk.f32.mxu1 %vm403_vm2, %v897_v40 }
 0x25a   :  { %18151 = vmatmul.mubr.msk.f32.gmra.mrb[30].mxu1 %vm403_vm2, %v898_v43 }
 0x2e9   :  { %v22108_v14 = vpop.f32.mrb[0].mxu1 }
 0x2ea   :  { %v1065_v33 = vpop.f32.mrb[1].mxu1  ;;  %1647 = vrot.lane.b32.xlu1 %v22108_v14, %s21244_s5  ;;  %1583 = vrot.lane.b32.xlu0 %v22108_v14, %s21245_s14 }
 0x2eb   :  { %18213 = vmatprep.mubr.msk.f32.mxu1 %vm2099_vm3, %v1065_v33  ;;  %v20155_v12 = vpack.i.bf16 %v22108_v14, %v1065_v33 }
 0x2ee   :  { %1711 = vrot.lane.b32.xlu1 %v22108_v14, %s21246_s3  ;;  %20156 = vrot.lane.b32.xlu0 %v20155_v12, %s21247_s4  ;;  %v22276_v12 = vpop.permute.xlu1 %20061 }
 0x2ef   :  { %27494 = vst [vmem:[#allocation76_spill] sm:$0xff] %v22276_v12 }
 0x2f1   :  { %v22119_v30 = vpop.f32.mrb[2].mxu1 }
 0x2f2   :  { %v22121_v51 = vpop.f32.mrb[3].mxu1  ;;  %1581 = vrot.lane.b32.xlu1 %v1065_v33, %s21245_s14  ;;  %1645 = vrot.lane.b32.xlu0 %v1065_v33, %s21244_s5 }
 0x2f3   :  { %v20160_v57 = vpack.i.bf16 %v22119_v30, %v22121_v51 }
 0x2f5   :  { %v22127_v47 = vpop.f32.mrb[4].mxu1 }
 0x2f6   :  { %20161 = vrot.lane.b32.xlu1 %v20160_v57, %s21247_s4  ;;  %1709 = vrot.lane.b32.xlu0 %v1065_v33, %s21246_s3  ;;  %v22131_v36 = vpop.f32.mrb[5].mxu1  ;;  %v22278_v57 = vpop.permute.xlu0 %20066 }
 0x2f7   :  { %v20165_v18 = vpack.i.bf16 %v22127_v47, %v22131_v36  ;;  %27495 = vst [vmem:[#allocation77_spill] sm:$0xff] %v22278_v57 }
 0x2f9   :  { %v22135_v34 = vpop.f32.mrb[6].mxu1 }
 0x2fa   :  { %1585 = vrot.lane.b32.xlu1 %v22121_v51, %s21245_s14  ;;  %1587 = vrot.lane.b32.xlu0 %v22119_v30, %s21245_s14  ;;  %v22141_v27 = vpop.f32.mrb[7].mxu1 }
 0x2fb   :  { %v20170_v6 = vpack.i.bf16 %v22135_v34, %v22141_v27 }
 0x2fd   :  { %v22145_v13 = vpop.f32.mrb[8].mxu1 }
 0x2fe   :  { %1649 = vrot.lane.b32.xlu1 %v22121_v51, %s21244_s5  ;;  %1651 = vrot.lane.b32.xlu0 %v22119_v30, %s21244_s5  ;;  %v22151_v0 = vpop.f32.mrb[9].mxu1 }
 0x2ff   :  { %v20175_v29 = vpack.i.bf16 %v22145_v13, %v22151_v0 }
 0x301   :  { %v22155_v32 = vpop.f32.mrb[10].mxu1 }
 0x302   :  { %1713 = vrot.lane.b32.xlu1 %v22121_v51, %s21246_s3  ;;  %1715 = vrot.lane.b32.xlu0 %v22119_v30, %s21246_s3  ;;  %v22161_v38 = vpop.f32.mrb[11].mxu1 }
 0x303   :  { %v20180_v55 = vpack.i.bf16 %v22155_v32, %v22161_v38 }
 0x305   :  { %v22165_v63 = vpop.f32.mrb[12].mxu1 }
 0x306   :  { %1591 = vrot.lane.b32.xlu1 %v22127_v47, %s21245_s14  ;;  %1589 = vrot.lane.b32.xlu0 %v22131_v36, %s21245_s14  ;;  %v22171_v62 = vpop.f32.mrb[13].mxu1 }
 0x307   :  { %v20185_v17 = vpack.i.bf16 %v22165_v63, %v22171_v62 }
 0x309   :  { %v22175_v25 = vpop.f32.mrb[14].mxu1 }
 0x30a   :  { %1655 = vrot.lane.b32.xlu1 %v22127_v47, %s21244_s5  ;;  %1653 = vrot.lane.b32.xlu0 %v22131_v36, %s21244_s5  ;;  %v22181_v53 = vpop.f32.mrb[15].mxu1 }
 0x30b   :  { %v20190_v9 = vpack.i.bf16 %v22175_v25, %v22181_v53 }
 0x30d   :  { %v22185_v5 = vpop.f32.mrb[16].mxu1 }
 0x30e   :  { %1719 = vrot.lane.b32.xlu1 %v22127_v47, %s21246_s3  ;;  %1717 = vrot.lane.b32.xlu0 %v22131_v36, %s21246_s3  ;;  %v22191_v19 = vpop.f32.mrb[17].mxu1 }
 0x30f   :  { %18269 = vmatprep.mubr.msk.f32.mxu0 %vm2099_vm3, %v22191_v19 }
 0x311   :  { %v22197_v59 = vpop.f32.mrb[18].mxu1 }
 0x312   :  { %20166 = vrot.lane.b32.xlu1 %v20165_v18, %s21247_s4  ;;  %1659 = vrot.lane.b32.xlu0 %v22135_v34, %s21244_s5  ;;  %v22202_v20 = vpop.f32.mrb[19].mxu1  ;;  %v22283_v18 = vpop.permute.xlu1 %20076 }
 0x313   :  { %27496 = vst [vmem:[#allocation78_spill] sm:$0xff] %v22283_v18 }
 0x315   :  { %v22206_v44 = vpop.f32.mrb[20].mxu1 }
 0x316   :  { %1723 = vrot.lane.b32.xlu0 %v22135_v34, %s21246_s3  ;;  %1595 = vrot.lane.b32.xlu1 %v22135_v34, %s21245_s14  ;;  %v22212_v61 = vpop.f32.mrb[21].mxu1 }
 0x319   :  { %v22216_v22 = vpop.f32.mrb[22].mxu1 }
 0x31a   :  { %1593 = vrot.lane.b32.xlu0 %v22141_v27, %s21245_s14  ;;  %20171 = vrot.lane.b32.xlu1 %v20170_v6, %s21247_s4  ;;  %v22221_v21 = vpop.f32.mrb[23].mxu1  ;;  %v22289_v6 = vpop.permute.xlu0 %20071 }
 0x31b   :  { %27497 = vst [vmem:[#allocation79_spill] sm:$0xff] %v22289_v6  ;;  %v27527_v45 = vpack.i.bf16 %v22216_v22, %v22221_v21 }
 0x31d   :  { %v22225_v1 = vpop.f32.mrb[24].mxu1 }
 0x31e   :  { %27484 = vst [vmem:[#allocation66_spill] sm:$0xff] %v22225_v1  ;;  %1657 = vrot.lane.b32.xlu1 %v22141_v27, %s21244_s5  ;;  %1599 = vrot.lane.b32.xlu0 %v22145_v13, %s21245_s14  ;;  %v22231_v39 = vpop.f32.mrb[25].mxu1  ;;  %v22296_v33 = vpop.permute.xlu0 %20086 }
 0x31f   :  { %27499 = vst [vmem:[#allocation81_spill] sm:$0xff] %v22296_v33  ;;  %v27529_v60 = vpack.i.bf16 %v22225_v1, %v22231_v39 }
 0x321   :  { %v22237_v8 = vpop.f32.mrb[26].mxu1 }
 0x322   :  { %27486 = vst [vmem:[#allocation68_spill] sm:$0xff] %v22237_v8  ;;  %1721 = vrot.lane.b32.xlu1 %v22141_v27, %s21246_s3  ;;  %20176 = vrot.lane.b32.xlu0 %v20175_v29, %s21247_s4  ;;  %v22242_v16 = vpop.f32.mrb[27].mxu1  ;;  %v22291_v29 = vpop.permute.xlu1 %20081 }
 0x323   :  { %27487 = vst [vmem:[#allocation69_spill] sm:$0xff] %v22242_v16  ;;  %27498 = vst [vmem:[#allocation80_spill] sm:$0xff] %v22291_v29  ;;  %v22304_v26 = vpop.permute.xlu0 %20101 }
 0x324   :  { %27501 = vst [vmem:[#allocation83_spill] sm:$0xff] %v22304_v26 }
 0x325   :  { %v22248_v2 = vpop.f32.mrb[28].mxu1 }
 0x326   :  { %27489 = vst [vmem:[#allocation71_spill] sm:$0xff] %v22248_v2  ;;  %1663 = vrot.lane.b32.xlu1 %v22145_v13, %s21244_s5  ;;  %1661 = vrot.lane.b32.xlu0 %v22151_v0, %s21244_s5  ;;  %v22254_v56 = vpop.f32.mrb[29].mxu1 }
 0x327   :  { %27490 = vst [vmem:[#allocation72_spill] sm:$0xff] %v22254_v56 }
 0x32a   :  { %1727 = vrot.lane.b32.xlu1 %v22145_v13, %s21246_s3  ;;  %1725 = vrot.lane.b32.xlu0 %v22151_v0, %s21246_s3 }
 0x32d   :  { %v22266_v40 = vpop.f32.mrb[30].mxu1 }
 0x32e   :  { %27493 = vst [vmem:[#allocation75_spill] sm:$0xff] %v22266_v40  ;;  %1597 = vrot.lane.b32.xlu1 %v22151_v0, %s21245_s14  ;;  %1603 = vrot.lane.b32.xlu0 %v22155_v32, %s21245_s14  ;;  %v22272_v43 = vpop.f32.mrb[31].mxu1 }
 0x332   :  { %1667 = vrot.lane.b32.xlu0 %v22155_v32, %s21244_s5  ;;  %20181 = vrot.lane.b32.xlu1 %v20180_v55, %s21247_s4  ;;  %v22298_v55 = vpop.permute.xlu1 %20091 }
 0x333   :  { %27500 = vst [vmem:[#allocation82_spill] sm:$0xff] %v22298_v55 }
 0x336   :  { %1731 = vrot.lane.b32.xlu0 %v22155_v32, %s21246_s3  ;;  %1601 = vrot.lane.b32.xlu1 %v22161_v38, %s21245_s14  ;;  %v22310_v58 = vpop.permute.xlu1 %20096 }
 0x337   :  { %27502 = vst [vmem:[#allocation84_spill] sm:$0xff] %v22310_v58 }
 0x33a   :  { %1665 = vrot.lane.b32.xlu1 %v22161_v38, %s21244_s5  ;;  %20186 = vrot.lane.b32.xlu0 %v20185_v17, %s21247_s4  ;;  %v22316_v17 = vpop.permute.xlu0 %20106  ;;  %v22318_v7 = vpop.permute.xlu1 %20111 }
 0x33b   :  { %27503 = vst [vmem:[#allocation85_spill] sm:$0xff] %v22316_v17  ;;  %27504 = vst [vmem:[#allocation86_spill] sm:$0xff] %v22318_v7 }
 0x33e   :  { %1729 = vrot.lane.b32.xlu1 %v22161_v38, %s21246_s3  ;;  %1605 = vrot.lane.b32.xlu0 %v22171_v62, %s21245_s14  ;;  %v22324_v42 = vpop.permute.xlu0 %20116  ;;  %v22326_v10 = vpop.permute.xlu1 %20121 }
 0x33f   :  { %27505 = vst [vmem:[#allocation87_spill] sm:$0xff] %v22324_v42  ;;  %27506 = vst [vmem:[#allocation88_spill] sm:$0xff] %v22326_v10  ;;  %v27521_v42 = vpack.i.bf16 %v22197_v59, %v22202_v20 }
 0x342   :  { %1607 = vrot.lane.b32.xlu1 %v22165_v63, %s21245_s14  ;;  %1669 = vrot.lane.b32.xlu0 %v22171_v62, %s21244_s5  ;;  %v22334_v4 = vpop.permute.xlu0 %20126  ;;  %v22336_v37 = vpop.permute.xlu1 %20131 }
 0x343   :  { %27507 = vst [vmem:[#allocation89_spill] sm:$0xff] %v22334_v4  ;;  %27508 = vst [vmem:[#allocation90_spill] sm:$0xff] %v22336_v37 }
 0x346   :  { %1671 = vrot.lane.b32.xlu1 %v22165_v63, %s21244_s5  ;;  %1733 = vrot.lane.b32.xlu0 %v22171_v62, %s21246_s3  ;;  %v22342_v17 = vpop.permute.xlu0 %20136  ;;  %v22344_v58 = vpop.permute.xlu1 %20141 }
 0x347   :  { %27509 = vst [vmem:[#allocation91_spill] sm:$0xff] %v22342_v17  ;;  %27510 = vst [vmem:[#allocation92_spill] sm:$0xff] %v22344_v58 }
 0x34a   :  { %1735 = vrot.lane.b32.xlu1 %v22165_v63, %s21246_s3  ;;  %1611 = vrot.lane.b32.xlu0 %v22175_v25, %s21245_s14  ;;  %v22352_v33 = vpop.permute.xlu0 %20146  ;;  %v22354_v18 = vpop.permute.xlu1 %20151 }
 0x34b   :  { %27512 = vst [vmem:[#allocation93_spill] sm:$0xff] %v22352_v33  ;;  %27513 = vst [vmem:[#allocation94_spill] sm:$0xff] %v22354_v18 }
 0x34e   :  { %1675 = vrot.lane.b32.xlu0 %v22175_v25, %s21244_s5  ;;  %20191 = vrot.lane.b32.xlu1 %v20190_v9, %s21247_s4  ;;  %v27511_v9 = vpack.i.bf16 %v22185_v5, %v22191_v19 }
 0x352   :  { %1739 = vrot.lane.b32.xlu0 %v22175_v25, %s21246_s3  ;;  %1609 = vrot.lane.b32.xlu1 %v22181_v53, %s21245_s14 }
 0x356   :  { %1673 = vrot.lane.b32.xlu1 %v22181_v53, %s21244_s5  ;;  %20196 = vrot.lane.b32.xlu0 %v27511_v9, %s21247_s4 }
 0x35a   :  { %1737 = vrot.lane.b32.xlu1 %v22181_v53, %s21246_s3  ;;  %1613 = vrot.lane.b32.xlu0 %v22191_v19, %s21245_s14 }
 0x35c   :  { %v22360_v57 = vpop.permute.xlu0 %1583  ;;  %v22362_v46 = vpop.permute.xlu1 %1647 }
 0x35d   :  { %27514 = vst [vmem:[#allocation95_spill] sm:$0xff] %v22360_v57  ;;  %27515 = vst [vmem:[#allocation96_spill] sm:$0xff] %v22362_v46 }
 0x35e   :  { %1615 = vrot.lane.b32.xlu1 %v22185_v5, %s21245_s14  ;;  %1677 = vrot.lane.b32.xlu0 %v22191_v19, %s21244_s5 }
 0x360   :  { %v20157_v9 = vpop.permute.xlu0 %20156  ;;  %v22368_v41 = vpop.permute.xlu1 %1711 }
 0x361   :  { %27516 = vst [vmem:[#allocation97_spill] sm:$0xff] %v22368_v41  ;;  %v20159_v18 = vunpack.i.h.bf16 %v20157_v9  ;;  %v20158_v33 = vunpack.i.l.bf16 %v20157_v9 }
 0x362   :  { %1679 = vrot.lane.b32.xlu1 %v22185_v5, %s21244_s5  ;;  %1741 = vrot.lane.b32.xlu0 %v22191_v19, %s21246_s3 }
 0x363   :  { %v19353_v17 = vpack.c.bf16 %v20159_v18, %v20158_v33 }
 0x364   :  { %v22380_v37 = vpop.permute.xlu0 %1645  ;;  %v22382_v4 = vpop.permute.xlu1 %1581 }
 0x365   :  { %27519 = vst [vmem:[#allocation98_spill] sm:$0xff] %v22382_v4  ;;  %19355 = vmatprep.subr.msk.bf16.mxu1 %vm22376_vm4, %v19353_v17 }
 0x366   :  { %19358 = vmatpush3.bf16.xpose.msk.msra.mxu1 %vm22376_vm4, %v19353_v17  ;;  %1619 = vrot.lane.b32.xlu0 %v22197_v59, %s21245_s14 }
 0x367   :  { %1743 = vrot.lane.b32.xlu1 %v22185_v5, %s21246_s3 }
 0x368   :  { %v22392_v19 = vpop.permute.xlu0 %1709  ;;  %v20162_v9 = vpop.permute.xlu1 %20161 }
 0x369   :  { %27520 = vst [vmem:[#allocation99_spill] sm:$0xff] %v22392_v19  ;;  %v20164_v33 = vunpack.i.h.bf16 %v20162_v9  ;;  %v20163_v18 = vunpack.i.l.bf16 %v20162_v9 }
 0x36a   :  { %1683 = vrot.lane.b32.xlu0 %v22197_v59, %s21244_s5 }
 0x36b   :  { %v19359_v10 = vpack.c.bf16 %v20164_v33, %v20163_v18  ;;  %20201 = vrot.lane.b32.xlu1 %v27521_v42, %s21247_s4 }
 0x36c   :  { %v22400_v17 = vpop.permute.xlu0 %1587  ;;  %v22402_v7 = vpop.permute.xlu1 %1585 }
 0x36d   :  { %18214 = vmatmul.mubr.msk.f32.vlgmr.msra.gmra.mrb[32].mxu1 %vm2099_vm3, %v22108_v14  ;;  %19361 = vmatprep.subr.msk.bf16.mxu1 %vm22376_vm4, %v19359_v10  ;;  %v27522_v14 = vpack.i.bf16 %v22206_v44, %v22212_v61 }
 0x36e   :  { %1747 = vrot.lane.b32.xlu0 %v22197_v59, %s21246_s3  ;;  %19364 = vmatpush3.bf16.xpose.msk.msra.mxu1 %vm22376_vm4, %v19359_v10 }
 0x36f   :  { %1617 = vrot.lane.b32.xlu1 %v22202_v20, %s21245_s14  ;;  %18220 = vmatprep.mubr.msk.f32.mxu1 %vm2099_vm3, %v22121_v51 }
 0x370   :  { %v22416_v42 = vpop.permute.xlu0 %1651  ;;  %v22418_v9 = vpop.permute.xlu1 %1649 }
 0x372   :  { %20206 = vrot.lane.b32.xlu0 %v27522_v14, %s21247_s4 }
 0x373   :  { %1681 = vrot.lane.b32.xlu1 %v22202_v20, %s21244_s5 }
 0x374   :  { %v22426_v33 = vpop.permute.xlu0 %1715  ;;  %v22428_v10 = vpop.permute.xlu1 %1713 }
 0x375   :  { %27523 = vst [vmem:[#allocation100_spill] sm:$0xff] %v22426_v33  ;;  %27524 = vst [vmem:[#allocation101_spill] sm:$0xff] %v22428_v10  ;;  %18221 = vmatmul.mubr.msk.f32.vlgmr.msra.gmra.mrb[34].mxu1 %vm2099_vm3, %v22119_v30 }
 0x376   :  { %1621 = vrot.lane.b32.xlu0 %v22212_v61, %s21245_s14  ;;  %18227 = vmatprep.mubr.msk.f32.mxu1 %vm2099_vm3, %v22131_v36 }
 0x377   :  { %1745 = vrot.lane.b32.xlu1 %v22202_v20, %s21246_s3 }
 0x378   :  { %v22438_v51 = vpop.permute.xlu0 %1589  ;;  %v22440_v18 = vpop.permute.xlu1 %1591 }
 0x37a   :  { %1685 = vrot.lane.b32.xlu0 %v22212_v61, %s21244_s5 }
 0x37b   :  { %1623 = vrot.lane.b32.xlu1 %v22206_v44, %s21245_s14 }
 0x37c   :  { %v22446_v30 = vpop.permute.xlu0 %1653  ;;  %v22448_v14 = vpop.permute.xlu1 %1655 }
 0x37e   :  { %1749 = vrot.lane.b32.xlu0 %v22212_v61, %s21246_s3 }
 0x37f   :  { %1687 = vrot.lane.b32.xlu1 %v22206_v44, %s21244_s5 }
 0x380   :  { %v22454_v36 = vpop.permute.xlu0 %1717  ;;  %v22456_v26 = vpop.permute.xlu1 %1719 }
 0x381   :  { %27525 = vst [vmem:[#allocation102_spill] sm:$0xff] %v22454_v36  ;;  %27526 = vst [vmem:[#allocation103_spill] sm:$0xff] %v22456_v26 }
 0x382   :  { %1627 = vrot.lane.b32.xlu0 %v22216_v22, %s21245_s14 }
 0x383   :  { %1751 = vrot.lane.b32.xlu1 %v22206_v44, %s21246_s3 }
 0x384   :  { %v22462_v55 = vpop.permute.xlu0 %1659  ;;  %v20167_v29 = vpop.permute.xlu1 %20166 }
 0x385   :  { %v20169_v6 = vunpack.i.h.bf16 %v20167_v29  ;;  %v20168_v35 = vunpack.i.l.bf16 %v20167_v29 }
 0x386   :  { %1691 = vrot.lane.b32.xlu0 %v22216_v22, %s21244_s5 }
 0x387   :  { %v19365_v12 = vpack.c.bf16 %v20169_v6, %v20168_v35  ;;  %20211 = vrot.lane.b32.xlu1 %v27527_v45, %s21247_s4 }
 0x388   :  { %v22470_v48 = vpop.permute.xlu0 %1723  ;;  %v22472_v52 = vpop.permute.xlu1 %1595 }
 0x389   :  { %27528 = vst [vmem:[#allocation104_spill] sm:$0xff] %v22470_v48  ;;  %19367 = vmatprep.subr.msk.bf16.mxu1 %vm22376_vm4, %v19365_v12 }
 0x38a   :  { %1755 = vrot.lane.b32.xlu0 %v22216_v22, %s21246_s3  ;;  %19370 = vmatpush3.bf16.xpose.msk.msra.mxu1 %vm22376_vm4, %v19365_v12 }
 0x38b   :  { %1625 = vrot.lane.b32.xlu1 %v22221_v21, %s21245_s14 }
 0x38c   :  { %v22482_v35 = vpop.permute.xlu0 %1593  ;;  %v20172_v6 = vpop.permute.xlu1 %20171 }
 0x38d   :  { %v20174_v45 = vunpack.i.h.bf16 %v20172_v6  ;;  %v20173_v29 = vunpack.i.l.bf16 %v20172_v6 }
 0x38e   :  { %20216 = vrot.lane.b32.xlu0 %v27529_v60, %s21247_s4 }
 0x38f   :  { %v19371_v11 = vpack.c.bf16 %v20174_v45, %v20173_v29  ;;  %1689 = vrot.lane.b32.xlu1 %v22221_v21, %s21244_s5 }
 0x390   :  { %v22490_v54 = vpop.permute.xlu0 %1599  ;;  %v22492_v12 = vpop.permute.xlu1 %1657 }
 0x391   :  { %18228 = vmatmul.mubr.msk.f32.vlgmr.msra.gmra.mrb[36].mxu1 %vm2099_vm3, %v22127_v47  ;;  %19373 = vmatprep.subr.msk.bf16.mxu1 %vm22376_vm4, %v19371_v11 }
 0x392   :  { %1629 = vrot.lane.b32.xlu0 %v22231_v39, %s21245_s14  ;;  %19376 = vmatpush3.bf16.xpose.msk.msra.mxu1 %vm22376_vm4, %v19371_v11 }
 0x393   :  { %1753 = vrot.lane.b32.xlu1 %v22221_v21, %s21246_s3  ;;  %18234 = vmatprep.mubr.msk.f32.mxu1 %vm2099_vm3, %v22141_v27 }
 0x394   :  { %v20177_v60 = vpop.permute.xlu0 %20176  ;;  %v22506_v6 = vpop.permute.xlu1 %1721 }
 0x395   :  { %27530 = vst [vmem:[#allocation105_spill] sm:$0xff] %v22506_v6  ;;  %v20179_v45 = vunpack.i.h.bf16 %v20177_v60  ;;  %v20178_v47 = vunpack.i.l.bf16 %v20177_v60 }
 0x396   :  { %1693 = vrot.lane.b32.xlu0 %v22231_v39, %s21244_s5 }
 0x397   :  { %v19377_v29 = vpack.c.bf16 %v20179_v45, %v20178_v47  ;;  %1631 = vrot.lane.b32.xlu1 %v22225_v1, %s21245_s14 }
 0x398   :  { %v22512_v49 = vpop.permute.xlu0 %1661  ;;  %v22514_v11 = vpop.permute.xlu1 %1663 }
 0x399   :  { %18235 = vmatmul.mubr.msk.f32.vlgmr.msra.gmra.mrb[38].mxu1 %vm2099_vm3, %v22135_v34  ;;  %19379 = vmatprep.subr.msk.bf16.mxu1 %vm22376_vm4, %v19377_v29 }
 0x39a   :  { %1757 = vrot.lane.b32.xlu0 %v22231_v39, %s21246_s3  ;;  %19382 = vmatpush3.bf16.xpose.msk.msra.mxu1 %vm22376_vm4, %v19377_v29 }
 0x39b   :  { %1695 = vrot.lane.b32.xlu1 %v22225_v1, %s21244_s5  ;;  %18241 = vmatprep.mubr.msk.f32.mxu1 %vm2099_vm3, %v22151_v0  ;;  %v27533_v0 = vpack.i.bf16 %v22237_v8, %v22242_v16 }
 0x39c   :  { %v22528_v27 = vpop.permute.xlu0 %1725  ;;  %v22530_v60 = vpop.permute.xlu1 %1727 }
 0x39d   :  { %27531 = vst [vmem:[#allocation106_spill] sm:$0xff] %v22528_v27  ;;  %27532 = vst [vmem:[#allocation107_spill] sm:$0xff] %v22530_v60 }
 0x39e   :  { %1635 = vrot.lane.b32.xlu0 %v22237_v8, %s21245_s14 }
 0x39f   :  { %1759 = vrot.lane.b32.xlu1 %v22225_v1, %s21246_s3 }
 0x3a0   :  { %v22536_v34 = vpop.permute.xlu0 %1603  ;;  %v22538_v45 = vpop.permute.xlu1 %1597 }
 0x3a1   :  { %18242 = vmatmul.mubr.msk.f32.vlgmr.msra.gmra.mrb[40].mxu1 %vm2099_vm3, %v22145_v13 }
 0x3a2   :  { %1699 = vrot.lane.b32.xlu0 %v22237_v8, %s21244_s5  ;;  %18248 = vmatprep.mubr.msk.f32.mxu1 %vm2099_vm3, %v22161_v38 }
 0x3a3   :  { %20221 = vrot.lane.b32.xlu1 %v27533_v0, %s21247_s4  ;;  %v27535_v0 = vpack.i.bf16 %v22248_v2, %v22254_v56 }
 0x3a4   :  { %v22550_v47 = vpop.permute.xlu0 %1667  ;;  %v20182_v29 = vpop.permute.xlu1 %20181 }
 0x3a5   :  { %v20184_v3 = vunpack.i.h.bf16 %v20182_v29  ;;  %v20183_v31 = vunpack.i.l.bf16 %v20182_v29 }
 0x3a6   :  { %1763 = vrot.lane.b32.xlu0 %v22237_v8, %s21246_s3 }
 0x3a7   :  { %v19383_v13 = vpack.c.bf16 %v20184_v3, %v20183_v31  ;;  %1633 = vrot.lane.b32.xlu1 %v22242_v16, %s21245_s14 }
 0x3a8   :  { %v22556_v15 = vpop.permute.xlu0 %1731  ;;  %v22558_v38 = vpop.permute.xlu1 %1601 }
 0x3a9   :  { %27534 = vst [vmem:[#allocation108_spill] sm:$0xff] %v22556_v15  ;;  %19385 = vmatprep.subr.msk.bf16.mxu1 %vm22376_vm4, %v19383_v13 }
 0x3aa   :  { %20226 = vrot.lane.b32.xlu0 %v27535_v0, %s21247_s4  ;;  %19388 = vmatpush3.bf16.xpose.msk.msra.mxu1 %vm22376_vm4, %v19383_v13 }
 0x3ab   :  { %1697 = vrot.lane.b32.xlu1 %v22242_v16, %s21244_s5 }
 0x3ac   :  { %v20187_v31 = vpop.permute.xlu0 %20186  ;;  %v22570_v3 = vpop.permute.xlu1 %1665 }
 0x3ad   :  { %v20189_v29 = vunpack.i.h.bf16 %v20187_v31  ;;  %v20188_v50 = vunpack.i.l.bf16 %v20187_v31 }
 0x3ae   :  { %1637 = vrot.lane.b32.xlu0 %v22254_v56, %s21245_s14 }
 0x3af   :  { %v19389_v24 = vpack.c.bf16 %v20189_v29, %v20188_v50  ;;  %1761 = vrot.lane.b32.xlu1 %v22242_v16, %s21246_s3 }
 0x3b0   :  { %v22576_v23 = vpop.permute.xlu0 %1605  ;;  %v22578_v0 = vpop.permute.xlu1 %1729 }
 0x3b1   :  { %27536 = vst [vmem:[#allocation109_spill] sm:$0xff] %v22578_v0  ;;  %18249 = vmatmul.mubr.msk.f32.vlgmr.msra.gmra.mrb[42].mxu1 %vm2099_vm3, %v22155_v32  ;;  %19391 = vmatprep.subr.msk.bf16.mxu1 %vm22376_vm4, %v19389_v24 }
 0x3b2   :  { %1701 = vrot.lane.b32.xlu0 %v22254_v56, %s21244_s5  ;;  %19394 = vmatpush3.bf16.xpose.msk.msra.mxu1 %vm22376_vm4, %v19389_v24 }
 0x3b3   :  { %1639 = vrot.lane.b32.xlu1 %v22248_v2, %s21245_s14  ;;  %18255 = vmatprep.mubr.msk.f32.mxu1 %vm2099_vm3, %v22171_v62 }
 0x3b4   :  { %v22592_v50 = vpop.permute.xlu0 %1669  ;;  %v22594_v13 = vpop.permute.xlu1 %1607 }
 0x3b6   :  { %1765 = vrot.lane.b32.xlu0 %v22254_v56, %s21246_s3  ;;  %v20235_v56 = vpack.i.bf16 %v22360_v57, %v22382_v4 }
 0x3b7   :  { %1703 = vrot.lane.b32.xlu1 %v22248_v2, %s21244_s5 }
 0x3b8   :  { %v22600_v32 = vpop.permute.xlu0 %1733  ;;  %v22602_v31 = vpop.permute.xlu1 %1671 }
 0x3b9   :  { %27537 = vst [vmem:[#allocation110_spill] sm:$0xff] %v22600_v32  ;;  %18256 = vmatmul.mubr.msk.f32.vlgmr.msra.gmra.mrb[44].mxu1 %vm2099_vm3, %v22165_v63  ;;  %v27539_v63 = vpack.i.bf16 %v22266_v40, %v22272_v43 }
 0x3ba   :  { %1643 = vrot.lane.b32.xlu0 %v22266_v40, %s21245_s14  ;;  %18262 = vmatprep.mubr.msk.f32.mxu1 %vm2099_vm3, %v22181_v53 }
 0x3bb   :  { %1767 = vrot.lane.b32.xlu1 %v22248_v2, %s21246_s3 }
 0x3bc   :  { %v22612_v24 = vpop.permute.xlu0 %1611  ;;  %v22614_v62 = vpop.permute.xlu1 %1735 }
 0x3bd   :  { %27538 = vst [vmem:[#allocation111_spill] sm:$0xff] %v22614_v62 }
 0x3be   :  { %1707 = vrot.lane.b32.xlu0 %v22266_v40, %s21244_s5 }
 0x3bf   :  { %20231 = vrot.lane.b32.xlu1 %v27539_v63, %s21247_s4 }
 0x3c0   :  { %v22622_v29 = vpop.permute.xlu0 %1675  ;;  %v20192_v28 = vpop.permute.xlu1 %20191 }
 0x3c1   :  { %27540 = vst [vmem:[#allocation112_spill] sm:$0xff] %v22622_v29  ;;  %v20194_v8 = vunpack.i.h.bf16 %v20192_v28  ;;  %v20193_v53 = vunpack.i.l.bf16 %v20192_v28  ;;  %v20240_v28 = vpack.i.bf16 %v22362_v46, %v22380_v37  ;;  %v20250_v46 = vpack.i.bf16 %v22400_v17, %v22402_v7 }
 0x3c2   :  { %1771 = vrot.lane.b32.xlu0 %v22266_v40, %s21246_s3 }
 0x3c3   :  { %v19395_v2 = vpack.c.bf16 %v20194_v8, %v20193_v53  ;;  %1641 = vrot.lane.b32.xlu1 %v22272_v43, %s21245_s14 }
 0x3c4   :  { %v22630_v1 = vpop.permute.xlu0 %1739  ;;  %v22632_v16 = vpop.permute.xlu1 %1609 }
 0x3c5   :  { %27541 = vst [vmem:[#allocation113_spill] sm:$0xff] %v22630_v1  ;;  %19397 = vmatprep.subr.msk.bf16.mxu1 %vm22376_vm4, %v19395_v2 }
 0x3c6   :  { %20236 = vrot.lane.b32.xlu0 %v20235_v56, %s21247_s4  ;;  %19400 = vmatpush3.bf16.xpose.msk.msra.mxu1 %vm22376_vm4, %v19395_v2  ;;  %v20245_v2 = vpack.i.bf16 %v22368_v41, %v22392_v19 }
 0x3c7   :  { %1705 = vrot.lane.b32.xlu1 %v22272_v43, %s21244_s5 }
 0x3c8   :  { %v20197_v8 = vpop.permute.xlu0 %20196  ;;  %v22643_v63 = vpop.permute.xlu1 %1673 }
 0x3c9   :  { %v20199_v53 = vunpack.i.h.bf16 %v20197_v8  ;;  %v20198_v57 = vunpack.i.l.bf16 %v20197_v8 }
 0x3ca   :  { %20241 = vrot.lane.b32.xlu0 %v20240_v28, %s21247_s4 }
 0x3cb   :  { %v19401_v40 = vpack.c.bf16 %v20199_v53, %v20198_v57  ;;  %1769 = vrot.lane.b32.xlu1 %v22272_v43, %s21246_s3  ;;  %v20265_v57 = vpack.i.bf16 %v22440_v18, %v22438_v51  ;;  %v20260_v53 = vpack.i.bf16 %v22426_v33, %v22428_v10 }
 0x3cc   :  { %v22650_v56 = vpop.permute.xlu0 %1613  ;;  %v22652_v4 = vpop.permute.xlu1 %1737 }
 0x3cd   :  { %27542 = vst [vmem:[#allocation114_spill] sm:$0xff] %v22652_v4  ;;  %18263 = vmatmul.mubr.msk.f32.vlgmr.msra.gmra.mrb[46].mxu1 %vm2099_vm3, %v22175_v25  ;;  %19403 = vmatprep.subr.msk.bf16.mxu0 %vm22376_vm4, %v19401_v40  ;;  %v20255_v25 = vpack.i.bf16 %v22416_v42, %v22418_v9 }
 0x3ce   :  { %19406 = vmatpush3.bf16.xpose.msk.msra.mxu0 %vm22376_vm4, %v19401_v40  ;;  %20246 = vrot.lane.b32.xlu0 %v20245_v2, %s21247_s4  ;;  %v20275_v2 = vpack.i.bf16 %v22456_v26, %v22454_v36  ;;  %v20290_v36 = vpack.i.bf16 %v22470_v48, %v22506_v6 }
 0x3cf   :  { %20251 = vrot.lane.b32.xlu1 %v20250_v46, %s21247_s4  ;;  %18276 = vmatprep.mubr.msk.f32.mxu1 %vm2099_vm3, %v22202_v20  ;;  %v20270_v46 = vpack.i.bf16 %v22448_v14, %v22446_v30 }
 0x3d0   :  { %v22668_v28 = vpop.permute.xlu0 %1677  ;;  %v22670_v8 = vpop.permute.xlu1 %1615 }
 0x3d2   :  { %20266 = vrot.lane.b32.xlu0 %v20265_v57, %s21247_s4 }
 0x3d3   :  { %20256 = vrot.lane.b32.xlu1 %v20255_v25, %s21247_s4  ;;  %v20280_v25 = vpack.i.bf16 %v22472_v52, %v22482_v35 }
 0x3d4   :  { %v22678_v40 = vpop.permute.xlu0 %1741  ;;  %v22680_v20 = vpop.permute.xlu1 %1679 }
 0x3d5   :  { %27543 = vst [vmem:[#allocation115_spill] sm:$0xff] %v22678_v40  ;;  %18270 = vmatmul.mubr.msk.f32.vlgmr.msra.gmra.mrb[64].mxu0 %vm2099_vm3, %v22185_v5  ;;  %v20295_v5 = vpack.i.bf16 %v22490_v54, %v22538_v45 }
 0x3d6   :  { %18283 = vmatprep.mubr.msk.f32.mxu0 %vm2099_vm3, %v22212_v61  ;;  %20271 = vrot.lane.b32.xlu0 %v20270_v46, %s21247_s4  ;;  %v20285_v46 = vpack.i.bf16 %v22462_v55, %v22492_v12 }
 0x3d7   :  { %20261 = vrot.lane.b32.xlu1 %v20260_v53, %s21247_s4 }
 0x3d8   :  { %v22692_v57 = vpop.permute.xlu0 %1619 }
 0x3d9   :  { %v22696_v41 = vpop.permute.xlu1 %1743 }
 0x3da   :  { %27544 = vst [vmem:[#allocation116_spill] sm:$0xff] %v22696_v41  ;;  %20276 = vrot.lane.b32.xlu0 %v20275_v2, %s21247_s4  ;;  %v20300_v2 = vpack.i.bf16 %v22514_v11, %v22512_v49 }
 0x3db   :  { %20281 = vrot.lane.b32.xlu1 %v20280_v25, %s21247_s4 }
 0x3dc   :  { %v22702_v61 = vpop.permute.xlu0 %1683 }
 0x3dd   :  { %27545 = vst [vmem:[#allocation117_spill] sm:$0xff] %v22702_v61  ;;  %v20202_v53 = vpop.permute.xlu1 %20201 }
 0x3de   :  { %v20204_v33 = vunpack.i.h.bf16 %v20202_v53  ;;  %v20203_v10 = vunpack.i.l.bf16 %v20202_v53  ;;  %20296 = vrot.lane.b32.xlu0 %v20295_v5, %s21247_s4  ;;  %v20310_v5 = vpack.i.bf16 %v22536_v34, %v22558_v38 }
 0x3df   :  { %20286 = vrot.lane.b32.xlu1 %v20285_v46, %s21247_s4 }
 0x3e0   :  { %v19407_v26 = vpack.c.bf16 %v20204_v33, %v20203_v10  ;;  %v22710_v25 = vpop.permute.xlu0 %1747  ;;  %v20305_v33 = vpack.i.bf16 %v22530_v60, %v22528_v27 }
 0x3e1   :  { %27546 = vst [vmem:[#allocation118_spill] sm:$0xff] %v22710_v25  ;;  %v22714_v19 = vpop.permute.xlu1 %1617 }
 0x3e2   :  { %19409 = vmatprep.subr.msk.bf16.mxu1 %vm22376_vm4, %v19407_v26  ;;  %20301 = vrot.lane.b32.xlu0 %v20300_v2, %s21247_s4  ;;  %v20325_v2 = vpack.i.bf16 %v22594_v13, %v22576_v23 }
 0x3e3   :  { %20291 = vrot.lane.b32.xlu1 %v20290_v36, %s21247_s4  ;;  %19412 = vmatpush3.bf16.xpose.msk.msra.mxu1 %vm22376_vm4, %v19407_v26  ;;  %v20315_v26 = vpack.i.bf16 %v22550_v47, %v22570_v3 }
 0x3e4   :  { %v20207_v10 = vpop.permute.xlu0 %20206 }
 0x3e5   :  { %v20209_v46 = vunpack.i.h.bf16 %v20207_v10  ;;  %v20208_v53 = vunpack.i.l.bf16 %v20207_v10  ;;  %v22726_v48 = vpop.permute.xlu1 %1681  ;;  %v20320_v10 = vpack.i.bf16 %v22556_v15, %v22578_v0 }
 0x3e6   :  { %27547 = vst [vmem:[#allocation119_spill] sm:$0xff] %v22726_v48  ;;  %20306 = vrot.lane.b32.xlu0 %v20305_v33, %s21247_s4 }
 0x3e7   :  { %v19413_v6 = vpack.c.bf16 %v20209_v46, %v20208_v53  ;;  %20311 = vrot.lane.b32.xlu1 %v20310_v5, %s21247_s4  ;;  %v20330_v5 = vpack.i.bf16 %v22602_v31, %v22592_v50 }
 0x3e8   :  { %v22730_v36 = vpop.permute.xlu0 %1621 }
 0x3e9   :  { %v22736_v60 = vpop.permute.xlu1 %1745  ;;  %19415 = vmatprep.subr.msk.bf16.mxu0 %vm22376_vm4, %v19413_v6 }
 0x3ea   :  { %27548 = vst [vmem:[#allocation120_spill] sm:$0xff] %v22736_v60  ;;  %18277 = vmatmul.mubr.msk.f32.vlgmr.msra.gmra.mrb[48].mxu1 %vm2099_vm3, %v22197_v59  ;;  %19418 = vmatpush3.bf16.xpose.msk.msra.mxu0 %vm22376_vm4, %v19413_v6  ;;  %v20335_v6 = vpack.i.bf16 %v22614_v62, %v22600_v32 }
 0x3eb   :  { %20316 = vrot.lane.b32.xlu1 %v20315_v26, %s21247_s4  ;;  %20326 = vrot.lane.b32.xlu0 %v20325_v2, %s21247_s4  ;;  %v20345_v2 = vpack.i.bf16 %v22622_v29, %v22643_v63 }
 0x3ec   :  { %18290 = vmatprep.mubr.msk.f32.mxu1 %vm2099_vm3, %v22221_v21  ;;  %v22748_v33 = vpop.permute.xlu0 %1685  ;;  %v20340_v21 = vpack.i.bf16 %v22612_v24, %v22632_v16 }
 0x3ed   :  { %27549 = vst [vmem:[#allocation121_spill] sm:$0xff] %v22748_v33  ;;  %v22754_v46 = vpop.permute.xlu1 %1623 }
 0x3ef   :  { %20321 = vrot.lane.b32.xlu1 %v20320_v10, %s21247_s4  ;;  %20331 = vrot.lane.b32.xlu0 %v20330_v5, %s21247_s4  ;;  %v20355_v10 = vpack.i.bf16 %v22670_v8, %v22650_v56 }
 0x3f0   :  { %v22758_v59 = vpop.permute.xlu0 %1749 }
 0x3f1   :  { %27550 = vst [vmem:[#allocation122_spill] sm:$0xff] %v22758_v59  ;;  %v22764_v53 = vpop.permute.xlu1 %1687  ;;  %18284 = vmatmul.mubr.msk.f32.vlgmr.msra.gmra.mrb[66].mxu0 %vm2099_vm3, %v22206_v44 }
 0x3f2   :  { %27551 = vst [vmem:[#allocation123_spill] sm:$0xff] %v22764_v53  ;;  %18297 = vmatprep.mubr.msk.f32.mxu0 %vm2099_vm3, %v22231_v39  ;;  %v20350_v39 = vpack.i.bf16 %v22630_v1, %v22652_v4 }
 0x3f3   :  { %20336 = vrot.lane.b32.xlu0 %v20335_v6, %s21247_s4  ;;  %20341 = vrot.lane.b32.xlu1 %v20340_v21, %s21247_s4  ;;  %v20360_v6 = vpack.i.bf16 %v22680_v20, %v22668_v28 }
 0x3f4   :  { %v22772_v26 = vpop.permute.xlu0 %1627 }
 0x3f5   :  { %v22778_v5 = vpop.permute.xlu1 %1751 }
 0x3f6   :  { %27552 = vst [vmem:[#allocation124_spill] sm:$0xff] %v22778_v5 }
 0x3f7   :  { %20346 = vrot.lane.b32.xlu1 %v20345_v2, %s21247_s4  ;;  %20356 = vrot.lane.b32.xlu0 %v20355_v10, %s21247_s4  ;;  %v20365_v2 = vpack.i.bf16 %v22696_v41, %v22678_v40  ;;  %v20370_v10 = vpack.i.bf16 %v22692_v57, %v22714_v19 }
 0x3f8   :  { %v22782_v44 = vpop.permute.xlu0 %1691 }
 0x3f9   :  { %27553 = vst [vmem:[#allocation125_spill] sm:$0xff] %v22782_v44  ;;  %v20212_v21 = vpop.permute.xlu1 %20211 }
 0x3fa   :  { %v20214_v15 = vunpack.i.h.bf16 %v20212_v21  ;;  %v20213_v0 = vunpack.i.l.bf16 %v20212_v21 }
 0x3fb   :  { %20351 = vrot.lane.b32.xlu1 %v20350_v39, %s21247_s4  ;;  %20361 = vrot.lane.b32.xlu0 %v20360_v6, %s21247_s4  ;;  %v20385_v39 = vpack.i.bf16 %v22754_v46, %v22730_v36 }
 0x3fc   :  { %v19419_v62 = vpack.c.bf16 %v20214_v15, %v20213_v0  ;;  %v22790_v32 = vpop.permute.xlu0 %1755  ;;  %v20375_v0 = vpack.i.bf16 %v22702_v61, %v22726_v48 }
 0x3fd   :  { %27554 = vst [vmem:[#allocation126_spill] sm:$0xff] %v22790_v32  ;;  %v22796_v1 = vpop.permute.xlu1 %1625 }
 0x3fe   :  { %19421 = vmatprep.subr.msk.bf16.mxu1 %vm22376_vm4, %v19419_v62 }
 0x3ff   :  { %20366 = vrot.lane.b32.xlu0 %v20365_v2, %s21247_s4  ;;  %20371 = vrot.lane.b32.xlu1 %v20370_v10, %s21247_s4 }
 0x400   :  { %19424 = vmatpush3.bf16.xpose.msk.msra.mxu1 %vm22376_vm4, %v19419_v62  ;;  %v20217_v15 = vpop.permute.xlu0 %20216  ;;  %v20380_v62 = vpack.i.bf16 %v22710_v25, %v22736_v60  ;;  %v27562_v60 = vld [vmem:[#allocation72_spill] sm:$0xff] }
 0x401   :  { %v20219_v6 = vunpack.i.h.bf16 %v20217_v15  ;;  %v20218_v21 = vunpack.i.l.bf16 %v20217_v15  ;;  %v22808_v4 = vpop.permute.xlu1 %1689  ;;  %v20390_v15 = vpack.i.bf16 %v22764_v53, %v22748_v33 }
 0x402   :  { %27555 = vst [vmem:[#allocation127_spill] sm:$0xff] %v22808_v4 }
 0x403   :  { %v19425_v41 = vpack.c.bf16 %v20219_v6, %v20218_v21  ;;  %20376 = vrot.lane.b32.xlu1 %v20375_v0, %s21247_s4  ;;  %20386 = vrot.lane.b32.xlu0 %v20385_v39, %s21247_s4  ;;  %v27557_v0 = vld [vmem:[#allocation69_spill] sm:$0xff]  ;;  %v20400_v6 = vpack.i.bf16 %v22772_v26, %v22796_v1 }
 0x404   :  { %v22812_v2 = vpop.permute.xlu0 %1629 }
 0x405   :  { %v22816_v10 = vpop.permute.xlu1 %1753  ;;  %19427 = vmatprep.subr.msk.bf16.mxu0 %vm22376_vm4, %v19425_v41 }
 0x406   :  { %27556 = vst [vmem:[#allocation128_spill] sm:$0xff] %v22816_v10  ;;  %19430 = vmatpush3.bf16.xpose.msk.msra.mxu0 %vm22376_vm4, %v19425_v41  ;;  %v20395_v41 = vpack.i.bf16 %v22778_v5, %v22758_v59 }
 0x407   :  { %18291 = vmatmul.mubr.msk.f32.vlgmr.msra.gmra.mrb[50].mxu1 %vm2099_vm3, %v22216_v22  ;;  %20381 = vrot.lane.b32.xlu1 %v20380_v62, %s21247_s4  ;;  %v20405_v62 = vpack.i.bf16 %v22782_v44, %v22808_v4 }
 0x408   :  { %20391 = vrot.lane.b32.xlu0 %v20390_v15, %s21247_s4  ;;  %18304 = vmatprep.mubr.msk.f32.mxu1 %vm2099_vm3, %v27557_v0  ;;  %v22830_v39 = vpop.permute.xlu0 %1693  ;;  %v27561_v0 = vld [vmem:[#allocation66_spill] sm:$0xff] }
 0x409   :  { %27558 = vst [vmem:[#allocation69_spill] sm:$0xff] %v22830_v39  ;;  %v22834_v21 = vpop.permute.xlu1 %1631 }
 0x40a   :  { %v20415_v25 = vpack.i.bf16 %v22834_v21, %v22812_v2 }
 0x40b   :  { %20401 = vrot.lane.b32.xlu1 %v20400_v6, %s21247_s4 }
 0x40c   :  { %20396 = vrot.lane.b32.xlu0 %v20395_v41, %s21247_s4  ;;  %v22840_v22 = vpop.permute.xlu0 %1757  ;;  %v20410_v41 = vpack.i.bf16 %v22790_v32, %v22816_v10 }
 0x40d   :  { %27559 = vst [vmem:[#allocation129_spill] sm:$0xff] %v22840_v22  ;;  %v22844_v15 = vpop.permute.xlu1 %1695  ;;  %18298 = vmatmul.mubr.msk.f32.vlgmr.msra.gmra.mrb[68].mxu0 %vm2099_vm3, %v27561_v0 }
 0x40e   :  { %27560 = vst [vmem:[#allocation130_spill] sm:$0xff] %v22844_v15  ;;  %18311 = vmatprep.mubr.msk.f32.mxu0 %vm2099_vm3, %v27562_v60  ;;  %v20420_v0 = vpack.i.bf16 %v22844_v15, %v22830_v39 }
 0x40f   :  { %20406 = vrot.lane.b32.xlu1 %v20405_v62, %s21247_s4 }
 0x410   :  { %20416 = vrot.lane.b32.xlu0 %v20415_v25, %s21247_s4  ;;  %v22854_v6 = vpop.permute.xlu0 %1635 }
 0x411   :  { %v22858_v5 = vpop.permute.xlu1 %1759 }
 0x412   :  { %27563 = vst [vmem:[#allocation66_spill] sm:$0xff] %v22858_v5  ;;  %v20425_v25 = vpack.i.bf16 %v22858_v5, %v22840_v22 }
 0x413   :  { %20411 = vrot.lane.b32.xlu1 %v20410_v41, %s21247_s4 }
 0x414   :  { %20421 = vrot.lane.b32.xlu0 %v20420_v0, %s21247_s4  ;;  %v22864_v59 = vpop.permute.xlu0 %1699 }
 0x415   :  { %27564 = vst [vmem:[#allocation72_spill] sm:$0xff] %v22864_v59  ;;  %v20222_v60 = vpop.permute.xlu1 %20221 }
 0x416   :  { %v20224_v62 = vunpack.i.h.bf16 %v20222_v60  ;;  %v20223_v40 = vunpack.i.l.bf16 %v20222_v60 }
 0x418   :  { %v19431_v27 = vpack.c.bf16 %v20224_v62, %v20223_v40  ;;  %20426 = vrot.lane.b32.xlu0 %v20425_v25, %s21247_s4  ;;  %v22869_v32 = vpop.permute.xlu0 %1763 }
 0x419   :  { %27565 = vst [vmem:[#allocation131_spill] sm:$0xff] %v22869_v32  ;;  %v22871_v10 = vpop.permute.xlu1 %1633 }
 0x41a   :  { %v20430_v41 = vpack.i.bf16 %v22854_v6, %v22871_v10  ;;  %19433 = vmatprep.subr.msk.bf16.mxu1 %vm22376_vm4, %v19431_v27 }
 0x41b   :  { %19436 = vmatpush3.bf16.xpose.msk.msra.mxu1 %vm22376_vm4, %v19431_v27 }
 0x41c   :  { %20431 = vrot.lane.b32.xlu1 %v20430_v41, %s21247_s4  ;;  %v20227_v0 = vpop.permute.xlu0 %20226  ;;  %v27568_v41 = vld [vmem:[#allocation68_spill] sm:$0xff] }
 0x41d   :  { %v20229_v60 = vunpack.i.h.bf16 %v20227_v0  ;;  %v20228_v40 = vunpack.i.l.bf16 %v20227_v0  ;;  %v22880_v62 = vpop.permute.xlu1 %1697 }
 0x41e   :  { %27566 = vst [vmem:[#allocation132_spill] sm:$0xff] %v22880_v62  ;;  %v20435_v25 = vpack.i.bf16 %v22864_v59, %v22880_v62 }
 0x41f   :  { %v19437_v5 = vpack.c.bf16 %v20229_v60, %v20228_v40 }
 0x420   :  { %20436 = vrot.lane.b32.xlu1 %v20435_v25, %s21247_s4  ;;  %v22885_v22 = vpop.permute.xlu0 %1637 }
 0x421   :  { %v22887_v44 = vpop.permute.xlu1 %1761  ;;  %19439 = vmatprep.subr.msk.bf16.mxu0 %vm22376_vm4, %v19437_v5 }
 0x422   :  { %27567 = vst [vmem:[#allocation133_spill] sm:$0xff] %v22887_v44  ;;  %v20440_v27 = vpack.i.bf16 %v22869_v32, %v22887_v44  ;;  %18305 = vmatmul.mubr.msk.f32.vlgmr.msra.gmra.mrb[52].mxu1 %vm2099_vm3, %v27568_v41  ;;  %19442 = vmatpush3.bf16.xpose.msk.msra.mxu0 %vm22376_vm4, %v19437_v5  ;;  %v27572_v32 = vld [vmem:[#allocation71_spill] sm:$0xff]  ;;  %v27573_v5 = vld [vmem:[#allocation98_spill] sm:$0xff] }
 0x423   :  { %18318 = vmatprep.mubr.msk.f32.mxu1 %vm2099_vm3, %v22272_v43 }
 0x424   :  { %20441 = vrot.lane.b32.xlu1 %v20440_v27, %s21247_s4  ;;  %v22900_v0 = vpop.permute.xlu0 %1701 }
 0x425   :  { %27569 = vst [vmem:[#allocation68_spill] sm:$0xff] %v22900_v0  ;;  %v22902_v60 = vpop.permute.xlu1 %1639 }
 0x426   :  { %v20445_v40 = vpack.i.bf16 %v22902_v60, %v22885_v22 }
 0x428   :  { %20446 = vrot.lane.b32.xlu0 %v20445_v40, %s21247_s4  ;;  %v22907_v25 = vpop.permute.xlu0 %1765 }
 0x429   :  { %27570 = vst [vmem:[#allocation134_spill] sm:$0xff] %v22907_v25  ;;  %v22909_v41 = vpop.permute.xlu1 %1703  ;;  %18312 = vmatmul.mubr.msk.f32.vlgmr.msra.gmra.mrb[70].mxu0 %vm2099_vm3, %v27572_v32 }
 0x42a   :  { %27571 = vst [vmem:[#allocation135_spill] sm:$0xff] %v22909_v41  ;;  %v20450_v43 = vpack.i.bf16 %v22909_v41, %v22900_v0  ;;  %18325 = vmatprep.mubr.msk.f32.mxu0 %vm2099_vm3, %v27573_v5 }
 0x42c   :  { %20451 = vrot.lane.b32.xlu0 %v20450_v43, %s21247_s4  ;;  %v22918_v27 = vpop.permute.xlu0 %1643 }
 0x42d   :  { %v22920_v44 = vpop.permute.xlu1 %1767 }
 0x42e   :  { %27574 = vst [vmem:[#allocation71_spill] sm:$0xff] %v22920_v44  ;;  %v20455_v40 = vpack.i.bf16 %v22920_v44, %v22907_v25 }
 0x430   :  { %20456 = vrot.lane.b32.xlu0 %v20455_v40, %s21247_s4  ;;  %v22925_v59 = vpop.permute.xlu0 %1707 }
 0x431   :  { %27575 = vst [vmem:[#allocation98_spill] sm:$0xff] %v22925_v59  ;;  %v20232_v32 = vpop.permute.xlu1 %20231 }
 0x432   :  { %v20234_v62 = vunpack.i.h.bf16 %v20232_v32  ;;  %v20233_v4 = vunpack.i.l.bf16 %v20232_v32 }
 0x434   :  { %v19443_v41 = vpack.c.bf16 %v20234_v62, %v20233_v4  ;;  %v22927_v0 = vpop.permute.xlu0 %1771 }
 0x435   :  { %27576 = vst [vmem:[#allocation136_spill] sm:$0xff] %v22927_v0  ;;  %v22929_v5 = vpop.permute.xlu1 %1641 }
 0x436   :  { %v20460_v43 = vpack.i.bf16 %v22918_v27, %v22929_v5  ;;  %19445 = vmatprep.subr.msk.bf16.mxu1 %vm22376_vm4, %v19443_v41 }
 0x437   :  { %19448 = vmatpush3.bf16.xpose.msk.msra.mxu1 %vm22376_vm4, %v19443_v41 }
 0x438   :  { %20461 = vrot.lane.b32.xlu1 %v20460_v43, %s21247_s4  ;;  %v20237_v40 = vpop.permute.xlu0 %20236  ;;  %v27579_v43 = vld [vmem:[#allocation75_spill] sm:$0xff] }
 0x439   :  { %v20239_v44 = vunpack.i.h.bf16 %v20237_v40  ;;  %v20238_v25 = vunpack.i.l.bf16 %v20237_v40  ;;  %v22938_v32 = vpop.permute.xlu1 %1705 }
 0x43a   :  { %27577 = vst [vmem:[#allocation137_spill] sm:$0xff] %v22938_v32  ;;  %v20465_v4 = vpack.i.bf16 %v22925_v59, %v22938_v32 }
 0x43b   :  { %v19449_v62 = vpack.c.bf16 %v20239_v44, %v20238_v25 }
 0x43c   :  { %20466 = vrot.lane.b32.xlu1 %v20465_v4, %s21247_s4  ;;  %v22943_v15 = vpop.permute.xlu0 %20241 }
 0x43d   :  { %v22945_v61 = vpop.permute.xlu1 %1769  ;;  %19451 = vmatprep.subr.msk.bf16.mxu0 %vm22376_vm4, %v19449_v62 }
 0x43e   :  { %27578 = vst [vmem:[#allocation138_spill] sm:$0xff] %v22945_v61  ;;  %v20470_v41 = vpack.i.bf16 %v22927_v0, %v22945_v61  ;;  %18319 = vmatmul.mubr.msk.f32.vlgmr.msra.gmra.mrb[54].mxu1 %vm2099_vm3, %v27579_v43  ;;  %19454 = vmatpush3.bf16.xpose.msk.msra.mxu0 %vm22376_vm4, %v19449_v62  ;;  %v27581_v62 = vld [vmem:[#allocation95_spill] sm:$0xff] }
 0x43f   :  { %18332 = vmatprep.mubr.msk.f32.mxu1 %vm2099_vm3, %v22402_v7  ;;  %v22973_v7 = vld [vmem:[%s27081_s1] sm:$0xff] }
 0x440   :  { %20471 = vrot.lane.b32.xlu1 %v20470_v41, %s21247_s4  ;;  %v22958_v44 = vpop.f32.mrb[32].mxu1  ;;  %v22960_v25 = vpop.permute.xlu0 %20246 }
 0x441   :  { %27580 = vst [vmem:[#allocation75_spill] sm:$0xff] %v22960_v25  ;;  %v20252_v40 = vpop.permute.xlu1 %20251  ;;  %v2174_v4 = vpop.f32.mrb[33].mxu1 }
 0x442   :  { %v20254_v59 = vunpack.i.h.bf16 %v20252_v40  ;;  %v20253_v32 = vunpack.i.l.bf16 %v20252_v40 }
 0x444   :  { %v19455_v0 = vpack.c.bf16 %v20254_v59, %v20253_v32  ;;  %v20267_v61 = vpop.permute.xlu0 %20266 }
 0x445   :  { %v20269_v39 = vunpack.i.h.bf16 %v20267_v61  ;;  %v20268_v43 = vunpack.i.l.bf16 %v20267_v61  ;;  %v22962_v48 = vpop.permute.xlu1 %20256  ;;  %18326 = vmatmul.mubr.msk.f32.vlgmr.msra.gmra.mrb[72].mxu0 %vm2099_vm3, %v27581_v62 }
 0x446   :  { %19457 = vmatprep.subr.msk.bf16.mxu1 %vm22376_vm4, %v19455_v0  ;;  %18339 = vmatprep.mubr.msk.f32.mxu0 %vm2099_vm3, %v22438_v51  ;;  %v22984_v51 = vadd.f32 %v2174_v4, %v22973_v7 }
 0x447   :  { %v19461_v59 = vpack.c.bf16 %v20269_v39, %v20268_v43  ;;  %19460 = vmatpush3.bf16.xpose.msk.msra.mxu1 %vm22376_vm4, %v19455_v0  ;;  %v22993_v0 = vld [vmem:[%s27081_s1 + $0x8] sm:$0xff] }
 0x448   :  { %v22977_v61 = vpop.permute.xlu0 %20271  ;;  %v18222_v32 = vpop.f32.mrb[34].mxu1  ;;  %v7665_v4 = vsel %vm7664_vm5, %v22984_v51, -inf }
 0x449   :  { %v22979_v41 = vpop.permute.xlu1 %20261  ;;  %v2261_v40 = vpop.f32.mrb[35].mxu1  ;;  %19463 = vmatprep.subr.msk.bf16.mxu0 %vm22376_vm4, %v19461_v59  ;;  %v22996_v62 = vadd.f32 %v18222_v32, %v22993_v0 }
 0x44a   :  { %27582 = vst [vmem:[#allocation95_spill] sm:$0xff] %v22979_v41  ;;  %19466 = vmatpush3.bf16.xpose.msk.msra.mxu0 %vm22376_vm4, %v19461_v59  ;;  %v23009_v32 = vadd.f32 %v2261_v40, %v22973_v7 }
 0x44b   :  { %27584 = vst [vmem:[#allocation140_spill] sm:$0xff] %v22996_v62 }
 0x44c   :  { %v22988_v39 = vpop.permute.xlu0 %20276  ;;  %27585 = vst [vmem:[#allocation141_spill] sm:$0xff] %v23009_v32 }
 0x44d   :  { %27583 = vst [vmem:[#allocation139_spill] sm:$0xff] %v22988_v39  ;;  %v20282_v43 = vpop.permute.xlu1 %20281 }
 0x44e   :  { %v20284_v41 = vunpack.i.h.bf16 %v20282_v43  ;;  %v20283_v25 = vunpack.i.l.bf16 %v20282_v43  ;;  %18333 = vmatmul.mubr.msk.f32.vlgmr.msra.gmra.mrb[56].mxu1 %vm2099_vm3, %v22400_v17  ;;  %v7674_v17 = vsel %vm7664_vm5, %v22996_v62, -inf }
 0x44f   :  { %7666 = vmax.xlane.f32.xlu0 %v7665_v4  ;;  %18346 = vmatprep.mubr.msk.f32.mxu1 %vm2099_vm3, %v22482_v35 }
 0x450   :  { %v19467_v59 = vpack.c.bf16 %v20284_v41, %v20283_v25  ;;  %v20297_v39 = vpop.permute.xlu0 %20296 }
 0x451   :  { %v20299_v53 = vunpack.i.h.bf16 %v20297_v39  ;;  %v20298_v29 = vunpack.i.l.bf16 %v20297_v39  ;;  %v23004_v33 = vpop.permute.xlu1 %20286  ;;  %18340 = vmatmul.mubr.msk.f32.vlgmr.msra.gmra.mrb[74].mxu0 %vm2099_vm3, %v22440_v18 }
 0x452   :  { %19469 = vmatprep.subr.msk.bf16.mxu1 %vm22376_vm4, %v19467_v59  ;;  %18353 = vmatprep.mubr.msk.f32.mxu0 %vm2099_vm3, %v22538_v45  ;;  %v7671_v45 = vsel %vm7664_vm5, %v23009_v32, -inf }
 0x453   :  { %v19473_v35 = vpack.c.bf16 %v20299_v53, %v20298_v29  ;;  %19472 = vmatpush3.bf16.xpose.msk.msra.mxu1 %vm22376_vm4, %v19467_v59  ;;  %7675 = vmax.xlane.f32.xlu0 %v7674_v17 }
 0x454   :  { %v23019_v25 = vpop.permute.xlu0 %20301 }
 0x455   :  { %v23021_v18 = vpop.permute.xlu1 %20291  ;;  %19475 = vmatprep.subr.msk.bf16.mxu0 %vm22376_vm4, %v19473_v35 }
 0x456   :  { %19478 = vmatpush3.bf16.xpose.msk.msra.mxu0 %vm22376_vm4, %v19473_v35 }
 0x457   :  { %7672 = vmax.xlane.f32.xlu0 %v7671_v45 }
 0x458   :  { %v23029_v41 = vpop.permute.xlu0 %20306 }
 0x459   :  { %v20312_v29 = vpop.permute.xlu1 %20311 }
 0x45a   :  { %v20314_v53 = vunpack.i.h.bf16 %v20312_v29  ;;  %v20313_v40 = vunpack.i.l.bf16 %v20312_v29  ;;  %18347 = vmatmul.mubr.msk.f32.vlgmr.msra.gmra.mrb[58].mxu1 %vm2099_vm3, %v22472_v52  ;;  %v23045_v52 = vadd.f32 %v22958_v44, %v22993_v0 }
 0x45b   :  { %18360 = vmatprep.mubr.msk.f32.mxu1 %vm2099_vm3, %v22558_v38 }
 0x45c   :  { %v19479_v39 = vpack.c.bf16 %v20314_v53, %v20313_v40 }
 0x45d   :  { %v20327_v43 = vpop.permute.xlu0 %20326  ;;  %v23035_v4 = vpop.permute.xlu1 %20316  ;;  %18354 = vmatmul.mubr.msk.f32.vlgmr.msra.gmra.mrb[76].mxu0 %vm2099_vm3, %v22490_v54 }
 0x45e   :  { %v20329_v59 = vunpack.i.h.bf16 %v20327_v43  ;;  %v20328_v17 = vunpack.i.l.bf16 %v20327_v43  ;;  %19481 = vmatprep.subr.msk.bf16.mxu1 %vm22376_vm4, %v19479_v39  ;;  %18367 = vmatprep.mubr.msk.f32.mxu0 %vm2099_vm3, %v22576_v23  ;;  %v7668_v23 = vsel %vm7664_vm5, %v23045_v52, -inf }
 0x45f   :  { %19484 = vmatpush3.bf16.xpose.msk.msra.mxu1 %vm22376_vm4, %v19479_v39 }
 0x460   :  { %v19485_v38 = vpack.c.bf16 %v20329_v59, %v20328_v17 }
 0x461   :  { %v23049_v35 = vpop.permute.xlu0 %20331  ;;  %v23051_v45 = vpop.permute.xlu1 %20321 }
 0x462   :  { %19487 = vmatprep.subr.msk.bf16.mxu0 %vm22376_vm4, %v19485_v38 }
 0x463   :  { %19490 = vmatpush3.bf16.xpose.msk.msra.mxu0 %vm22376_vm4, %v19485_v38 }
 0x464   :  { %7669 = vmax.xlane.f32.xlu1 %v7668_v23  ;;  %v18229_v54 = vpop.f32.mrb[36].mxu1 }
 0x465   :  { %v23059_v44 = vpop.permute.xlu0 %20336  ;;  %v20342_v29 = vpop.permute.xlu1 %20341  ;;  %v23062_v53 = vadd.f32 %v18229_v54, %v22993_v0 }
 0x466   :  { %v20344_v40 = vunpack.i.h.bf16 %v20342_v29  ;;  %v20343_v39 = vunpack.i.l.bf16 %v20342_v29  ;;  %v2348_v43 = vpop.f32.mrb[37].mxu1  ;;  %18361 = vmatmul.mubr.msk.f32.vlgmr.msra.gmra.mrb[60].mxu1 %vm2099_vm3, %v22536_v34 }
 0x467   :  { %27586 = vst [vmem:[#allocation142_spill] sm:$0xff] %v23062_v53  ;;  %v23067_v59 = vadd.f32 %v2348_v43, %v22973_v7  ;;  %18374 = vmatprep.mubr.msk.f32.mxu1 %vm2099_vm3, %v22632_v16  ;;  %v7680_v17 = vsel %vm7664_vm5, %v23062_v53, -inf }
 0x468   :  { %v19491_v38 = vpack.c.bf16 %v20344_v40, %v20343_v39  ;;  %7681 = vmax.xlane.f32.xlu1 %v7680_v17 }
 0x469   :  { %27587 = vst [vmem:[#allocation143_spill] sm:$0xff] %v23067_v59  ;;  %v20357_v23 = vpop.permute.xlu0 %20356  ;;  %v23073_v54 = vpop.permute.xlu1 %20346  ;;  %v7677_v29 = vsel %vm7664_vm5, %v23067_v59, -inf }
 0x46a   :  { %v20359_v32 = vunpack.i.h.bf16 %v20357_v23  ;;  %v20358_v62 = vunpack.i.l.bf16 %v20357_v23  ;;  %18368 = vmatmul.mubr.msk.f32.vlgmr.msra.gmra.mrb[78].mxu0 %vm2099_vm3, %v22594_v13  ;;  %19493 = vmatprep.subr.msk.bf16.mxu1 %vm22376_vm4, %v19491_v38 }
 0x46b   :  { %7678 = vmax.xlane.f32.xlu0 %v7677_v29  ;;  %19496 = vmatpush3.bf16.xpose.msk.msra.mxu1 %vm22376_vm4, %v19491_v38 }
 0x46c   :  { %v19497_v16 = vpack.c.bf16 %v20359_v32, %v20358_v62  ;;  %18381 = vmatprep.mubr.msk.f32.mxu0 %vm2099_vm3, %v22650_v56  ;;  %v18236_v34 = vpop.f32.mrb[38].mxu1 }
 0x46d   :  { %v23085_v40 = vpop.permute.xlu0 %20361  ;;  %v23087_v39 = vpop.permute.xlu1 %20351  ;;  %v23090_v43 = vadd.f32 %v18236_v34, %v22993_v0 }
 0x46e   :  { %v2435_v13 = vpop.f32.mrb[39].mxu1  ;;  %19499 = vmatprep.subr.msk.bf16.mxu0 %vm22376_vm4, %v19497_v16 }
 0x46f   :  { %27588 = vst [vmem:[#allocation144_spill] sm:$0xff] %v23090_v43  ;;  %v23095_v17 = vadd.f32 %v2435_v13, %v22973_v7  ;;  %19502 = vmatpush3.bf16.xpose.msk.msra.mxu0 %vm22376_vm4, %v19497_v16  ;;  %v7686_v56 = vsel %vm7664_vm5, %v23090_v43, -inf }
 0x470   :  { %7687 = vmax.xlane.f32.xlu0 %v7686_v56 }
 0x471   :  { %v23101_v62 = vpop.permute.xlu0 %20366  ;;  %v20372_v32 = vpop.permute.xlu1 %20371  ;;  %v7683_v29 = vsel %vm7664_vm5, %v23095_v17, -inf }
 0x472   :  { %v20374_v38 = vunpack.i.h.bf16 %v20372_v32  ;;  %v20373_v23 = vunpack.i.l.bf16 %v20372_v32  ;;  %18375 = vmatmul.mubr.msk.f32.vlgmr.msra.gmra.mrb[62].mxu1 %vm2099_vm3, %v22612_v24 }
 0x473   :  { %18388 = vmatprep.mubr.msk.f32.mxu1 %vm2099_vm3, %v22714_v19 }
 0x474   :  { %v19503_v34 = vpack.c.bf16 %v20374_v38, %v20373_v23  ;;  %v18243_v16 = vpop.f32.mrb[40].mxu1  ;;  %7684 = vmax.xlane.f32.xlu0 %v7683_v29 }
 0x475   :  { %v20387_v13 = vpop.permute.xlu0 %20386  ;;  %v23109_v43 = vpop.permute.xlu1 %20376  ;;  %v23112_v56 = vadd.f32 %v18243_v16, %v22993_v0 }
 0x476   :  { %v20389_v59 = vunpack.i.h.bf16 %v20387_v13  ;;  %v20388_v32 = vunpack.i.l.bf16 %v20387_v13  ;;  %v23114_v53 = vpop.f32.mrb[41].mxu1  ;;  %18382 = vmatmul.mubr.msk.f32.vlgmr.msra.gmra.mrb[80].mxu0 %vm2099_vm3, %v22670_v8  ;;  %19505 = vmatprep.subr.msk.bf16.mxu1 %vm22376_vm4, %v19503_v34 }
 0x477   :  { %19508 = vmatpush3.bf16.xpose.msk.msra.mxu1 %vm22376_vm4, %v19503_v34  ;;  %18395 = vmatprep.mubr.msk.f32.mxu0 %vm2099_vm3, %v22730_v36  ;;  %v7692_v19 = vsel %vm7664_vm5, %v23112_v56, -inf }
 0x478   :  { %v19509_v24 = vpack.c.bf16 %v20389_v59, %v20388_v32  ;;  %7693 = vmax.xlane.f32.xlu1 %v7692_v19 }
 0x479   :  { %v23126_v38 = vpop.permute.xlu1 %20381 }
 0x47a   :  { %v23128_v23 = vpop.permute.xlu0 %20391  ;;  %19511 = vmatprep.subr.msk.bf16.mxu0 %vm22376_vm4, %v19509_v24 }
 0x47b   :  { %19514 = vmatpush3.bf16.xpose.msk.msra.mxu0 %vm22376_vm4, %v19509_v24 }
 0x47d   :  { %v20402_v8 = vpop.permute.xlu1 %20401 }
 0x47e   :  { %v23134_v29 = vpop.permute.xlu0 %20396  ;;  %v20404_v34 = vunpack.i.h.bf16 %v20402_v8  ;;  %v20403_v36 = vunpack.i.l.bf16 %v20402_v8  ;;  %18389 = vmatmul.mubr.msk.f32.vlgmr.msra.gmra.mrb[64].mxu1 %vm2099_vm3, %v22692_v57 }
 0x47f   :  { %18402 = vmatprep.mubr.msk.f32.mxu1 %vm2099_vm3, %v22796_v1 }
 0x480   :  { %v19515_v59 = vpack.c.bf16 %v20404_v34, %v20403_v36 }
 0x481   :  { %v23148_v57 = vpop.permute.xlu1 %20406 }
 0x482   :  { %v20417_v16 = vpop.permute.xlu0 %20416  ;;  %18396 = vmatmul.mubr.msk.f32.vlgmr.msra.gmra.mrb[82].mxu0 %vm2099_vm3, %v22754_v46  ;;  %19517 = vmatprep.subr.msk.bf16.mxu1 %vm22376_vm4, %v19515_v59 }
 0x483   :  { %v20419_v13 = vunpack.i.h.bf16 %v20417_v16  ;;  %v20418_v32 = vunpack.i.l.bf16 %v20417_v16  ;;  %19520 = vmatpush3.bf16.xpose.msk.msra.mxu1 %vm22376_vm4, %v19515_v59  ;;  %18409 = vmatprep.mubr.msk.f32.mxu0 %vm2099_vm3, %v22812_v2 }
 0x484   :  { %v18250_v19 = vpop.f32.mrb[42].mxu1 }
 0x485   :  { %v19521_v1 = vpack.c.bf16 %v20419_v13, %v20418_v32  ;;  %v23151_v24 = vadd.f32 %v18250_v19, %v22993_v0  ;;  %v2609_v8 = vpop.f32.mrb[43].mxu1  ;;  %v23162_v2 = vpop.permute.xlu1 %20411 }
 0x486   :  { %v23154_v46 = vadd.f32 %v2609_v8, %v22973_v7 }
 0x487   :  { %19523 = vmatprep.subr.msk.bf16.mxu0 %vm22376_vm4, %v19521_v1  ;;  %v7698_v34 = vsel %vm7664_vm5, %v23151_v24, -inf }
 0x488   :  { %27589 = vst [vmem:[#allocation145_spill] sm:$0xff] %v23154_v46  ;;  %19526 = vmatpush3.bf16.xpose.msk.msra.mxu0 %vm22376_vm4, %v19521_v1  ;;  %7699 = vmax.xlane.f32.xlu0 %v7698_v34  ;;  %v7695_v36 = vsel %vm7664_vm5, %v23154_v46, -inf  ;;  %v23176_v1 = vpop.permute.xlu0 %20421  ;;  %v20244_v34 = vunpack.i.h.bf16 %v22943_v15 }
 0x48a   :  { %18403 = vmatmul.mubr.msk.f32.vlgmr.msra.gmra.mrb[66].mxu1 %vm2099_vm3, %v22772_v26 }
 0x48b   :  { %18416 = vmatprep.mubr.msk.f32.mxu1 %vm2099_vm3, %v22871_v10 }
 0x48c   :  { %v23170_v59 = vpop.f32.mrb[44].mxu1  ;;  %7696 = vmax.xlane.f32.xlu0 %v7695_v36  ;;  %v23184_v10 = vpop.permute.xlu0 %20426 }
 0x48d   :  { %v23172_v16 = vpop.f32.mrb[45].mxu1 }
 0x48e   :  { %v20432_v13 = vpop.permute.xlu1 %20431 }
 0x48f   :  { %18410 = vmatmul.mubr.msk.f32.vlgmr.msra.gmra.mrb[84].mxu0 %vm2099_vm3, %v22834_v21  ;;  %v20434_v32 = vunpack.i.h.bf16 %v20432_v13  ;;  %v20433_v19 = vunpack.i.l.bf16 %v20432_v13  ;;  %v20243_v21 = vunpack.i.l.bf16 %v22943_v15 }
 0x490   :  { %18423 = vmatprep.mubr.msk.f32.mxu0 %vm2099_vm3, %v22885_v22 }
 0x491   :  { %v19527_v26 = vpack.c.bf16 %v20434_v32, %v20433_v19  ;;  %v19545_v32 = vpack.c.bf16 %v20244_v34, %v20243_v21 }
 0x492   :  { %v23194_v19 = vpop.permute.xlu1 %20436 }
 0x493   :  { %19529 = vmatprep.subr.msk.bf16.mxu1 %vm22376_vm4, %v19527_v26 }
 0x494   :  { %19532 = vmatpush3.bf16.xpose.msk.msra.mxu1 %vm22376_vm4, %v19527_v26 }
 0x49a   :  { %v20447_v8 = vpop.permute.xlu0 %20446 }
 0x49b   :  { %v20449_v36 = vunpack.i.h.bf16 %v20447_v8  ;;  %v20448_v13 = vunpack.i.l.bf16 %v20447_v8  ;;  %18417 = vmatmul.mubr.msk.f32.vlgmr.msra.gmra.mrb[68].mxu1 %vm2099_vm3, %v22854_v6  ;;  %v20273_v8 = vunpack.i.l.bf16 %v22977_v61 }
 0x49c   :  { %18430 = vmatprep.mubr.msk.f32.mxu1 %vm2099_vm3, %v22929_v5  ;;  %v20274_v5 = vunpack.i.h.bf16 %v22977_v61 }
 0x49d   :  { %v19533_v22 = vpack.c.bf16 %v20449_v36, %v20448_v13  ;;  %v23210_v36 = vpop.permute.xlu1 %20441 }
 0x49e   :  { %v19557_v13 = vpack.c.bf16 %v20274_v5, %v20273_v8 }
 0x49f   :  { %19535 = vmatprep.subr.msk.bf16.mxu0 %vm22376_vm4, %v19533_v22 }
 0x4a0   :  { %19538 = vmatpush3.bf16.xpose.msk.msra.mxu0 %vm22376_vm4, %v19533_v22  ;;  %v18264_v26 = vpop.f32.mrb[46].mxu1 }
 0x4a1   :  { %v23199_v15 = vadd.f32 %v18264_v26, %v22993_v0  ;;  %19547 = vmatprep.subr.msk.bf16.mxu0 %vm22376_vm4, %v19545_v32  ;;  %v2783_v6 = vpop.f32.mrb[47].mxu1 }
 0x4a2   :  { %v23208_v21 = vadd.f32 %v2783_v6, %v22973_v7 }
 0x4a3   :  { %27590 = vst [vmem:[#allocation146_spill] sm:$0xff] %v23199_v15  ;;  %v7710_v34 = vsel %vm7664_vm5, %v23199_v15, -inf  ;;  %v23233_v15 = vadd.f32 %v23114_v53, %v22973_v7 }
 0x4a4   :  { %27591 = vst [vmem:[#allocation147_spill] sm:$0xff] %v23208_v21  ;;  %7711 = vmax.xlane.f32.xlu0 %v7710_v34  ;;  %v7707_v22 = vsel %vm7664_vm5, %v23208_v21, -inf  ;;  %v20304_v21 = vunpack.i.h.bf16 %v23019_v25 }
 0x4a5   :  { %v7689_v53 = vsel %vm7664_vm5, %v23233_v15, -inf }
 0x4a7   :  { %18424 = vmatmul.mubr.msk.f32.vlgmr.msra.gmra.mrb[86].mxu0 %vm2099_vm3, %v22902_v60  ;;  %v20259_v60 = vunpack.i.h.bf16 %v22962_v48 }
 0x4a8   :  { %19550 = vmatpush3.bf16.xpose.msk.msra.mxu0 %vm22376_vm4, %v19545_v32  ;;  %18437 = vmatprep.mubr.msk.f32.mxu0 %vm2099_vm3, %v22380_v37  ;;  %v18271_v61 = vpop.f32.mrb[64].mxu0  ;;  %v20258_v32 = vunpack.i.l.bf16 %v22962_v48  ;;  %v27592_v48 = vld [vmem:[#allocation96_spill] sm:$0xff] }
 0x4a9   :  { %v23221_v26 = vadd.f32 %v18271_v61, %v22993_v0  ;;  %19559 = vmatprep.subr.msk.bf16.mxu0 %vm22376_vm4, %v19557_v13  ;;  %7708 = vmax.xlane.f32.xlu0 %v7707_v22  ;;  %v2870_v6 = vpop.f32.mrb[65].mxu0  ;;  %v20303_v61 = vunpack.i.l.bf16 %v23019_v25 }
 0x4aa   :  { %v20462_v5 = vpop.permute.xlu1 %20461  ;;  %v19551_v46 = vpack.c.bf16 %v20259_v60, %v20258_v32  ;;  %v23244_v25 = vadd.f32 %v2870_v6, %v22973_v7  ;;  %v20334_v6 = vunpack.i.h.bf16 %v23049_v35  ;;  %v20333_v60 = vunpack.i.l.bf16 %v23049_v35 }
 0x4ab   :  { %v20464_v8 = vunpack.i.h.bf16 %v20462_v5  ;;  %v20463_v34 = vunpack.i.l.bf16 %v20462_v5  ;;  %v7716_v37 = vsel %vm7664_vm5, %v23221_v26, -inf  ;;  %v19569_v5 = vpack.c.bf16 %v20304_v21, %v20303_v61 }
 0x4ac   :  { %7717 = vmax.xlane.f32.xlu1 %v7716_v37  ;;  %v20289_v21 = vunpack.i.h.bf16 %v23004_v33  ;;  %v20394_v61 = vunpack.i.h.bf16 %v23128_v23 }
 0x4ad   :  { %v19539_v22 = vpack.c.bf16 %v20464_v8, %v20463_v34  ;;  %v19581_v8 = vpack.c.bf16 %v20334_v6, %v20333_v60  ;;  %v23340_v6 = vadd.f32 %v23170_v59, %v22993_v0  ;;  %v20452_v59 = vpop.permute.xlu0 %20451 }
 0x4af   :  { %19541 = vmatprep.subr.msk.bf16.mxu1 %vm22376_vm4, %v19539_v22  ;;  %18438 = vmatmul.mubr.msk.f32.vlgmr.msra.gmra.mrb[88].mxu0 %vm2099_vm3, %v27592_v48 }
 0x4b0   :  { %19544 = vmatpush3.bf16.xpose.msk.msra.mxu1 %vm22376_vm4, %v19539_v22  ;;  %19562 = vmatpush3.bf16.xpose.msk.msra.mxu0 %vm22376_vm4, %v19557_v13  ;;  %v20288_v13 = vunpack.i.l.bf16 %v23004_v33  ;;  %v20318_v33 = vunpack.i.l.bf16 %v23035_v4  ;;  %v20393_v22 = vunpack.i.l.bf16 %v23128_v23 }
 0x4b1   :  { %18451 = vmatprep.mubr.msk.f32.mxu0 %vm2099_vm3, %v22446_v30  ;;  %19553 = vmatprep.subr.msk.bf16.mxu1 %vm22376_vm4, %v19551_v46  ;;  %v7713_v30 = vsel %vm7664_vm5, %v23244_v25, -inf }
 0x4b2   :  { %19571 = vmatprep.subr.msk.bf16.mxu0 %vm22376_vm4, %v19569_v5  ;;  %7690 = vmax.xlane.f32.xlu1 %v7689_v53  ;;  %v19563_v32 = vpack.c.bf16 %v20289_v21, %v20288_v13  ;;  %v19605_v23 = vpack.c.bf16 %v20394_v61, %v20393_v22  ;;  %v20423_v13 = vunpack.i.l.bf16 %v23176_v1 }
 0x4b6   :  { %7714 = vmax.xlane.f32.xlu1 %v7713_v30  ;;  %v20454_v30 = vunpack.i.h.bf16 %v20452_v59 }
 0x4b7   :  { %18431 = vmatmul.mubr.msk.f32.vlgmr.msra.gmra.mrb[70].mxu1 %vm2099_vm3, %v22918_v27  ;;  %18452 = vmatmul.mubr.msk.f32.vlgmr.msra.gmra.mrb[90].mxu0 %vm2099_vm3, %v22448_v14  ;;  %v20319_v14 = vunpack.i.h.bf16 %v23035_v4  ;;  %v20364_v27 = vunpack.i.h.bf16 %v23085_v40 }
 0x4b8   :  { %19556 = vmatpush3.bf16.xpose.msk.msra.mxu1 %vm22376_vm4, %v19551_v46  ;;  %18444 = vmatprep.mubr.msk.f32.mxu1 %vm2099_vm3, %v22418_v9  ;;  %v20363_v9 = vunpack.i.l.bf16 %v23085_v40 }
 0x4b9   :  { %19574 = vmatpush3.bf16.xpose.msk.msra.mxu0 %vm22376_vm4, %v19569_v5  ;;  %18465 = vmatprep.mubr.msk.f32.mxu0 %vm2099_vm3, %v22512_v49  ;;  %v19575_v49 = vpack.c.bf16 %v20319_v14, %v20318_v33  ;;  %v27595_v33 = vld [vmem:[#allocation123_spill] sm:$0xff] }
 0x4ba   :  { %19565 = vmatprep.subr.msk.bf16.mxu1 %vm22376_vm4, %v19563_v32  ;;  %19583 = vmatprep.subr.msk.bf16.mxu0 %vm22376_vm4, %v19581_v8  ;;  %v19593_v37 = vpack.c.bf16 %v20364_v27, %v20363_v9  ;;  %v27596_v9 = vld [vmem:[#allocation119_spill] sm:$0xff] }
 0x4bd   :  { %v18278_v35 = vpop.f32.mrb[48].mxu1 }
 0x4be   :  { %v23281_v46 = vadd.f32 %v18278_v35, %v22993_v0  ;;  %v2957_v34 = vpop.f32.mrb[49].mxu1 }
 0x4bf   :  { %18445 = vmatmul.mubr.msk.f32.vlgmr.msra.gmra.mrb[72].mxu1 %vm2099_vm3, %v22416_v42  ;;  %v23296_v40 = vadd.f32 %v2957_v34, %v22973_v7  ;;  %v20349_v42 = vunpack.i.h.bf16 %v23073_v54 }
 0x4c0   :  { %18466 = vmatmul.mubr.msk.f32.vlgmr.msra.gmra.mrb[92].mxu0 %vm2099_vm3, %v22514_v11  ;;  %19568 = vmatpush3.bf16.xpose.msk.msra.mxu1 %vm22376_vm4, %v19563_v32  ;;  %v7722_v4 = vsel %vm7664_vm5, %v23281_v46, -inf  ;;  %v20453_v32 = vunpack.i.l.bf16 %v20452_v59 }
 0x4c1   :  { %18458 = vmatprep.mubr.msk.f32.mxu1 %vm2099_vm3, %v22492_v12  ;;  %19586 = vmatpush3.bf16.xpose.msk.msra.mxu0 %vm22376_vm4, %v19581_v8  ;;  %v20348_v12 = vunpack.i.l.bf16 %v23073_v54  ;;  %v7719_v5 = vsel %vm7664_vm5, %v23296_v40, -inf  ;;  %v27594_v8 = vld [vmem:[#allocation112_spill] sm:$0xff] }
 0x4c2   :  { %18479 = vmatprep.mubr.msk.f32.mxu0 %vm2099_vm3, %v22592_v50  ;;  %19577 = vmatprep.subr.msk.bf16.mxu1 %vm22376_vm4, %v19575_v49  ;;  %v19629_v27 = vpack.c.bf16 %v20454_v30, %v20453_v32  ;;  %v27604_v30 = vld [vmem:[#allocation125_spill] sm:$0xff] }
 0x4c3   :  { %19595 = vmatprep.subr.msk.bf16.mxu0 %vm22376_vm4, %v19593_v37  ;;  %7723 = vmax.xlane.f32.xlu0 %v7722_v4  ;;  %v19587_v53 = vpack.c.bf16 %v20349_v42, %v20348_v12  ;;  %v20439_v4 = vunpack.i.h.bf16 %v23194_v19  ;;  %v27598_v42 = vld [vmem:[#allocation75_spill] sm:$0xff] }
 0x4c4   :  { %v18285_v11 = vpop.f32.mrb[66].mxu0  ;;  %v20249_v12 = vunpack.i.h.bf16 %v27598_v42 }
 0x4c5   :  { %v23309_v48 = vadd.f32 %v18285_v11, %v22993_v0  ;;  %v3044_v50 = vpop.f32.mrb[67].mxu0  ;;  %v20248_v11 = vunpack.i.l.bf16 %v27598_v42 }
 0x4c6   :  { %v23326_v21 = vadd.f32 %v3044_v50, %v22973_v7  ;;  %v27599_v50 = vld [vmem:[#allocation117_spill] sm:$0xff] }
 0x4c7   :  { %7720 = vmax.xlane.f32.xlu0 %v7719_v5  ;;  %18459 = vmatmul.mubr.msk.f32.vlgmr.msra.gmra.mrb[74].mxu1 %vm2099_vm3, %v22462_v55  ;;  %v7728_v54 = vsel %vm7664_vm5, %v23309_v48, -inf  ;;  %v20379_v55 = vunpack.i.h.bf16 %v23109_v43 }
 0x4c8   :  { %18480 = vmatmul.mubr.msk.f32.vlgmr.msra.gmra.mrb[94].mxu0 %vm2099_vm3, %v22602_v31  ;;  %19580 = vmatpush3.bf16.xpose.msk.msra.mxu1 %vm22376_vm4, %v19575_v49  ;;  %v20424_v31 = vunpack.i.h.bf16 %v23176_v1  ;;  %v27593_v1 = vld [vmem:[#allocation121_spill] sm:$0xff] }
 0x4c9   :  { %18472 = vmatprep.mubr.msk.f32.mxu1 %vm2099_vm3, %v22570_v3  ;;  %19598 = vmatpush3.bf16.xpose.msk.msra.mxu0 %vm22376_vm4, %v19593_v37  ;;  %v20378_v3 = vunpack.i.l.bf16 %v23109_v43  ;;  %v20438_v37 = vunpack.i.l.bf16 %v23194_v19 }
 0x4ca   :  { %18493 = vmatprep.mubr.msk.f32.mxu0 %vm2099_vm3, %v22668_v28  ;;  %19589 = vmatprep.subr.msk.bf16.mxu1 %vm22376_vm4, %v19587_v53  ;;  %v7725_v28 = vsel %vm7664_vm5, %v23326_v21, -inf  ;;  %v19617_v43 = vpack.c.bf16 %v20424_v31, %v20423_v13  ;;  %v27602_v13 = vld [vmem:[#allocation68_spill] sm:$0xff] }
 0x4cb   :  { %19607 = vmatprep.subr.msk.bf16.mxu0 %vm22376_vm4, %v19605_v23  ;;  %7729 = vmax.xlane.f32.xlu1 %v7728_v54  ;;  %v19599_v60 = vpack.c.bf16 %v20379_v55, %v20378_v3  ;;  %v19623_v5 = vpack.c.bf16 %v20439_v4, %v20438_v37  ;;  %v19641_v54 = vpack.c.bf16 %v20249_v12, %v20248_v11  ;;  %v27601_v55 = vld [vmem:[#allocation127_spill] sm:$0xff]  ;;  %v27609_v12 = vld [vmem:[#allocation72_spill] sm:$0xff] }
 0x4cf   :  { %7726 = vmax.xlane.f32.xlu1 %v7725_v28  ;;  %18473 = vmatmul.mubr.msk.f32.vlgmr.msra.gmra.mrb[76].mxu1 %vm2099_vm3, %v22550_v47  ;;  %v7704_v47 = vsel %vm7664_vm5, %v23340_v6, -inf }
 0x4d0   :  { %18494 = vmatmul.mubr.msk.f32.vlgmr.msra.gmra.mrb[96].mxu0 %vm2099_vm3, %v22680_v20  ;;  %19592 = vmatpush3.bf16.xpose.msk.msra.mxu1 %vm22376_vm4, %v19587_v53  ;;  %v20409_v20 = vunpack.i.h.bf16 %v23148_v57  ;;  %v27600_v53 = vld [vmem:[#allocation130_spill] sm:$0xff] }
 0x4d1   :  { %18486 = vmatprep.mubr.msk.f32.mxu1 %vm2099_vm3, %v22643_v63  ;;  %19610 = vmatpush3.bf16.xpose.msk.msra.mxu0 %vm22376_vm4, %v19605_v23  ;;  %v20408_v63 = vunpack.i.l.bf16 %v23148_v57  ;;  %v27597_v57 = vld [vmem:[#allocation69_spill] sm:$0xff]  ;;  %v20467_v23 = vpop.permute.xlu1 %20466 }
 0x4d2   :  { %18507 = vmatprep.mubr.msk.f32.mxu0 %vm2099_vm3, %v27593_v1  ;;  %19601 = vmatprep.subr.msk.bf16.mxu1 %vm22376_vm4, %v19599_v60  ;;  %v20468_v59 = vunpack.i.l.bf16 %v20467_v23  ;;  %v27603_v1 = vld [vmem:[#allocation139_spill] sm:$0xff] }
 0x4d3   :  { %19619 = vmatprep.subr.msk.bf16.mxu0 %vm22376_vm4, %v19617_v43  ;;  %7705 = vmax.xlane.f32.xlu1 %v7704_v47  ;;  %v19611_v14 = vpack.c.bf16 %v20409_v20, %v20408_v63  ;;  %v20279_v47 = vunpack.i.h.bf16 %v27603_v1  ;;  %v20278_v20 = vunpack.i.l.bf16 %v27603_v1  ;;  %v23419_v63 = vadd.f32 %v23172_v16, %v22973_v7 }
 0x4d7   :  { %18487 = vmatmul.mubr.msk.f32.vlgmr.msra.gmra.mrb[78].mxu1 %vm2099_vm3, %v27594_v8  ;;  %v27605_v8 = vld [vmem:[#allocation135_spill] sm:$0xff] }
 0x4d8   :  { %18508 = vmatmul.mubr.msk.f32.vlgmr.msra.gmra.mrb[98].mxu0 %vm2099_vm3, %v27595_v33  ;;  %19604 = vmatpush3.bf16.xpose.msk.msra.mxu1 %vm22376_vm4, %v19599_v60  ;;  %v27606_v33 = vld [vmem:[#allocation132_spill] sm:$0xff] }
 0x4d9   :  { %18500 = vmatprep.mubr.msk.f32.mxu1 %vm2099_vm3, %v27596_v9  ;;  %19622 = vmatpush3.bf16.xpose.msk.msra.mxu0 %vm22376_vm4, %v19617_v43  ;;  %v20469_v43 = vunpack.i.h.bf16 %v20467_v23  ;;  %v7701_v9 = vsel %vm7664_vm5, %v23419_v63, -inf  ;;  %v20338_v23 = vunpack.i.l.bf16 %v23059_v44 }
 0x4da   :  { %18521 = vmatprep.mubr.msk.f32.mxu0 %vm2099_vm3, %v27597_v57  ;;  %v18292_v35 = vpop.f32.mrb[50].mxu1  ;;  %19613 = vmatprep.subr.msk.bf16.mxu1 %vm22376_vm4, %v19611_v14  ;;  %v20309_v57 = vunpack.i.h.bf16 %v23029_v41 }
 0x4db   :  { %v23379_v34 = vadd.f32 %v18292_v35, %v22993_v0  ;;  %19631 = vmatprep.subr.msk.bf16.mxu0 %vm22376_vm4, %v19629_v27  ;;  %v3131_v49 = vpop.f32.mrb[51].mxu1  ;;  %v19635_v32 = vpack.c.bf16 %v20469_v43, %v20468_v59  ;;  %v20308_v35 = vunpack.i.l.bf16 %v23029_v41  ;;  %v27611_v41 = vld [vmem:[#allocation137_spill] sm:$0xff]  ;;  %v27614_v43 = vld [vmem:[#allocation103_spill] sm:$0xff] }
 0x4dc   :  { %v23390_v22 = vadd.f32 %v3131_v49, %v22973_v7  ;;  %v27608_v49 = vld [vmem:[#allocation95_spill] sm:$0xff] }
 0x4dd   :  { %v7734_v61 = vsel %vm7664_vm5, %v23379_v34, -inf  ;;  %v20264_v4 = vunpack.i.h.bf16 %v27608_v49  ;;  %v20263_v37 = vunpack.i.l.bf16 %v27608_v49  ;;  %v19665_v11 = vpack.c.bf16 %v20309_v57, %v20308_v35  ;;  %v27617_v57 = vld [vmem:[#allocation100_spill] sm:$0xff]  ;;  %v27618_v49 = vld [vmem:[#allocation107_spill] sm:$0xff] }
 0x4de   :  { %7735 = vmax.xlane.f32.xlu0 %v7734_v61  ;;  %v7731_v28 = vsel %vm7664_vm5, %v23390_v22, -inf  ;;  %v27610_v61 = vld [vmem:[#allocation97_spill] sm:$0xff] }
 0x4df   :  { %18501 = vmatmul.mubr.msk.f32.vlgmr.msra.gmra.mrb[80].mxu1 %vm2099_vm3, %v27599_v50  ;;  %v19647_v50 = vpack.c.bf16 %v20264_v4, %v20263_v37  ;;  %v27619_v4 = vld [vmem:[#allocation105_spill] sm:$0xff] }
 0x4e0   :  { %18522 = vmatmul.mubr.msk.f32.vlgmr.msra.gmra.mrb[100].mxu0 %vm2099_vm3, %v27600_v53  ;;  %19616 = vmatpush3.bf16.xpose.msk.msra.mxu1 %vm22376_vm4, %v19611_v14  ;;  %v18299_v19 = vpop.f32.mrb[68].mxu0  ;;  %v19653_v14 = vpack.c.bf16 %v20279_v47, %v20278_v20  ;;  %v20294_v53 = vunpack.i.h.bf16 %v23021_v18  ;;  %v27616_v47 = vld [vmem:[#allocation106_spill] sm:$0xff]  ;;  %v20324_v20 = vunpack.i.h.bf16 %v23051_v45 }
 0x4e1   :  { %18514 = vmatprep.mubr.msk.f32.mxu1 %vm2099_vm3, %v27601_v55  ;;  %19634 = vmatpush3.bf16.xpose.msk.msra.mxu0 %vm22376_vm4, %v19629_v27  ;;  %v23403_v3 = vadd.f32 %v18299_v19, %v22993_v0  ;;  %v3218_v31 = vpop.f32.mrb[69].mxu0  ;;  %v27607_v27 = vld [vmem:[#allocation99_spill] sm:$0xff]  ;;  %v20293_v19 = vunpack.i.l.bf16 %v23021_v18 }
 0x4e2   :  { %18535 = vmatprep.mubr.msk.f32.mxu0 %vm2099_vm3, %v27602_v13  ;;  %19625 = vmatprep.subr.msk.bf16.mxu1 %vm22376_vm4, %v19623_v5  ;;  %v23432_v16 = vadd.f32 %v3218_v31, %v22973_v7 }
 0x4e3   :  { %19643 = vmatprep.subr.msk.bf16.mxu0 %vm22376_vm4, %v19641_v54  ;;  %7732 = vmax.xlane.f32.xlu0 %v7731_v28  ;;  %v7740_v60 = vsel %vm7664_vm5, %v23403_v3, -inf  ;;  %v27613_v28 = vld [vmem:[#allocation98_spill] sm:$0xff] }
 0x4e4   :  { %7741 = vmax.xlane.f32.xlu1 %v7740_v60  ;;  %v7737_v42 = vsel %vm7664_vm5, %v23432_v16, -inf  ;;  %v19659_v60 = vpack.c.bf16 %v20294_v53, %v20293_v19  ;;  %v27622_v19 = vld [vmem:[#allocation111_spill] sm:$0xff] }
 0x4e7   :  { %18515 = vmatmul.mubr.msk.f32.vlgmr.msra.gmra.mrb[82].mxu1 %vm2099_vm3, %v27604_v30  ;;  %v20323_v30 = vunpack.i.l.bf16 %v23051_v45 }
 0x4e8   :  { %18536 = vmatmul.mubr.msk.f32.vlgmr.msra.gmra.mrb[102].mxu0 %vm2099_vm3, %v27605_v8  ;;  %19628 = vmatpush3.bf16.xpose.msk.msra.mxu1 %vm22376_vm4, %v19623_v5  ;;  %v27612_v5 = vld [vmem:[#allocation102_spill] sm:$0xff]  ;;  %v20369_v8 = vunpack.i.h.bf16 %v23101_v62 }
 0x4e9   :  { %18528 = vmatprep.mubr.msk.f32.mxu1 %vm2099_vm3, %v27606_v33  ;;  %19646 = vmatpush3.bf16.xpose.msk.msra.mxu0 %vm22376_vm4, %v19641_v54  ;;  %v20339_v54 = vunpack.i.h.bf16 %v23059_v44  ;;  %v27615_v44 = vld [vmem:[#allocation101_spill] sm:$0xff]  ;;  %v19671_v35 = vpack.c.bf16 %v20324_v20, %v20323_v30 }
 0x4ea   :  { %18549 = vmatprep.mubr.msk.f32.mxu0 %vm2099_vm3, %v27607_v27  ;;  %19637 = vmatprep.subr.msk.bf16.mxu1 %vm22376_vm4, %v19635_v32 }
 0x4eb   :  { %19655 = vmatprep.subr.msk.bf16.mxu0 %vm22376_vm4, %v19653_v14  ;;  %7702 = vmax.xlane.f32.xlu1 %v7701_v9  ;;  %v19677_v59 = vpack.c.bf16 %v20339_v54, %v20338_v23  ;;  %v20384_v23 = vunpack.i.h.bf16 %v23126_v38 }
 0x4ef   :  { %7738 = vmax.xlane.f32.xlu1 %v7737_v42  ;;  %18529 = vmatmul.mubr.msk.f32.vlgmr.msra.gmra.mrb[84].mxu1 %vm2099_vm3, %v27609_v12  ;;  %v27620_v42 = vld [vmem:[#allocation110_spill] sm:$0xff]  ;;  %v20354_v12 = vunpack.i.h.bf16 %v23087_v39 }
 0x4f0   :  { %18550 = vmatmul.mubr.msk.f32.vlgmr.msra.gmra.mrb[104].mxu0 %vm2099_vm3, %v27610_v61  ;;  %19640 = vmatpush3.bf16.xpose.msk.msra.mxu1 %vm22376_vm4, %v19635_v32  ;;  %v20399_v61 = vunpack.i.h.bf16 %v23134_v29 }
 0x4f1   :  { %18542 = vmatprep.mubr.msk.f32.mxu1 %vm2099_vm3, %v27611_v41  ;;  %19658 = vmatpush3.bf16.xpose.msk.msra.mxu0 %vm22376_vm4, %v19653_v14  ;;  %v20368_v14 = vunpack.i.l.bf16 %v23101_v62 }
 0x4f2   :  { %18563 = vmatprep.mubr.msk.f32.mxu0 %vm2099_vm3, %v27612_v5  ;;  %19667 = vmatprep.subr.msk.bf16.mxu0 %vm22376_vm4, %v19665_v11  ;;  %v27621_v5 = vld [vmem:[#allocation104_spill] sm:$0xff] }
 0x4f3   :  { %19649 = vmatprep.subr.msk.bf16.mxu1 %vm22376_vm4, %v19647_v50  ;;  %v19689_v62 = vpack.c.bf16 %v20369_v8, %v20368_v14  ;;  %v20413_v8 = vunpack.i.l.bf16 %v23162_v2 }
 0x4f5   :  { %v18306_v55 = vpop.f32.mrb[52].mxu1 }
 0x4f6   :  { %v23469_v31 = vadd.f32 %v18306_v55, %v22993_v0  ;;  %v3305_v13 = vpop.f32.mrb[53].mxu1  ;;  %v20383_v55 = vunpack.i.l.bf16 %v23126_v38 }
 0x4f7   :  { %18543 = vmatmul.mubr.msk.f32.vlgmr.msra.gmra.mrb[86].mxu1 %vm2099_vm3, %v27613_v28  ;;  %v23484_v1 = vadd.f32 %v3305_v13, %v22973_v7  ;;  %v20429_v13 = vunpack.i.h.bf16 %v23184_v10  ;;  %v20428_v28 = vunpack.i.l.bf16 %v23184_v10  ;;  %v27628_v10 = vld [vmem:[#allocation122_spill] sm:$0xff] }
 0x4f8   :  { %18564 = vmatmul.mubr.msk.f32.vlgmr.msra.gmra.mrb[106].mxu0 %vm2099_vm3, %v27614_v43  ;;  %19652 = vmatpush3.bf16.xpose.msk.msra.mxu1 %vm22376_vm4, %v19647_v50  ;;  %v7746_v18 = vsel %vm7664_vm5, %v23469_v31, -inf  ;;  %v20398_v50 = vunpack.i.l.bf16 %v23134_v29  ;;  %v27624_v29 = vld [vmem:[#allocation115_spill] sm:$0xff]  ;;  %v19695_v43 = vpack.c.bf16 %v20384_v23, %v20383_v55  ;;  %v27635_v23 = vld [vmem:[#allocation128_spill] sm:$0xff]  ;;  %v27636_v55 = vld [vmem:[#allocation134_spill] sm:$0xff] }
 0x4f9   :  { %18556 = vmatprep.mubr.msk.f32.mxu1 %vm2099_vm3, %v27615_v44  ;;  %19670 = vmatpush3.bf16.xpose.msk.msra.mxu0 %vm22376_vm4, %v19665_v11  ;;  %v7743_v9 = vsel %vm7664_vm5, %v23484_v1, -inf  ;;  %v20353_v11 = vunpack.i.l.bf16 %v23087_v39  ;;  %v27623_v39 = vld [vmem:[#allocation109_spill] sm:$0xff]  ;;  %v27627_v44 = vld [vmem:[#allocation114_spill] sm:$0xff] }
 0x4fa   :  { %18577 = vmatprep.mubr.msk.f32.mxu0 %vm2099_vm3, %v27616_v47  ;;  %19661 = vmatprep.subr.msk.bf16.mxu1 %vm22376_vm4, %v19659_v60  ;;  %v19701_v54 = vpack.c.bf16 %v20399_v61, %v20398_v50  ;;  %v20457_v47 = vpop.permute.xlu0 %20456 }
 0x4fb   :  { %19679 = vmatprep.subr.msk.bf16.mxu0 %vm22376_vm4, %v19677_v59  ;;  %7747 = vmax.xlane.f32.xlu0 %v7746_v18  ;;  %v19683_v53 = vpack.c.bf16 %v20354_v12, %v20353_v11  ;;  %v27626_v18 = vld [vmem:[#allocation116_spill] sm:$0xff]  ;;  %v27632_v11 = vld [vmem:[#allocation129_spill] sm:$0xff] }
 0x4fc   :  { %v18313_v32 = vpop.f32.mrb[70].mxu0 }
 0x4fd   :  { %v23497_v33 = vadd.f32 %v18313_v32, %v22993_v0  ;;  %v3392_v27 = vpop.f32.mrb[71].mxu0  ;;  %v20414_v32 = vunpack.i.h.bf16 %v23162_v2 }
 0x4fe   :  { %v23514_v37 = vadd.f32 %v3392_v27, %v22973_v7  ;;  %v20459_v27 = vunpack.i.h.bf16 %v20457_v47 }
 0x4ff   :  { %7744 = vmax.xlane.f32.xlu0 %v7743_v9  ;;  %18557 = vmatmul.mubr.msk.f32.vlgmr.msra.gmra.mrb[88].mxu1 %vm2099_vm3, %v27617_v57  ;;  %v7752_v45 = vsel %vm7664_vm5, %v23497_v33, -inf  ;;  %v20458_v9 = vunpack.i.l.bf16 %v20457_v47 }
 0x500   :  { %18578 = vmatmul.mubr.msk.f32.vlgmr.msra.gmra.mrb[108].mxu0 %vm2099_vm3, %v27618_v49  ;;  %19664 = vmatpush3.bf16.xpose.msk.msra.mxu1 %vm22376_vm4, %v19659_v60  ;;  %v7749_v41 = vsel %vm7664_vm5, %v23514_v37, -inf  ;;  %v27625_v60 = vld [vmem:[#allocation108_spill] sm:$0xff]  ;;  %v19707_v49 = vpack.c.bf16 %v20414_v32, %v20413_v8  ;;  %v27638_v32 = vld [vmem:[#allocation126_spill] sm:$0xff] }
 0x501   :  { %18570 = vmatprep.mubr.msk.f32.mxu1 %vm2099_vm3, %v27619_v4  ;;  %19682 = vmatpush3.bf16.xpose.msk.msra.mxu0 %vm22376_vm4, %v19677_v59  ;;  %v19713_v59 = vpack.c.bf16 %v20429_v13, %v20428_v28  ;;  %v27631_v4 = vld [vmem:[#allocation120_spill] sm:$0xff] }
 0x502   :  { %18591 = vmatprep.mubr.msk.f32.mxu0 %vm2099_vm3, %v27620_v42  ;;  %19673 = vmatprep.subr.msk.bf16.mxu1 %vm22376_vm4, %v19671_v35 }
 0x503   :  { %19691 = vmatprep.subr.msk.bf16.mxu0 %vm22376_vm4, %v19689_v62  ;;  %7753 = vmax.xlane.f32.xlu1 %v7752_v45  ;;  %v27630_v45 = vld [vmem:[#allocation124_spill] sm:$0xff] }
 0x507   :  { %7750 = vmax.xlane.f32.xlu1 %v7749_v41  ;;  %18571 = vmatmul.mubr.msk.f32.vlgmr.msra.gmra.mrb[90].mxu1 %vm2099_vm3, %v27621_v5  ;;  %v20444_v41 = vunpack.i.h.bf16 %v23210_v36  ;;  %v20443_v5 = vunpack.i.l.bf16 %v23210_v36 }
 0x508   :  { %18592 = vmatmul.mubr.msk.f32.vlgmr.msra.gmra.mrb[110].mxu0 %vm2099_vm3, %v27622_v19  ;;  %19676 = vmatpush3.bf16.xpose.msk.msra.mxu1 %vm22376_vm4, %v19671_v35  ;;  %v27629_v35 = vld [vmem:[#allocation113_spill] sm:$0xff]  ;;  %v27633_v19 = vld [vmem:[#allocation118_spill] sm:$0xff] }
 0x509   :  { %18584 = vmatprep.mubr.msk.f32.mxu1 %vm2099_vm3, %v27623_v39  ;;  %19694 = vmatpush3.bf16.xpose.msk.msra.mxu0 %vm22376_vm4, %v19689_v62  ;;  %v19725_v62 = vpack.c.bf16 %v20459_v27, %v20458_v9  ;;  %v27634_v39 = vld [vmem:[#allocation66_spill] sm:$0xff]  ;;  %v27640_v9 = vld [vmem:[#allocation133_spill] sm:$0xff] }
 0x50a   :  { %18605 = vmatprep.mubr.msk.f32.mxu0 %vm2099_vm3, %v27624_v29  ;;  %19685 = vmatprep.subr.msk.bf16.mxu1 %vm22376_vm4, %v19683_v53  ;;  %v20472_v29 = vpop.permute.xlu1 %20471 }
 0x50b   :  { %19703 = vmatprep.subr.msk.bf16.mxu0 %vm22376_vm4, %v19701_v54 }
 0x50f   :  { %18585 = vmatmul.mubr.msk.f32.vlgmr.msra.gmra.mrb[92].mxu1 %vm2099_vm3, %v27625_v60 }
 0x510   :  { %18606 = vmatmul.mubr.msk.f32.vlgmr.msra.gmra.mrb[112].mxu0 %vm2099_vm3, %v27626_v18  ;;  %19688 = vmatpush3.bf16.xpose.msk.msra.mxu1 %vm22376_vm4, %v19683_v53  ;;  %v20474_v18 = vunpack.i.h.bf16 %v20472_v29 }
 0x511   :  { %18598 = vmatprep.mubr.msk.f32.mxu1 %vm2099_vm3, %v27627_v44  ;;  %19706 = vmatpush3.bf16.xpose.msk.msra.mxu0 %vm22376_vm4, %v19701_v54  ;;  %v18320_v38 = vpop.f32.mrb[54].mxu1  ;;  %v19719_v54 = vpack.c.bf16 %v20444_v41, %v20443_v5  ;;  %v23673_v5 = vld [vmem:[%s27081_s1 + $0x8] sm:$0xff] }
 0x512   :  { %18619 = vmatprep.mubr.msk.f32.mxu0 %vm2099_vm3, %v27628_v10  ;;  %v23561_v20 = vadd.f32 %v18320_v38, %v22993_v0  ;;  %19697 = vmatprep.subr.msk.bf16.mxu1 %vm22376_vm4, %v19695_v43  ;;  %v3479_v30 = vpop.f32.mrb[55].mxu1 }
 0x513   :  { %19715 = vmatprep.subr.msk.bf16.mxu0 %vm22376_vm4, %v19713_v59  ;;  %v23572_v57 = vadd.f32 %v3479_v30, %v22973_v7 }
 0x514   :  { %v7758_v14 = vsel %vm7664_vm5, %v23561_v20, -inf }
 0x515   :  { %7759 = vmax.xlane.f32.xlu0 %v7758_v14  ;;  %v7755_v61 = vsel %vm7664_vm5, %v23572_v57, -inf  ;;  %v27639_v14 = vld [vmem:[#allocation71_spill] sm:$0xff] }
 0x517   :  { %18599 = vmatmul.mubr.msk.f32.vlgmr.msra.gmra.mrb[94].mxu1 %vm2099_vm3, %v27629_v35 }
 0x518   :  { %18620 = vmatmul.mubr.msk.f32.vlgmr.msra.gmra.mrb[114].mxu0 %vm2099_vm3, %v27630_v45  ;;  %19700 = vmatpush3.bf16.xpose.msk.msra.mxu1 %vm22376_vm4, %v19695_v43  ;;  %v18327_v2 = vpop.f32.mrb[72].mxu0  ;;  %v27637_v43 = vld [vmem:[#allocation35_spill] sm:$0xff] }
 0x519   :  { %18612 = vmatprep.mubr.msk.f32.mxu1 %vm2099_vm3, %v27631_v4  ;;  %19718 = vmatpush3.bf16.xpose.msk.msra.mxu0 %vm22376_vm4, %v19713_v59  ;;  %v23585_v42 = vadd.f32 %v18327_v2, %v22993_v0  ;;  %v3566_v12 = vpop.f32.mrb[73].mxu0  ;;  %v20473_v59 = vunpack.i.l.bf16 %v20472_v29 }
 0x51a   :  { %18633 = vmatprep.mubr.msk.f32.mxu0 %vm2099_vm3, %v27632_v11  ;;  %19709 = vmatprep.subr.msk.bf16.mxu1 %vm22376_vm4, %v19707_v49  ;;  %v23600_v53 = vadd.f32 %v3566_v12, %v22973_v7  ;;  %v23659_v11 = vld [vmem:[%s27081_s1] sm:$0xff] }
 0x51b   :  { %19727 = vmatprep.subr.msk.bf16.mxu0 %vm22376_vm4, %v19725_v62  ;;  %7756 = vmax.xlane.f32.xlu0 %v7755_v61  ;;  %v7764_v50 = vsel %vm7664_vm5, %v23585_v42, -inf  ;;  %v19731_v8 = vpack.c.bf16 %v20474_v18, %v20473_v59 }
 0x51c   :  { %7765 = vmax.xlane.f32.xlu1 %v7764_v50  ;;  %v7761_v28 = vsel %vm7664_vm5, %v23600_v53, -inf }
 0x51f   :  { %18613 = vmatmul.mubr.msk.f32.vlgmr.msra.gmra.mrb[96].mxu1 %vm2099_vm3, %v27633_v19 }
 0x520   :  { %18634 = vmatmul.mubr.msk.f32.vlgmr.msra.gmra.mrb[116].mxu0 %vm2099_vm3, %v27634_v39  ;;  %19712 = vmatpush3.bf16.xpose.msk.msra.mxu1 %vm22376_vm4, %v19707_v49  ;;  %v27642_v49 = vld [vmem:[#allocation37_spill] sm:$0xff] }
 0x521   :  { %18626 = vmatprep.mubr.msk.f32.mxu1 %vm2099_vm3, %v27635_v23  ;;  %19730 = vmatpush3.bf16.xpose.msk.msra.mxu0 %vm22376_vm4, %v19725_v62  ;;  %v18334_v36 = vpop.f32.mrb[56].mxu1 }
 0x522   :  { %18647 = vmatprep.mubr.msk.f32.mxu0 %vm2099_vm3, %v27636_v55  ;;  %v23615_v13 = vadd.f32 %v18334_v36, %v22993_v0  ;;  %19721 = vmatprep.subr.msk.bf16.mxu1 %vm22376_vm4, %v19719_v54  ;;  %v3653_v60 = vpop.f32.mrb[57].mxu1  ;;  %v27650_v36 = vld [vmem:[#allocation136_spill] sm:$0xff] }
 0x523   :  { %19738 = vmatprep.subr.bf16.mxu0 %v27637_v43  ;;  %7762 = vmax.xlane.f32.xlu1 %v7761_v28  ;;  %v23628_v30 = vadd.f32 %v3653_v60, %v22973_v7  ;;  %v27651_v60 = vld [vmem:[#allocation43_spill] sm:$0xff] }
 0x524   :  { %v18341_v44 = vpop.f32.mrb[74].mxu0  ;;  %v7770_v38 = vsel %vm7664_vm5, %v23615_v13, -inf }
 0x525   :  { %v23625_v47 = vadd.f32 %v18341_v44, %v22993_v0  ;;  %7771 = vmax.xlane.f32.xlu0 %v7770_v38  ;;  %v3740_v10 = vpop.f32.mrb[75].mxu0  ;;  %v7767_v45 = vsel %vm7664_vm5, %v23628_v30, -inf }
 0x526   :  { %v23642_v35 = vadd.f32 %v3740_v10, %v22973_v7  ;;  %v27644_v7 = vld [vmem:[#allocation131_spill] sm:$0xff] }
 0x527   :  { %18627 = vmatmul.mubr.msk.f32.vlgmr.msra.gmra.mrb[98].mxu1 %vm2099_vm3, %v27638_v32  ;;  %v7776_v27 = vsel %vm7664_vm5, %v23625_v47, -inf }
 0x528   :  { %18648 = vmatmul.mubr.msk.f32.vlgmr.msra.gmra.mrb[118].mxu0 %vm2099_vm3, %v27639_v14  ;;  %19724 = vmatpush3.bf16.xpose.msk.msra.mxu1 %vm22376_vm4, %v19719_v54  ;;  %27641 = vst [vmem:[#allocation96_spill] sm:$0xff] %v23642_v35  ;;  %v7773_v4 = vsel %vm7664_vm5, %v23642_v35, -inf  ;;  %v27648_v54 = vld [vmem:[#allocation39_spill] sm:$0xff] }
 0x529   :  { %18640 = vmatprep.mubr.msk.f32.mxu1 %vm2099_vm3, %v27640_v9  ;;  %19740 = vmatpush3.bf16.msra.mxu0 %v27637_v43 }
 0x52a   :  { %19733 = vmatprep.subr.msk.bf16.mxu1 %vm22376_vm4, %v19731_v8  ;;  %19742 = vmatprep.subr.bf16.mxu0 %v27642_v49 }
 0x52b   :  { %7777 = vmax.xlane.f32.xlu1 %v7776_v27  ;;  %7768 = vmax.xlane.f32.xlu0 %v7767_v45 }
 0x52d   :  { %v18348_v2 = vpop.f32.mrb[58].mxu1 }
 0x52e   :  { %v23650_v62 = vadd.f32 %v18348_v2, %v22993_v0  ;;  %v3827_v12 = vpop.f32.mrb[59].mxu1  ;;  %v27646_v0 = vld [vmem:[#allocation138_spill] sm:$0xff] }
 0x52f   :  { %7774 = vmax.xlane.f32.xlu1 %v7773_v4  ;;  %18641 = vmatmul.mubr.msk.f32.vlgmr.msra.gmra.mrb[100].mxu1 %vm2099_vm3, %v27644_v7  ;;  %v23662_v61 = vadd.f32 %v23659_v11, %v3827_v12  ;;  %v7670_v12 = vpop.xlane.xlu1 %7669 }
 0x530   :  { %27643 = vst [vmem:[#allocation121_spill] sm:$0xff] %v23650_v62  ;;  %19736 = vmatpush3.bf16.xpose.msk.msra.mxu1 %vm22376_vm4, %v19731_v8  ;;  %18654 = vmatprep.mubr.msk.f32.mxu1 %vm2099_vm3, %v27646_v0  ;;  %v18355_v50 = vpop.f32.mrb[76].mxu0  ;;  %v7782_v41 = vsel %vm7664_vm5, %v23650_v62, -inf }
 0x531   :  { %27645 = vst [vmem:[#allocation112_spill] sm:$0xff] %v23662_v61  ;;  %v23676_v19 = vadd.f32 %v23673_v5, %v18355_v50  ;;  %19746 = vmatprep.subr.bf16.mxu1 %v27648_v54  ;;  %7783 = vmax.xlane.f32.xlu0 %v7782_v41  ;;  %v3914_v58 = vpop.f32.mrb[77].mxu0  ;;  %v7779_v23 = vsel %vm7664_vm5, %v23662_v61, -inf }
 0x532   :  { %v23680_v39 = vadd.f32 %v23659_v11, %v3914_v58  ;;  %v8050_v58 = vsub.f32 %v23045_v52, %v7670_v12 }
 0x533   :  { %27647 = vst [vmem:[#allocation123_spill] sm:$0xff] %v23676_v19  ;;  %v7788_v29 = vsel %vm7664_vm5, %v23676_v19, -inf }
 0x534   :  { %27649 = vst [vmem:[#allocation119_spill] sm:$0xff] %v23680_v39  ;;  %7789 = vmax.xlane.f32.xlu1 %v7788_v29  ;;  %v7785_v55 = vsel %vm7664_vm5, %v23680_v39, -inf  ;;  %v7667_v29 = vpop.xlane.xlu0 %7666 }
 0x535   :  { %7780 = vmax.xlane.f32.xlu0 %v7779_v23 }
 0x537   :  { %18655 = vmatmul.mubr.msk.f32.vlgmr.msra.gmra.mrb[102].mxu1 %vm2099_vm3, %v27650_v36 }
 0x538   :  { %19748 = vmatpush3.bf16.msra.mxu1 %v27648_v54  ;;  %7786 = vmax.xlane.f32.xlu1 %v7785_v55 }
 0x539   :  { %v18362_v28 = vpop.f32.mrb[60].mxu1  ;;  %19754 = vmatprep.subr.bf16.mxu1 %v27651_v60 }
 0x53a   :  { %v23693_v43 = vadd.f32 %v23673_v5, %v18362_v28  ;;  %v4001_v18 = vpop.f32.mrb[61].mxu1  ;;  %v8049_v28 = vsub.f32 %v22984_v51, %v7667_v29 }
 0x53b   :  { %v23696_v59 = vadd.f32 %v23659_v11, %v4001_v18  ;;  %v8179_v18 = vmul.f32 1.442695, %v8050_v58 }
 0x53c   :  { %27652 = vst [vmem:[#allocation69_spill] sm:$0xff] %v23693_v43  ;;  %v7794_v44 = vsel %vm7664_vm5, %v23693_v43, -inf }
 0x53d   :  { %27653 = vst [vmem:[#allocation75_spill] sm:$0xff] %v23696_v59  ;;  %v18369_v38 = vpop.f32.mrb[78].mxu0  ;;  %7795 = vmax.xlane.f32.xlu0 %v7794_v44  ;;  %v7791_v27 = vsel %vm7664_vm5, %v23696_v59, -inf  ;;  %20664 = vpow2.f32 %v8179_v18 }
 0x53e   :  { %v23701_v10 = vadd.f32 %v23673_v5, %v18369_v38  ;;  %v4088_v32 = vpop.f32.mrb[79].mxu0 }
 0x53f   :  { %v23704_v8 = vadd.f32 %v23659_v11, %v4088_v32 }
 0x540   :  { %27654 = vst [vmem:[#allocation117_spill] sm:$0xff] %v23701_v10  ;;  %v7800_v14 = vsel %vm7664_vm5, %v23701_v10, -inf }
 0x541   :  { %27655 = vst [vmem:[#allocation130_spill] sm:$0xff] %v23704_v8  ;;  %7801 = vmax.xlane.f32.xlu1 %v7800_v14  ;;  %7792 = vmax.xlane.f32.xlu0 %v7791_v27  ;;  %v7797_v9 = vsel %vm7664_vm5, %v23704_v8, -inf  ;;  %v8177_v14 = vmul.f32 1.442695, %v8049_v28  ;;  %v7676_v27 = vpop.xlane.xlu0 %7675 }
 0x543   :  { %20666 = vpow2.f32 %v8177_v14  ;;  %v27666_v14 = vld [vmem:[#allocation141_spill] sm:$0xff] }
 0x545   :  { %v18376_v45 = vpop.f32.mrb[62].mxu1  ;;  %7798 = vmax.xlane.f32.xlu1 %v7797_v9  ;;  %v7673_v18 = vpop.xlane.xlu0 %7672 }
 0x546   :  { %v23713_v2 = vadd.f32 %v23673_v5, %v18376_v45  ;;  %v4175_v4 = vpop.f32.mrb[63].mxu1 }
 0x547   :  { %v23716_v7 = vadd.f32 %v23659_v11, %v4175_v4  ;;  %v23755_v28 = vpop.eup %20664 }
 0x548   :  { %27656 = vst [vmem:[#allocation127_spill] sm:$0xff] %v23713_v2  ;;  %v7806_v0 = vsel %vm7664_vm5, %v23713_v2, -inf }
 0x549   :  { %27657 = vst [vmem:[#allocation68_spill] sm:$0xff] %v23716_v7  ;;  %v18383_v50 = vpop.f32.mrb[80].mxu0  ;;  %7807 = vmax.xlane.f32.xlu0 %v7806_v0  ;;  %v7803_v55 = vsel %vm7664_vm5, %v23716_v7, -inf  ;;  %v27663_v0 = vld [vmem:[#allocation140_spill] sm:$0xff] }
 0x54a   :  { %v23721_v41 = vadd.f32 %v23673_v5, %v18383_v50  ;;  %v4262_v54 = vpop.f32.mrb[81].mxu0  ;;  %v8052_v50 = vsub.f32 %v27663_v0, %v7676_v27  ;;  %v8051_v27 = vsub.f32 %v27666_v14, %v7673_v18 }
 0x54b   :  { %v23725_v23 = vadd.f32 %v23659_v11, %v4262_v54 }
 0x54c   :  { %27658 = vst [vmem:[#allocation139_spill] sm:$0xff] %v23721_v41  ;;  %v7812_v36 = vsel %vm7664_vm5, %v23721_v41, -inf }
 0x54d   :  { %27659 = vst [vmem:[#allocation125_spill] sm:$0xff] %v23725_v23  ;;  %7813 = vmax.xlane.f32.xlu1 %v7812_v36  ;;  %7804 = vmax.xlane.f32.xlu0 %v7803_v55  ;;  %v7809_v44 = vsel %vm7664_vm5, %v23725_v23, -inf  ;;  %v8183_v36 = vmul.f32 1.442695, %v8052_v50 }
 0x54f   :  { %20668 = vpow2.f32 %v8183_v36 }
 0x551   :  { %v18390_v38 = vpop.f32.mrb[64].mxu1  ;;  %7810 = vmax.xlane.f32.xlu1 %v7809_v44 }
 0x552   :  { %v23735_v52 = vadd.f32 %v23673_v5, %v18390_v38  ;;  %v4349_v32 = vpop.f32.mrb[65].mxu1 }
 0x553   :  { %v23738_v9 = vadd.f32 %v23659_v11, %v4349_v32 }
 0x554   :  { %27660 = vst [vmem:[#allocation135_spill] sm:$0xff] %v23735_v52  ;;  %v7818_v45 = vsel %vm7664_vm5, %v23735_v52, -inf }
 0x555   :  { %27661 = vst [vmem:[#allocation132_spill] sm:$0xff] %v23738_v9  ;;  %v18397_v51 = vpop.f32.mrb[82].mxu0  ;;  %7819 = vmax.xlane.f32.xlu0 %v7818_v45  ;;  %v7815_v29 = vsel %vm7664_vm5, %v23738_v9, -inf  ;;  %v8436_v45 = vsel %vm7664_vm5, %v23755_v28, 0.0 }
 0x556   :  { %v23743_v4 = vadd.f32 %v23673_v5, %v18397_v51  ;;  %v4436_v12 = vpop.f32.mrb[83].mxu0 }
 0x557   :  { %v23747_v54 = vadd.f32 %v23659_v11, %v4436_v12  ;;  %v23765_v12 = vpop.eup %20666 }
 0x558   :  { %27662 = vst [vmem:[#allocation99_spill] sm:$0xff] %v23743_v4  ;;  %v7824_v58 = vsel %vm7664_vm5, %v23743_v4, -inf }
 0x559   :  { %27664 = vst [vmem:[#allocation95_spill] sm:$0xff] %v23747_v54  ;;  %7825 = vmax.xlane.f32.xlu1 %v7824_v58  ;;  %7816 = vmax.xlane.f32.xlu0 %v7815_v29  ;;  %v7821_v55 = vsel %vm7664_vm5, %v23747_v54, -inf  ;;  %v8181_v29 = vmul.f32 1.442695, %v8051_v27 }
 0x55b   :  { %20670 = vpow2.f32 %v8181_v29 }
 0x55d   :  { %v18404_v44 = vpop.f32.mrb[66].mxu1  ;;  %7822 = vmax.xlane.f32.xlu1 %v7821_v55  ;;  %v8433_v55 = vsel %vm7664_vm5, %v23765_v12, 0.0 }
 0x55e   :  { %v23758_v38 = vadd.f32 %v23673_v5, %v18404_v44  ;;  %v4523_v32 = vpop.f32.mrb[67].mxu1 }
 0x55f   :  { %v23771_v36 = vadd.f32 %v23659_v11, %v4523_v32 }
 0x560   :  { %27665 = vst [vmem:[#allocation72_spill] sm:$0xff] %v23758_v38  ;;  %v7830_v51 = vsel %vm7664_vm5, %v23758_v38, -inf }
 0x561   :  { %8437 = vadd.xlane.f32.xlu1 %v8436_v45  ;;  %7831 = vmax.xlane.f32.xlu0 %v7830_v51  ;;  %27668 = vst [vmem:[#allocation137_spill] sm:$0xff] %v23771_v36  ;;  %v7827_v14 = vsel %vm7664_vm5, %v23771_v36, -inf  ;;  %v23782_v45 = vpop.eup %20668  ;;  %v7682_v51 = vpop.xlane.xlu1 %7681 }
 0x562   :  { %v18411_v0 = vpop.f32.mrb[84].mxu0  ;;  %v8442_v27 = vsel %vm7664_vm5, %v23782_v45, 0.0 }
 0x563   :  { %v23768_v50 = vadd.f32 %v23673_v5, %v18411_v0  ;;  %v4610_v58 = vpop.f32.mrb[85].mxu0 }
 0x564   :  { %v23776_v18 = vadd.f32 %v23659_v11, %v4610_v58 }
 0x565   :  { %27667 = vst [vmem:[#allocation97_spill] sm:$0xff] %v23768_v50  ;;  %v7836_v44 = vsel %vm7664_vm5, %v23768_v50, -inf  ;;  %8434 = vadd.xlane.f32.xlu0 %v8433_v55  ;;  %v27671_v55 = vld [vmem:[#allocation142_spill] sm:$0xff]  ;;  %v7679_v50 = vpop.xlane.xlu0 %7678  ;;  %v23794_v38 = vpop.eup %20670 }
 0x566   :  { %27669 = vst [vmem:[#allocation102_spill] sm:$0xff] %v23776_v18  ;;  %7837 = vmax.xlane.f32.xlu1 %v7836_v44  ;;  %v7833_v32 = vsel %vm7664_vm5, %v23776_v18, -inf  ;;  %v8054_v44 = vsub.f32 %v27671_v55, %v7682_v51  ;;  %v7694_v4 = vpop.xlane.xlu1 %7693 }
 0x569   :  { %7828 = vmax.xlane.f32.xlu0 %v7827_v14  ;;  %v8187_v14 = vmul.f32 1.442695, %v8054_v44  ;;  %v7688_v54 = vpop.xlane.xlu0 %7687 }
 0x56a   :  { %7834 = vmax.xlane.f32.xlu1 %v7833_v32  ;;  %v27672_v32 = vld [vmem:[#allocation143_spill] sm:$0xff]  ;;  %v7718_v55 = vpop.xlane.xlu1 %7717 }
 0x56b   :  { %v8053_v18 = vsub.f32 %v27672_v32, %v7679_v50  ;;  %20672 = vpow2.f32 %v8187_v14 }
 0x56d   :  { %8443 = vadd.xlane.f32.xlu0 %v8442_v27  ;;  %v8185_v51 = vmul.f32 1.442695, %v8053_v18  ;;  %v7685_v9 = vpop.xlane.xlu0 %7684 }
 0x56e   :  { %v18418_v0 = vpop.f32.mrb[68].mxu1  ;;  %v7691_v18 = vpop.xlane.xlu1 %7690 }
 0x56f   :  { %v23789_v58 = vadd.f32 %v23673_v5, %v18418_v0  ;;  %v4697_v29 = vpop.f32.mrb[69].mxu1  ;;  %v8439_v0 = vsel %vm7664_vm5, %v23794_v38, 0.0  ;;  %20674 = vpow2.f32 %v8185_v51 }
 0x570   :  { %v23798_v27 = vadd.f32 %v23659_v11, %v4697_v29 }
 0x571   :  { %27670 = vst [vmem:[#allocation98_spill] sm:$0xff] %v23789_v58  ;;  %v7842_v36 = vsel %vm7664_vm5, %v23789_v58, -inf  ;;  %v23812_v14 = vpop.xlane.xlu0 %7699 }
 0x572   :  { %7843 = vmax.xlane.f32.xlu0 %v7842_v36  ;;  %27673 = vst [vmem:[#allocation103_spill] sm:$0xff] %v23798_v27  ;;  %v7839_v58 = vsel %vm7664_vm5, %v23798_v27, -inf  ;;  %v7715_v41 = vpop.xlane.xlu1 %7714 }
 0x575   :  { %v23817_v52 = vpop.eup %20672 }
 0x576   :  { %8440 = vadd.xlane.f32.xlu0 %v8439_v0  ;;  %v27676_v0 = vld [vmem:[#allocation144_spill] sm:$0xff]  ;;  %27677 = vst [vmem:[#allocation100_spill] sm:$0xff] %v23817_v52 }
 0x577   :  { %v8056_v27 = vsub.f32 %v27676_v0, %v7688_v54  ;;  %v8055_v54 = vsub.f32 %v23095_v17, %v7685_v9  ;;  %v8066_v9 = vsub.f32 %v23221_v26, %v7718_v55  ;;  %v8057_v55 = vsub.f32 %v23233_v15, %v7691_v18 }
 0x579   :  { %v8191_v23 = vmul.f32 1.442695, %v8056_v27  ;;  %v23823_v7 = vpop.eup %20674  ;;  %v8189_v10 = vmul.f32 1.442695, %v8055_v54  ;;  %v8211_v26 = vmul.f32 1.442695, %v8066_v9 }
 0x57a   :  { %v18425_v36 = vpop.f32.mrb[86].mxu0  ;;  %7840 = vmax.xlane.f32.xlu0 %v7839_v58  ;;  %27678 = vst [vmem:[#allocation107_spill] sm:$0xff] %v23823_v7  ;;  %v8193_v15 = vmul.f32 1.442695, %v8057_v55 }
 0x57b   :  { %v23805_v50 = vadd.f32 %v23673_v5, %v18425_v36  ;;  %v4784_v44 = vpop.f32.mrb[87].mxu0  ;;  %20676 = vpow2.f32 %v8191_v23 }
 0x57c   :  { %v23808_v29 = vadd.f32 %v23659_v11, %v4784_v44  ;;  %v23819_v44 = vpop.xlane.xlu0 %7696  ;;  %20678 = vpow2.f32 %v8189_v10 }
 0x57d   :  { %27674 = vst [vmem:[#allocation101_spill] sm:$0xff] %v23805_v50  ;;  %v7848_v32 = vsel %vm7664_vm5, %v23805_v50, -inf  ;;  %v8448_v50 = vsel %vm7664_vm5, %v23817_v52, 0.0 }
 0x57e   :  { %27675 = vst [vmem:[#allocation106_spill] sm:$0xff] %v23808_v29  ;;  %7849 = vmax.xlane.f32.xlu1 %v7848_v32  ;;  %v7845_v58 = vsel %vm7664_vm5, %v23808_v29, -inf  ;;  %v8058_v32 = vsub.f32 %v23112_v56, %v7694_v4  ;;  %v23829_v29 = vpop.xlane.xlu1 %7729 }
 0x580   :  { %v23827_v0 = vpop.xlane.xlu0 %7711  ;;  %v8195_v56 = vmul.f32 1.442695, %v8058_v32 }
 0x582   :  { %v18439_v36 = vpop.f32.mrb[88].mxu0  ;;  %7846 = vmax.xlane.f32.xlu1 %v7845_v58  ;;  %v8445_v58 = vsel %vm7664_vm5, %v23823_v7, 0.0  ;;  %20680 = vpow2.f32 %v8195_v56 }
 0x583   :  { %v4958_v51 = vpop.f32.mrb[89].mxu0  ;;  %v23832_v27 = vadd.f32 %v23673_v5, %v18439_v36  ;;  %20682 = vpow2.f32 %v8211_v26 }
 0x584   :  { %v23841_v4 = vadd.f32 %v23659_v11, %v4958_v51  ;;  %20684 = vpow2.f32 %v8193_v15 }
 0x585   :  { %27679 = vst [vmem:[#allocation105_spill] sm:$0xff] %v23832_v27  ;;  %v7860_v54 = vsel %vm7664_vm5, %v23832_v27, -inf }
 0x586   :  { %8449 = vadd.xlane.f32.xlu1 %v8448_v50  ;;  %27681 = vst [vmem:[#allocation104_spill] sm:$0xff] %v23841_v4 }
 0x58a   :  { %v18432_v2 = vpop.f32.mrb[70].mxu1  ;;  %v18453_v8 = vpop.f32.mrb[90].mxu0  ;;  %8446 = vadd.xlane.f32.xlu1 %v8445_v58 }
 0x58b   :  { %v23837_v50 = vadd.f32 %v23673_v5, %v18432_v2  ;;  %v4871_v17 = vpop.f32.mrb[71].mxu1  ;;  %v5132_v23 = vpop.f32.mrb[91].mxu0  ;;  %v23856_v51 = vadd.f32 %v23673_v5, %v18453_v8  ;;  %v8065_v8 = vsub.f32 %v23244_v25, %v7715_v41 }
 0x58c   :  { %v23844_v36 = vadd.f32 %v23659_v11, %v4871_v17  ;;  %v23850_v58 = vpop.xlane.xlu0 %7708  ;;  %v23852_v2 = vpop.xlane.xlu1 %7726  ;;  %v7857_v17 = vsel %vm7664_vm5, %v23841_v4, -inf }
 0x58d   :  { %27680 = vst [vmem:[#allocation110_spill] sm:$0xff] %v23837_v50  ;;  %v7854_v59 = vsel %vm7664_vm5, %v23837_v50, -inf  ;;  %27683 = vst [vmem:[#allocation109_spill] sm:$0xff] %v23856_v51  ;;  %v23862_v50 = vpop.eup %20676  ;;  %v8209_v26 = vmul.f32 1.442695, %v8065_v8 }
 0x58e   :  { %27682 = vst [vmem:[#allocation111_spill] sm:$0xff] %v23844_v36  ;;  %7855 = vmax.xlane.f32.xlu0 %v7854_v59  ;;  %7861 = vmax.xlane.f32.xlu1 %v7860_v54  ;;  %v7851_v32 = vsel %vm7664_vm5, %v23844_v36, -inf  ;;  %27684 = vst [vmem:[#allocation115_spill] sm:$0xff] %v23862_v50  ;;  %v23870_v54 = vadd.f32 %v23659_v11, %v5132_v23  ;;  %v7872_v36 = vsel %vm7664_vm5, %v23856_v51, -inf  ;;  %v23883_v55 = vpop.eup %20678 }
 0x58f   :  { %27687 = vst [vmem:[#allocation114_spill] sm:$0xff] %v23883_v55  ;;  %20686 = vpow2.f32 %v8209_v26 }
 0x590   :  { %v23864_v27 = vpop.xlane.xlu0 %7723  ;;  %v23867_v18 = vpop.xlane.xlu1 %7705  ;;  %27685 = vst [vmem:[#allocation108_spill] sm:$0xff] %v23870_v54  ;;  %v7869_v23 = vsel %vm7664_vm5, %v23870_v54, -inf }
 0x592   :  { %v18446_v59 = vpop.f32.mrb[72].mxu1  ;;  %7852 = vmax.xlane.f32.xlu0 %v7851_v32  ;;  %7858 = vmax.xlane.f32.xlu1 %v7857_v17  ;;  %v8454_v32 = vsel %vm7664_vm5, %v23862_v50, 0.0 }
 0x593   :  { %v18467_v10 = vpop.f32.mrb[92].mxu0  ;;  %v5045_v56 = vpop.f32.mrb[73].mxu1  ;;  %v23873_v4 = vadd.f32 %v23673_v5, %v18446_v59 }
 0x594   :  { %v5306_v9 = vpop.f32.mrb[93].mxu0  ;;  %v23879_v25 = vpop.xlane.xlu0 %7720 }
 0x595   :  { %27686 = vst [vmem:[#allocation116_spill] sm:$0xff] %v23873_v4  ;;  %v23881_v41 = vpop.xlane.xlu1 %7741  ;;  %v7866_v17 = vsel %vm7664_vm5, %v23873_v4, -inf  ;;  %v23889_v59 = vpop.eup %20680  ;;  %v23902_v4 = vadd.f32 %v23659_v11, %v5045_v56 }
 0x596   :  { %7873 = vmax.xlane.f32.xlu1 %v7872_v36  ;;  %8455 = vadd.xlane.f32.xlu0 %v8454_v32  ;;  %27688 = vst [vmem:[#allocation122_spill] sm:$0xff] %v23889_v59  ;;  %v8060_v36 = vsub.f32 %v23151_v24, %v23812_v14  ;;  %v8070_v32 = vsub.f32 %v23309_v48, %v23829_v29  ;;  %v8451_v24 = vsel %vm7664_vm5, %v23883_v55, 0.0  ;;  %v23908_v14 = vpop.eup %20682  ;;  %v27691_v29 = vld [vmem:[#allocation145_spill] sm:$0xff] }
 0x597   :  { %27689 = vst [vmem:[#allocation113_spill] sm:$0xff] %v23902_v4  ;;  %27690 = vst [vmem:[#allocation124_spill] sm:$0xff] %v23908_v14  ;;  %v8059_v26 = vsub.f32 %v27691_v29, %v23819_v44  ;;  %v7863_v55 = vsel %vm7664_vm5, %v23902_v4, -inf  ;;  %v23921_v39 = vpop.eup %20684  ;;  %v23934_v4 = vadd.f32 %v23673_v5, %v18467_v10 }
 0x598   :  { %v23897_v50 = vpop.xlane.xlu0 %7735  ;;  %v8199_v48 = vmul.f32 1.442695, %v8060_v36  ;;  %v8219_v43 = vmul.f32 1.442695, %v8070_v32  ;;  %27693 = vst [vmem:[#allocation129_spill] sm:$0xff] %v23921_v39  ;;  %v8069_v32 = vsub.f32 %v23326_v21, %v23852_v2  ;;  %v23947_v2 = vadd.f32 %v23659_v11, %v5306_v9 }
 0x599   :  { %27694 = vst [vmem:[#allocation118_spill] sm:$0xff] %v23934_v4  ;;  %v8062_v9 = vsub.f32 %v23340_v6, %v23867_v18  ;;  %v8074_v6 = vsub.f32 %v23403_v3, %v23881_v41 }
 0x59a   :  { %v18460_v51 = vpop.f32.mrb[74].mxu1  ;;  %7870 = vmax.xlane.f32.xlu1 %v7869_v23  ;;  %7867 = vmax.xlane.f32.xlu0 %v7866_v17  ;;  %v8460_v23 = vsel %vm7664_vm5, %v23889_v59, 0.0  ;;  %v23910_v17 = vpop.xlane.xlu1 %7702  ;;  %v8484_v59 = vsel %vm7664_vm5, %v23908_v14, 0.0  ;;  %20688 = vpow2.f32 %v8199_v48  ;;  %v8217_v21 = vmul.f32 1.442695, %v8069_v32  ;;  %27696 = vst [vmem:[#allocation128_spill] sm:$0xff] %v23947_v2 }
 0x59b   :  { %v23893_v15 = vpop.f32.mrb[94].mxu0  ;;  %v5219_v8 = vpop.f32.mrb[75].mxu1  ;;  %v23915_v56 = vadd.f32 %v23673_v5, %v18460_v51  ;;  %v8197_v51 = vmul.f32 1.442695, %v8059_v26  ;;  %20690 = vpow2.f32 %v8219_v43  ;;  %v7884_v26 = vsel %vm7664_vm5, %v23934_v4, -inf }
 0x59c   :  { %v23899_v54 = vpop.f32.mrb[95].mxu0  ;;  %v23923_v19 = vpop.xlane.xlu0 %7732  ;;  %v23950_v10 = vadd.f32 %v23659_v11, %v5219_v8  ;;  %v7881_v4 = vsel %vm7664_vm5, %v23947_v2, -inf  ;;  %v8203_v18 = vmul.f32 1.442695, %v8062_v9 }
 0x59d   :  { %27692 = vst [vmem:[#allocation120_spill] sm:$0xff] %v23915_v56  ;;  %v23940_v48 = vpop.eup %20686  ;;  %20692 = vpow2.f32 %v8197_v51 }
 0x59e   :  { %8461 = vadd.xlane.f32.xlu1 %v8460_v23  ;;  %8452 = vadd.xlane.f32.xlu0 %v8451_v24  ;;  %v7739_v24 = vpop.xlane.xlu1 %7738  ;;  %27695 = vst [vmem:[#allocation66_spill] sm:$0xff] %v23940_v48  ;;  %27697 = vst [vmem:[#allocation134_spill] sm:$0xff] %v23950_v10  ;;  %20694 = vpow2.f32 %v8217_v21  ;;  %v8061_v21 = vsub.f32 %v23419_v63, %v23910_v17  ;;  %v8227_v63 = vmul.f32 1.442695, %v8074_v6 }
 0x59f   :  { %20696 = vpow2.f32 %v8203_v18  ;;  %v8073_v9 = vsub.f32 %v23432_v16, %v7739_v24 }
 0x5a0   :  { %v23942_v14 = vpop.xlane.xlu0 %7747  ;;  %20698 = vpow2.f32 %v8227_v63 }
 0x5a1   :  { %v8225_v16 = vmul.f32 1.442695, %v8073_v9 }
 0x5a2   :  { %v18474_v23 = vpop.f32.mrb[76].mxu1  ;;  %8485 = vadd.xlane.f32.xlu1 %v8484_v59  ;;  %7864 = vmax.xlane.f32.xlu0 %v7863_v55  ;;  %v8457_v59 = vsel %vm7664_vm5, %v23921_v39, 0.0  ;;  %v7878_v55 = vsel %vm7664_vm5, %v23915_v56, -inf  ;;  %v23944_v43 = vpop.xlane.xlu1 %7753  ;;  %v8481_v56 = vsel %vm7664_vm5, %v23940_v48, 0.0 }
 0x5a3   :  { %v23925_v36 = vpop.f32.mrb[96].mxu0  ;;  %v23927_v44 = vpop.f32.mrb[77].mxu1  ;;  %v23983_v2 = vadd.f32 %v23673_v5, %v18474_v23  ;;  %v8201_v23 = vmul.f32 1.442695, %v8061_v21 }
 0x5a4   :  { %v23931_v29 = vpop.f32.mrb[97].mxu0  ;;  %v23962_v32 = vpop.xlane.xlu0 %7744  ;;  %v24022_v18 = vadd.f32 %v23659_v11, %v23927_v44  ;;  %v8078_v44 = vsub.f32 %v23497_v33, %v23944_v43  ;;  %v27709_v33 = vld [vmem:[#allocation147_spill] sm:$0xff] }
 0x5a5   :  { %27700 = vst [vmem:[#allocation71_spill] sm:$0xff] %v23983_v2  ;;  %v7890_v60 = vsel %vm7664_vm5, %v23983_v2, -inf  ;;  %20700 = vpow2.f32 %v8201_v23  ;;  %v27706_v23 = vld [vmem:[#allocation146_spill] sm:$0xff]  ;;  %v8063_v43 = vsub.f32 %v27709_v33, %v23850_v58 }
 0x5a6   :  { %8458 = vadd.xlane.f32.xlu1 %v8457_v59  ;;  %7879 = vmax.xlane.f32.xlu0 %v7878_v55  ;;  %v23966_v55 = vpop.eup %20688  ;;  %v23974_v48 = vpop.xlane.xlu1 %7750  ;;  %27705 = vst [vmem:[#allocation39_spill] sm:$0xff] %v24022_v18  ;;  %20702 = vpow2.f32 %v8225_v16 }
 0x5a7   :  { %27698 = vst [vmem:[#allocation35_spill] sm:$0xff] %v23966_v55  ;;  %v8466_v61 = vsel %vm7664_vm5, %v23966_v55, 0.0  ;;  %v24004_v55 = vadd.f32 %v23673_v5, %v23893_v15  ;;  %v24018_v15 = vadd.f32 %v23659_v11, %v23899_v54  ;;  %v8064_v54 = vsub.f32 %v27706_v23, %v23827_v0 }
 0x5a8   :  { %v23980_v62 = vpop.xlane.xlu0 %7759  ;;  %v8235_v23 = vmul.f32 1.442695, %v8078_v44  ;;  %v8205_v44 = vmul.f32 1.442695, %v8063_v43 }
 0x5a9   :  { %27702 = vst [vmem:[#allocation37_spill] sm:$0xff] %v24004_v55  ;;  %27704 = vst [vmem:[#allocation138_spill] sm:$0xff] %v24018_v15  ;;  %v7893_v0 = vsel %vm7664_vm5, %v24018_v15, -inf  ;;  %v8207_v16 = vmul.f32 1.442695, %v8064_v54 }
 0x5aa   :  { %v18488_v39 = vpop.f32.mrb[78].mxu1  ;;  %7885 = vmax.xlane.f32.xlu1 %v7884_v26  ;;  %8482 = vadd.xlane.f32.xlu0 %v8481_v56  ;;  %v7875_v56 = vsel %vm7664_vm5, %v23950_v10, -inf  ;;  %v23972_v26 = vpop.eup %20690 }
 0x5ab   :  { %v23956_v59 = vpop.f32.mrb[98].mxu0  ;;  %v23958_v51 = vpop.f32.mrb[79].mxu1  ;;  %27699 = vst [vmem:[#allocation126_spill] sm:$0xff] %v23972_v26  ;;  %v8496_v10 = vsel %vm7664_vm5, %v23972_v26, 0.0  ;;  %20704 = vpow2.f32 %v8207_v16 }
 0x5ac   :  { %v23964_v8 = vpop.f32.mrb[99].mxu0  ;;  %v24012_v6 = vpop.xlane.xlu0 %7756  ;;  %20706 = vpow2.f32 %v8235_v23 }
 0x5ad   :  { %20708 = vpow2.f32 %v8205_v44 }
 0x5ae   :  { %7882 = vmax.xlane.f32.xlu1 %v7881_v4  ;;  %7876 = vmax.xlane.f32.xlu0 %v7875_v56  ;;  %v23989_v4 = vpop.eup %20692  ;;  %v23991_v56 = vpop.xlane.xlu1 %7765 }
 0x5af   :  { %27701 = vst [vmem:[#allocation133_spill] sm:$0xff] %v23989_v4 }
 0x5b2   :  { %v23993_v3 = vpop.f32.mrb[80].mxu1  ;;  %8497 = vadd.xlane.f32.xlu1 %v8496_v10  ;;  %8467 = vadd.xlane.f32.xlu0 %v8466_v61  ;;  %v8463_v61 = vsel %vm7664_vm5, %v23989_v4, 0.0  ;;  %v24010_v10 = vpop.eup %20694  ;;  %v24045_v4 = vadd.f32 %v23673_v5, %v18488_v39 }
 0x5b3   :  { %v23995_v41 = vpop.f32.mrb[100].mxu0  ;;  %v23997_v17 = vpop.f32.mrb[81].mxu1  ;;  %27703 = vst [vmem:[#allocation131_spill] sm:$0xff] %v24010_v10  ;;  %v8493_v21 = vsel %vm7664_vm5, %v24010_v10, 0.0 }
 0x5b4   :  { %v24000_v26 = vpop.f32.mrb[101].mxu0  ;;  %v24014_v24 = vpop.xlane.xlu1 %7762  ;;  %27707 = vst [vmem:[#allocation136_spill] sm:$0xff] %v24045_v4  ;;  %v7902_v39 = vsel %vm7664_vm5, %v24045_v4, -inf }
 0x5b6   :  { %7891 = vmax.xlane.f32.xlu0 %v7890_v60  ;;  %8464 = vadd.xlane.f32.xlu1 %v8463_v61  ;;  %v7896_v60 = vsel %vm7664_vm5, %v24004_v55, -inf  ;;  %v24028_v61 = vpop.xlane.xlu0 %7771 }
 0x5b8   :  { %v24040_v10 = vpop.xlane.xlu1 %7777 }
 0x5ba   :  { %v24030_v63 = vpop.f32.mrb[82].mxu1  ;;  %8494 = vadd.xlane.f32.xlu0 %v8493_v21  ;;  %7897 = vmax.xlane.f32.xlu1 %v7896_v60  ;;  %v7887_v21 = vsel %vm7664_vm5, %v24022_v18, -inf  ;;  %v24051_v60 = vpop.eup %20696 }
 0x5bb   :  { %v24034_v9 = vpop.f32.mrb[102].mxu0  ;;  %v24036_v2 = vpop.f32.mrb[83].mxu1  ;;  %27708 = vst [vmem:[#allocation140_spill] sm:$0xff] %v24051_v60  ;;  %v8472_v18 = vsel %vm7664_vm5, %v24051_v60, 0.0  ;;  %v24081_v60 = vadd.f32 %v23673_v5, %v23925_v36  ;;  %v24097_v36 = vadd.f32 %v23659_v11, %v23958_v51  ;;  %v8068_v51 = vsub.f32 %v23281_v46, %v23864_v27 }
 0x5bc   :  { %v24042_v55 = vpop.f32.mrb[103].mxu0  ;;  %v24055_v52 = vpop.xlane.xlu0 %7768  ;;  %v8067_v27 = vsub.f32 %v23296_v40, %v23879_v25 }
 0x5bd   :  { %v24057_v7 = vpop.eup %20698  ;;  %v24065_v35 = vpop.xlane.xlu1 %7774  ;;  %27713 = vst [vmem:[#allocation144_spill] sm:$0xff] %v24081_v60  ;;  %27717 = vst [vmem:[#allocation148_spill] sm:$0xff] %v24097_v36  ;;  %v8215_v46 = vmul.f32 1.442695, %v8068_v51 }
 0x5be   :  { %7888 = vmax.xlane.f32.xlu0 %v7887_v21  ;;  %7894 = vmax.xlane.f32.xlu1 %v7893_v0  ;;  %27710 = vst [vmem:[#allocation141_spill] sm:$0xff] %v24057_v7  ;;  %v24063_v15 = vpop.eup %20700  ;;  %v8077_v0 = vsub.f32 %v23514_v37, %v23974_v48  ;;  %v8508_v16 = vsel %vm7664_vm5, %v24057_v7, 0.0  ;;  %v24093_v48 = vadd.f32 %v23659_v11, %v23931_v29  ;;  %v7908_v7 = vsel %vm7664_vm5, %v24081_v60, -inf }
 0x5bf   :  { %27711 = vst [vmem:[#allocation142_spill] sm:$0xff] %v24063_v15  ;;  %v7899_v60 = vsel %vm7664_vm5, %v24097_v36, -inf  ;;  %v8213_v25 = vmul.f32 1.442695, %v8067_v27 }
 0x5c0   :  { %v24075_v33 = vpop.xlane.xlu0 %7783  ;;  %v8233_v37 = vmul.f32 1.442695, %v8077_v0  ;;  %27716 = vst [vmem:[#allocation147_spill] sm:$0xff] %v24093_v48 }
 0x5c1   :  { %27712 = vst [vmem:[#allocation143_spill] sm:$0xff] %v24075_v33  ;;  %v24089_v43 = vpop.xlane.xlu1 %7789 }
 0x5c2   :  { %v24067_v21 = vpop.f32.mrb[84].mxu1  ;;  %7903 = vmax.xlane.f32.xlu0 %v7902_v39  ;;  %8473 = vadd.xlane.f32.xlu1 %v8472_v18  ;;  %v8469_v18 = vsel %vm7664_vm5, %v24063_v15, 0.0  ;;  %v24087_v39 = vpop.eup %20702  ;;  %27715 = vst [vmem:[#allocation146_spill] sm:$0xff] %v24089_v43  ;;  %20710 = vpow2.f32 %v8233_v37  ;;  %v24131_v37 = vadd.f32 %v23673_v5, %v23993_v3 }
 0x5c3   :  { %v24069_v58 = vpop.f32.mrb[104].mxu0  ;;  %v24071_v54 = vpop.f32.mrb[85].mxu1  ;;  %27714 = vst [vmem:[#allocation145_spill] sm:$0xff] %v24087_v39  ;;  %v8505_v23 = vsel %vm7664_vm5, %v24087_v39, 0.0  ;;  %20712 = vpow2.f32 %v8215_v46  ;;  %v8072_v46 = vsub.f32 %v23379_v34, %v23897_v50 }
 0x5c4   :  { %v24077_v4 = vpop.f32.mrb[105].mxu0  ;;  %v24115_v39 = vpop.eup %20704  ;;  %27721 = vst [vmem:[#allocation152_spill] sm:$0xff] %v24131_v37  ;;  %20714 = vpow2.f32 %v8213_v25 }
 0x5c5   :  { %27718 = vst [vmem:[#allocation149_spill] sm:$0xff] %v24115_v39  ;;  %v24117_v15 = vpop.xlane.xlu1 %7786 }
 0x5c6   :  { %8470 = vadd.xlane.f32.xlu0 %v8469_v18  ;;  %8509 = vadd.xlane.f32.xlu1 %v8508_v16  ;;  %v24103_v18 = vpop.xlane.xlu0 %7780  ;;  %27719 = vst [vmem:[#allocation150_spill] sm:$0xff] %v24117_v15 }
 0x5ca   :  { %v24105_v16 = vpop.f32.mrb[86].mxu1  ;;  %8506 = vadd.xlane.f32.xlu0 %v8505_v23  ;;  %7909 = vmax.xlane.f32.xlu1 %v7908_v7  ;;  %v7905_v7 = vsel %vm7664_vm5, %v24093_v48, -inf  ;;  %v24123_v23 = vpop.eup %20706  ;;  %v8478_v48 = vsel %vm7664_vm5, %v24115_v39, 0.0  ;;  %v7914_v39 = vsel %vm7664_vm5, %v24131_v37, -inf  ;;  %v24171_v37 = vadd.f32 %v23659_v11, %v23964_v8 }
 0x5cb   :  { %v24107_v44 = vpop.f32.mrb[106].mxu0  ;;  %v24109_v29 = vpop.f32.mrb[87].mxu1  ;;  %27720 = vst [vmem:[#allocation151_spill] sm:$0xff] %v24123_v23  ;;  %v8520_v36 = vsel %vm7664_vm5, %v24123_v23, 0.0  ;;  %v24153_v23 = vadd.f32 %v23673_v5, %v23956_v59  ;;  %v8071_v59 = vsub.f32 %v23390_v22, %v23923_v19  ;;  %v8223_v22 = vmul.f32 1.442695, %v8072_v46 }
 0x5cc   :  { %v24113_v0 = vpop.f32.mrb[107].mxu0  ;;  %v24125_v43 = vpop.xlane.xlu0 %7795  ;;  %27727 = vst [vmem:[#allocation158_spill] sm:$0xff] %v24171_v37 }
 0x5cd   :  { %v24139_v33 = vpop.eup %20708  ;;  %27724 = vst [vmem:[#allocation155_spill] sm:$0xff] %v24153_v23  ;;  %v7920_v34 = vsel %vm7664_vm5, %v24153_v23, -inf  ;;  %v8221_v8 = vmul.f32 1.442695, %v8071_v59  ;;  %20716 = vpow2.f32 %v8223_v22  ;;  %v24205_v59 = vadd.f32 %v23659_v11, %v24036_v2 }
 0x5ce   :  { %7900 = vmax.xlane.f32.xlu0 %v7899_v60  ;;  %7906 = vmax.xlane.f32.xlu1 %v7905_v7  ;;  %v24133_v15 = vpop.xlane.xlu1 %7801  ;;  %27723 = vst [vmem:[#allocation154_spill] sm:$0xff] %v24139_v33  ;;  %v8076_v2 = vsub.f32 %v23469_v31, %v23942_v14 }
 0x5cf   :  { %27722 = vst [vmem:[#allocation153_spill] sm:$0xff] %v24133_v15  ;;  %20718 = vpow2.f32 %v8221_v8  ;;  %27733 = vst [vmem:[#allocation164_spill] sm:$0xff] %v24205_v59  ;;  %v7923_v31 = vsel %vm7664_vm5, %v24205_v59, -inf }
 0x5d0   :  { %v24147_v3 = vpop.xlane.xlu0 %7792 }
 0x5d2   :  { %v24141_v60 = vpop.f32.mrb[88].mxu1  ;;  %8521 = vadd.xlane.f32.xlu1 %v8520_v36  ;;  %8479 = vadd.xlane.f32.xlu0 %v8478_v48  ;;  %v8475_v48 = vsel %vm7664_vm5, %v24139_v33, 0.0  ;;  %v24159_v36 = vpop.eup %20710  ;;  %v24175_v33 = vadd.f32 %v23659_v11, %v23997_v17 }
 0x5d3   :  { %v24143_v51 = vpop.f32.mrb[108].mxu0  ;;  %v24145_v40 = vpop.f32.mrb[89].mxu1  ;;  %27725 = vst [vmem:[#allocation156_spill] sm:$0xff] %v24159_v36 }
 0x5d4   :  { %v24149_v7 = vpop.f32.mrb[109].mxu0  ;;  %v24163_v27 = vpop.xlane.xlu1 %7798  ;;  %27728 = vst [vmem:[#allocation159_spill] sm:$0xff] %v24175_v33  ;;  %v7911_v23 = vsel %vm7664_vm5, %v24175_v33, -inf }
 0x5d5   :  { %v24199_v46 = vpop.eup %20712 }
 0x5d6   :  { %7915 = vmax.xlane.f32.xlu0 %v7914_v39  ;;  %8476 = vadd.xlane.f32.xlu1 %v8475_v48  ;;  %v24167_v15 = vpop.xlane.xlu0 %7807  ;;  %v8517_v39 = vsel %vm7664_vm5, %v24159_v36, 0.0  ;;  %v24193_v36 = vadd.f32 %v23673_v5, %v24030_v63  ;;  %27731 = vst [vmem:[#allocation162_spill] sm:$0xff] %v24199_v46 }
 0x5d7   :  { %27726 = vst [vmem:[#allocation157_spill] sm:$0xff] %v24167_v15 }
 0x5d8   :  { %27730 = vst [vmem:[#allocation161_spill] sm:$0xff] %v24193_v36  ;;  %v7926_v33 = vsel %vm7664_vm5, %v24193_v36, -inf }
 0x5da   :  { %v24181_v50 = vpop.f32.mrb[90].mxu1  ;;  %8518 = vadd.xlane.f32.xlu0 %v8517_v39  ;;  %7921 = vmax.xlane.f32.xlu1 %v7920_v34  ;;  %v24185_v25 = vpop.xlane.xlu1 %7813  ;;  %v7917_v39 = vsel %vm7664_vm5, %v24171_v37, -inf  ;;  %v8490_v37 = vsel %vm7664_vm5, %v24199_v46, 0.0  ;;  %v24231_v46 = vadd.f32 %v23673_v5, %v23995_v41 }
 0x5db   :  { %v24183_v19 = vpop.f32.mrb[110].mxu0  ;;  %27729 = vst [vmem:[#allocation160_spill] sm:$0xff] %v24185_v25  ;;  %v24187_v48 = vpop.f32.mrb[91].mxu1 }
 0x5dc   :  { %v24189_v17 = vpop.f32.mrb[111].mxu0  ;;  %v24201_v34 = vpop.xlane.xlu0 %7804  ;;  %27737 = vst [vmem:[#allocation168_spill] sm:$0xff] %v24231_v46 }
 0x5dd   :  { %27732 = vst [vmem:[#allocation163_spill] sm:$0xff] %v24201_v34  ;;  %v24213_v25 = vpop.eup %20714 }
 0x5de   :  { %7912 = vmax.xlane.f32.xlu0 %v7911_v23  ;;  %7918 = vmax.xlane.f32.xlu1 %v7917_v39  ;;  %v24207_v63 = vpop.xlane.xlu1 %7810  ;;  %27735 = vst [vmem:[#allocation166_spill] sm:$0xff] %v24213_v25  ;;  %v8075_v39 = vsub.f32 %v23484_v1, %v23962_v32  ;;  %v8487_v14 = vsel %vm7664_vm5, %v24213_v25, 0.0  ;;  %v8231_v1 = vmul.f32 1.442695, %v8076_v2 }
 0x5df   :  { %27734 = vst [vmem:[#allocation165_spill] sm:$0xff] %v24207_v63 }
 0x5e0   :  { %v8229_v32 = vmul.f32 1.442695, %v8075_v39  ;;  %20720 = vpow2.f32 %v8231_v1 }
 0x5e2   :  { %v24215_v15 = vpop.f32.mrb[92].mxu1  ;;  %7927 = vmax.xlane.f32.xlu1 %v7926_v33  ;;  %8491 = vadd.xlane.f32.xlu0 %v8490_v37  ;;  %v24217_v23 = vpop.xlane.xlu0 %7819  ;;  %v24235_v33 = vadd.f32 %v23659_v11, %v24000_v26  ;;  %v7932_v26 = vsel %vm7664_vm5, %v24231_v46, -inf  ;;  %20722 = vpow2.f32 %v8229_v32  ;;  %v8080_v32 = vsub.f32 %v23561_v20, %v23980_v62 }
 0x5e3   :  { %27736 = vst [vmem:[#allocation167_spill] sm:$0xff] %v24217_v23  ;;  %v24221_v22 = vpop.f32.mrb[112].mxu0  ;;  %v24223_v8 = vpop.f32.mrb[93].mxu1 }
 0x5e4   :  { %v24227_v36 = vpop.f32.mrb[113].mxu0  ;;  %27738 = vst [vmem:[#allocation169_spill] sm:$0xff] %v24235_v33  ;;  %v24243_v23 = vpop.eup %20716  ;;  %v7929_v63 = vsel %vm7664_vm5, %v24235_v33, -inf  ;;  %v24269_v33 = vadd.f32 %v23673_v5, %v24067_v21  ;;  %v24285_v21 = vadd.f32 %v23659_v11, %v24071_v54 }
 0x5e5   :  { %27739 = vst [vmem:[#allocation170_spill] sm:$0xff] %v24243_v23  ;;  %v24251_v59 = vpop.eup %20718 }
 0x5e6   :  { %v24241_v37 = vpop.xlane.xlu1 %7825  ;;  %7924 = vmax.xlane.f32.xlu0 %v7923_v31  ;;  %8488 = vadd.xlane.f32.xlu1 %v8487_v14  ;;  %v24245_v41 = vpop.xlane.xlu0 %7816  ;;  %27740 = vst [vmem:[#allocation171_spill] sm:$0xff] %v24251_v59  ;;  %v24265_v14 = vadd.f32 %v23673_v5, %v24034_v9  ;;  %27742 = vst [vmem:[#allocation173_spill] sm:$0xff] %v24269_v33  ;;  %v24281_v9 = vadd.f32 %v23659_v11, %v24042_v55 }
 0x5e7   :  { %27745 = vst [vmem:[#allocation176_spill] sm:$0xff] %v24285_v21  ;;  %v8079_v55 = vsub.f32 %v23572_v57, %v24012_v6 }
 0x5e8   :  { %27741 = vst [vmem:[#allocation172_spill] sm:$0xff] %v24265_v14  ;;  %27744 = vst [vmem:[#allocation175_spill] sm:$0xff] %v24281_v9 }
 0x5e9   :  { %v8237_v57 = vmul.f32 1.442695, %v8079_v55 }
 0x5ea   :  { %v24253_v34 = vpop.f32.mrb[94].mxu1  ;;  %v24255_v25 = vpop.xlane.xlu1 %7822  ;;  %7933 = vmax.xlane.f32.xlu0 %v7932_v26  ;;  %7930 = vmax.xlane.f32.xlu1 %v7929_v63  ;;  %v8502_v26 = vsel %vm7664_vm5, %v24243_v23, 0.0  ;;  %v8499_v63 = vsel %vm7664_vm5, %v24251_v59, 0.0  ;;  %v7938_v23 = vsel %vm7664_vm5, %v24269_v33, -inf }
 0x5eb   :  { %v24257_v2 = vpop.f32.mrb[114].mxu0  ;;  %v24259_v39 = vpop.f32.mrb[95].mxu1 }
 0x5ec   :  { %v24261_v31 = vpop.f32.mrb[115].mxu0  ;;  %v24301_v33 = vpop.eup %20720 }
 0x5ed   :  { %27746 = vst [vmem:[#allocation177_spill] sm:$0xff] %v24301_v33  ;;  %v8514_v6 = vsel %vm7664_vm5, %v24301_v33, 0.0  ;;  %v24341_v33 = vadd.f32 %v23659_v11, %v24109_v29 }
 0x5ee   :  { %8503 = vadd.xlane.f32.xlu0 %v8502_v26  ;;  %8500 = vadd.xlane.f32.xlu1 %v8499_v63  ;;  %v24275_v1 = vpop.xlane.xlu0 %7831  ;;  %v8438_v46 = vpop.xlane.xlu1 %8437  ;;  %v7944_v26 = vsel %vm7664_vm5, %v24265_v14, -inf  ;;  %v7935_v14 = vsel %vm7664_vm5, %v24285_v21, -inf }
 0x5ef   :  { %27743 = vst [vmem:[#allocation174_spill] sm:$0xff] %v24275_v1  ;;  %20724 = vrcp.f32 %v8438_v46  ;;  %v8239_v1 = vmul.f32 1.442695, %v8080_v32  ;;  %v24307_v46 = vpop.eup %20722  ;;  %v24315_v32 = vadd.f32 %v23673_v5, %v24069_v58  ;;  %27752 = vst [vmem:[#allocation183_spill] sm:$0xff] %v24341_v33 }
 0x5f0   :  { %27747 = vst [vmem:[#allocation178_spill] sm:$0xff] %v24307_v46 }
 0x5f1   :  { %27749 = vst [vmem:[#allocation180_spill] sm:$0xff] %v24315_v32 }
 0x5f2   :  { %v24291_v63 = vpop.f32.mrb[96].mxu1  ;;  %7939 = vmax.xlane.f32.xlu0 %v7938_v23  ;;  %7945 = vmax.xlane.f32.xlu1 %v7944_v26  ;;  %v8435_v20 = vpop.xlane.xlu0 %8434  ;;  %v7941_v23 = vsel %vm7664_vm5, %v24281_v9, -inf  ;;  %v8511_v9 = vsel %vm7664_vm5, %v24307_v46, 0.0 }
 0x5f3   :  { %v24293_v62 = vpop.f32.mrb[116].mxu0  ;;  %20726 = vrcp.f32 %v8435_v20  ;;  %v24297_v54 = vpop.f32.mrb[97].mxu1  ;;  %v24319_v20 = vadd.f32 %v23673_v5, %v24105_v16  ;;  %v24333_v5 = vadd.f32 %v23659_v11, %v24077_v4 }
 0x5f4   :  { %v24299_v59 = vpop.f32.mrb[117].mxu0  ;;  %20728 = vpow2.f32 %v8239_v1 }
 0x5f5   :  { %27750 = vst [vmem:[#allocation181_spill] sm:$0xff] %v24319_v20  ;;  %20730 = vpow2.f32 %v8237_v57  ;;  %27751 = vst [vmem:[#allocation182_spill] sm:$0xff] %v24333_v5  ;;  %v7950_v16 = vsel %vm7664_vm5, %v24319_v20, -inf  ;;  %v24350_v20 = vld [vmem:[%s27081_s1 + $0x8] sm:$0xff]  ;;  %v7953_v11 = vsel %vm7664_vm5, %v24333_v5, -inf }
 0x5f6   :  { %7936 = vmax.xlane.f32.xlu0 %v7935_v14  ;;  %7942 = vmax.xlane.f32.xlu1 %v7941_v23  ;;  %v24309_v26 = vpop.xlane.xlu0 %7828 }
 0x5f7   :  { %27748 = vst [vmem:[#allocation179_spill] sm:$0xff] %v24309_v26  ;;  %v24356_v26 = vpop.xlane.xlu1 %7837 }
 0x5f9   :  { %v20725_v58 = vpop.eup %20724 }
 0x5fa   :  { %v24323_v14 = vpop.f32.mrb[98].mxu1  ;;  %8515 = vadd.xlane.f32.xlu0 %v8514_v6  ;;  %8512 = vadd.xlane.f32.xlu1 %v8511_v9  ;;  %v8444_v55 = vpop.xlane.xlu0 %8443  ;;  %v7956_v6 = vsel %vm7664_vm5, %v24315_v32, -inf  ;;  %v8946_v4 = vmul.f32 %v20725_v58, %v23755_v28  ;;  %v24354_v32 = vadd.f32 %v24350_v20, %v24141_v60  ;;  %v7947_v28 = vsel %vm7664_vm5, %v24341_v33, -inf }
 0x5fb   :  { %v24325_v23 = vpop.f32.mrb[118].mxu0  ;;  %v24327_v21 = vpop.f32.mrb[99].mxu1  ;;  %20732 = vrcp.f32 %v8444_v55  ;;  %v8082_v33 = vsub.f32 %v23585_v42, %v23991_v56  ;;  %v24428_v42 = vadd.f32 %v24350_v20, %v24143_v51  ;;  %v27764_v51 = vld [vmem:[#allocation45_spill] sm:$0xff] }
 0x5fc   :  { %v24329_v1 = vpop.f32.mrb[119].mxu0  ;;  %27753 = vst [vmem:[#allocation184_spill] sm:$0xff] %v24354_v32 }
 0x5fd   :  { %v20727_v9 = vpop.eup %20726  ;;  %27761 = vst [vmem:[#allocation190_spill] sm:$0xff] %v24428_v42 }
 0x5fe   :  { %7951 = vmax.xlane.f32.xlu0 %v7950_v16  ;;  %7957 = vmax.xlane.f32.xlu1 %v7956_v6  ;;  %v8945_v46 = vmul.f32 %v20727_v9, %v23765_v12  ;;  %v24366_v29 = vpop.eup %20728  ;;  %v7962_v16 = vsel %vm7664_vm5, %v24354_v32, -inf  ;;  %v24379_v9 = vld [vmem:[%s27081_s1] sm:$0xff]  ;;  %s21248_s1 = smov 8  }
 0x5ff   :  { %v24343_v57 = vpop.xlane.xlu0 %7843  ;;  %27754 = vst [vmem:[#allocation185_spill] sm:$0xff] %v24366_v29  ;;  %v24374_v6 = vpop.eup %20730  ;;  %v8526_v55 = vsel %vm7664_vm5, %v24366_v29, 0.0 }
 0x600   :  { %18661 = vmatprep.mubr.msk.f32.mxu0 %vm7664_vm5, %v8945_v46  ;;  %v27755_v46 = vld [vmem:[#allocation41_spill] sm:$0xff] }
 0x601   :  { %18662 = vmatmul.mubr.msk.f32.vlgmr.msra.gmra.mrb[120].mxu0 %vm7664_vm5, %v8946_v4  ;;  %v24387_v4 = vpop.xlane.xlu1 %7834 }
 0x602   :  { %v24362_v12 = vpop.f32.mrb[100].mxu1  ;;  %7954 = vmax.xlane.f32.xlu1 %v7953_v11  ;;  %19744 = vmatpush3.bf16.msra.mxu0 %v27642_v49  ;;  %v24383_v49 = vadd.f32 %v24379_v9, %v24145_v40  ;;  %v24391_v11 = vadd.f32 %v24350_v20, %v24107_v44  ;;  %v24409_v44 = vadd.f32 %v24350_v20, %v24181_v50 }
 0x603   :  { %7948 = vmax.xlane.f32.xlu0 %v7947_v28  ;;  %v24369_v60 = vpop.f32.mrb[101].mxu1  ;;  %v8441_v58 = vpop.xlane.xlu0 %8440  ;;  %19750 = vmatprep.subr.bf16.mxu0 %v27755_v46  ;;  %v8523_v28 = vsel %vm7664_vm5, %v24374_v6, 0.0 }
 0x604   :  { %20734 = vrcp.f32 %v8441_v58  ;;  %27756 = vst [vmem:[#allocation41_spill] sm:$0xff] %v24383_v49  ;;  %27757 = vst [vmem:[#allocation186_spill] sm:$0xff] %v24391_v11  ;;  %v24397_v58 = vadd.f32 %v24379_v9, %v24113_v0  ;;  %v7968_v5 = vsel %vm7664_vm5, %v24391_v11, -inf  ;;  %v8081_v11 = vsub.f32 %v23600_v53, %v24014_v24 }
 0x605   :  { %27759 = vst [vmem:[#allocation188_spill] sm:$0xff] %v24409_v44  ;;  %v20733_v0 = vpop.eup %20732  ;;  %v7974_v56 = vsel %vm7664_vm5, %v24409_v44, -inf }
 0x606   :  { %7963 = vmax.xlane.f32.xlu1 %v7962_v16  ;;  %27758 = vst [vmem:[#allocation187_spill] sm:$0xff] %v24397_v58  ;;  %v7959_v16 = vsel %vm7664_vm5, %v24383_v49, -inf  ;;  %v8241_v24 = vmul.f32 1.442695, %v8081_v11  ;;  %v8083_v11 = vsub.f32 %v23628_v30, %v24055_v52 }
 0x607   :  { %8527 = vadd.xlane.f32.xlu0 %v8526_v55 }
 0x60a   :  { %v24399_v40 = vpop.f32.mrb[102].mxu1  ;;  %8524 = vadd.xlane.f32.xlu1 %v8523_v28  ;;  %v24417_v28 = vadd.f32 %v24379_v9, %v24187_v48  ;;  %v8948_v48 = vmul.f32 %v20733_v0, %v23782_v45  ;;  %v24444_v45 = vadd.f32 %v24350_v20, %v24215_v15  ;;  %v8084_v0 = vsub.f32 %v23615_v13, %v24028_v61 }
 0x60b   :  { %7960 = vmax.xlane.f32.xlu0 %v7959_v16  ;;  %v24403_v32 = vpop.f32.mrb[103].mxu1  ;;  %v24405_v55 = vpop.xlane.xlu1 %7849  ;;  %v7965_v16 = vsel %vm7664_vm5, %v24397_v58, -inf  ;;  %v8245_v13 = vmul.f32 1.442695, %v8083_v11 }
 0x60c   :  { %27760 = vst [vmem:[#allocation189_spill] sm:$0xff] %v24417_v28  ;;  %v7971_v53 = vsel %vm7664_vm5, %v24417_v28, -inf  ;;  %27763 = vst [vmem:[#allocation192_spill] sm:$0xff] %v24444_v45  ;;  %v8247_v61 = vmul.f32 1.442695, %v8084_v0 }
 0x60e   :  { %7969 = vmax.xlane.f32.xlu1 %v7968_v5  ;;  %v20735_v49 = vpop.eup %20734  ;;  %v8243_v5 = vmul.f32 1.442695, %v8082_v33  ;;  %v24451_v33 = vadd.f32 %v24379_v9, %v24223_v8  ;;  %v24463_v8 = vadd.f32 %v24350_v20, %v24183_v19  ;;  %v24479_v19 = vadd.f32 %v24350_v20, %v24253_v34 }
 0x60f   :  { %7966 = vmax.xlane.f32.xlu0 %v7965_v16  ;;  %v24421_v29 = vpop.xlane.xlu1 %7846  ;;  %v8947_v50 = vmul.f32 %v20735_v49, %v23794_v38  ;;  %v24435_v16 = vadd.f32 %v24379_v9, %v24149_v7  ;;  %v7980_v7 = vsel %vm7664_vm5, %v24428_v42, -inf  ;;  %v8086_v34 = vsub.f32 %v23625_v47, %v24040_v10  ;;  %v27771_v10 = vld [vmem:[#allocation107_spill] sm:$0xff] }
 0x610   :  { %20736 = vpow2.f32 %v8243_v5  ;;  %27765 = vst [vmem:[#allocation45_spill] sm:$0xff] %v24451_v33  ;;  %27766 = vst [vmem:[#allocation193_spill] sm:$0xff] %v24463_v8  ;;  %v7983_v30 = vsel %vm7664_vm5, %v24451_v33, -inf  ;;  %v7992_v5 = vsel %vm7664_vm5, %v24463_v8, -inf  ;;  %v7998_v11 = vsel %vm7664_vm5, %v24479_v19, -inf  ;;  %v27785_v8 = vld [vmem:[#allocation119_spill] sm:$0xff] }
 0x611   :  { %27762 = vst [vmem:[#allocation191_spill] sm:$0xff] %v24435_v16  ;;  %18668 = vmatprep.mubr.msk.f32.mxu0 %vm7664_vm5, %v8947_v50  ;;  %v7977_v49 = vsel %vm7664_vm5, %v24435_v16, -inf  ;;  %v7986_v50 = vsel %vm7664_vm5, %v24444_v45, -inf  ;;  %27768 = vst [vmem:[#allocation195_spill] sm:$0xff] %v24479_v19 }
 0x612   :  { %7975 = vmax.xlane.f32.xlu1 %v7974_v56  ;;  %18669 = vmatmul.mubr.msk.f32.vlgmr.msra.gmra.mrb[122].mxu0 %vm7664_vm5, %v8948_v48  ;;  %v24469_v56 = vadd.f32 %v24379_v9, %v24189_v17  ;;  %v24485_v17 = vadd.f32 %v24379_v9, %v24259_v39  ;;  %v27770_v39 = vld [vmem:[#allocation96_spill] sm:$0xff] }
 0x613   :  { %7972 = vmax.xlane.f32.xlu0 %v7971_v53  ;;  %v8450_v38 = vpop.xlane.xlu1 %8449  ;;  %19752 = vmatpush3.bf16.msra.mxu0 %v27755_v46  ;;  %v24455_v46 = vpop.xlane.xlu0 %7840 }
 0x614   :  { %19758 = vmatprep.subr.bf16.mxu0 %v27764_v51  ;;  %20738 = vrcp.f32 %v8450_v38  ;;  %27767 = vst [vmem:[#allocation194_spill] sm:$0xff] %v24469_v56  ;;  %27769 = vst [vmem:[#allocation196_spill] sm:$0xff] %v24485_v17  ;;  %v7989_v53 = vsel %vm7664_vm5, %v24469_v56, -inf }
 0x616   :  { %7981 = vmax.xlane.f32.xlu1 %v7980_v7 }
 0x617   :  { %7978 = vmax.xlane.f32.xlu0 %v7977_v49  ;;  %v8447_v15 = vpop.xlane.xlu1 %8446 }
 0x618   :  { %20740 = vrcp.f32 %v8447_v15  ;;  %v8085_v15 = vsub.f32 %v27770_v39, %v24065_v35  ;;  %v24511_v39 = vadd.f32 %v24350_v20, %v24221_v22 }
 0x619   :  { %20742 = vpow2.f32 %v8241_v24 }
 0x61a   :  { %7987 = vmax.xlane.f32.xlu1 %v7986_v50  ;;  %v24493_v7 = vpop.eup %20736  ;;  %20744 = vpow2.f32 %v8245_v13  ;;  %v7995_v50 = vsel %vm7664_vm5, %v24485_v17, -inf  ;;  %v8249_v35 = vmul.f32 1.442695, %v8085_v15  ;;  %27773 = vst [vmem:[#allocation96_spill] sm:$0xff] %v24511_v39 }
 0x61b   :  { %7984 = vmax.xlane.f32.xlu0 %v7983_v30  ;;  %v24473_v52 = vpop.xlane.xlu1 %7861  ;;  %v24475_v48 = vpop.xlane.xlu0 %7855  ;;  %20746 = vpow2.f32 %v8247_v61  ;;  %v8251_v61 = vmul.f32 1.442695, %v8086_v34 }
 0x61d   :  { %20748 = vpow2.f32 %v8251_v61 }
 0x61e   :  { %7993 = vmax.xlane.f32.xlu1 %v7992_v5  ;;  %v20739_v49 = vpop.eup %20738  ;;  %20750 = vpow2.f32 %v8249_v35  ;;  %v24543_v35 = vadd.f32 %v24350_v20, %v24291_v63  ;;  %v27782_v63 = vld [vmem:[#allocation146_spill] sm:$0xff] }
 0x61f   :  { %7990 = vmax.xlane.f32.xlu0 %v7989_v53  ;;  %v24489_v38 = vpop.xlane.xlu1 %7858  ;;  %v24491_v24 = vpop.xlane.xlu0 %7852  ;;  %v27772_v53 = vld [vmem:[#allocation100_spill] sm:$0xff] }
 0x620   :  { %v8950_v56 = vmul.f32 %v20739_v49, %v27772_v53  ;;  %v27775_v49 = vld [vmem:[#allocation43_spill] sm:$0xff]  ;;  %27780 = vst [vmem:[#allocation100_spill] sm:$0xff] %v24543_v35 }
 0x622   :  { %v20741_v0 = vpop.eup %20740  ;;  %7999 = vmax.xlane.f32.xlu1 %v7998_v11  ;;  %v8532_v11 = vsel %vm7664_vm5, %v24493_v7, 0.0 }
 0x623   :  { %v24503_v30 = vpop.eup %20742  ;;  %7996 = vmax.xlane.f32.xlu0 %v7995_v50  ;;  %v24505_v5 = vpop.xlane.xlu1 %7873  ;;  %v8949_v13 = vmul.f32 %v20741_v0, %v27771_v10  ;;  %v24518_v50 = vadd.f32 %v24379_v9, %v24227_v36  ;;  %v27776_v0 = vld [vmem:[#allocation112_spill] sm:$0xff]  ;;  %v27778_v36 = vld [vmem:[#allocation143_spill] sm:$0xff] }
 0x624   :  { %v8456_v47 = vpop.xlane.xlu0 %8455  ;;  %v8529_v34 = vsel %vm7664_vm5, %v24503_v30, 0.0  ;;  %v8087_v10 = vsub.f32 %v27776_v0, %v24103_v18  ;;  %v24535_v19 = vpop.eup %20744 }
 0x625   :  { %18675 = vmatprep.mubr.msk.f32.mxu1 %vm7664_vm5, %v8949_v13  ;;  %27774 = vst [vmem:[#allocation107_spill] sm:$0xff] %v24518_v50  ;;  %v27777_v13 = vld [vmem:[#allocation47_spill] sm:$0xff]  ;;  %20752 = vrcp.f32 %v8456_v47 }
 0x626   :  { %18676 = vmatmul.mubr.msk.f32.vlgmr.msra.gmra.mrb[104].mxu1 %vm7664_vm5, %v8950_v56  ;;  %8533 = vadd.xlane.f32.xlu1 %v8532_v11  ;;  %v27779_v56 = vld [vmem:[#allocation121_spill] sm:$0xff]  ;;  %v8004_v11 = vsel %vm7664_vm5, %v24511_v39, -inf  ;;  %v8253_v0 = vmul.f32 1.442695, %v8087_v10 }
 0x627   :  { %19756 = vmatpush3.bf16.msra.mxu1 %v27775_v49  ;;  %8530 = vadd.xlane.f32.xlu0 %v8529_v34  ;;  %v24524_v22 = vpop.xlane.xlu1 %7870  ;;  %v8088_v53 = vsub.f32 %v27779_v56, %v27778_v36  ;;  %v8001_v34 = vsel %vm7664_vm5, %v24518_v50, -inf  ;;  %v24539_v49 = vpop.eup %20746  ;;  %v8535_v36 = vsel %vm7664_vm5, %v24535_v19, 0.0  ;;  %v24549_v56 = vadd.f32 %v24379_v9, %v24297_v54  ;;  %v27784_v50 = vld [vmem:[#allocation150_spill] sm:$0xff] }
 0x628   :  { %v24526_v15 = vpop.xlane.xlu0 %7867  ;;  %19762 = vmatprep.subr.bf16.mxu1 %v27777_v13  ;;  %v8089_v45 = vsub.f32 %v27785_v8, %v27784_v50  ;;  %v8010_v54 = vsel %vm7664_vm5, %v24543_v35, -inf  ;;  %v24563_v47 = vpop.eup %20748  ;;  %v27787_v8 = vld [vmem:[#allocation69_spill] sm:$0xff]  ;;  %v24575_v50 = vadd.f32 %v24350_v20, %v24257_v2  ;;  %v27792_v35 = vld [vmem:[#allocation114_spill] sm:$0xff] }
 0x629   :  { %v8255_v17 = vmul.f32 1.442695, %v8088_v53  ;;  %27781 = vst [vmem:[#allocation43_spill] sm:$0xff] %v24549_v56 }
 0x62a   :  { %8005 = vmax.xlane.f32.xlu1 %v8004_v11  ;;  %v8538_v11 = vsel %vm7664_vm5, %v24539_v49, 0.0  ;;  %27788 = vst [vmem:[#allocation47_spill] sm:$0xff] %v24575_v50 }
 0x62b   :  { %8002 = vmax.xlane.f32.xlu0 %v8001_v34  ;;  %v8462_v61 = vpop.xlane.xlu1 %8461  ;;  %v27783_v34 = vld [vmem:[#allocation123_spill] sm:$0xff] }
 0x62c   :  { %v8453_v18 = vpop.xlane.xlu0 %8452  ;;  %v8090_v39 = vsub.f32 %v27783_v34, %v27782_v63  ;;  %v8257_v63 = vmul.f32 1.442695, %v8089_v45  ;;  %v8544_v34 = vsel %vm7664_vm5, %v24563_v47, 0.0 }
 0x62d   :  { %20754 = vrcp.f32 %v8453_v18  ;;  %v8007_v18 = vsel %vm7664_vm5, %v24549_v56, -inf }
 0x62e   :  { %8536 = vadd.xlane.f32.xlu1 %v8535_v36  ;;  %20756 = vpow2.f32 %v8253_v0  ;;  %v24567_v36 = vpop.eup %20750  ;;  %v8259_v0 = vmul.f32 1.442695, %v8090_v39 }
 0x62f   :  { %8539 = vadd.xlane.f32.xlu0 %v8538_v11  ;;  %v24553_v10 = vpop.xlane.xlu1 %8485  ;;  %20758 = vpow2.f32 %v8255_v17  ;;  %27786 = vst [vmem:[#allocation112_spill] sm:$0xff] %v24567_v36  ;;  %v8092_v17 = vsub.f32 %v27787_v8, %v24125_v43  ;;  %v8541_v45 = vsel %vm7664_vm5, %v24567_v36, 0.0 }
 0x630   :  { %v24555_v53 = vpop.xlane.xlu0 %7864  ;;  %20760 = vrcp.f32 %v8462_v61  ;;  %v20753_v61 = vpop.eup %20752 }
 0x632   :  { %8011 = vmax.xlane.f32.xlu1 %v8010_v54  ;;  %v24581_v54 = vadd.f32 %v24379_v9, %v24261_v31  ;;  %v27791_v31 = vld [vmem:[#allocation75_spill] sm:$0xff] }
 0x633   :  { %8008 = vmax.xlane.f32.xlu0 %v8007_v18  ;;  %v8459_v11 = vpop.xlane.xlu1 %8458  ;;  %v8263_v18 = vmul.f32 1.442695, %v8092_v17 }
 0x634   :  { %v24569_v33 = vpop.xlane.xlu0 %7879  ;;  %20762 = vrcp.f32 %v8459_v11  ;;  %27789 = vst [vmem:[#allocation143_spill] sm:$0xff] %v24581_v54  ;;  %v8016_v11 = vsel %vm7664_vm5, %v24575_v50, -inf  ;;  %v27800_v50 = vld [vmem:[#allocation129_spill] sm:$0xff] }
 0x635   :  { %20764 = vpow2.f32 %v8259_v0  ;;  %v27794_v0 = vld [vmem:[#allocation115_spill] sm:$0xff] }
 0x636   :  { %8545 = vadd.xlane.f32.xlu1 %v8544_v34  ;;  %20766 = vpow2.f32 %v8257_v63  ;;  %v8091_v34 = vsub.f32 %v27791_v31, %v24147_v3  ;;  %v8952_v63 = vmul.f32 %v20753_v61, %v27794_v0  ;;  %v24608_v3 = vadd.f32 %v24350_v20, %v24323_v14  ;;  %v27797_v14 = vld [vmem:[#allocation49_spill] sm:$0xff] }
 0x637   :  { %8542 = vadd.xlane.f32.xlu0 %v8541_v45  ;;  %v24585_v39 = vpop.xlane.xlu1 %7885  ;;  %v20755_v2 = vpop.eup %20754  ;;  %v8013_v45 = vsel %vm7664_vm5, %v24581_v54, -inf  ;;  %20768 = vpow2.f32 %v8263_v18  ;;  %v24615_v61 = vadd.f32 %v24379_v9, %v24327_v21  ;;  %v27798_v0 = vld [vmem:[#allocation153_spill] sm:$0xff]  ;;  %v27801_v21 = vld [vmem:[#allocation130_spill] sm:$0xff] }
 0x638   :  { %v24587_v43 = vpop.xlane.xlu0 %8482  ;;  %v24591_v8 = vpop.eup %20756  ;;  %v8951_v56 = vmul.f32 %v20755_v2, %v27792_v35  ;;  %27795 = vst [vmem:[#allocation123_spill] sm:$0xff] %v24608_v3  ;;  %v8093_v44 = vsub.f32 %v27801_v21, %v24163_v27  ;;  %v8022_v28 = vsel %vm7664_vm5, %v24608_v3, -inf  ;;  %v27809_v21 = vld [vmem:[#allocation127_spill] sm:$0xff] }
 0x639   :  { %27790 = vst [vmem:[#allocation121_spill] sm:$0xff] %v24591_v8  ;;  %v24598_v42 = vpop.eup %20758  ;;  %v8547_v35 = vsel %vm7664_vm5, %v24591_v8, 0.0  ;;  %27796 = vst [vmem:[#allocation150_spill] sm:$0xff] %v24615_v61 }
 0x63a   :  { %8017 = vmax.xlane.f32.xlu1 %v8016_v11  ;;  %27793 = vst [vmem:[#allocation146_spill] sm:$0xff] %v24598_v42  ;;  %18682 = vmatprep.mubr.msk.f32.mxu0 %vm7664_vm5, %v8951_v56  ;;  %v20761_v2 = vpop.eup %20760  ;;  %v8261_v11 = vmul.f32 1.442695, %v8091_v34  ;;  %v8550_v56 = vsel %vm7664_vm5, %v24598_v42, 0.0  ;;  %v27819_v42 = vld [vmem:[#allocation125_spill] sm:$0xff] }
 0x63b   :  { %8014 = vmax.xlane.f32.xlu0 %v8013_v45  ;;  %v24601_v17 = vpop.xlane.xlu1 %7882  ;;  %18683 = vmatmul.mubr.msk.f32.vlgmr.msra.gmra.mrb[124].mxu0 %vm7664_vm5, %v8952_v63  ;;  %v27799_v63 = vld [vmem:[#allocation117_spill] sm:$0xff] }
 0x63c   :  { %v24603_v16 = vpop.xlane.xlu0 %7876  ;;  %19760 = vmatpush3.bf16.msra.mxu0 %v27764_v51  ;;  %v8094_v34 = vsub.f32 %v27799_v63, %v27798_v0  ;;  %v27802_v51 = vld [vmem:[#allocation122_spill] sm:$0xff]  ;;  %20770 = vpow2.f32 %v8261_v11  ;;  %v8265_v11 = vmul.f32 1.442695, %v8093_v44 }
 0x63d   :  { %19766 = vmatprep.subr.bf16.mxu0 %v27797_v14 }
 0x63e   :  { %8548 = vadd.xlane.f32.xlu1 %v8547_v35  ;;  %v20763_v18 = vpop.eup %20762  ;;  %v8954_v35 = vmul.f32 %v20761_v2, %v27802_v51  ;;  %v8267_v2 = vmul.f32 1.442695, %v8094_v34  ;;  %v27808_v34 = vld [vmem:[#allocation157_spill] sm:$0xff] }
 0x63f   :  { %8551 = vadd.xlane.f32.xlu0 %v8550_v56  ;;  %v24621_v31 = vpop.xlane.xlu1 %8497  ;;  %v8953_v54 = vmul.f32 %v20763_v18, %v27800_v50  ;;  %v24631_v58 = vpop.eup %20764  ;;  %v8019_v56 = vsel %vm7664_vm5, %v24615_v61, -inf }
 0x640   :  { %v8468_v45 = vpop.xlane.xlu0 %8467  ;;  %27803 = vst [vmem:[#allocation119_spill] sm:$0xff] %v24631_v58  ;;  %v24636_v0 = vpop.eup %20766  ;;  %v8556_v18 = vsel %vm7664_vm5, %v24631_v58, 0.0 }
 0x641   :  { %18689 = vmatprep.mubr.msk.f32.mxu1 %vm7664_vm5, %v8953_v54  ;;  %27804 = vst [vmem:[#allocation69_spill] sm:$0xff] %v24636_v0  ;;  %20772 = vrcp.f32 %v8468_v45  ;;  %v27806_v54 = vld [vmem:[#allocation51_spill] sm:$0xff]  ;;  %v8553_v45 = vsel %vm7664_vm5, %v24636_v0, 0.0  ;;  %v24651_v63 = vpop.eup %20768  ;;  %v27817_v0 = vld [vmem:[#allocation133_spill] sm:$0xff] }
 0x642   :  { %8023 = vmax.xlane.f32.xlu1 %v8022_v28  ;;  %18690 = vmatmul.mubr.msk.f32.vlgmr.msra.gmra.mrb[106].mxu1 %vm7664_vm5, %v8954_v35  ;;  %v24644_v28 = vadd.f32 %v24350_v20, %v24293_v62  ;;  %27807 = vst [vmem:[#allocation114_spill] sm:$0xff] %v24651_v63  ;;  %v27810_v62 = vld [vmem:[#allocation163_spill] sm:$0xff]  ;;  %v27811_v35 = vld [vmem:[#allocation68_spill] sm:$0xff] }
 0x643   :  { %8020 = vmax.xlane.f32.xlu0 %v8019_v56  ;;  %v8465_v27 = vpop.xlane.xlu1 %8464  ;;  %19764 = vmatpush3.bf16.msra.mxu1 %v27777_v13  ;;  %v8096_v13 = vsub.f32 %v27809_v21, %v27808_v34  ;;  %v8095_v56 = vsub.f32 %v27811_v35, %v27810_v62  ;;  %v24669_v34 = vadd.f32 %v24350_v20, %v24362_v12 }
 0x644   :  { %v24639_v50 = vpop.xlane.xlu0 %7891  ;;  %20774 = vrcp.f32 %v8465_v27  ;;  %27805 = vst [vmem:[#allocation75_spill] sm:$0xff] %v24644_v28  ;;  %19770 = vmatprep.subr.bf16.mxu1 %v27806_v54  ;;  %v24663_v27 = vadd.f32 %v24379_v9, %v24299_v59  ;;  %v24683_v12 = vadd.f32 %v24379_v9, %v24369_v60  ;;  %v27820_v60 = vld [vmem:[#allocation35_spill] sm:$0xff] }
 0x645   :  { %20776 = vpow2.f32 %v8267_v2  ;;  %27813 = vst [vmem:[#allocation49_spill] sm:$0xff] %v24669_v34  ;;  %v8271_v2 = vmul.f32 1.442695, %v8096_v13  ;;  %v8269_v59 = vmul.f32 1.442695, %v8095_v56  ;;  %v8034_v13 = vsel %vm7664_vm5, %v24669_v34, -inf }
 0x646   :  { %8557 = vadd.xlane.f32.xlu1 %v8556_v18  ;;  %20778 = vpow2.f32 %v8265_v11  ;;  %27812 = vst [vmem:[#allocation115_spill] sm:$0xff] %v24663_v27  ;;  %v8028_v18 = vsel %vm7664_vm5, %v24644_v28, -inf  ;;  %v24677_v62 = vpop.eup %20770  ;;  %v8025_v28 = vsel %vm7664_vm5, %v24663_v27, -inf  ;;  %27814 = vst [vmem:[#allocation153_spill] sm:$0xff] %v24683_v12  ;;  %v27818_v27 = vld [vmem:[#allocation165_spill] sm:$0xff] }
 0x647   :  { %8554 = vadd.xlane.f32.xlu0 %v8553_v45  ;;  %v24655_v44 = vpop.xlane.xlu1 %7897  ;;  %v8562_v45 = vsel %vm7664_vm5, %v24651_v63, 0.0  ;;  %20780 = vpow2.f32 %v8271_v2  ;;  %v8097_v8 = vsub.f32 %v27819_v42, %v27818_v27  ;;  %v27822_v42 = vld [vmem:[#allocation135_spill] sm:$0xff] }
 0x648   :  { %v24657_v51 = vpop.xlane.xlu0 %8494  ;;  %20782 = vpow2.f32 %v8269_v59  ;;  %v27821_v59 = vld [vmem:[#allocation167_spill] sm:$0xff] }
 0x649   :  { %v8100_v27 = vsub.f32 %v27822_v42, %v27821_v59  ;;  %20784 = vrcp.f32 %v24587_v43  ;;  %v27828_v42 = vld [vmem:[#allocation95_spill] sm:$0xff] }
 0x64a   :  { %8029 = vmax.xlane.f32.xlu1 %v8028_v18  ;;  %v27815_v18 = vld [vmem:[#allocation160_spill] sm:$0xff] }
 0x64b   :  { %8563 = vadd.xlane.f32.xlu0 %v8562_v45  ;;  %v24673_v21 = vpop.xlane.xlu1 %7894  ;;  %v20773_v35 = vpop.eup %20772  ;;  %v27816_v45 = vld [vmem:[#allocation139_spill] sm:$0xff]  ;;  %v8279_v43 = vmul.f32 1.442695, %v8100_v27 }
 0x64c   :  { %v24675_v11 = vpop.xlane.xlu0 %7888  ;;  %v8098_v3 = vsub.f32 %v27816_v45, %v27815_v18  ;;  %v8956_v36 = vmul.f32 %v20773_v35, %v27820_v60  ;;  %v8273_v18 = vmul.f32 1.442695, %v8097_v8  ;;  %v27823_v45 = vld [vmem:[#allocation132_spill] sm:$0xff]  ;;  %v27827_v8 = vld [vmem:[#allocation99_spill] sm:$0xff] }
 0x64d   :  { %v8099_v60 = vsub.f32 %v27823_v45, %v24245_v41 }
 0x64e   :  { %v20775_v61 = vpop.eup %20774  ;;  %8026 = vmax.xlane.f32.xlu1 %v8025_v28  ;;  %v8559_v28 = vsel %vm7664_vm5, %v24677_v62, 0.0 }
 0x64f   :  { %8035 = vmax.xlane.f32.xlu0 %v8034_v13  ;;  %v8474_v63 = vpop.xlane.xlu1 %8473  ;;  %v8955_v58 = vmul.f32 %v20775_v61, %v27817_v0  ;;  %v24698_v2 = vpop.eup %20776  ;;  %v8031_v13 = vsel %vm7664_vm5, %v24683_v12, -inf  ;;  %v8275_v0 = vmul.f32 1.442695, %v8098_v3  ;;  %v8277_v59 = vmul.f32 1.442695, %v8099_v60 }
 0x650   :  { %v24689_v56 = vpop.xlane.xlu0 %7903  ;;  %v24703_v61 = vpop.eup %20778  ;;  %20786 = vrcp.f32 %v8474_v63  ;;  %v8568_v3 = vsel %vm7664_vm5, %v24698_v2, 0.0 }
 0x651   :  { %18696 = vmatprep.mubr.msk.f32.mxu0 %vm7664_vm5, %v8955_v58  ;;  %v8565_v41 = vsel %vm7664_vm5, %v24703_v61, 0.0  ;;  %v24730_v45 = vpop.eup %20780 }
 0x652   :  { %8560 = vadd.xlane.f32.xlu1 %v8559_v28  ;;  %18697 = vmatmul.mubr.msk.f32.vlgmr.msra.gmra.mrb[126].mxu0 %vm7664_vm5, %v8956_v36  ;;  %v27824_v28 = vld [vmem:[#allocation53_spill] sm:$0xff]  ;;  %v24714_v36 = vadd.f32 %v24379_v9, %v24329_v1  ;;  %v24735_v27 = vpop.eup %20782 }
 0x653   :  { %8032 = vmax.xlane.f32.xlu0 %v8031_v13  ;;  %19768 = vmatpush3.bf16.msra.mxu0 %v27797_v14  ;;  %v8510_v58 = vpop.xlane.xlu1 %8509  ;;  %v24720_v14 = vadd.f32 %v24350_v20, %v24325_v23  ;;  %v8102_v13 = vsub.f32 %v27827_v8, %v24241_v37  ;;  %v8101_v23 = vsub.f32 %v27828_v42, %v24255_v25  ;;  %v27830_v37 = vld [vmem:[#allocation72_spill] sm:$0xff]  ;;  %v8574_v8 = vsel %vm7664_vm5, %v24730_v45, 0.0  ;;  %v27831_v42 = vld [vmem:[#allocation98_spill] sm:$0xff] }
 0x654   :  { %v8471_v35 = vpop.xlane.xlu0 %8470  ;;  %19774 = vmatprep.subr.bf16.mxu0 %v27824_v28  ;;  %27825 = vst [vmem:[#allocation117_spill] sm:$0xff] %v24714_v36 }
 0x655   :  { %27826 = vst [vmem:[#allocation129_spill] sm:$0xff] %v24720_v14  ;;  %20788 = vrcp.f32 %v8471_v35  ;;  %v27829_v35 = vld [vmem:[#allocation174_spill] sm:$0xff]  ;;  %v8283_v25 = vmul.f32 1.442695, %v8102_v13  ;;  %v20785_v13 = vpop.eup %20784 }
 0x656   :  { %8569 = vadd.xlane.f32.xlu1 %v8568_v3  ;;  %20790 = vpow2.f32 %v8275_v0  ;;  %v8037_v0 = vsel %vm7664_vm5, %v24714_v36, -inf  ;;  %v8104_v3 = vsub.f32 %v27830_v37, %v27829_v35  ;;  %v8108_v35 = vsub.f32 %v27831_v42, %v24343_v57  ;;  %v27833_v37 = vld [vmem:[#allocation179_spill] sm:$0xff] }
 0x657   :  { %8566 = vadd.xlane.f32.xlu0 %v8565_v41  ;;  %v24726_v1 = vpop.xlane.xlu1 %7909  ;;  %20792 = vpow2.f32 %v8273_v18  ;;  %v8040_v18 = vsel %vm7664_vm5, %v24720_v14, -inf  ;;  %v8281_v41 = vmul.f32 1.442695, %v8101_v23 }
 0x658   :  { %v8507_v63 = vpop.xlane.xlu0 %8506  ;;  %20794 = vrcp.f32 %v24553_v10  ;;  %v8295_v36 = vmul.f32 1.442695, %v8108_v35 }
 0x659   :  { %20796 = vrcp.f32 %v24657_v51  ;;  %v24752_v51 = vadd.f32 %v24379_v9, %v24403_v32  ;;  %v27836_v32 = vld [vmem:[#allocation101_spill] sm:$0xff] }
 0x65a   :  { %8038 = vmax.xlane.f32.xlu1 %v8037_v0  ;;  %20798 = vpow2.f32 %v8279_v43  ;;  %v8571_v43 = vsel %vm7664_vm5, %v24735_v27, 0.0  ;;  %v8287_v0 = vmul.f32 1.442695, %v8104_v3  ;;  %v20787_v57 = vpop.eup %20786  ;;  %v8110_v9 = vsub.f32 %v27836_v32, %v24405_v55 }
 0x65b   :  { %8041 = vmax.xlane.f32.xlu0 %v8040_v18  ;;  %v24742_v60 = vpop.xlane.xlu1 %7906  ;;  %20800 = vpow2.f32 %v8277_v59  ;;  %27832 = vst [vmem:[#allocation130_spill] sm:$0xff] %v24752_v51  ;;  %v27834_v59 = vld [vmem:[#allocation137_spill] sm:$0xff]  ;;  %v24761_v18 = vadd.f32 %v24350_v20, %v24399_v40  ;;  %v8043_v20 = vsel %vm7664_vm5, %v24752_v51, -inf }
 0x65c   :  { %v24744_v10 = vpop.xlane.xlu0 %7900  ;;  %20802 = vrcp.f32 %v24621_v31  ;;  %v8103_v23 = vsub.f32 %v27834_v59, %v27833_v37  ;;  %v27837_v37 = vld [vmem:[#allocation142_spill] sm:$0xff] }
 0x65d   :  { %27835 = vst [vmem:[#allocation122_spill] sm:$0xff] %v24761_v18  ;;  %20804 = vrcp.f32 %v8507_v63  ;;  %v8046_v55 = vsel %vm7664_vm5, %v24761_v18, -inf }
 0x65e   :  { %8572 = vadd.xlane.f32.xlu1 %v8571_v43  ;;  %20806 = vpow2.f32 %v8283_v25  ;;  %v8285_v63 = vmul.f32 1.442695, %v8103_v23  ;;  %v27838_v25 = vld [vmem:[#allocation140_spill] sm:$0xff]  ;;  %v8299_v43 = vmul.f32 1.442695, %v8110_v9 }
 0x65f   :  { %8575 = vadd.xlane.f32.xlu0 %v8574_v8  ;;  %v8522_v31 = vpop.xlane.xlu1 %8521  ;;  %v20789_v14 = vpop.eup %20788  ;;  %20808 = vpow2.f32 %v8281_v41  ;;  %v8958_v8 = vmul.f32 %v20787_v57, %v27838_v25  ;;  %v27841_v57 = vld [vmem:[#allocation106_spill] sm:$0xff] }
 0x660   :  { %v8480_v42 = vpop.xlane.xlu0 %8479  ;;  %v24765_v3 = vpop.eup %20790  ;;  %20810 = vrcp.f32 %v8510_v58  ;;  %v8957_v59 = vmul.f32 %v20789_v14, %v27837_v37  ;;  %v27839_v14 = vld [vmem:[#allocation66_spill] sm:$0xff]  ;;  %v8109_v9 = vsub.f32 %v27841_v57, %v24421_v29 }
 0x661   :  { %v24770_v40 = vpop.eup %20792  ;;  %20812 = vpow2.f32 %v8287_v0  ;;  %v8961_v35 = vmul.f32 %v20785_v13, %v27839_v14  ;;  %v27840_v0 = vld [vmem:[#allocation97_spill] sm:$0xff]  ;;  %v8580_v13 = vsel %vm7664_vm5, %v24765_v3, 0.0 }
 0x662   :  { %8044 = vmax.xlane.f32.xlu1 %v8043_v20  ;;  %v20795_v41 = vpop.eup %20794  ;;  %20814 = vrcp.f32 %v8480_v42  ;;  %18703 = vmatprep.mubr.msk.f32.mxu1 %vm7664_vm5, %v8957_v59  ;;  %v8106_v23 = vsub.f32 %v27840_v0, %v24356_v26  ;;  %v27842_v26 = vld [vmem:[#allocation55_spill] sm:$0xff]  ;;  %v8577_v59 = vsel %vm7664_vm5, %v24770_v40, 0.0 }
 0x663   :  { %8047 = vmax.xlane.f32.xlu0 %v8046_v55  ;;  %v8477_v58 = vpop.xlane.xlu1 %8476  ;;  %v20797_v37 = vpop.eup %20796  ;;  %18704 = vmatmul.mubr.msk.f32.vlgmr.msra.gmra.mrb[108].mxu1 %vm7664_vm5, %v8958_v8 }
 0x664   :  { %v24777_v32 = vpop.xlane.xlu0 %7915  ;;  %20816 = vrcp.f32 %v8477_v58  ;;  %v24782_v20 = vpop.eup %20798  ;;  %19772 = vmatpush3.bf16.msra.mxu1 %v27806_v54  ;;  %18717 = vmatprep.mubr.msk.f32.mxu1 %vm7664_vm5, %v8961_v35  ;;  %v27844_v54 = vld [vmem:[#allocation131_spill] sm:$0xff]  ;;  %v8291_v35 = vmul.f32 1.442695, %v8106_v23 }
 0x665   :  { %20818 = vpow2.f32 %v8295_v36  ;;  %v24790_v42 = vpop.eup %20800  ;;  %19778 = vmatprep.subr.bf16.mxu1 %v27842_v26  ;;  %v27843_v36 = vld [vmem:[#allocation124_spill] sm:$0xff]  ;;  %v8965_v8 = vmul.f32 %v20797_v37, %v27844_v54 }
 0x666   :  { %20820 = vpow2.f32 %v8285_v63  ;;  %8581 = vadd.xlane.f32.xlu1 %v8580_v13  ;;  %v8962_v55 = vmul.f32 %v20795_v41, %v27843_v36  ;;  %v20803_v25 = vpop.eup %20802  ;;  %v27845_v63 = vld [vmem:[#allocation102_spill] sm:$0xff]  ;;  %v8297_v13 = vmul.f32 1.442695, %v8109_v9  ;;  %v27846_v41 = vld [vmem:[#allocation111_spill] sm:$0xff]  ;;  %v8583_v37 = vsel %vm7664_vm5, %v24790_v42, 0.0 }
 0x667   :  { %20822 = vpow2.f32 %v8299_v43  ;;  %8578 = vadd.xlane.f32.xlu0 %v8577_v59  ;;  %v24796_v29 = vpop.xlane.xlu1 %7921  ;;  %v20805_v14 = vpop.eup %20804  ;;  %v8105_v0 = vsub.f32 %v27845_v63, %v24387_v4  ;;  %v8111_v43 = vsub.f32 %v27846_v41, %v24491_v24  ;;  %v27848_v4 = vld [vmem:[#allocation103_spill] sm:$0xff]  ;;  %v8586_v9 = vsel %vm7664_vm5, %v24782_v20, 0.0  ;;  %v27850_v24 = vld [vmem:[#allocation126_spill] sm:$0xff] }
 0x668   :  { %v8519_v58 = vpop.xlane.xlu0 %8518  ;;  %20824 = vrcp.f32 %v8522_v31  ;;  %18718 = vmatmul.mubr.msk.f32.vlgmr.msra.gmra.mrb[110].mxu1 %vm7664_vm5, %v8962_v55  ;;  %v24802_v57 = vpop.eup %20806  ;;  %v8107_v31 = vsub.f32 %v27848_v4, %v24455_v46  ;;  %v27849_v59 = vld [vmem:[#allocation59_spill] sm:$0xff]  ;;  %v8966_v36 = vmul.f32 %v20803_v25, %v27850_v24  ;;  %v27851_v55 = vld [vmem:[#allocation105_spill] sm:$0xff] }
 0x669   :  { %19780 = vmatpush3.bf16.msra.mxu1 %v27842_v26  ;;  %18731 = vmatprep.mubr.msk.f32.mxu1 %vm7664_vm5, %v8965_v8  ;;  %20826 = vrcp.f32 %v8519_v58  ;;  %v24810_v23 = vpop.eup %20808  ;;  %v8114_v54 = vsub.f32 %v27851_v55, %v24473_v52  ;;  %v27852_v58 = vld [vmem:[#allocation145_spill] sm:$0xff]  ;;  %v27853_v4 = vld [vmem:[#allocation67_spill] sm:$0xff]  ;;  %v8289_v18 = vmul.f32 1.442695, %v8105_v0  ;;  %v8301_v52 = vmul.f32 1.442695, %v8111_v43 }
 0x66a   :  { %27847 = vst [vmem:[#allocation51_spill] sm:$0xff] %v24810_v23  ;;  %19786 = vmatprep.subr.bf16.mxu1 %v27849_v59  ;;  %8584 = vadd.xlane.f32.xlu1 %v8583_v37  ;;  %v20811_v26 = vpop.eup %20810  ;;  %v8969_v63 = vmul.f32 %v20805_v14, %v27852_v58  ;;  %v20044_v37 = vunpack.i.h.bf16 %v27853_v4  ;;  %v20043_v51 = vunpack.i.l.bf16 %v27853_v4  ;;  %20828 = vpow2.f32 %v8291_v35  ;;  %v27854_v55 = vld [vmem:[#allocation63_spill] sm:$0xff]  ;;  %v27855_v0 = vld [vmem:[#allocation141_spill] sm:$0xff] }
 0x66b   :  { %8587 = vadd.xlane.f32.xlu0 %v8586_v9  ;;  %v24820_v8 = vpop.xlane.xlu1 %7918  ;;  %v24825_v46 = vpop.eup %20812  ;;  %20830 = vpow2.f32 %v8297_v13  ;;  %v8592_v14 = vsel %vm7664_vm5, %v24802_v57, 0.0  ;;  %v8293_v24 = vmul.f32 1.442695, %v8107_v31  ;;  %v8589_v35 = vsel %vm7664_vm5, %v24810_v23, 0.0  ;;  %v27857_v31 = vld [vmem:[#allocation110_spill] sm:$0xff] }
 0x66c   :  { %v24823_v41 = vpop.xlane.xlu0 %7912  ;;  %18732 = vmatmul.mubr.msk.f32.vlgmr.msra.gmra.mrb[112].mxu1 %vm7664_vm5, %v8966_v36  ;;  %v20815_v25 = vpop.eup %20814  ;;  %v8970_v36 = vmul.f32 %v20811_v26, %v27855_v0  ;;  %v8307_v13 = vmul.f32 1.442695, %v8114_v54  ;;  %20832 = vpow2.f32 %v8289_v18  ;;  %v19801_v34 = vpack.c.bf16 %v20044_v37, %v20043_v51  ;;  %v27859_v26 = vld [vmem:[#allocation104_spill] sm:$0xff]  ;;  %v27860_v18 = vld [vmem:[#allocation149_spill] sm:$0xff] }
 0x66d   :  { %19788 = vmatpush3.bf16.msra.mxu1 %v27849_v59  ;;  %18745 = vmatprep.mubr.msk.f32.mxu1 %vm7664_vm5, %v8969_v63  ;;  %v27856_v63 = vld [vmem:[#allocation154_spill] sm:$0xff]  ;;  %v8113_v54 = vsub.f32 %v27859_v26, %v24489_v38  ;;  %20834 = vpow2.f32 %v8301_v52  ;;  %v27861_v37 = vld [vmem:[#allocation76_spill] sm:$0xff] }
 0x66e   :  { %v20817_v9 = vpop.eup %20816  ;;  %19794 = vmatprep.subr.bf16.mxu1 %v27854_v55  ;;  %8593 = vadd.xlane.f32.xlu1 %v8592_v14  ;;  %v8112_v14 = vsub.f32 %v27857_v31, %v24475_v48  ;;  %20836 = vpow2.f32 %v8293_v24  ;;  %v20064_v38 = vunpack.i.h.bf16 %v27861_v37  ;;  %v20063_v52 = vunpack.i.l.bf16 %v27861_v37 }
 0x66f   :  { %v24838_v58 = vpop.eup %20818  ;;  %8590 = vadd.xlane.f32.xlu0 %v8589_v35  ;;  %v24840_v43 = vpop.xlane.xlu1 %7927  ;;  %v8959_v4 = vmul.f32 %v20817_v9, %v27856_v63  ;;  %v8598_v9 = vsel %vm7664_vm5, %v24825_v46, 0.0  ;;  %v8960_v35 = vmul.f32 %v20815_v25, %v27860_v18  ;;  %20838 = vpow2.f32 %v8307_v13  ;;  %v27864_v13 = vld [vmem:[#allocation113_spill] sm:$0xff] }
 0x670   :  { %v8492_v59 = vpop.xlane.xlu0 %8491  ;;  %v24843_v12 = vpop.eup %20820  ;;  %18746 = vmatmul.mubr.msk.f32.vlgmr.msra.gmra.mrb[114].mxu1 %vm7664_vm5, %v8970_v36  ;;  %v8610_v48 = vsel %vm7664_vm5, %v24838_v58, 0.0  ;;  %v8303_v24 = vmul.f32 1.442695, %v8112_v14  ;;  %v8115_v18 = vsub.f32 %v27864_v13, %v24555_v53 }
 0x671   :  { %v24848_v23 = vpop.eup %20822  ;;  %19796 = vmatpush3.bf16.msra.mxu1 %v27854_v55  ;;  %18710 = vmatprep.mubr.msk.f32.mxu0 %vm7664_vm5, %v8959_v4  ;;  %v27862_v55 = vld [vmem:[#allocation116_spill] sm:$0xff]  ;;  %20840 = vrcp.f32 %v8492_v59  ;;  %v8595_v26 = vsel %vm7664_vm5, %v24843_v12, 0.0 }
 0x672   :  { %27858 = vst [vmem:[#allocation157_spill] sm:$0xff] %v24848_v23  ;;  %v20825_v0 = vpop.eup %20824  ;;  %19802 = vmatprep.subr.bf16.mxu1 %v19801_v34  ;;  %8599 = vadd.xlane.f32.xlu1 %v8598_v9  ;;  %v8116_v36 = vsub.f32 %v27862_v55, %v24526_v15  ;;  %v27863_v4 = vld [vmem:[#allocation156_spill] sm:$0xff]  ;;  %v8305_v9 = vmul.f32 1.442695, %v8113_v54  ;;  %v27865_v15 = vld [vmem:[#allocation57_spill] sm:$0xff] }
 0x673   :  { %v20827_v51 = vpop.eup %20826  ;;  %8611 = vadd.xlane.f32.xlu0 %v8610_v48  ;;  %18711 = vmatmul.mubr.msk.f32.vlgmr.msra.gmra.mrb[128].mxu0 %vm7664_vm5, %v8960_v35  ;;  %v8489_v25 = vpop.xlane.xlu1 %8488  ;;  %v27866_v35 = vld [vmem:[#allocation151_spill] sm:$0xff] }
 0x674   :  { %v24864_v63 = vpop.xlane.xlu0 %7924  ;;  %19776 = vmatpush3.bf16.msra.mxu0 %v27824_v28  ;;  %v8973_v31 = vmul.f32 %v20827_v51, %v27863_v4  ;;  %20842 = vrcp.f32 %v8489_v25  ;;  %v8974_v48 = vmul.f32 %v20825_v0, %v27866_v35  ;;  %v24874_v37 = vpop.eup %20828  ;;  %v8616_v28 = vsel %vm7664_vm5, %v24848_v23, 0.0  ;;  %v27867_v0 = vld [vmem:[#allocation108_spill] sm:$0xff]  ;;  %v27868_v25 = vld [vmem:[#allocation109_spill] sm:$0xff] }
 0x675   :  { %19782 = vmatprep.subr.bf16.mxu0 %v27865_v15  ;;  %v24879_v59 = vpop.eup %20830  ;;  %v8311_v14 = vmul.f32 1.442695, %v8116_v36  ;;  %v24886_v51 = vpack.c.bf16 %v20064_v38, %v20063_v52  ;;  %20844 = vpow2.f32 %v8303_v24  ;;  %v8117_v55 = vsub.f32 %v27867_v0, %v24524_v22 }
 0x676   :  { %18759 = vmatprep.mubr.msk.f32.mxu1 %vm7664_vm5, %v8973_v31  ;;  %8596 = vadd.xlane.f32.xlu1 %v8595_v26  ;;  %20846 = vpow2.f32 %v8305_v9  ;;  %v8118_v4 = vsub.f32 %v27868_v25, %v24505_v5  ;;  %v8309_v31 = vmul.f32 1.442695, %v8115_v18  ;;  %v8604_v36 = vsel %vm7664_vm5, %v24874_v37, 0.0  ;;  %v24895_v26 = vpop.eup %20832  ;;  %v27870_v9 = vld [vmem:[#allocation120_spill] sm:$0xff] }
 0x677   :  { %8617 = vadd.xlane.f32.xlu0 %v8616_v28  ;;  %18760 = vmatmul.mubr.msk.f32.vlgmr.msra.gmra.mrb[116].mxu1 %vm7664_vm5, %v8974_v48  ;;  %v24882_v53 = vpop.xlane.xlu1 %7930  ;;  %v8613_v38 = vsel %vm7664_vm5, %v24879_v59, 0.0  ;;  %v24899_v52 = vpop.eup %20834  ;;  %20848 = vpow2.f32 %v8311_v14  ;;  %v8313_v5 = vmul.f32 1.442695, %v8117_v55  ;;  %v8120_v13 = vsub.f32 %v27870_v9, %v24569_v33  ;;  %v27872_v48 = vld [vmem:[#allocation118_spill] sm:$0xff] }
 0x678   :  { %v24884_v54 = vpop.xlane.xlu0 %7933  ;;  %19804 = vmatpush3.bf16.msra.mxu1 %v19801_v34  ;;  %27869 = vst [vmem:[#allocation127_spill] sm:$0xff] %v24899_v52  ;;  %v24901_v24 = vpop.eup %20836  ;;  %v8315_v35 = vmul.f32 1.442695, %v8118_v4  ;;  %20850 = vpow2.f32 %v8309_v31  ;;  %v8122_v28 = vsub.f32 %v27872_v48, %v24585_v39  ;;  %v8601_v0 = vsel %vm7664_vm5, %v24895_v26, 0.0  ;;  %v27873_v31 = vld [vmem:[#allocation134_spill] sm:$0xff] }
 0x679   :  { %19810 = vmatprep.subr.bf16.mxu1 %v24886_v51  ;;  %v24905_v18 = vpop.eup %20838  ;;  %v8619_v25 = vsel %vm7664_vm5, %v24899_v52, 0.0  ;;  %v8607_v4 = vsel %vm7664_vm5, %v24901_v24, 0.0  ;;  %v8319_v39 = vmul.f32 1.442695, %v8120_v13 }
 0x67a   :  { %8605 = vadd.xlane.f32.xlu1 %v8604_v36  ;;  %27871 = vst [vmem:[#allocation163_spill] sm:$0xff] %v24905_v18  ;;  %v8323_v48 = vmul.f32 1.442695, %v8122_v28  ;;  %v27878_v28 = vld [vmem:[#allocation71_spill] sm:$0xff] }
 0x67b   :  { %8614 = vadd.xlane.f32.xlu0 %v8613_v38  ;;  %v8501_v22 = vpop.xlane.xlu1 %8500  ;;  %v20841_v14 = vpop.eup %20840  ;;  %v8119_v38 = vsub.f32 %v27873_v31, %v24603_v16  ;;  %v27879_v31 = vld [vmem:[#allocation37_spill] sm:$0xff] }
 0x67c   :  { %v8504_v34 = vpop.xlane.xlu0 %8503  ;;  %20852 = vrcp.f32 %v8501_v22  ;;  %v27874_v22 = vld [vmem:[#allocation166_spill] sm:$0xff] }
 0x67d   :  { %20854 = vrcp.f32 %v8504_v34 }
 0x67e   :  { %8602 = vadd.xlane.f32.xlu1 %v8601_v0  ;;  %v20843_v55 = vpop.eup %20842  ;;  %20856 = vpow2.f32 %v8313_v5  ;;  %v27875_v0 = vld [vmem:[#allocation128_spill] sm:$0xff]  ;;  %v8628_v5 = vsel %vm7664_vm5, %v24905_v18, 0.0  ;;  %v27884_v18 = vld [vmem:[#allocation171_spill] sm:$0xff] }
 0x67f   :  { %8620 = vadd.xlane.f32.xlu0 %v8619_v25  ;;  %v24913_v33 = vpop.xlane.xlu1 %7945  ;;  %v8963_v9 = vmul.f32 %v20843_v55, %v27874_v22  ;;  %20858 = vpow2.f32 %v8315_v35  ;;  %v8121_v34 = vsub.f32 %v27875_v0, %v24601_v17  ;;  %v27876_v25 = vld [vmem:[#allocation162_spill] sm:$0xff]  ;;  %v24925_v23 = vpop.eup %20844  ;;  %v8317_v17 = vmul.f32 1.442695, %v8119_v38 }
 0x680   :  { %v24915_v36 = vpop.xlane.xlu0 %7939  ;;  %v8964_v52 = vmul.f32 %v20841_v14, %v27876_v25  ;;  %v24930_v13 = vpop.eup %20846  ;;  %20860 = vpow2.f32 %v8319_v39  ;;  %v8124_v14 = vsub.f32 %v27878_v28, %v24639_v50  ;;  %v8126_v22 = vsub.f32 %v27879_v31, %v24655_v44  ;;  %v27883_v31 = vld [vmem:[#allocation138_spill] sm:$0xff] }
 0x681   :  { %18724 = vmatprep.mubr.msk.f32.mxu0 %vm7664_vm5, %v8963_v9  ;;  %27877 = vst [vmem:[#allocation68_spill] sm:$0xff] %v24930_v13  ;;  %v24940_v55 = vpop.eup %20848  ;;  %20862 = vpow2.f32 %v8323_v48  ;;  %v27880_v9 = vld [vmem:[#allocation61_spill] sm:$0xff]  ;;  %v8625_v39 = vsel %vm7664_vm5, %v24930_v13, 0.0 }
 0x682   :  { %8608 = vadd.xlane.f32.xlu1 %v8607_v4  ;;  %18725 = vmatmul.mubr.msk.f32.vlgmr.msra.gmra.mrb[130].mxu0 %vm7664_vm5, %v8964_v52  ;;  %v8321_v4 = vmul.f32 1.442695, %v8121_v34  ;;  %v8622_v52 = vsel %vm7664_vm5, %v24925_v23, 0.0  ;;  %v24949_v38 = vpop.eup %20850  ;;  %20864 = vpow2.f32 %v8317_v17  ;;  %v8327_v48 = vmul.f32 1.442695, %v8124_v14  ;;  %v27882_v34 = vld [vmem:[#allocation39_spill] sm:$0xff] }
 0x683   :  { %8629 = vadd.xlane.f32.xlu0 %v8628_v5  ;;  %v24933_v16 = vpop.xlane.xlu1 %7942  ;;  %19784 = vmatpush3.bf16.msra.mxu0 %v27865_v15  ;;  %27881 = vst [vmem:[#allocation160_spill] sm:$0xff] %v24949_v38  ;;  %v8123_v44 = vsub.f32 %v27882_v34, %v24675_v11  ;;  %v8634_v25 = vsel %vm7664_vm5, %v24940_v55, 0.0  ;;  %v8331_v28 = vmul.f32 1.442695, %v8126_v22  ;;  %v8631_v17 = vsel %vm7664_vm5, %v24949_v38, 0.0  ;;  %v27886_v14 = vld [vmem:[#allocation170_spill] sm:$0xff] }
 0x684   :  { %v24935_v35 = vpop.xlane.xlu0 %7936  ;;  %19790 = vmatprep.subr.bf16.mxu0 %v27880_v9  ;;  %20866 = vpow2.f32 %v8321_v4  ;;  %v27888_v22 = vld [vmem:[#allocation136_spill] sm:$0xff] }
 0x686   :  { %8623 = vadd.xlane.f32.xlu1 %v8622_v52  ;;  %v20853_v0 = vpop.eup %20852  ;;  %v8125_v52 = vsub.f32 %v27883_v31, %v24673_v21  ;;  %v27892_v31 = vld [vmem:[#allocation65_spill] sm:$0xff] }
 0x687   :  { %8626 = vadd.xlane.f32.xlu0 %v8625_v39  ;;  %v8513_v50 = vpop.xlane.xlu1 %8512  ;;  %v20855_v5 = vpop.eup %20854  ;;  %v8967_v13 = vmul.f32 %v20853_v0, %v27884_v18  ;;  %v8325_v18 = vmul.f32 1.442695, %v8123_v44 }
 0x688   :  { %v8516_v15 = vpop.xlane.xlu0 %8515  ;;  %v24958_v39 = vpop.eup %20856  ;;  %20868 = vrcp.f32 %v8513_v50  ;;  %v8968_v11 = vmul.f32 %v20855_v5, %v27886_v14  ;;  %v8128_v50 = vsub.f32 %v27888_v22, %v24689_v56  ;;  %v8329_v0 = vmul.f32 1.442695, %v8125_v52 }
 0x689   :  { %27885 = vst [vmem:[#allocation139_spill] sm:$0xff] %v24958_v39  ;;  %v24963_v34 = vpop.eup %20858  ;;  %20870 = vrcp.f32 %v8516_v15  ;;  %18738 = vmatprep.mubr.msk.f32.mxu0 %vm7664_vm5, %v8967_v13  ;;  %v8637_v13 = vsel %vm7664_vm5, %v24958_v39, 0.0  ;;  %v27899_v39 = vld [vmem:[#allocation178_spill] sm:$0xff] }
 0x68a   :  { %8635 = vadd.xlane.f32.xlu1 %v8634_v25  ;;  %27887 = vst [vmem:[#allocation133_spill] sm:$0xff] %v24963_v34  ;;  %20872 = vpow2.f32 %v8327_v48  ;;  %18739 = vmatmul.mubr.msk.f32.vlgmr.msra.gmra.mrb[132].mxu0 %vm7664_vm5, %v8968_v11  ;;  %v27889_v25 = vld [vmem:[#allocation144_spill] sm:$0xff]  ;;  %v24978_v15 = vpop.eup %20860  ;;  %v8640_v56 = vsel %vm7664_vm5, %v24963_v34, 0.0 }
 0x68b   :  { %8632 = vadd.xlane.f32.xlu0 %v8631_v17  ;;  %v24966_v4 = vpop.xlane.xlu1 %7957  ;;  %20874 = vpow2.f32 %v8331_v28  ;;  %v8130_v5 = vsub.f32 %v27889_v25, %v24726_v1  ;;  %19792 = vmatpush3.bf16.msra.mxu0 %v27880_v9  ;;  %27890 = vst [vmem:[#allocation165_spill] sm:$0xff] %v24978_v15  ;;  %v27891_v48 = vld [vmem:[#allocation148_spill] sm:$0xff]  ;;  %v24985_v28 = vpop.eup %20862  ;;  %v27894_v1 = vld [vmem:[#allocation147_spill] sm:$0xff]  ;;  %v8335_v17 = vmul.f32 1.442695, %v8128_v50  ;;  %v8646_v11 = vsel %vm7664_vm5, %v24978_v15, 0.0 }
 0x68c   :  { %v24968_v21 = vpop.xlane.xlu0 %7951  ;;  %v8127_v44 = vsub.f32 %v27891_v48, %v24744_v10  ;;  %19798 = vmatprep.subr.bf16.mxu0 %v27892_v31  ;;  %27893 = vst [vmem:[#allocation125_spill] sm:$0xff] %v24985_v28  ;;  %v8129_v52 = vsub.f32 %v27894_v1, %v24742_v60  ;;  %20876 = vpow2.f32 %v8325_v18  ;;  %v24995_v22 = vpop.eup %20864  ;;  %v27897_v1 = vld [vmem:[#allocation152_spill] sm:$0xff] }
 0x68d   :  { %20878 = vpow2.f32 %v8329_v0  ;;  %v8339_v10 = vmul.f32 1.442695, %v8130_v5  ;;  %v8132_v15 = vsub.f32 %v27897_v1, %v24777_v32 }
 0x68e   :  { %8638 = vadd.xlane.f32.xlu1 %v8637_v13  ;;  %v8333_v25 = vmul.f32 1.442695, %v8127_v44  ;;  %v8652_v13 = vsel %vm7664_vm5, %v24985_v28, 0.0  ;;  %v24999_v60 = vpop.eup %20866  ;;  %v8337_v48 = vmul.f32 1.442695, %v8129_v52  ;;  %20880 = vpow2.f32 %v8335_v17  ;;  %v27898_v28 = vld [vmem:[#allocation155_spill] sm:$0xff] }
 0x68f   :  { %8641 = vadd.xlane.f32.xlu0 %v8640_v56  ;;  %v24989_v9 = vpop.xlane.xlu1 %7954  ;;  %27895 = vst [vmem:[#allocation35_spill] sm:$0xff] %v24999_v60  ;;  %v27896_v56 = vld [vmem:[#allocation74_spill] sm:$0xff]  ;;  %20882 = vpow2.f32 %v8339_v10  ;;  %v8134_v34 = vsub.f32 %v27898_v28, %v24796_v29  ;;  %v8649_v17 = vsel %vm7664_vm5, %v24999_v60, 0.0  ;;  %v27903_v28 = vld [vmem:[#allocation159_spill] sm:$0xff] }
 0x690   :  { %v24991_v14 = vpop.xlane.xlu0 %7948  ;;  %v20054_v0 = vunpack.i.h.bf16 %v27896_v56  ;;  %v20053_v5 = vunpack.i.l.bf16 %v27896_v56  ;;  %20884 = vpow2.f32 %v8333_v25  ;;  %v27901_v56 = vld [vmem:[#allocation177_spill] sm:$0xff]  ;;  %v8131_v10 = vsub.f32 %v27903_v28, %v24823_v41 }
 0x691   :  { %20886 = vpow2.f32 %v8337_v48 }
 0x692   :  { %8647 = vadd.xlane.f32.xlu1 %v8646_v11  ;;  %v20869_v50 = vpop.eup %20868  ;;  %v25023_v25 = vpack.c.bf16 %v20054_v0, %v20053_v5 }
 0x693   :  { %8653 = vadd.xlane.f32.xlu0 %v8652_v13  ;;  %v25001_v18 = vpop.xlane.xlu1 %7963  ;;  %v20871_v11 = vpop.eup %20870  ;;  %v8971_v52 = vmul.f32 %v20869_v50, %v27899_v39  ;;  %v8643_v13 = vsel %vm7664_vm5, %v24995_v22, 0.0  ;;  %v8343_v39 = vmul.f32 1.442695, %v8132_v15 }
 0x694   :  { %v8528_v44 = vpop.xlane.xlu0 %8527  ;;  %v25012_v38 = vpop.eup %20872  ;;  %v8972_v32 = vmul.f32 %v20871_v11, %v27901_v56  ;;  %v27904_v11 = vld [vmem:[#allocation158_spill] sm:$0xff] }
 0x695   :  { %27900 = vst [vmem:[#allocation167_spill] sm:$0xff] %v25012_v38  ;;  %v25017_v1 = vpop.eup %20874  ;;  %18752 = vmatprep.mubr.msk.f32.mxu0 %vm7664_vm5, %v8971_v52  ;;  %20888 = vrcp.f32 %v8528_v44  ;;  %v8133_v56 = vsub.f32 %v27904_v11, %v24820_v8  ;;  %v8658_v15 = vsel %vm7664_vm5, %v25012_v38, 0.0  ;;  %v8341_v8 = vmul.f32 1.442695, %v8131_v10  ;;  %v27913_v38 = vld [vmem:[#allocation79_spill] sm:$0xff] }
 0x696   :  { %8644 = vadd.xlane.f32.xlu1 %v8643_v13  ;;  %27902 = vst [vmem:[#allocation135_spill] sm:$0xff] %v25017_v1  ;;  %18753 = vmatmul.mubr.msk.f32.vlgmr.msra.gmra.mrb[134].mxu0 %vm7664_vm5, %v8972_v32  ;;  %v8347_v13 = vmul.f32 1.442695, %v8134_v34  ;;  %v25032_v48 = vpop.eup %20876  ;;  %v8664_v41 = vsel %vm7664_vm5, %v25017_v1, 0.0 }
 0x697   :  { %8650 = vadd.xlane.f32.xlu0 %v8649_v17  ;;  %v8525_v29 = vpop.xlane.xlu1 %8524  ;;  %19800 = vmatpush3.bf16.msra.mxu0 %v27892_v31  ;;  %27905 = vst [vmem:[#allocation132_spill] sm:$0xff] %v25032_v48  ;;  %v25037_v0 = vpop.eup %20878  ;;  %v27907_v31 = vld [vmem:[#allocation161_spill] sm:$0xff]  ;;  %v8345_v52 = vmul.f32 1.442695, %v8133_v56  ;;  %v27908_v17 = vld [vmem:[#allocation168_spill] sm:$0xff] }
 0x698   :  { %v25025_v50 = vpop.xlane.xlu0 %7960  ;;  %20890 = vrcp.f32 %v8525_v29  ;;  %19806 = vmatprep.subr.bf16.mxu0 %v25023_v25  ;;  %27906 = vst [vmem:[#allocation53_spill] sm:$0xff] %v25037_v0  ;;  %v8136_v5 = vsub.f32 %v27907_v31, %v24840_v43  ;;  %v8138_v32 = vsub.f32 %v27908_v17, %v24884_v54  ;;  %v8655_v29 = vsel %vm7664_vm5, %v25032_v48, 0.0  ;;  %v25049_v28 = vpop.eup %20880  ;;  %v27911_v54 = vld [vmem:[#allocation164_spill] sm:$0xff]  ;;  %v27912_v31 = vld [vmem:[#allocation169_spill] sm:$0xff] }
 0x699   :  { %20892 = vpow2.f32 %v8343_v39  ;;  %27909 = vst [vmem:[#allocation99_spill] sm:$0xff] %v25049_v28  ;;  %v8661_v39 = vsel %vm7664_vm5, %v25037_v0, 0.0  ;;  %v25053_v10 = vpop.eup %20882  ;;  %v8135_v56 = vsub.f32 %v27911_v54, %v24864_v63  ;;  %v8137_v17 = vsub.f32 %v27912_v31, %v24882_v53  ;;  %v27916_v48 = vld [vmem:[#allocation172_spill] sm:$0xff] }
 0x69a   :  { %8659 = vadd.xlane.f32.xlu1 %v8658_v15  ;;  %20894 = vpow2.f32 %v8347_v13  ;;  %27910 = vst [vmem:[#allocation95_spill] sm:$0xff] %v25053_v10  ;;  %v25057_v11 = vpop.eup %20884  ;;  %v8351_v13 = vmul.f32 1.442695, %v8136_v5  ;;  %v20074_v63 = vunpack.i.h.bf16 %v27913_v38  ;;  %v20073_v54 = vunpack.i.l.bf16 %v27913_v38 }
 0x69b   :  { %8665 = vadd.xlane.f32.xlu0 %v8664_v41  ;;  %v25039_v34 = vpop.xlane.xlu1 %7969  ;;  %20896 = vpow2.f32 %v8341_v8  ;;  %v25063_v41 = vpop.eup %20886  ;;  %v8676_v8 = vsel %vm7664_vm5, %v25053_v10, 0.0  ;;  %v8667_v53 = vsel %vm7664_vm5, %v25057_v11, 0.0  ;;  %v8142_v38 = vsub.f32 %v27916_v48, %v24913_v33 }
 0x69c   :  { %v25043_v44 = vpop.xlane.xlu0 %7966  ;;  %20898 = vpow2.f32 %v8345_v52  ;;  %v8349_v52 = vmul.f32 1.442695, %v8135_v56  ;;  %v25095_v56 = vpack.c.bf16 %v20074_v63, %v20073_v54 }
 0x69d   :  { %20900 = vpow2.f32 %v8351_v13  ;;  %v8673_v13 = vsel %vm7664_vm5, %v25063_v41, 0.0 }
 0x69e   :  { %8656 = vadd.xlane.f32.xlu1 %v8655_v29  ;;  %v8355_v29 = vmul.f32 1.442695, %v8138_v32  ;;  %v27915_v32 = vld [vmem:[#allocation173_spill] sm:$0xff] }
 0x69f   :  { %8662 = vadd.xlane.f32.xlu0 %v8661_v39  ;;  %v25055_v43 = vpop.xlane.xlu1 %7975  ;;  %v8670_v39 = vsel %vm7664_vm5, %v25049_v28, 0.0  ;;  %v20889_v1 = vpop.eup %20888  ;;  %v8140_v31 = vsub.f32 %v27915_v32, %v24915_v36  ;;  %v8353_v28 = vmul.f32 1.442695, %v8137_v17  ;;  %v8363_v17 = vmul.f32 1.442695, %v8142_v38 }
 0x6a0   :  { %v25061_v15 = vpop.xlane.xlu0 %7972  ;;  %20902 = vpow2.f32 %v8355_v29  ;;  %v27919_v29 = vld [vmem:[#allocation175_spill] sm:$0xff] }
 0x6a1   :  { %20904 = vpow2.f32 %v8349_v52  ;;  %v8359_v33 = vmul.f32 1.442695, %v8140_v31  ;;  %v27921_v31 = vld [vmem:[#allocation180_spill] sm:$0xff] }
 0x6a2   :  { %8671 = vadd.xlane.f32.xlu1 %v8670_v39  ;;  %v20891_v5 = vpop.eup %20890  ;;  %20906 = vpow2.f32 %v8353_v28  ;;  %v8146_v38 = vsub.f32 %v27921_v31, %v24966_v4 }
 0x6a3   :  { %8677 = vadd.xlane.f32.xlu0 %v8676_v8  ;;  %v25073_v0 = vpop.xlane.xlu1 %7981  ;;  %v8975_v10 = vmul.f32 %v20891_v5, %v24374_v6  ;;  %v27917_v8 = vld [vmem:[#allocation185_spill] sm:$0xff]  ;;  %v8141_v5 = vsub.f32 %v27919_v29, %v24933_v16  ;;  %20908 = vpow2.f32 %v8359_v33 }
 0x6a4   :  { %27914 = vst [vmem:[#allocation174_spill] sm:$0xff] %v25073_v0  ;;  %v25079_v39 = vpop.xlane.xlu0 %7978  ;;  %v8976_v60 = vmul.f32 %v20889_v1, %v27917_v8  ;;  %v25085_v0 = vpop.eup %20892  ;;  %v27918_v1 = vld [vmem:[#allocation176_spill] sm:$0xff]  ;;  %v27920_v16 = vld [vmem:[#allocation181_spill] sm:$0xff]  ;;  %20910 = vpow2.f32 %v8363_v17  ;;  %v27923_v17 = vld [vmem:[#allocation183_spill] sm:$0xff] }
 0x6a5   :  { %18766 = vmatprep.mubr.msk.f32.mxu0 %vm7664_vm5, %v8975_v10  ;;  %v25090_v36 = vpop.eup %20894  ;;  %v8139_v48 = vsub.f32 %v27918_v1, %v24935_v35  ;;  %v8361_v32 = vmul.f32 1.442695, %v8141_v5  ;;  %v8143_v29 = vsub.f32 %v27923_v17, %v24991_v14  ;;  %v8371_v5 = vmul.f32 1.442695, %v8146_v38  ;;  %v27926_v17 = vld [vmem:[#allocation184_spill] sm:$0xff] }
 0x6a6   :  { %8668 = vadd.xlane.f32.xlu1 %v8667_v53  ;;  %18767 = vmatmul.mubr.msk.f32.vlgmr.msra.gmra.mrb[136].mxu0 %vm7664_vm5, %v8976_v60  ;;  %v8682_v60 = vsel %vm7664_vm5, %v25085_v0, 0.0  ;;  %v25107_v63 = vpop.eup %20896  ;;  %v8688_v35 = vsel %vm7664_vm5, %v25090_v36, 0.0  ;;  %v8144_v53 = vsub.f32 %v27920_v16, %v24968_v21 }
 0x6a7   :  { %8674 = vadd.xlane.f32.xlu0 %v8673_v13  ;;  %v25093_v6 = vpop.xlane.xlu1 %7987  ;;  %19808 = vmatpush3.bf16.msra.mxu0 %v25023_v25  ;;  %v25111_v54 = vpop.eup %20898  ;;  %v8357_v28 = vmul.f32 1.442695, %v8139_v48  ;;  %v8679_v8 = vsel %vm7664_vm5, %v25107_v63, 0.0 }
 0x6a8   :  { %v25100_v10 = vpop.xlane.xlu0 %7984  ;;  %19814 = vmatprep.subr.bf16.mxu0 %v25095_v56  ;;  %v25123_v13 = vpop.eup %20900  ;;  %v8685_v33 = vsel %vm7664_vm5, %v25111_v54, 0.0  ;;  %v8367_v48 = vmul.f32 1.442695, %v8144_v53 }
 0x6a9   :  { %27922 = vst [vmem:[#allocation72_spill] sm:$0xff] %v25123_v13  ;;  %20912 = vpow2.f32 %v8357_v28  ;;  %v8694_v16 = vsel %vm7664_vm5, %v25123_v13, 0.0 }
 0x6aa   :  { %8683 = vadd.xlane.f32.xlu1 %v8682_v60  ;;  %v25127_v1 = vpop.eup %20902  ;;  %20914 = vpow2.f32 %v8361_v32  ;;  %v27924_v60 = vld [vmem:[#allocation182_spill] sm:$0xff]  ;;  %v27925_v32 = vld [vmem:[#allocation41_spill] sm:$0xff] }
 0x6ab   :  { %8689 = vadd.xlane.f32.xlu0 %v8688_v35  ;;  %v25113_v25 = vpop.xlane.xlu1 %7993  ;;  %v8145_v35 = vsub.f32 %v27924_v60, %v24989_v9  ;;  %v25139_v31 = vpop.eup %20904  ;;  %v8700_v28 = vsel %vm7664_vm5, %v25127_v1, 0.0  ;;  %20916 = vpow2.f32 %v8367_v48  ;;  %v8147_v38 = vsub.f32 %v27925_v32, %v25025_v50 }
 0x6ac   :  { %v25117_v52 = vpop.xlane.xlu0 %7990  ;;  %v25143_v53 = vpop.eup %20906  ;;  %20918 = vpow2.f32 %v8371_v5  ;;  %v8148_v60 = vsub.f32 %v27926_v17, %v25001_v18 }
 0x6ad   :  { %v8369_v9 = vmul.f32 1.442695, %v8145_v35  ;;  %v25151_v13 = vpop.eup %20908  ;;  %v8697_v48 = vsel %vm7664_vm5, %v25143_v53, 0.0  ;;  %v8373_v5 = vmul.f32 1.442695, %v8147_v38 }
 0x6ae   :  { %8680 = vadd.xlane.f32.xlu1 %v8679_v8  ;;  %v8365_v8 = vmul.f32 1.442695, %v8143_v29  ;;  %27927 = vst [vmem:[#allocation98_spill] sm:$0xff] %v25151_v13  ;;  %v25155_v29 = vpop.eup %20910  ;;  %v8375_v18 = vmul.f32 1.442695, %v8148_v60 }
 0x6af   :  { %8686 = vadd.xlane.f32.xlu0 %v8685_v33  ;;  %v25129_v21 = vpop.xlane.xlu1 %7999  ;;  %27928 = vst [vmem:[#allocation179_spill] sm:$0xff] %v25155_v29  ;;  %v8712_v32 = vsel %vm7664_vm5, %v25155_v29, 0.0 }
 0x6b0   :  { %v25133_v4 = vpop.xlane.xlu0 %7996 }
 0x6b2   :  { %8695 = vadd.xlane.f32.xlu1 %v8694_v16  ;;  %v8691_v16 = vsel %vm7664_vm5, %v25139_v31, 0.0 }
 0x6b3   :  { %8701 = vadd.xlane.f32.xlu0 %v8700_v28  ;;  %v8534_v14 = vpop.xlane.xlu1 %8533  ;;  %v8706_v28 = vsel %vm7664_vm5, %v25151_v13, 0.0 }
 0x6b4   :  { %v8531_v33 = vpop.xlane.xlu0 %8530  ;;  %20920 = vrcp.f32 %v8534_v14  ;;  %v25163_v14 = vpop.eup %20912 }
 0x6b5   :  { %20922 = vrcp.f32 %v8531_v33  ;;  %v25167_v17 = vpop.eup %20914  ;;  %v8703_v38 = vsel %vm7664_vm5, %v25163_v14, 0.0 }
 0x6b6   :  { %8692 = vadd.xlane.f32.xlu1 %v8691_v16  ;;  %20924 = vpow2.f32 %v8365_v8  ;;  %v8709_v60 = vsel %vm7664_vm5, %v25167_v17, 0.0 }
 0x6b7   :  { %8698 = vadd.xlane.f32.xlu0 %v8697_v48  ;;  %v25157_v50 = vpop.xlane.xlu1 %8005  ;;  %20926 = vpow2.f32 %v8369_v9  ;;  %v25171_v9 = vpop.eup %20916 }
 0x6b8   :  { %27929 = vst [vmem:[#allocation137_spill] sm:$0xff] %v25157_v50  ;;  %v25159_v35 = vpop.xlane.xlu0 %8002  ;;  %20928 = vpow2.f32 %v8373_v5  ;;  %27930 = vst [vmem:[#allocation101_spill] sm:$0xff] %v25171_v9  ;;  %v25175_v16 = vpop.eup %20918 }
 0x6b9   :  { %20930 = vpow2.f32 %v8375_v18  ;;  %27931 = vst [vmem:[#allocation142_spill] sm:$0xff] %v25175_v16 }
 0x6ba   :  { %8707 = vadd.xlane.f32.xlu1 %v8706_v28 }
 0x6bb   :  { %8713 = vadd.xlane.f32.xlu0 %v8712_v32  ;;  %v8537_v33 = vpop.xlane.xlu1 %8536  ;;  %v27934_v32 = vld [vmem:[#allocation80_spill] sm:$0xff] }
 0x6bc   :  { %v8540_v8 = vpop.xlane.xlu0 %8539  ;;  %20932 = vrcp.f32 %v8537_v33  ;;  %v20084_v29 = vunpack.i.h.bf16 %v27934_v32  ;;  %v20083_v13 = vunpack.i.l.bf16 %v27934_v32  ;;  %v8718_v33 = vsel %vm7664_vm5, %v25171_v9, 0.0 }
 0x6bd   :  { %20934 = vrcp.f32 %v8540_v8 }
 0x6be   :  { %8704 = vadd.xlane.f32.xlu1 %v8703_v38  ;;  %v20921_v28 = vpop.eup %20920  ;;  %v19817_v9 = vpack.c.bf16 %v20084_v29, %v20083_v13  ;;  %v27939_v29 = vld [vmem:[#allocation82_spill] sm:$0xff] }
 0x6bf   :  { %8710 = vadd.xlane.f32.xlu0 %v8709_v60  ;;  %v25177_v48 = vpop.xlane.xlu1 %8011  ;;  %v20923_v18 = vpop.eup %20922  ;;  %v8978_v38 = vmul.f32 %v20921_v28, %v24493_v7  ;;  %v8724_v60 = vsel %vm7664_vm5, %v25175_v16, 0.0 }
 0x6c0   :  { %27932 = vst [vmem:[#allocation140_spill] sm:$0xff] %v25177_v48  ;;  %v25179_v5 = vpop.xlane.xlu0 %8008  ;;  %v25186_v50 = vpop.eup %20924  ;;  %v8977_v8 = vmul.f32 %v20923_v18, %v24503_v30 }
 0x6c1   :  { %27933 = vst [vmem:[#allocation66_spill] sm:$0xff] %v25179_v5  ;;  %v25191_v48 = vpop.eup %20926  ;;  %v8715_v7 = vsel %vm7664_vm5, %v25186_v50, 0.0 }
 0x6c2   :  { %8719 = vadd.xlane.f32.xlu1 %v8718_v33  ;;  %27935 = vst [vmem:[#allocation97_spill] sm:$0xff] %v25191_v48  ;;  %18773 = vmatprep.mubr.msk.f32.mxu1 %vm7664_vm5, %v8977_v8  ;;  %v25197_v28 = vpop.eup %20928  ;;  %v8721_v30 = vsel %vm7664_vm5, %v25191_v48, 0.0  ;;  %v20093_v8 = vunpack.i.l.bf16 %v27939_v29 }
 0x6c3   :  { %8725 = vadd.xlane.f32.xlu0 %v8724_v60  ;;  %v8546_v5 = vpop.xlane.xlu1 %8545  ;;  %18774 = vmatmul.mubr.msk.f32.vlgmr.msra.gmra.mrb[118].mxu1 %vm7664_vm5, %v8978_v38  ;;  %27936 = vst [vmem:[#allocation106_spill] sm:$0xff] %v25197_v28  ;;  %v25202_v18 = vpop.eup %20930  ;;  %v20094_v38 = vunpack.i.h.bf16 %v27939_v29 }
 0x6c4   :  { %v8543_v32 = vpop.xlane.xlu0 %8542  ;;  %19812 = vmatpush3.bf16.msra.mxu1 %v24886_v51  ;;  %20936 = vrcp.f32 %v8546_v5  ;;  %27937 = vst [vmem:[#allocation55_spill] sm:$0xff] %v25202_v18 }
 0x6c5   :  { %20938 = vrcp.f32 %v8543_v32  ;;  %19818 = vmatprep.subr.bf16.mxu1 %v19817_v9  ;;  %v8730_v32 = vsel %vm7664_vm5, %v25202_v18, 0.0 }
 0x6c6   :  { %8716 = vadd.xlane.f32.xlu1 %v8715_v7  ;;  %v20933_v13 = vpop.eup %20932  ;;  %v8727_v7 = vsel %vm7664_vm5, %v25197_v28, 0.0 }
 0x6c7   :  { %8722 = vadd.xlane.f32.xlu0 %v8721_v30  ;;  %v25204_v33 = vpop.xlane.xlu1 %8017  ;;  %v20935_v51 = vpop.eup %20934  ;;  %v8979_v5 = vmul.f32 %v20933_v13, %v24535_v19 }
 0x6c8   :  { %27938 = vst [vmem:[#allocation124_spill] sm:$0xff] %v25204_v33  ;;  %v25208_v60 = vpop.xlane.xlu0 %8014  ;;  %v8980_v30 = vmul.f32 %v20935_v51, %v24539_v49  ;;  %v19821_v33 = vpack.c.bf16 %v20094_v38, %v20093_v8  ;;  %v27943_v49 = vld [vmem:[#allocation83_spill] sm:$0xff] }
 0x6c9   :  { %27940 = vst [vmem:[#allocation131_spill] sm:$0xff] %v25208_v60  ;;  %18780 = vmatprep.mubr.msk.f32.mxu0 %vm7664_vm5, %v8979_v5  ;;  %v20104_v51 = vunpack.i.h.bf16 %v27943_v49  ;;  %v20103_v5 = vunpack.i.l.bf16 %v27943_v49 }
 0x6ca   :  { %8728 = vadd.xlane.f32.xlu1 %v8727_v7  ;;  %18781 = vmatmul.mubr.msk.f32.vlgmr.msra.gmra.mrb[138].mxu0 %vm7664_vm5, %v8980_v30  ;;  %v27944_v30 = vld [vmem:[#allocation112_spill] sm:$0xff] }
 0x6cb   :  { %8731 = vadd.xlane.f32.xlu0 %v8730_v32  ;;  %v8549_v16 = vpop.xlane.xlu1 %8548  ;;  %19816 = vmatpush3.bf16.msra.mxu0 %v25095_v56 }
 0x6cc   :  { %v8552_v29 = vpop.xlane.xlu0 %8551  ;;  %20940 = vrcp.f32 %v8549_v16  ;;  %19822 = vmatprep.subr.bf16.mxu0 %v19821_v33  ;;  %v19825_v16 = vpack.c.bf16 %v20104_v51, %v20103_v5  ;;  %v27950_v51 = vld [vmem:[#allocation146_spill] sm:$0xff] }
 0x6cd   :  { %20942 = vrcp.f32 %v8552_v29 }
 0x6ce   :  { %v20937_v13 = vpop.eup %20936 }
 0x6cf   :  { %v25219_v19 = vpop.xlane.xlu1 %8023  ;;  %v20939_v7 = vpop.eup %20938  ;;  %v8982_v32 = vmul.f32 %v20937_v13, %v24563_v47  ;;  %v27948_v13 = vld [vmem:[#allocation86_spill] sm:$0xff] }
 0x6d0   :  { %27941 = vst [vmem:[#allocation102_spill] sm:$0xff] %v25219_v19  ;;  %v25221_v18 = vpop.xlane.xlu0 %8020  ;;  %v8981_v28 = vmul.f32 %v20939_v7, %v27944_v30  ;;  %v20114_v7 = vunpack.i.h.bf16 %v27948_v13  ;;  %v20113_v30 = vunpack.i.l.bf16 %v27948_v13  ;;  %v27949_v19 = vld [vmem:[#allocation121_spill] sm:$0xff] }
 0x6d1   :  { %27942 = vst [vmem:[#allocation111_spill] sm:$0xff] %v25221_v18 }
 0x6d2   :  { %18787 = vmatprep.mubr.msk.f32.mxu1 %vm7664_vm5, %v8981_v28 }
 0x6d3   :  { %v8558_v38 = vpop.xlane.xlu1 %8557  ;;  %18788 = vmatmul.mubr.msk.f32.vlgmr.msra.gmra.mrb[120].mxu1 %vm7664_vm5, %v8982_v32 }
 0x6d4   :  { %v8555_v56 = vpop.xlane.xlu0 %8554  ;;  %v25229_v8 = vpop.f32.mrb[120].mxu0  ;;  %19820 = vmatpush3.bf16.msra.mxu1 %v19817_v9  ;;  %20944 = vrcp.f32 %v8558_v38  ;;  %v27952_v38 = vld [vmem:[#allocation48_spill] sm:$0xff] }
 0x6d5   :  { %27945 = vst [vmem:[#allocation103_spill] sm:$0xff] %v25229_v8  ;;  %v25231_v29 = vpop.f32.mrb[121].mxu0  ;;  %20946 = vrcp.f32 %v8555_v56  ;;  %19826 = vmatprep.subr.bf16.mxu1 %v19825_v16  ;;  %v19829_v8 = vpack.c.bf16 %v20114_v7, %v20113_v30 }
 0x6d6   :  { %27946 = vst [vmem:[#allocation59_spill] sm:$0xff] %v25231_v29  ;;  %v20941_v47 = vpop.eup %20940 }
 0x6d7   :  { %v25233_v49 = vpop.xlane.xlu1 %8029  ;;  %v20943_v18 = vpop.eup %20942  ;;  %v8983_v32 = vmul.f32 %v20941_v47, %v27949_v19 }
 0x6d8   :  { %27947 = vst [vmem:[#allocation126_spill] sm:$0xff] %v25233_v49  ;;  %v8564_v28 = vpop.xlane.xlu0 %8563  ;;  %v8984_v5 = vmul.f32 %v20943_v18, %v27950_v51  ;;  %v27955_v18 = vld [vmem:[#allocation87_spill] sm:$0xff]  ;;  %v27956_v51 = vld [vmem:[#allocation50_spill] sm:$0xff] }
 0x6d9   :  { %18794 = vmatprep.mubr.msk.f32.mxu0 %vm7664_vm5, %v8983_v32  ;;  %v20119_v47 = vunpack.i.h.bf16 %v27955_v18  ;;  %v20118_v32 = vunpack.i.l.bf16 %v27955_v18  ;;  %20948 = vrcp.f32 %v8564_v28 }
 0x6da   :  { %18795 = vmatmul.mubr.msk.f32.vlgmr.msra.gmra.mrb[140].mxu0 %vm7664_vm5, %v8984_v5 }
 0x6db   :  { %v25240_v9 = vpop.xlane.xlu1 %8026  ;;  %20476 = vrot.lane.b32.xlu1 %v27952_v38, %s21244_s5  ;;  %19824 = vmatpush3.bf16.msra.mxu0 %v19821_v33  ;;  %v27957_v38 = vld [vmem:[#allocation119_spill] sm:$0xff] }
 0x6dc   :  { %27951 = vst [vmem:[#allocation105_spill] sm:$0xff] %v25240_v9  ;;  %v25245_v56 = vpop.xlane.xlu0 %8035  ;;  %19830 = vmatprep.subr.bf16.mxu0 %v19829_v8 }
 0x6dd   :  { %27953 = vst [vmem:[#allocation145_spill] sm:$0xff] %v25245_v56  ;;  %v27958_v56 = vld [vmem:[#allocation69_spill] sm:$0xff] }
 0x6de   :  { %v20945_v29 = vpop.eup %20944 }
 0x6df   :  { %v8561_v13 = vpop.xlane.xlu1 %8560  ;;  %v20947_v19 = vpop.eup %20946  ;;  %v8986_v5 = vmul.f32 %v20945_v29, %v27957_v38  ;;  %v27963_v38 = vld [vmem:[#allocation187_spill] sm:$0xff] }
 0x6e0   :  { %v25247_v49 = vpop.xlane.xlu0 %8032  ;;  %20950 = vrcp.f32 %v8561_v13  ;;  %v8985_v7 = vmul.f32 %v20947_v19, %v27958_v56  ;;  %v8149_v56 = vsub.f32 %v27963_v38, %v25043_v44  ;;  %v27964_v13 = vld [vmem:[#allocation186_spill] sm:$0xff]  ;;  %v27967_v38 = vld [vmem:[#allocation89_spill] sm:$0xff] }
 0x6e1   :  { %27954 = vst [vmem:[#allocation67_spill] sm:$0xff] %v25247_v49  ;;  %20481 = vrot.lane.b32.xlu0 %v27956_v51, %s21244_s5  ;;  %v19833_v49 = vpack.c.bf16 %v20119_v47, %v20118_v32  ;;  %v8150_v19 = vsub.f32 %v27964_v13, %v25039_v34  ;;  %v20129_v13 = vunpack.i.h.bf16 %v27967_v38  ;;  %v20128_v48 = vunpack.i.l.bf16 %v27967_v38 }
 0x6e2   :  { %18801 = vmatprep.mubr.msk.f32.mxu1 %vm7664_vm5, %v8985_v7 }
 0x6e3   :  { %v8570_v33 = vpop.xlane.xlu1 %8569  ;;  %18802 = vmatmul.mubr.msk.f32.vlgmr.msra.gmra.mrb[122].mxu1 %vm7664_vm5, %v8986_v5  ;;  %v20949_v7 = vpop.eup %20948  ;;  %v8379_v9 = vmul.f32 1.442695, %v8150_v19 }
 0x6e4   :  { %20952 = vrcp.f32 %v8570_v33  ;;  %v8567_v30 = vpop.xlane.xlu0 %8566  ;;  %19828 = vmatpush3.bf16.msra.mxu1 %v19825_v16  ;;  %v27965_v16 = vld [vmem:[#allocation88_spill] sm:$0xff] }
 0x6e5   :  { %20954 = vrcp.f32 %v8567_v30  ;;  %v25257_v18 = vpop.f32.mrb[122].mxu0  ;;  %19834 = vmatprep.subr.bf16.mxu1 %v19833_v49  ;;  %v20124_v32 = vunpack.i.h.bf16 %v27965_v16  ;;  %v20123_v33 = vunpack.i.l.bf16 %v27965_v16 }
 0x6e6   :  { %27959 = vst [vmem:[#allocation63_spill] sm:$0xff] %v25257_v18  ;;  %v25259_v28 = vpop.f32.mrb[123].mxu0  ;;  %v8377_v18 = vmul.f32 1.442695, %v8149_v56 }
 0x6e7   :  { %27960 = vst [vmem:[#allocation141_spill] sm:$0xff] %v25259_v28  ;;  %v25261_v51 = vpop.xlane.xlu1 %8038 }
 0x6e8   :  { %27961 = vst [vmem:[#allocation154_spill] sm:$0xff] %v25261_v51  ;;  %v25263_v29 = vpop.xlane.xlu0 %8041 }
 0x6e9   :  { %27962 = vst [vmem:[#allocation110_spill] sm:$0xff] %v25263_v29  ;;  %v27966_v29 = vld [vmem:[#allocation114_spill] sm:$0xff] }
 0x6ea   :  { %v20951_v47 = vpop.eup %20950  ;;  %v8988_v60 = vmul.f32 %v20949_v7, %v27966_v29 }
 0x6eb   :  { %v8573_v5 = vpop.xlane.xlu1 %8572  ;;  %v8987_v28 = vmul.f32 %v20951_v47, %v24677_v62  ;;  %v19837_v62 = vpack.c.bf16 %v20124_v32, %v20123_v33 }
 0x6ec   :  { %v8576_v30 = vpop.xlane.xlu0 %8575  ;;  %20956 = vrcp.f32 %v8573_v5  ;;  %v19841_v5 = vpack.c.bf16 %v20129_v13, %v20128_v48 }
 0x6ed   :  { %20958 = vrcp.f32 %v8576_v30  ;;  %18808 = vmatprep.mubr.msk.f32.mxu0 %vm7664_vm5, %v8987_v28 }
 0x6ee   :  { %v20953_v51 = vpop.eup %20952  ;;  %18809 = vmatmul.mubr.msk.f32.vlgmr.msra.gmra.mrb[142].mxu0 %vm7664_vm5, %v8988_v60  ;;  %20960 = vpow2.f32 %v8377_v18 }
 0x6ef   :  { %v25274_v34 = vpop.xlane.xlu1 %8044  ;;  %v20955_v44 = vpop.eup %20954  ;;  %v8990_v19 = vmul.f32 %v20953_v51, %v24698_v2  ;;  %19832 = vmatpush3.bf16.msra.mxu0 %v19829_v8  ;;  %20962 = vpow2.f32 %v8379_v9  ;;  %v27968_v2 = vld [vmem:[#allocation90_spill] sm:$0xff] }
 0x6f0   :  { %v25279_v56 = vpop.xlane.xlu0 %8047  ;;  %v8989_v29 = vmul.f32 %v20955_v44, %v24703_v61  ;;  %19838 = vmatprep.subr.bf16.mxu0 %v19837_v62  ;;  %v20134_v51 = vunpack.i.h.bf16 %v27968_v2  ;;  %v20133_v8 = vunpack.i.l.bf16 %v27968_v2 }
 0x6f2   :  { %18815 = vmatprep.mubr.msk.f32.mxu1 %vm7664_vm5, %v8989_v29  ;;  %v19845_v38 = vpack.c.bf16 %v20134_v51, %v20133_v8  ;;  %v27972_v51 = vld [vmem:[#allocation92_spill] sm:$0xff] }
 0x6f3   :  { %v8582_v28 = vpop.xlane.xlu1 %8581  ;;  %18816 = vmatmul.mubr.msk.f32.vlgmr.msra.gmra.mrb[124].mxu1 %vm7664_vm5, %v8990_v19  ;;  %v20144_v8 = vunpack.i.h.bf16 %v27972_v51 }
 0x6f4   :  { %v8579_v7 = vpop.xlane.xlu0 %8578  ;;  %19836 = vmatpush3.bf16.msra.mxu1 %v19833_v49  ;;  %20964 = vrcp.f32 %v8582_v28 }
 0x6f5   :  { %19842 = vmatprep.subr.bf16.mxu1 %v19841_v5  ;;  %20966 = vrcp.f32 %v8579_v7  ;;  %v27971_v7 = vld [vmem:[#allocation91_spill] sm:$0xff] }
 0x6f6   :  { %v20957_v47 = vpop.eup %20956 }
 0x6f7   :  { %v8585_v60 = vpop.xlane.xlu1 %8584  ;;  %v20959_v9 = vpop.eup %20958  ;;  %v8991_v16 = vmul.f32 %v20957_v47, %v24735_v27  ;;  %v20138_v47 = vunpack.i.l.bf16 %v27971_v7 }
 0x6f8   :  { %20968 = vrcp.f32 %v8585_v60  ;;  %v8588_v61 = vpop.xlane.xlu0 %8587  ;;  %v8992_v48 = vmul.f32 %v20959_v9, %v24730_v45  ;;  %v25293_v49 = vpop.eup %20960  ;;  %v20139_v60 = vunpack.i.h.bf16 %v27971_v7 }
 0x6f9   :  { %20970 = vrcp.f32 %v8588_v61  ;;  %v25287_v18 = vpop.f32.mrb[104].mxu1  ;;  %18822 = vmatprep.mubr.msk.f32.mxu0 %vm7664_vm5, %v8991_v16  ;;  %v25296_v30 = vpop.eup %20962  ;;  %v8733_v27 = vsel %vm7664_vm5, %v25293_v49, 0.0  ;;  %v20143_v61 = vunpack.i.l.bf16 %v27972_v51 }
 0x6fa   :  { %27969 = vst [vmem:[#allocation104_spill] sm:$0xff] %v25287_v18  ;;  %v25290_v32 = vpop.f32.mrb[105].mxu1  ;;  %18823 = vmatmul.mubr.msk.f32.vlgmr.msra.gmra.mrb[144].mxu0 %vm7664_vm5, %v8992_v48  ;;  %v8736_v45 = vsel %vm7664_vm5, %v25296_v30, 0.0 }
 0x6fb   :  { %27970 = vst [vmem:[#allocation149_spill] sm:$0xff] %v25290_v32  ;;  %v8594_v33 = vpop.xlane.xlu1 %8593  ;;  %19840 = vmatpush3.bf16.msra.mxu0 %v19837_v62 }
 0x6fc   :  { %20972 = vrcp.f32 %v8594_v33  ;;  %v8591_v44 = vpop.xlane.xlu0 %8590  ;;  %19846 = vmatprep.subr.bf16.mxu0 %v19845_v38 }
 0x6fd   :  { %20974 = vrcp.f32 %v8591_v44 }
 0x6fe   :  { %v20965_v19 = vpop.eup %20964 }
 0x6ff   :  { %v8600_v13 = vpop.xlane.xlu1 %8599  ;;  %8734 = vadd.xlane.f32.xlu1 %v8733_v27  ;;  %v20967_v28 = vpop.eup %20966  ;;  %v8994_v62 = vmul.f32 %v20965_v19, %v24765_v3  ;;  %v19849_v3 = vpack.c.bf16 %v20139_v60, %v20138_v47  ;;  %v27973_v19 = vld [vmem:[#allocation93_spill] sm:$0xff]  ;;  %v27974_v60 = vld [vmem:[#allocation51_spill] sm:$0xff] }
 0x700   :  { %8737 = vadd.xlane.f32.xlu0 %v8736_v45  ;;  %v8612_v29 = vpop.xlane.xlu0 %8611  ;;  %v8993_v9 = vmul.f32 %v20967_v28, %v24770_v40  ;;  %20976 = vrcp.f32 %v8600_v13  ;;  %v19853_v40 = vpack.c.bf16 %v20144_v8, %v20143_v61  ;;  %v20149_v28 = vunpack.i.h.bf16 %v27973_v19  ;;  %v27975_v61 = vld [vmem:[#allocation94_spill] sm:$0xff] }
 0x702   :  { %v20969_v2 = vpop.eup %20968  ;;  %18829 = vmatprep.mubr.msk.f32.mxu1 %vm7664_vm5, %v8993_v9  ;;  %v20153_v9 = vunpack.i.l.bf16 %v27975_v61 }
 0x703   :  { %v20971_v16 = vpop.eup %20970  ;;  %v8597_v48 = vpop.xlane.xlu1 %8596  ;;  %v8995_v33 = vmul.f32 %v20969_v2, %v24790_v42  ;;  %18830 = vmatmul.mubr.msk.f32.vlgmr.msra.gmra.mrb[126].mxu1 %vm7664_vm5, %v8994_v62  ;;  %v20148_v42 = vunpack.i.l.bf16 %v27973_v19 }
 0x704   :  { %20978 = vrcp.f32 %v8597_v48  ;;  %v8618_v44 = vpop.xlane.xlu0 %8617  ;;  %v8996_v27 = vmul.f32 %v20971_v16, %v24782_v20  ;;  %19844 = vmatpush3.bf16.msra.mxu1 %v19841_v5 }
 0x705   :  { %18836 = vmatprep.mubr.msk.f32.mxu0 %vm7664_vm5, %v8995_v33  ;;  %19850 = vmatprep.subr.bf16.mxu1 %v19849_v3  ;;  %v19857_v62 = vpack.c.bf16 %v20149_v28, %v20148_v42 }
 0x706   :  { %v20973_v45 = vpop.eup %20972  ;;  %18837 = vmatmul.mubr.msk.f32.vlgmr.msra.gmra.mrb[146].mxu0 %vm7664_vm5, %v8996_v27 }
 0x707   :  { %v20975_v13 = vpop.eup %20974  ;;  %19848 = vmatpush3.bf16.msra.mxu0 %v19845_v38  ;;  %v8606_v7 = vpop.xlane.xlu1 %8605  ;;  %v8998_v20 = vmul.f32 %v20973_v45, %v24802_v57  ;;  %v20154_v57 = vunpack.i.h.bf16 %v27975_v61 }
 0x708   :  { %v8615_v2 = vpop.xlane.xlu0 %8614  ;;  %19854 = vmatprep.subr.bf16.mxu0 %v19853_v40  ;;  %v8997_v47 = vmul.f32 %v20975_v13, %v27974_v60  ;;  %20980 = vrcp.f32 %v8606_v7  ;;  %v27979_v7 = vld [vmem:[#allocation70_spill] sm:$0xff] }
 0x709   :  { %20982 = vrcp.f32 %v8615_v2  ;;  %v27981_v60 = vld [vmem:[#allocation54_spill] sm:$0xff] }
 0x70a   :  { %18843 = vmatprep.mubr.msk.f32.mxu1 %vm7664_vm5, %v8997_v47  ;;  %v20977_v8 = vpop.eup %20976 }
 0x70b   :  { %18844 = vmatmul.mubr.msk.f32.vlgmr.msra.gmra.mrb[128].mxu1 %vm7664_vm5, %v8998_v20  ;;  %v8603_v5 = vpop.xlane.xlu1 %8602  ;;  %v9000_v45 = vmul.f32 %v20977_v8, %v24825_v46  ;;  %v20049_v46 = vunpack.i.h.bf16 %v27979_v7  ;;  %v20048_v20 = vunpack.i.l.bf16 %v27979_v7 }
 0x70c   :  { %19852 = vmatpush3.bf16.msra.mxu1 %v19849_v3  ;;  %20984 = vrcp.f32 %v8603_v5  ;;  %v8621_v51 = vpop.xlane.xlu0 %8620  ;;  %v27977_v3 = vld [vmem:[#allocation52_spill] sm:$0xff] }
 0x70d   :  { %19858 = vmatprep.subr.bf16.mxu1 %v19857_v62  ;;  %20986 = vrcp.f32 %v8612_v29  ;;  %v19861_v29 = vpack.c.bf16 %v20154_v57, %v20153_v9  ;;  %v27983_v57 = vld [vmem:[#allocation73_spill] sm:$0xff] }
 0x70e   :  { %v20979_v38 = vpop.eup %20978  ;;  %20988 = vrcp.f32 %v8618_v44  ;;  %v25324_v33 = vpop.f32.mrb[124].mxu0  ;;  %v20059_v9 = vunpack.i.h.bf16 %v27983_v57 }
 0x70f   :  { %v8609_v16 = vpop.xlane.xlu1 %8608  ;;  %v8999_v48 = vmul.f32 %v20979_v38, %v24843_v12  ;;  %27976 = vst [vmem:[#allocation76_spill] sm:$0xff] %v25324_v33  ;;  %v25329_v13 = vpop.f32.mrb[125].mxu0 }
 0x710   :  { %20990 = vrcp.f32 %v8609_v16  ;;  %v8630_v27 = vpop.xlane.xlu0 %8629  ;;  %20486 = vrot.lane.b32.xlu1 %v27977_v3, %s21244_s5  ;;  %27978 = vst [vmem:[#allocation116_spill] sm:$0xff] %v25329_v13  ;;  %v20058_v16 = vunpack.i.l.bf16 %v27983_v57 }
 0x711   :  { %20992 = vrcp.f32 %v8621_v51  ;;  %18850 = vmatprep.mubr.msk.f32.mxu0 %vm7664_vm5, %v8999_v48 }
 0x712   :  { %18851 = vmatmul.mubr.msk.f32.vlgmr.msra.gmra.mrb[148].mxu0 %vm7664_vm5, %v9000_v45  ;;  %20994 = vrcp.f32 %v8630_v27  ;;  %v20981_v44 = vpop.eup %20980  ;;  %v27984_v45 = vld [vmem:[#allocation77_spill] sm:$0xff] }
 0x713   :  { %19856 = vmatpush3.bf16.msra.mxu0 %v19853_v40  ;;  %v8624_v12 = vpop.xlane.xlu1 %8623  ;;  %v20983_v28 = vpop.eup %20982  ;;  %v9002_v38 = vmul.f32 %v20981_v44, %v24874_v37 }
 0x714   :  { %20996 = vrcp.f32 %v8624_v12  ;;  %v8627_v19 = vpop.xlane.xlu0 %8626  ;;  %19862 = vmatprep.subr.bf16.mxu0 %v19861_v29  ;;  %v9005_v48 = vmul.f32 %v20983_v28, %v24879_v59  ;;  %v20069_v12 = vunpack.i.h.bf16 %v27984_v45  ;;  %v27985_v28 = vld [vmem:[#allocation157_spill] sm:$0xff] }
 0x715   :  { %20998 = vrcp.f32 %v8627_v19  ;;  %v25335_v2 = vpop.f32.mrb[106].mxu1  ;;  %v19865_v19 = vpack.c.bf16 %v20049_v46, %v20048_v20  ;;  %v27987_v20 = vld [vmem:[#allocation189_spill] sm:$0xff] }
 0x716   :  { %v20985_v42 = vpop.eup %20984  ;;  %27980 = vst [vmem:[#allocation156_spill] sm:$0xff] %v25335_v2  ;;  %20491 = vrot.lane.b32.xlu0 %v27981_v60, %s21244_s5  ;;  %v25339_v47 = vpop.f32.mrb[107].mxu1 }
 0x717   :  { %27982 = vst [vmem:[#allocation113_spill] sm:$0xff] %v25339_v47  ;;  %v8636_v40 = vpop.xlane.xlu1 %8635  ;;  %v9001_v5 = vmul.f32 %v20985_v42, %v24895_v26  ;;  %v20987_v51 = vpop.eup %20986  ;;  %v20068_v26 = vunpack.i.l.bf16 %v27984_v45 }
 0x718   :  { %21000 = vrcp.f32 %v8636_v40  ;;  %v8633_v8 = vpop.xlane.xlu0 %8632  ;;  %v20989_v61 = vpop.eup %20988  ;;  %v9004_v59 = vmul.f32 %v20987_v51, %v24838_v58  ;;  %v27988_v58 = vld [vmem:[#allocation127_spill] sm:$0xff] }
 0x719   :  { %21002 = vrcp.f32 %v8633_v8  ;;  %18857 = vmatprep.mubr.msk.f32.mxu1 %vm7664_vm5, %v9001_v5  ;;  %v9006_v40 = vmul.f32 %v20989_v61, %v27985_v28  ;;  %v27986_v8 = vld [vmem:[#allocation78_spill] sm:$0xff]  ;;  %v19873_v61 = vpack.c.bf16 %v20069_v12, %v20068_v26  ;;  %v27992_v12 = vld [vmem:[#allocation163_spill] sm:$0xff] }
 0x71a   :  { %v20991_v27 = vpop.eup %20990  ;;  %18858 = vmatmul.mubr.msk.f32.vlgmr.msra.gmra.mrb[130].mxu1 %vm7664_vm5, %v9002_v38  ;;  %v20079_v57 = vunpack.i.h.bf16 %v27986_v8  ;;  %v20078_v38 = vunpack.i.l.bf16 %v27986_v8  ;;  %v27993_v8 = vld [vmem:[#allocation84_spill] sm:$0xff] }
 0x71b   :  { %v20993_v42 = vpop.eup %20992  ;;  %19860 = vmatpush3.bf16.msra.mxu1 %v19857_v62  ;;  %v8639_v37 = vpop.xlane.xlu1 %8638  ;;  %18871 = vmatprep.mubr.msk.f32.mxu1 %vm7664_vm5, %v9005_v48  ;;  %v9003_v44 = vmul.f32 %v20991_v27, %v24901_v24  ;;  %v19869_v62 = vpack.c.bf16 %v20059_v9, %v20058_v16  ;;  %v8151_v24 = vsub.f32 %v27987_v20, %v25061_v15  ;;  %v27989_v27 = vld [vmem:[#allocation81_spill] sm:$0xff]  ;;  %v20099_v20 = vunpack.i.h.bf16 %v27993_v8 }
 0x71c   :  { %21004 = vrcp.f32 %v8639_v37  ;;  %v8642_v7 = vpop.xlane.xlu0 %8641  ;;  %19866 = vmatprep.subr.bf16.mxu1 %v19865_v19  ;;  %v20995_v5 = vpop.eup %20994  ;;  %v9007_v51 = vmul.f32 %v20993_v42, %v27988_v58  ;;  %v20089_v45 = vunpack.i.h.bf16 %v27989_v27  ;;  %v20088_v37 = vunpack.i.l.bf16 %v27989_v27  ;;  %v27996_v27 = vld [vmem:[#allocation85_spill] sm:$0xff] }
 0x71d   :  { %21006 = vrcp.f32 %v8642_v7  ;;  %18864 = vmatprep.mubr.msk.f32.mxu0 %vm7664_vm5, %v9003_v44  ;;  %v27990_v7 = vld [vmem:[#allocation188_spill] sm:$0xff]  ;;  %v9010_v26 = vmul.f32 %v20995_v5, %v27992_v12  ;;  %v19877_v28 = vpack.c.bf16 %v20079_v57, %v20078_v38 }
 0x71e   :  { %v20997_v46 = vpop.eup %20996  ;;  %18865 = vmatmul.mubr.msk.f32.vlgmr.msra.gmra.mrb[150].mxu0 %vm7664_vm5, %v9004_v59  ;;  %18872 = vmatmul.mubr.msk.f32.vlgmr.msra.gmra.mrb[132].mxu1 %vm7664_vm5, %v9006_v40  ;;  %v8152_v44 = vsub.f32 %v27990_v7, %v25055_v43  ;;  %v27991_v59 = vld [vmem:[#allocation68_spill] sm:$0xff]  ;;  %v20098_v43 = vunpack.i.l.bf16 %v27993_v8  ;;  %v19881_v5 = vpack.c.bf16 %v20089_v45, %v20088_v37  ;;  %v20109_v7 = vunpack.i.h.bf16 %v27996_v27  ;;  %v27998_v37 = vld [vmem:[#allocation139_spill] sm:$0xff] }
 0x71f   :  { %v20999_v48 = vpop.eup %20998  ;;  %19864 = vmatpush3.bf16.msra.mxu0 %v19861_v29  ;;  %19868 = vmatpush3.bf16.msra.mxu1 %v19865_v19  ;;  %v8648_v9 = vpop.xlane.xlu1 %8647  ;;  %v9008_v15 = vmul.f32 %v20997_v46, %v24925_v23  ;;  %v8381_v29 = vmul.f32 1.442695, %v8151_v24  ;;  %v27994_v24 = vld [vmem:[#allocation160_spill] sm:$0xff] }
 0x720   :  { %v8654_v16 = vpop.xlane.xlu0 %8653  ;;  %18878 = vmatprep.mubr.msk.f32.mxu0 %vm7664_vm5, %v9007_v51  ;;  %19870 = vmatprep.subr.bf16.mxu0 %v19869_v62  ;;  %v9009_v42 = vmul.f32 %v20999_v48, %v27991_v59  ;;  %21008 = vrcp.f32 %v8648_v9  ;;  %v8383_v19 = vmul.f32 1.442695, %v8152_v44  ;;  %v20108_v44 = vunpack.i.l.bf16 %v27996_v27 }
 0x721   :  { %19874 = vmatprep.subr.bf16.mxu1 %v19873_v61  ;;  %21010 = vrcp.f32 %v8654_v16  ;;  %v19885_v45 = vpack.c.bf16 %v20099_v20, %v20098_v43  ;;  %v27999_v16 = vld [vmem:[#allocation133_spill] sm:$0xff] }
 0x722   :  { %v21001_v40 = vpop.eup %21000  ;;  %18885 = vmatprep.mubr.msk.f32.mxu1 %vm7664_vm5, %v9009_v42  ;;  %18879 = vmatmul.mubr.msk.f32.vlgmr.msra.gmra.mrb[152].mxu0 %vm7664_vm5, %v9008_v15  ;;  %v19889_v42 = vpack.c.bf16 %v20109_v7, %v20108_v44 }
 0x723   :  { %v21003_v23 = vpop.eup %21002  ;;  %18886 = vmatmul.mubr.msk.f32.vlgmr.msra.gmra.mrb[134].mxu1 %vm7664_vm5, %v9010_v26  ;;  %19872 = vmatpush3.bf16.msra.mxu0 %v19869_v62  ;;  %v8645_v46 = vpop.xlane.xlu1 %8644  ;;  %v9012_v57 = vmul.f32 %v21001_v40, %v24940_v55 }
 0x724   :  { %19876 = vmatpush3.bf16.msra.mxu1 %v19873_v61  ;;  %21012 = vrcp.f32 %v8645_v46  ;;  %v8651_v38 = vpop.xlane.xlu0 %8650  ;;  %19878 = vmatprep.subr.bf16.mxu0 %v19877_v28  ;;  %v9011_v58 = vmul.f32 %v21003_v23, %v27994_v24  ;;  %v28000_v46 = vld [vmem:[#allocation35_spill] sm:$0xff] }
 0x725   :  { %21014 = vrcp.f32 %v8651_v38  ;;  %19882 = vmatprep.subr.bf16.mxu1 %v19881_v5  ;;  %v25377_v51 = vpop.f32.mrb[126].mxu0 }
 0x726   :  { %27995 = vst [vmem:[#allocation57_spill] sm:$0xff] %v25377_v51  ;;  %v21005_v48 = vpop.eup %21004  ;;  %21016 = vpow2.f32 %v8381_v29  ;;  %18892 = vmatprep.mubr.msk.f32.mxu0 %vm7664_vm5, %v9011_v58  ;;  %v25382_v62 = vpop.f32.mrb[127].mxu0  ;;  %v28002_v58 = vld [vmem:[#allocation125_spill] sm:$0xff] }
 0x727   :  { %27997 = vst [vmem:[#allocation151_spill] sm:$0xff] %v25382_v62  ;;  %v21007_v55 = vpop.eup %21006  ;;  %21018 = vpow2.f32 %v8383_v19  ;;  %18893 = vmatmul.mubr.msk.f32.vlgmr.msra.gmra.mrb[154].mxu0 %vm7664_vm5, %v9012_v57  ;;  %v8660_v61 = vpop.xlane.xlu1 %8659  ;;  %v9013_v9 = vmul.f32 %v21005_v48, %v27998_v37 }
 0x728   :  { %19880 = vmatpush3.bf16.msra.mxu0 %v19877_v28  ;;  %v8666_v15 = vpop.xlane.xlu0 %8665  ;;  %v9014_v59 = vmul.f32 %v21007_v55, %v27999_v16  ;;  %21020 = vrcp.f32 %v8660_v61  ;;  %v28004_v16 = vld [vmem:[#allocation132_spill] sm:$0xff] }
 0x729   :  { %19886 = vmatprep.subr.bf16.mxu0 %v19885_v45  ;;  %18899 = vmatprep.mubr.msk.f32.mxu1 %vm7664_vm5, %v9013_v9  ;;  %21022 = vrcp.f32 %v8666_v15 }
 0x72a   :  { %18900 = vmatmul.mubr.msk.f32.vlgmr.msra.gmra.mrb[136].mxu1 %vm7664_vm5, %v9014_v59  ;;  %v21009_v26 = vpop.eup %21008 }
 0x72b   :  { %19884 = vmatpush3.bf16.msra.mxu1 %v19881_v5  ;;  %v8657_v12 = vpop.xlane.xlu1 %8656  ;;  %v21011_v8 = vpop.eup %21010  ;;  %v28001_v5 = vld [vmem:[#allocation165_spill] sm:$0xff] }
 0x72c   :  { %21024 = vrcp.f32 %v8657_v12  ;;  %v8663_v40 = vpop.xlane.xlu0 %8662  ;;  %19890 = vmatprep.subr.bf16.mxu1 %v19889_v42  ;;  %v9016_v38 = vmul.f32 %v21009_v26, %v28001_v5  ;;  %v9018_v48 = vmul.f32 %v21011_v8, %v28002_v58  ;;  %v28006_v26 = vld [vmem:[#allocation53_spill] sm:$0xff]  ;;  %v28007_v8 = vld [vmem:[#allocation167_spill] sm:$0xff] }
 0x72d   :  { %21026 = vrcp.f32 %v8663_v40 }
 0x72e   :  { %v21013_v28 = vpop.eup %21012 }
 0x72f   :  { %v21015_v20 = vpop.eup %21014  ;;  %v25389_v43 = vpop.xlane.xlu1 %8671  ;;  %v9015_v29 = vmul.f32 %v21013_v28, %v24995_v22 }
 0x730   :  { %v25392_v23 = vpop.eup %21016  ;;  %v25394_v19 = vpop.xlane.xlu0 %8677  ;;  %v9017_v57 = vmul.f32 %v21015_v20, %v28000_v46  ;;  %v28008_v20 = vld [vmem:[#allocation135_spill] sm:$0xff] }
 0x731   :  { %v25398_v24 = vpop.eup %21018  ;;  %18906 = vmatprep.mubr.msk.f32.mxu0 %vm7664_vm5, %v9015_v29  ;;  %v8739_v27 = vsel %vm7664_vm5, %v25392_v23, 0.0 }
 0x732   :  { %18913 = vmatprep.mubr.msk.f32.mxu1 %vm7664_vm5, %v9017_v57  ;;  %18907 = vmatmul.mubr.msk.f32.vlgmr.msra.gmra.mrb[156].mxu0 %vm7664_vm5, %v9016_v38  ;;  %v21021_v7 = vpop.eup %21020  ;;  %v8742_v55 = vsel %vm7664_vm5, %v25398_v24, 0.0 }
 0x733   :  { %18914 = vmatmul.mubr.msk.f32.vlgmr.msra.gmra.mrb[138].mxu1 %vm7664_vm5, %v9018_v48  ;;  %19888 = vmatpush3.bf16.msra.mxu0 %v19885_v45  ;;  %v8669_v22 = vpop.xlane.xlu1 %8668  ;;  %v21023_v61 = vpop.eup %21022  ;;  %v9020_v28 = vmul.f32 %v21021_v7, %v28007_v8 }
 0x734   :  { %19892 = vmatpush3.bf16.msra.mxu1 %v19889_v42  ;;  %21028 = vrcp.f32 %v8669_v22  ;;  %v8675_v44 = vpop.xlane.xlu0 %8674  ;;  %8740 = vadd.xlane.f32.xlu1 %v8739_v27  ;;  %v9022_v29 = vmul.f32 %v21023_v61, %v28008_v20 }
 0x735   :  { %21030 = vrcp.f32 %v8675_v44  ;;  %8743 = vadd.xlane.f32.xlu0 %v8742_v55 }
 0x736   :  { %v21025_v37 = vpop.eup %21024  ;;  %v25409_v15 = vpop.f32.mrb[108].mxu1  ;;  %21032 = vrcp.f32 %v25389_v43 }
 0x737   :  { %v21027_v9 = vpop.eup %21026  ;;  %28003 = vst [vmem:[#allocation108_spill] sm:$0xff] %v25409_v15  ;;  %v25411_v45 = vpop.xlane.xlu1 %8683  ;;  %v9019_v59 = vmul.f32 %v21025_v37, %v28004_v16  ;;  %21034 = vrcp.f32 %v25394_v19 }
 0x738   :  { %v25414_v12 = vpop.f32.mrb[109].mxu1  ;;  %v25416_v42 = vpop.xlane.xlu0 %8689  ;;  %v9021_v40 = vmul.f32 %v21027_v9, %v28006_v26 }
 0x739   :  { %28005 = vst [vmem:[#allocation109_spill] sm:$0xff] %v25414_v12  ;;  %18920 = vmatprep.mubr.msk.f32.mxu0 %vm7664_vm5, %v9019_v59 }
 0x73a   :  { %18927 = vmatprep.mubr.msk.f32.mxu1 %vm7664_vm5, %v9021_v40  ;;  %18921 = vmatmul.mubr.msk.f32.vlgmr.msra.gmra.mrb[158].mxu0 %vm7664_vm5, %v9020_v28 }
 0x73b   :  { %v25424_v46 = vpop.f32.mrb[110].mxu1  ;;  %18928 = vmatmul.mubr.msk.f32.vlgmr.msra.gmra.mrb[140].mxu1 %vm7664_vm5, %v9022_v29  ;;  %v8681_v57 = vpop.xlane.xlu1 %8680  ;;  %v28020_v29 = vld [vmem:[#allocation58_spill] sm:$0xff] }
 0x73c   :  { %28009 = vst [vmem:[#allocation120_spill] sm:$0xff] %v25424_v46  ;;  %v25427_v5 = vpop.f32.mrb[111].mxu1  ;;  %v8687_v38 = vpop.xlane.xlu0 %8686  ;;  %21036 = vrcp.f32 %v8681_v57 }
 0x73d   :  { %28010 = vst [vmem:[#allocation118_spill] sm:$0xff] %v25427_v5  ;;  %21038 = vrcp.f32 %v8687_v38 }
 0x73e   :  { %v21029_v58 = vpop.eup %21028 }
 0x73f   :  { %v21031_v48 = vpop.eup %21030  ;;  %v25429_v22 = vpop.f32.mrb[112].mxu1  ;;  %v9023_v7 = vmul.f32 %v21029_v58, %v25057_v11  ;;  %v28015_v11 = vld [vmem:[#allocation56_spill] sm:$0xff] }
 0x740   :  { %28011 = vst [vmem:[#allocation134_spill] sm:$0xff] %v25429_v22  ;;  %v25431_v27 = vpop.xlane.xlu1 %8695  ;;  %v25434_v44 = vpop.f32.mrb[113].mxu1  ;;  %v9025_v61 = vmul.f32 %v21031_v48, %v25063_v41 }
 0x741   :  { %28012 = vst [vmem:[#allocation166_spill] sm:$0xff] %v25434_v44  ;;  %v25436_v55 = vpop.xlane.xlu0 %8701  ;;  %18934 = vmatprep.mubr.msk.f32.mxu0 %vm7664_vm5, %v9023_v7  ;;  %v28022_v44 = vld [vmem:[#allocation174_spill] sm:$0xff]  ;;  %v21033_v57 = vpop.eup %21032 }
 0x742   :  { %18941 = vmatprep.mubr.msk.f32.mxu1 %vm7664_vm5, %v9025_v61 }
 0x743   :  { %v25441_v37 = vpop.f32.mrb[114].mxu1 }
 0x744   :  { %28013 = vst [vmem:[#allocation128_spill] sm:$0xff] %v25441_v37  ;;  %v25443_v9 = vpop.xlane.xlu1 %8692  ;;  %v25445_v16 = vpop.f32.mrb[115].mxu1  ;;  %v28021_v37 = vld [vmem:[#allocation191_spill] sm:$0xff] }
 0x745   :  { %28014 = vst [vmem:[#allocation162_spill] sm:$0xff] %v25445_v16  ;;  %v25447_v59 = vpop.xlane.xlu0 %8698  ;;  %20496 = vrot.lane.b32.xlu1 %v28015_v11, %s21244_s5  ;;  %v8153_v16 = vsub.f32 %v28021_v37, %v25079_v39 }
 0x746   :  { %v25451_v26 = vpop.f32.mrb[128].mxu0 }
 0x747   :  { %28016 = vst [vmem:[#allocation71_spill] sm:$0xff] %v25451_v26  ;;  %v25453_v40 = vpop.f32.mrb[129].mxu0  ;;  %v8385_v26 = vmul.f32 1.442695, %v8153_v16 }
 0x748   :  { %28017 = vst [vmem:[#allocation37_spill] sm:$0xff] %v25453_v40  ;;  %v25455_v41 = vpop.xlane.xlu1 %8707 }
 0x749   :  { %v25457_v8 = vpop.xlane.xlu0 %8713  ;;  %21040 = vpow2.f32 %v8385_v26  ;;  %v28028_v26 = vld [vmem:[#allocation99_spill] sm:$0xff] }
 0x74a   :  { %v25459_v28 = vpop.f32.mrb[116].mxu1 }
 0x74b   :  { %28018 = vst [vmem:[#allocation61_spill] sm:$0xff] %v25459_v28  ;;  %v25461_v20 = vpop.f32.mrb[117].mxu1  ;;  %20501 = vrot.lane.b32.xlu0 %v28020_v29, %s21244_s5  ;;  %v28023_v28 = vld [vmem:[#allocation190_spill] sm:$0xff] }
 0x74c   :  { %28019 = vst [vmem:[#allocation39_spill] sm:$0xff] %v25461_v20  ;;  %v25465_v58 = vpop.xlane.xlu1 %8704  ;;  %v8154_v46 = vsub.f32 %v28023_v28, %v28022_v44 }
 0x74d   :  { %v25467_v48 = vpop.xlane.xlu0 %8710 }
 0x74e   :  { %v8387_v39 = vmul.f32 1.442695, %v8154_v46 }
 0x750   :  { %v25469_v7 = vpop.xlane.xlu1 %8719  ;;  %21042 = vpow2.f32 %v8387_v39  ;;  %v9024_v39 = vmul.f32 %v21033_v57, %v28028_v26  ;;  %v28035_v57 = vld [vmem:[#allocation62_spill] sm:$0xff]  ;;  %v28037_v26 = vld [vmem:[#allocation192_spill] sm:$0xff] }
 0x751   :  { %v25471_v61 = vpop.xlane.xlu0 %8725  ;;  %21044 = vrcp.f32 %v25411_v45 }
 0x752   :  { %21046 = vrcp.f32 %v25416_v42 }
 0x753   :  { %21048 = vrcp.f32 %v25443_v9 }
 0x754   :  { %v25475_v22 = vpop.xlane.xlu1 %8716  ;;  %21050 = vrcp.f32 %v25447_v59 }
 0x755   :  { %v25480_v20 = vpop.xlane.xlu0 %8722  ;;  %v25483_v5 = vpop.f32.mrb[130].mxu0 }
 0x756   :  { %28024 = vst [vmem:[#allocation138_spill] sm:$0xff] %v25483_v5  ;;  %v25485_v40 = vpop.f32.mrb[131].mxu0  ;;  %v21035_v5 = vpop.eup %21034 }
 0x757   :  { %28025 = vst [vmem:[#allocation171_spill] sm:$0xff] %v25485_v40  ;;  %v21037_v40 = vpop.eup %21036 }
 0x758   :  { %v25487_v15 = vpop.xlane.xlu1 %8728  ;;  %v21039_v46 = vpop.eup %21038 }
 0x759   :  { %v25489_v37 = vpop.xlane.xlu0 %8731 }
 0x75c   :  { %v20477_v44 = vpop.permute.xlu1 %20476 }
 0x75d   :  { %v20479_v43 = vunpack.i.h.bf16 %v20477_v44  ;;  %v20478_v28 = vunpack.i.l.bf16 %v20477_v44  ;;  %v20482_v12 = vpop.permute.xlu0 %20481  ;;  %v25491_v16 = vpop.f32.mrb[132].mxu0  ;;  %v28029_v44 = vld [vmem:[#allocation95_spill] sm:$0xff] }
 0x75e   :  { %v20484_v51 = vunpack.i.h.bf16 %v20482_v12  ;;  %v20483_v19 = vunpack.i.l.bf16 %v20482_v12  ;;  %28026 = vst [vmem:[#allocation170_spill] sm:$0xff] %v25491_v16  ;;  %v25493_v2 = vpop.f32.mrb[133].mxu0  ;;  %v9026_v47 = vmul.f32 %v21035_v5, %v28029_v44  ;;  %v9027_v12 = vmul.f32 %v21037_v40, %v25107_v63 }
 0x75f   :  { %v19893_v62 = vpack.c.bf16 %v20479_v43, %v20478_v28  ;;  %28027 = vst [vmem:[#allocation136_spill] sm:$0xff] %v25493_v2  ;;  %v9029_v43 = vmul.f32 %v21039_v46, %v25111_v54  ;;  %v25500_v28 = vpop.eup %21040 }
 0x760   :  { %v19897_v38 = vpack.c.bf16 %v20484_v51, %v20483_v19  ;;  %v25504_v51 = vpop.eup %21042 }
 0x761   :  { %19894 = vmatprep.subr.bf16.mxu0 %v19893_v62  ;;  %v8748_v63 = vsel %vm7664_vm5, %v25504_v51, 0.0 }
 0x762   :  { %19898 = vmatprep.subr.bf16.mxu1 %v19897_v38  ;;  %19896 = vmatpush3.bf16.msra.mxu0 %v19893_v62  ;;  %v8745_v62 = vsel %vm7664_vm5, %v25500_v28, 0.0 }
 0x763   :  { %19900 = vmatpush3.bf16.msra.mxu1 %v19897_v38  ;;  %v28036_v38 = vld [vmem:[#allocation45_spill] sm:$0xff] }
 0x764   :  { %v8155_v46 = vsub.f32 %v28036_v38, %v25100_v10 }
 0x765   :  { %18935 = vmatmul.mubr.msk.f32.vlgmr.msra.gmra.mrb[160].mxu0 %vm7664_vm5, %v9024_v39  ;;  %v8156_v39 = vsub.f32 %v28037_v26, %v25093_v6 }
 0x766   :  { %18942 = vmatmul.mubr.msk.f32.vlgmr.msra.gmra.mrb[142].mxu1 %vm7664_vm5, %v9026_v47  ;;  %18948 = vmatprep.mubr.msk.f32.mxu0 %vm7664_vm5, %v9027_v12  ;;  %v28033_v47 = vld [vmem:[#allocation60_spill] sm:$0xff]  ;;  %v8389_v44 = vmul.f32 1.442695, %v8155_v46 }
 0x767   :  { %18955 = vmatprep.mubr.msk.f32.mxu1 %vm7664_vm5, %v9029_v43  ;;  %v8391_v43 = vmul.f32 1.442695, %v8156_v39 }
 0x768   :  { %21052 = vpow2.f32 %v8389_v44 }
 0x769   :  { %8746 = vadd.xlane.f32.xlu1 %v8745_v62  ;;  %v25511_v5 = vpop.f32.mrb[134].mxu0  ;;  %21054 = vpow2.f32 %v8391_v43 }
 0x76a   :  { %8749 = vadd.xlane.f32.xlu0 %v8748_v63  ;;  %28030 = vst [vmem:[#allocation144_spill] sm:$0xff] %v25511_v5  ;;  %v25513_v54 = vpop.f32.mrb[135].mxu0  ;;  %21056 = vrcp.f32 %v25431_v27 }
 0x76b   :  { %28031 = vst [vmem:[#allocation148_spill] sm:$0xff] %v25513_v54  ;;  %21058 = vrcp.f32 %v25436_v55  ;;  %v28046_v54 = vld [vmem:[#allocation196_spill] sm:$0xff]  ;;  %v28049_v55 = vld [vmem:[#allocation195_spill] sm:$0xff] }
 0x76c   :  { %21060 = vrcp.f32 %v25465_v58  ;;  %v8159_v16 = vsub.f32 %v28046_v54, %v25133_v4  ;;  %v8160_v58 = vsub.f32 %v28049_v55, %v25129_v21  ;;  %v28052_v21 = vld [vmem:[#allocation72_spill] sm:$0xff] }
 0x76d   :  { %21062 = vrcp.f32 %v25467_v48 }
 0x779   :  { %v25515_v40 = vpop.f32.mrb[136].mxu0 }
 0x77a   :  { %28032 = vst [vmem:[#allocation65_spill] sm:$0xff] %v25515_v40  ;;  %20506 = vrot.lane.b32.xlu1 %v28033_v47, %s21244_s5  ;;  %v25519_v19 = vpop.f32.mrb[137].mxu0  ;;  %v21045_v40 = vpop.eup %21044 }
 0x77b   :  { %28034 = vst [vmem:[#allocation147_spill] sm:$0xff] %v25519_v19  ;;  %v21047_v19 = vpop.eup %21046  ;;  %v9028_v39 = vmul.f32 %v21045_v40, %v25085_v0 }
 0x77c   :  { %v21049_v46 = vpop.eup %21048  ;;  %v9030_v43 = vmul.f32 %v21047_v19, %v25090_v36 }
 0x77d   :  { %v21051_v59 = vpop.eup %21050 }
 0x780   :  { %20511 = vrot.lane.b32.xlu0 %v28035_v57, %s21244_s5 }
 0x78c   :  { %v25531_v12 = vpop.xlane.xlu1 %8734 }
 0x78d   :  { %v25533_v62 = vpop.xlane.xlu0 %8737 }
 0x790   :  { %v20487_v63 = vpop.permute.xlu1 %20486 }
 0x791   :  { %v20489_v10 = vunpack.i.h.bf16 %v20487_v63  ;;  %v20488_v38 = vunpack.i.l.bf16 %v20487_v63  ;;  %v20492_v6 = vpop.permute.xlu0 %20491  ;;  %v9031_v63 = vmul.f32 %v21049_v46, %v25139_v31 }
 0x792   :  { %v20494_v26 = vunpack.i.h.bf16 %v20492_v6  ;;  %v20493_v45 = vunpack.i.l.bf16 %v20492_v6 }
 0x793   :  { %v19901_v42 = vpack.c.bf16 %v20489_v10, %v20488_v38  ;;  %v9033_v10 = vmul.f32 %v21051_v59, %v25143_v53  ;;  %v25544_v38 = vpop.eup %21052 }
 0x794   :  { %v19905_v9 = vpack.c.bf16 %v20494_v26, %v20493_v45  ;;  %v25548_v6 = vpop.eup %21054  ;;  %v8751_v0 = vsel %vm7664_vm5, %v25544_v38, 0.0  ;;  %v28039_v45 = vld [vmem:[#allocation64_spill] sm:$0xff] }
 0x795   :  { %19902 = vmatprep.subr.bf16.mxu0 %v19901_v42  ;;  %v8754_v36 = vsel %vm7664_vm5, %v25548_v6, 0.0  ;;  %v21057_v4 = vpop.eup %21056 }
 0x796   :  { %19906 = vmatprep.subr.bf16.mxu1 %v19905_v9  ;;  %19904 = vmatpush3.bf16.msra.mxu0 %v19901_v42  ;;  %v25536_v44 = vpop.f32.mrb[118].mxu1 }
 0x797   :  { %19908 = vmatpush3.bf16.msra.mxu1 %v19905_v9  ;;  %v25540_v5 = vpop.f32.mrb[119].mxu1  ;;  %v28041_v9 = vld [vmem:[#allocation34_spill] sm:$0xff] }
 0x799   :  { %18949 = vmatmul.mubr.msk.f32.vlgmr.msra.gmra.mrb[162].mxu0 %vm7664_vm5, %v9028_v39  ;;  %v28044_v39 = vld [vmem:[#allocation193_spill] sm:$0xff] }
 0x79a   :  { %18956 = vmatmul.mubr.msk.f32.vlgmr.msra.gmra.mrb[144].mxu1 %vm7664_vm5, %v9030_v43  ;;  %18962 = vmatprep.mubr.msk.f32.mxu0 %vm7664_vm5, %v9031_v63  ;;  %v8158_v43 = vsub.f32 %v28044_v39, %v25113_v25  ;;  %v28045_v63 = vld [vmem:[#allocation194_spill] sm:$0xff]  ;;  %v8397_v39 = vmul.f32 1.442695, %v8159_v16  ;;  %v9032_v16 = vmul.f32 %v21057_v4, %v28052_v21  ;;  %v28061_v21 = vld [vmem:[#allocation36_spill] sm:$0xff] }
 0x79b   :  { %18969 = vmatprep.mubr.msk.f32.mxu1 %vm7664_vm5, %v9033_v10  ;;  %v8157_v10 = vsub.f32 %v28045_v63, %v25117_v52 }
 0x79d   :  { %v25555_v31 = vpop.f32.mrb[138].mxu0 }
 0x79e   :  { %8752 = vadd.xlane.f32.xlu1 %v8751_v0  ;;  %v25557_v53 = vpop.f32.mrb[139].mxu0  ;;  %v8395_v0 = vmul.f32 1.442695, %v8158_v43 }
 0x79f   :  { %8755 = vadd.xlane.f32.xlu0 %v8754_v36  ;;  %v8393_v36 = vmul.f32 1.442695, %v8157_v10 }
 0x7a0   :  { %21064 = vpow2.f32 %v8395_v0  ;;  %v21059_v0 = vpop.eup %21058 }
 0x7a1   :  { %21066 = vpow2.f32 %v8393_v36  ;;  %v8399_v36 = vmul.f32 1.442695, %v8160_v58 }
 0x7a2   :  { %21068 = vpow2.f32 %v8397_v39 }
 0x7a3   :  { %21070 = vpow2.f32 %v8399_v36 }
 0x7a4   :  { %21072 = vrcp.f32 %v25455_v41 }
 0x7a5   :  { %21074 = vrcp.f32 %v25457_v8 }
 0x7a6   :  { %v25559_v40 = vpop.f32.mrb[120].mxu1  ;;  %21076 = vrcp.f32 %v25475_v22  ;;  %v28074_v22 = vld [vmem:[#allocation137_spill] sm:$0xff] }
 0x7a7   :  { %v25561_v19 = vpop.f32.mrb[121].mxu1  ;;  %21078 = vrcp.f32 %v25480_v20 }
 0x7ad   :  { %v25563_v26 = vpop.f32.mrb[140].mxu0 }
 0x7ae   :  { %28038 = vst [vmem:[#allocation74_spill] sm:$0xff] %v25563_v26  ;;  %v25567_v42 = vpop.f32.mrb[141].mxu0  ;;  %v28082_v26 = vld [vmem:[#allocation100_spill] sm:$0xff] }
 0x7af   :  { %20516 = vrot.lane.b32.xlu1 %v28039_v45, %s21244_s5  ;;  %28040 = vst [vmem:[#allocation152_spill] sm:$0xff] %v25567_v42 }
 0x7b5   :  { %20521 = vrot.lane.b32.xlu0 %v28041_v9, %s21246_s3 }
 0x7b6   :  { %v25571_v46 = vpop.f32.mrb[122].mxu1 }
 0x7b7   :  { %28042 = vst [vmem:[#allocation155_spill] sm:$0xff] %v25571_v46  ;;  %v25573_v59 = vpop.f32.mrb[123].mxu1  ;;  %v28080_v46 = vld [vmem:[#allocation179_spill] sm:$0xff] }
 0x7b8   :  { %28043 = vst [vmem:[#allocation178_spill] sm:$0xff] %v25573_v59  ;;  %v28078_v59 = vld [vmem:[#allocation43_spill] sm:$0xff] }
 0x7c1   :  { %v25583_v9 = vpop.xlane.xlu1 %8740  ;;  %v25589_v25 = vpop.f32.mrb[142].mxu0 }
 0x7c2   :  { %v25587_v2 = vpop.xlane.xlu0 %8743  ;;  %28047 = vst [vmem:[#allocation177_spill] sm:$0xff] %v25589_v25  ;;  %v25591_v52 = vpop.f32.mrb[143].mxu0 }
 0x7c3   :  { %28048 = vst [vmem:[#allocation159_spill] sm:$0xff] %v25591_v52  ;;  %v21061_v52 = vpop.eup %21060 }
 0x7c4   :  { %v21063_v25 = vpop.eup %21062  ;;  %v9035_v55 = vmul.f32 %v21061_v52, %v25163_v14 }
 0x7c5   :  { %v20497_v27 = vpop.permute.xlu1 %20496 }
 0x7c6   :  { %v20499_v43 = vunpack.i.h.bf16 %v20497_v27  ;;  %v20498_v48 = vunpack.i.l.bf16 %v20497_v27  ;;  %v20502_v63 = vpop.permute.xlu0 %20501  ;;  %v25595_v13 = vpop.f32.mrb[124].mxu1  ;;  %v9034_v27 = vmul.f32 %v21059_v0, %v25127_v1 }
 0x7c7   :  { %v20504_v10 = vunpack.i.h.bf16 %v20502_v63  ;;  %v20503_v33 = vunpack.i.l.bf16 %v20502_v63  ;;  %28050 = vst [vmem:[#allocation158_spill] sm:$0xff] %v25595_v13  ;;  %v25597_v54 = vpop.f32.mrb[125].mxu1  ;;  %v25602_v63 = vpop.eup %21064  ;;  %v28077_v13 = vld [vmem:[#allocation66_spill] sm:$0xff] }
 0x7c8   :  { %28051 = vst [vmem:[#allocation161_spill] sm:$0xff] %v25597_v54  ;;  %v19909_v18 = vpack.c.bf16 %v20499_v43, %v20498_v48  ;;  %v25606_v58 = vpop.eup %21066  ;;  %v8760_v14 = vsel %vm7664_vm5, %v25602_v63, 0.0 }
 0x7c9   :  { %v19913_v32 = vpack.c.bf16 %v20504_v10, %v20503_v33  ;;  %v9037_v33 = vmul.f32 %v21063_v25, %v25167_v17  ;;  %v8757_v1 = vsel %vm7664_vm5, %v25606_v58, 0.0  ;;  %v25619_v17 = vpop.eup %21068 }
 0x7ca   :  { %19910 = vmatprep.subr.bf16.mxu0 %v19909_v18  ;;  %v25623_v25 = vpop.eup %21070 }
 0x7cb   :  { %19914 = vmatprep.subr.bf16.mxu1 %v19913_v32  ;;  %19912 = vmatpush3.bf16.msra.mxu0 %v19909_v18  ;;  %v8766_v4 = vsel %vm7664_vm5, %v25623_v25, 0.0 }
 0x7cc   :  { %19916 = vmatpush3.bf16.msra.mxu1 %v19913_v32  ;;  %v8763_v32 = vsel %vm7664_vm5, %v25619_v17, 0.0 }
 0x7cd   :  { %v25608_v39 = vpop.f32.mrb[144].mxu0 }
 0x7ce   :  { %18963 = vmatmul.mubr.msk.f32.vlgmr.msra.gmra.mrb[164].mxu0 %vm7664_vm5, %v9032_v16  ;;  %28053 = vst [vmem:[#allocation168_spill] sm:$0xff] %v25608_v39  ;;  %v25612_v18 = vpop.f32.mrb[145].mxu0 }
 0x7cf   :  { %18970 = vmatmul.mubr.msk.f32.vlgmr.msra.gmra.mrb[146].mxu1 %vm7664_vm5, %v9034_v27  ;;  %18976 = vmatprep.mubr.msk.f32.mxu0 %vm7664_vm5, %v9035_v55  ;;  %28054 = vst [vmem:[#allocation164_spill] sm:$0xff] %v25612_v18 }
 0x7d0   :  { %18983 = vmatprep.mubr.msk.f32.mxu1 %vm7664_vm5, %v9037_v33 }
 0x7d3   :  { %8758 = vadd.xlane.f32.xlu1 %v8757_v1 }
 0x7d4   :  { %8761 = vadd.xlane.f32.xlu0 %v8760_v14 }
 0x7d6   :  { %v25625_v52 = vpop.f32.mrb[126].mxu1 }
 0x7d7   :  { %28055 = vst [vmem:[#allocation169_spill] sm:$0xff] %v25625_v52  ;;  %v25627_v43 = vpop.f32.mrb[127].mxu1 }
 0x7d8   :  { %8764 = vadd.xlane.f32.xlu0 %v8763_v32  ;;  %28056 = vst [vmem:[#allocation79_spill] sm:$0xff] %v25627_v43  ;;  %v28068_v32 = vld [vmem:[#allocation107_spill] sm:$0xff] }
 0x7d9   :  { %v25629_v48 = vpop.f32.mrb[146].mxu0 }
 0x7da   :  { %28057 = vst [vmem:[#allocation173_spill] sm:$0xff] %v25629_v48  ;;  %v25631_v10 = vpop.f32.mrb[147].mxu0  ;;  %v21073_v48 = vpop.eup %21072 }
 0x7db   :  { %28058 = vst [vmem:[#allocation172_spill] sm:$0xff] %v25631_v10  ;;  %v21075_v52 = vpop.eup %21074 }
 0x7dc   :  { %8767 = vadd.xlane.f32.xlu0 %v8766_v4  ;;  %v8161_v4 = vsub.f32 %v28068_v32, %v25159_v35  ;;  %v21077_v39 = vpop.eup %21076  ;;  %v9038_v42 = vmul.f32 %v21075_v52, %v28080_v46  ;;  %v28088_v52 = vld [vmem:[#allocation143_spill] sm:$0xff] }
 0x7de   :  { %v25635_v0 = vpop.f32.mrb[128].mxu1 }
 0x7df   :  { %28059 = vst [vmem:[#allocation185_spill] sm:$0xff] %v25635_v0  ;;  %v25637_v36 = vpop.f32.mrb[129].mxu1 }
 0x7e0   :  { %28060 = vst [vmem:[#allocation176_spill] sm:$0xff] %v25637_v36  ;;  %v28069_v36 = vld [vmem:[#allocation38_spill] sm:$0xff] }
 0x7e4   :  { %20526 = vrot.lane.b32.xlu1 %v28061_v21, %s21246_s3 }
 0x7e5   :  { %v25641_v16 = vpop.f32.mrb[148].mxu0 }
 0x7e6   :  { %28062 = vst [vmem:[#allocation175_spill] sm:$0xff] %v25641_v16  ;;  %v25643_v27 = vpop.f32.mrb[149].mxu0 }
 0x7e7   :  { %28063 = vst [vmem:[#allocation181_spill] sm:$0xff] %v25643_v27 }
 0x7ed   :  { %v25645_v55 = vpop.f32.mrb[130].mxu1 }
 0x7ee   :  { %28064 = vst [vmem:[#allocation180_spill] sm:$0xff] %v25645_v55  ;;  %v25647_v33 = vpop.f32.mrb[131].mxu1 }
 0x7ef   :  { %28065 = vst [vmem:[#allocation183_spill] sm:$0xff] %v25647_v33 }
 0x7f1   :  { %v25649_v1 = vpop.f32.mrb[150].mxu0  ;;  %v25651_v14 = vpop.f32.mrb[132].mxu1 }
 0x7f2   :  { %28066 = vst [vmem:[#allocation182_spill] sm:$0xff] %v25649_v1  ;;  %28067 = vst [vmem:[#allocation41_spill] sm:$0xff] %v25651_v14  ;;  %20531 = vrot.lane.b32.xlu0 %v28069_v36, %s21246_s3  ;;  %v25657_v0 = vpop.f32.mrb[151].mxu0  ;;  %v25659_v21 = vpop.f32.mrb[133].mxu1  ;;  %v8401_v1 = vmul.f32 1.442695, %v8161_v4 }
 0x7f3   :  { %28070 = vst [vmem:[#allocation184_spill] sm:$0xff] %v25657_v0  ;;  %28071 = vst [vmem:[#allocation80_spill] sm:$0xff] %v25659_v21  ;;  %v28075_v0 = vld [vmem:[#allocation96_spill] sm:$0xff] }
 0x7f4   :  { %21080 = vpow2.f32 %v8401_v1 }
 0x7f5   :  { %v25664_v33 = vpop.f32.mrb[152].mxu0 }
 0x7f6   :  { %28072 = vst [vmem:[#allocation82_spill] sm:$0xff] %v25664_v33  ;;  %v25667_v14 = vpop.f32.mrb[134].mxu1  ;;  %v25669_v35 = vpop.xlane.xlu1 %8746  ;;  %v8162_v33 = vsub.f32 %v28075_v0, %v28074_v22  ;;  %v8163_v0 = vsub.f32 %v28078_v59, %v28077_v13  ;;  %v28079_v22 = vld [vmem:[#allocation98_spill] sm:$0xff] }
 0x7f7   :  { %v25671_v36 = vpop.xlane.xlu0 %8749  ;;  %v25673_v32 = vpop.f32.mrb[153].mxu0 }
 0x7f8   :  { %28073 = vst [vmem:[#allocation83_spill] sm:$0xff] %v25673_v32  ;;  %v25675_v21 = vpop.f32.mrb[135].mxu1  ;;  %v8403_v54 = vmul.f32 1.442695, %v8162_v33  ;;  %v28083_v33 = vld [vmem:[#allocation97_spill] sm:$0xff] }
 0x7fa   :  { %v25677_v41 = vpop.f32.mrb[154].mxu0  ;;  %v20507_v8 = vpop.permute.xlu1 %20506  ;;  %21082 = vpow2.f32 %v8403_v54 }
 0x7fb   :  { %v20509_v4 = vunpack.i.h.bf16 %v20507_v8  ;;  %v20508_v55 = vunpack.i.l.bf16 %v20507_v8  ;;  %v20512_v20 = vpop.permute.xlu0 %20511  ;;  %v25681_v27 = vpop.f32.mrb[155].mxu0 }
 0x7fc   :  { %v20514_v16 = vunpack.i.h.bf16 %v20512_v20  ;;  %v20513_v10 = vunpack.i.l.bf16 %v20512_v20  ;;  %v21079_v8 = vpop.eup %21078  ;;  %v9036_v20 = vmul.f32 %v21073_v48, %v28079_v22 }
 0x7fd   :  { %v25683_v43 = vpop.f32.mrb[136].mxu1  ;;  %v19917_v32 = vpack.c.bf16 %v20509_v4, %v20508_v55  ;;  %v9039_v55 = vmul.f32 %v21077_v39, %v25186_v50  ;;  %v28081_v4 = vld [vmem:[#allocation140_spill] sm:$0xff]  ;;  %v9041_v13 = vmul.f32 %v21079_v8, %v28083_v33  ;;  %v28087_v39 = vld [vmem:[#allocation131_spill] sm:$0xff] }
 0x7fe   :  { %v25685_v18 = vpop.f32.mrb[137].mxu1  ;;  %v19921_v1 = vpack.c.bf16 %v20514_v16, %v20513_v10  ;;  %v8164_v10 = vsub.f32 %v28082_v26, %v28081_v4  ;;  %v8405_v16 = vmul.f32 1.442695, %v8163_v0  ;;  %v25696_v59 = vpop.eup %21080  ;;  %v8165_v48 = vsub.f32 %v28088_v52, %v28087_v39  ;;  %v28094_v39 = vld [vmem:[#allocation40_spill] sm:$0xff] }
 0x7ff   :  { %28076 = vst [vmem:[#allocation112_spill] sm:$0xff] %v25685_v18  ;;  %19918 = vmatprep.subr.bf16.mxu0 %v19917_v32 }
 0x800   :  { %19922 = vmatprep.subr.bf16.mxu1 %v19921_v1  ;;  %19920 = vmatpush3.bf16.msra.mxu0 %v19917_v32  ;;  %v8407_v26 = vmul.f32 1.442695, %v8164_v10  ;;  %21084 = vpow2.f32 %v8405_v16 }
 0x801   :  { %19924 = vmatpush3.bf16.msra.mxu1 %v19921_v1  ;;  %v8409_v1 = vmul.f32 1.442695, %v8165_v48  ;;  %v28095_v48 = vld [vmem:[#allocation42_spill] sm:$0xff] }
 0x802   :  { %21086 = vpow2.f32 %v8407_v26 }
 0x803   :  { %18977 = vmatmul.mubr.msk.f32.vlgmr.msra.gmra.mrb[166].mxu0 %vm7664_vm5, %v9036_v20  ;;  %21088 = vpow2.f32 %v8409_v1  ;;  %v28097_v1 = vld [vmem:[#allocation47_spill] sm:$0xff] }
 0x804   :  { %18984 = vmatmul.mubr.msk.f32.vlgmr.msra.gmra.mrb[148].mxu1 %vm7664_vm5, %v9038_v42  ;;  %18990 = vmatprep.mubr.msk.f32.mxu0 %vm7664_vm5, %v9039_v55  ;;  %v8769_v42 = vsel %vm7664_vm5, %v25696_v59, 0.0  ;;  %v25713_v0 = vpop.eup %21082  ;;  %21090 = vrcp.f32 %v25469_v7 }
 0x805   :  { %18997 = vmatprep.mubr.msk.f32.mxu1 %vm7664_vm5, %v9041_v13  ;;  %v25701_v46 = vpop.f32.mrb[156].mxu0  ;;  %v8772_v4 = vsel %vm7664_vm5, %v25713_v0, 0.0  ;;  %21092 = vrcp.f32 %v25471_v61 }
 0x806   :  { %28084 = vst [vmem:[#allocation86_spill] sm:$0xff] %v25701_v46  ;;  %v25703_v50 = vpop.f32.mrb[138].mxu1  ;;  %v25705_v54 = vpop.f32.mrb[157].mxu0  ;;  %21094 = vrcp.f32 %v25487_v15 }
 0x807   :  { %28085 = vst [vmem:[#allocation121_spill] sm:$0xff] %v25703_v50  ;;  %28086 = vst [vmem:[#allocation146_spill] sm:$0xff] %v25705_v54  ;;  %v25709_v32 = vpop.f32.mrb[139].mxu1  ;;  %21096 = vrcp.f32 %v25531_v12  ;;  %v28100_v12 = vld [vmem:[#allocation44_spill] sm:$0xff] }
 0x808   :  { %28089 = vst [vmem:[#allocation87_spill] sm:$0xff] %v25709_v32  ;;  %8770 = vadd.xlane.f32.xlu1 %v8769_v42  ;;  %v28096_v42 = vld [vmem:[#allocation124_spill] sm:$0xff] }
 0x80a   :  { %v25725_v10 = vpop.eup %21084 }
 0x80b   :  { %v8775_v16 = vsel %vm7664_vm5, %v25725_v10, 0.0 }
 0x80c   :  { %v25729_v33 = vpop.eup %21086 }
 0x80d   :  { %v25715_v8 = vpop.f32.mrb[158].mxu0  ;;  %v8778_v13 = vsel %vm7664_vm5, %v25729_v33, 0.0  ;;  %v25733_v26 = vpop.eup %21088 }
 0x80e   :  { %28090 = vst [vmem:[#allocation119_spill] sm:$0xff] %v25715_v8  ;;  %v25717_v22 = vpop.f32.mrb[140].mxu1  ;;  %v25719_v20 = vpop.f32.mrb[159].mxu0  ;;  %v8781_v52 = vsel %vm7664_vm5, %v25733_v26, 0.0 }
 0x80f   :  { %28091 = vst [vmem:[#allocation69_spill] sm:$0xff] %v25717_v22  ;;  %28092 = vst [vmem:[#allocation187_spill] sm:$0xff] %v25719_v20  ;;  %v25721_v55 = vpop.f32.mrb[141].mxu1  ;;  %v21091_v15 = vpop.eup %21090 }
 0x810   :  { %28093 = vst [vmem:[#allocation186_spill] sm:$0xff] %v25721_v55  ;;  %v28099_v55 = vld [vmem:[#allocation123_spill] sm:$0xff]  ;;  %v21093_v54 = vpop.eup %21092 }
 0x811   :  { %8773 = vadd.xlane.f32.xlu0 %v8772_v4  ;;  %v8166_v4 = vsub.f32 %v28097_v1, %v28096_v42  ;;  %v21095_v46 = vpop.eup %21094 }
 0x815   :  { %8776 = vadd.xlane.f32.xlu0 %v8775_v16 }
 0x819   :  { %8779 = vadd.xlane.f32.xlu0 %v8778_v13  ;;  %20536 = vrot.lane.b32.xlu1 %v28094_v39, %s21246_s3  ;;  %v8411_v39 = vmul.f32 1.442695, %v8166_v4  ;;  %v21097_v4 = vpop.eup %21096 }
 0x81b   :  { %21098 = vpow2.f32 %v8411_v39 }
 0x81d   :  { %8782 = vadd.xlane.f32.xlu0 %v8781_v52  ;;  %20541 = vrot.lane.b32.xlu1 %v28095_v48, %s21246_s3  ;;  %v28098_v52 = vld [vmem:[#allocation102_spill] sm:$0xff] }
 0x81e   :  { %v8168_v22 = vsub.f32 %v28099_v55, %v28098_v52  ;;  %v28101_v55 = vld [vmem:[#allocation101_spill] sm:$0xff] }
 0x81f   :  { %v9040_v52 = vmul.f32 %v21091_v15, %v28101_v55 }
 0x820   :  { %v8415_v42 = vmul.f32 1.442695, %v8168_v22 }
 0x822   :  { %21100 = vpow2.f32 %v8415_v42 }
 0x82b   :  { %v25747_v16 = vpop.xlane.xlu1 %8752 }
 0x82c   :  { %v25749_v13 = vpop.xlane.xlu0 %8755 }
 0x82f   :  { %v20517_v48 = vpop.permute.xlu1 %20516 }
 0x830   :  { %v20519_v20 = vunpack.i.h.bf16 %v20517_v48  ;;  %v20518_v7 = vunpack.i.l.bf16 %v20517_v48  ;;  %v20522_v8 = vpop.permute.xlu0 %20521 }
 0x831   :  { %v20524_v61 = vunpack.i.h.bf16 %v20522_v8  ;;  %v20523_v32 = vunpack.i.l.bf16 %v20522_v8  ;;  %v28103_v8 = vld [vmem:[#allocation142_spill] sm:$0xff] }
 0x832   :  { %v19925_v50 = vpack.c.bf16 %v20519_v20, %v20518_v7  ;;  %v9042_v20 = vmul.f32 %v21093_v54, %v28103_v8  ;;  %v28104_v7 = vld [vmem:[#allocation106_spill] sm:$0xff] }
 0x833   :  { %20546 = vrot.lane.b32.xlu0 %v28100_v12, %s21246_s3  ;;  %v19929_v1 = vpack.c.bf16 %v20524_v61, %v20523_v32  ;;  %v9043_v39 = vmul.f32 %v21095_v46, %v28104_v7  ;;  %v9045_v32 = vmul.f32 %v21097_v4, %v25293_v49  ;;  %v28109_v54 = vld [vmem:[#allocation150_spill] sm:$0xff]  ;;  %v25773_v46 = vpop.eup %21098  ;;  %v28110_v12 = vld [vmem:[#allocation105_spill] sm:$0xff] }
 0x834   :  { %19926 = vmatprep.subr.bf16.mxu0 %v19925_v50  ;;  %v8784_v49 = vsel %vm7664_vm5, %v25773_v46, 0.0  ;;  %v25779_v4 = vpop.eup %21100 }
 0x835   :  { %19930 = vmatprep.subr.bf16.mxu1 %v19929_v1  ;;  %19928 = vmatpush3.bf16.msra.mxu0 %v19925_v50  ;;  %v28108_v50 = vld [vmem:[#allocation111_spill] sm:$0xff]  ;;  %v8790_v8 = vsel %vm7664_vm5, %v25779_v4, 0.0 }
 0x836   :  { %19932 = vmatpush3.bf16.msra.mxu1 %v19929_v1  ;;  %v8167_v15 = vsub.f32 %v28109_v54, %v28108_v50  ;;  %v28111_v1 = vld [vmem:[#allocation115_spill] sm:$0xff]  ;;  %v28112_v50 = vld [vmem:[#allocation46_spill] sm:$0xff] }
 0x837   :  { %v8169_v55 = vsub.f32 %v28111_v1, %v28110_v12  ;;  %v28114_v12 = vld [vmem:[#allocation75_spill] sm:$0xff] }
 0x838   :  { %v25756_v48 = vpop.f32.mrb[160].mxu0  ;;  %18991 = vmatmul.mubr.msk.f32.vlgmr.msra.gmra.mrb[168].mxu0 %vm7664_vm5, %v9040_v52  ;;  %v8413_v42 = vmul.f32 1.442695, %v8167_v15 }
 0x839   :  { %28102 = vst [vmem:[#allocation88_spill] sm:$0xff] %v25756_v48  ;;  %v25760_v22 = vpop.f32.mrb[142].mxu1  ;;  %v25762_v18 = vpop.f32.mrb[161].mxu0  ;;  %18998 = vmatmul.mubr.msk.f32.vlgmr.msra.gmra.mrb[150].mxu1 %vm7664_vm5, %v9042_v20  ;;  %19004 = vmatprep.mubr.msk.f32.mxu0 %vm7664_vm5, %v9043_v39  ;;  %v8417_v52 = vmul.f32 1.442695, %v8169_v55  ;;  %v28118_v48 = vld [vmem:[#allocation48_spill] sm:$0xff] }
 0x83a   :  { %28105 = vst [vmem:[#allocation114_spill] sm:$0xff] %v25760_v22  ;;  %28106 = vst [vmem:[#allocation89_spill] sm:$0xff] %v25762_v18  ;;  %v25766_v61 = vpop.f32.mrb[143].mxu1  ;;  %19011 = vmatprep.mubr.msk.f32.mxu1 %vm7664_vm5, %v9045_v32  ;;  %21102 = vpow2.f32 %v8413_v42  ;;  %v28113_v42 = vld [vmem:[#allocation126_spill] sm:$0xff] }
 0x83b   :  { %28107 = vst [vmem:[#allocation90_spill] sm:$0xff] %v25766_v61  ;;  %21104 = vpow2.f32 %v8417_v52  ;;  %v8170_v1 = vsub.f32 %v28114_v12, %v28113_v42  ;;  %v28116_v61 = vld [vmem:[#allocation49_spill] sm:$0xff]  ;;  %v28117_v42 = vld [vmem:[#allocation55_spill] sm:$0xff] }
 0x83c   :  { %21106 = vrcp.f32 %v25489_v37  ;;  %v28115_v37 = vld [vmem:[#allocation145_spill] sm:$0xff] }
 0x83d   :  { %21108 = vrcp.f32 %v25583_v9  ;;  %v8172_v9 = vsub.f32 %v28116_v61, %v28115_v37 }
 0x83e   :  { %21110 = vrcp.f32 %v25533_v62 }
 0x83f   :  { %21112 = vrcp.f32 %v25669_v35 }
 0x841   :  { %8785 = vadd.xlane.f32.xlu1 %v8784_v49 }
 0x844   :  { %v25783_v20 = vpop.eup %21102 }
 0x845   :  { %8791 = vadd.xlane.f32.xlu1 %v8790_v8  ;;  %v8787_v7 = vsel %vm7664_vm5, %v25783_v20, 0.0  ;;  %v25787_v39 = vpop.eup %21104 }
 0x846   :  { %v8793_v32 = vsel %vm7664_vm5, %v25787_v39, 0.0 }
 0x852   :  { %8788 = vadd.xlane.f32.xlu0 %v8787_v7 }
 0x856   :  { %8794 = vadd.xlane.f32.xlu0 %v8793_v32  ;;  %20551 = vrot.lane.b32.xlu1 %v28112_v50, %s21246_s3  ;;  %v21107_v32 = vpop.eup %21106  ;;  %v8419_v50 = vmul.f32 1.442695, %v8170_v1 }
 0x857   :  { %v21109_v22 = vpop.eup %21108  ;;  %v9044_v12 = vmul.f32 %v21107_v32, %v28117_v42 }
 0x858   :  { %21114 = vpow2.f32 %v8419_v50  ;;  %v9047_v1 = vmul.f32 %v21109_v22, %v25392_v23  ;;  %v28123_v22 = vld [vmem:[#allocation67_spill] sm:$0xff] }
 0x860   :  { %v25795_v54 = vpop.xlane.xlu1 %8758 }
 0x861   :  { %v25797_v15 = vpop.xlane.xlu0 %8761 }
 0x864   :  { %v20527_v55 = vpop.permute.xlu1 %20526 }
 0x865   :  { %v20529_v49 = vunpack.i.h.bf16 %v20527_v55  ;;  %v20528_v52 = vunpack.i.l.bf16 %v20527_v55  ;;  %v25801_v8 = vpop.xlane.xlu0 %8764  ;;  %v8423_v55 = vmul.f32 1.442695, %v8172_v9  ;;  %v28124_v9 = vld [vmem:[#allocation153_spill] sm:$0xff] }
 0x866   :  { %v8171_v42 = vsub.f32 %v28124_v9, %v28123_v22  ;;  %v28128_v9 = vld [vmem:[#allocation50_spill] sm:$0xff] }
 0x867   :  { %v19933_v7 = vpack.c.bf16 %v20529_v49, %v20528_v52  ;;  %21116 = vpow2.f32 %v8423_v55  ;;  %v28125_v55 = vld [vmem:[#allocation154_spill] sm:$0xff] }
 0x869   :  { %v25807_v18 = vpop.xlane.xlu0 %8767  ;;  %19934 = vmatprep.subr.bf16.mxu0 %v19933_v7 }
 0x86a   :  { %19936 = vmatpush3.bf16.msra.mxu0 %v19933_v7 }
 0x86c   :  { %20556 = vrot.lane.b32.xlu0 %v28118_v48, %s21246_s3  ;;  %v25812_v62 = vpop.f32.mrb[162].mxu0  ;;  %v21111_v48 = vpop.eup %21110 }
 0x86d   :  { %28119 = vst [vmem:[#allocation91_spill] sm:$0xff] %v25812_v62  ;;  %v20532_v49 = vpop.permute.xlu0 %20531  ;;  %v25815_v61 = vpop.f32.mrb[144].mxu1  ;;  %19005 = vmatmul.mubr.msk.f32.vlgmr.msra.gmra.mrb[170].mxu0 %vm7664_vm5, %v9044_v12  ;;  %v9046_v23 = vmul.f32 %v21111_v48, %v25296_v30 }
 0x86e   :  { %28120 = vst [vmem:[#allocation92_spill] sm:$0xff] %v25815_v61  ;;  %v20534_v35 = vunpack.i.h.bf16 %v20532_v49  ;;  %v20533_v52 = vunpack.i.l.bf16 %v20532_v49  ;;  %v25818_v37 = vpop.f32.mrb[163].mxu0  ;;  %v25820_v7 = vpop.f32.mrb[145].mxu1  ;;  %19018 = vmatprep.mubr.msk.f32.mxu0 %vm7664_vm5, %v9047_v1  ;;  %v8421_v1 = vmul.f32 1.442695, %v8171_v42 }
 0x86f   :  { %28121 = vst [vmem:[#allocation93_spill] sm:$0xff] %v25818_v37  ;;  %28122 = vst [vmem:[#allocation51_spill] sm:$0xff] %v25820_v7  ;;  %v21113_v50 = vpop.eup %21112 }
 0x870   :  { %v19937_v32 = vpack.c.bf16 %v20534_v35, %v20533_v52  ;;  %v9049_v12 = vmul.f32 %v21113_v50, %v25500_v28  ;;  %v25827_v49 = vpop.eup %21114  ;;  %v28126_v35 = vld [vmem:[#allocation117_spill] sm:$0xff]  ;;  %21118 = vpow2.f32 %v8421_v1 }
 0x871   :  { %v8173_v52 = vsub.f32 %v28126_v35, %v28125_v55  ;;  %v25835_v7 = vpop.eup %21116 }
 0x872   :  { %19938 = vmatprep.subr.bf16.mxu1 %v19937_v32  ;;  %28127 = vst [vmem:[#allocation94_spill] sm:$0xff] %v25835_v7  ;;  %v8802_v28 = vsel %vm7664_vm5, %v25835_v7, 0.0 }
 0x873   :  { %19940 = vmatpush3.bf16.msra.mxu1 %v19937_v32  ;;  %v8796_v32 = vsel %vm7664_vm5, %v25827_v49, 0.0  ;;  %v8425_v30 = vmul.f32 1.442695, %v8173_v52 }
 0x875   :  { %21120 = vpow2.f32 %v8425_v30  ;;  %v28130_v30 = vld [vmem:[#allocation129_spill] sm:$0xff] }
 0x876   :  { %19012 = vmatmul.mubr.msk.f32.vlgmr.msra.gmra.mrb[152].mxu1 %vm7664_vm5, %v9046_v23  ;;  %21122 = vrcp.f32 %v25587_v2 }
 0x877   :  { %19025 = vmatprep.mubr.msk.f32.mxu1 %vm7664_vm5, %v9049_v12  ;;  %21124 = vrcp.f32 %v25747_v16  ;;  %v28131_v16 = vld [vmem:[#allocation122_spill] sm:$0xff] }
 0x878   :  { %21126 = vrcp.f32 %v25671_v36  ;;  %v8176_v36 = vsub.f32 %v28131_v16, %v25279_v56 }
 0x879   :  { %21128 = vrcp.f32 %v25795_v54 }
 0x87a   :  { %8797 = vadd.xlane.f32.xlu1 %v8796_v32  ;;  %v25839_v48 = vpop.eup %21118  ;;  %v28129_v32 = vld [vmem:[#allocation110_spill] sm:$0xff]  ;;  %v8431_v7 = vmul.f32 1.442695, %v8176_v36 }
 0x87b   :  { %v8799_v50 = vsel %vm7664_vm5, %v25839_v48, 0.0 }
 0x87e   :  { %8803 = vadd.xlane.f32.xlu1 %v8802_v28  ;;  %v8174_v28 = vsub.f32 %v28130_v30, %v28129_v32 }
 0x87f   :  { %v25843_v23 = vpop.eup %21120 }
 0x880   :  { %v8805_v22 = vsel %vm7664_vm5, %v25843_v23, 0.0  ;;  %v21123_v52 = vpop.eup %21122 }
 0x881   :  { %v9048_v54 = vmul.f32 %v21123_v52, %v25398_v24 }
 0x88b   :  { %8800 = vadd.xlane.f32.xlu0 %v8799_v50 }
 0x88f   :  { %8806 = vadd.xlane.f32.xlu0 %v8805_v22  ;;  %20561 = vrot.lane.b32.xlu1 %v28128_v9, %s21246_s3  ;;  %v21125_v22 = vpop.eup %21124 }
 0x890   :  { %v9051_v32 = vmul.f32 %v21125_v22, %v25544_v38 }
 0x895   :  { %v25851_v42 = vpop.xlane.xlu1 %8770 }
 0x899   :  { %v20537_v12 = vpop.permute.xlu1 %20536 }
 0x89a   :  { %v20539_v1 = vunpack.i.h.bf16 %v20537_v12  ;;  %v20538_v55 = vunpack.i.l.bf16 %v20537_v12  ;;  %v21127_v12 = vpop.eup %21126 }
 0x89b   :  { %v21129_v30 = vpop.eup %21128  ;;  %v9050_v24 = vmul.f32 %v21127_v12, %v25504_v51  ;;  %v28132_v51 = vld [vmem:[#allocation130_spill] sm:$0xff] }
 0x89c   :  { %v19941_v35 = vpack.c.bf16 %v20539_v1, %v20538_v55  ;;  %v8427_v1 = vmul.f32 1.442695, %v8174_v28  ;;  %v9053_v38 = vmul.f32 %v21129_v30, %v25606_v58  ;;  %v8175_v28 = vsub.f32 %v28132_v51, %v25274_v34 }
 0x89d   :  { %v20542_v50 = vpop.permute.xlu1 %20541 }
 0x89e   :  { %v20544_v9 = vunpack.i.h.bf16 %v20542_v50  ;;  %v20543_v2 = vunpack.i.l.bf16 %v20542_v50  ;;  %v25857_v61 = vpop.xlane.xlu0 %8773  ;;  %19942 = vmatprep.subr.bf16.mxu0 %v19941_v35  ;;  %21130 = vpow2.f32 %v8427_v1  ;;  %v8429_v36 = vmul.f32 1.442695, %v8175_v28 }
 0x89f   :  { %19944 = vmatpush3.bf16.msra.mxu0 %v19941_v35  ;;  %21132 = vpow2.f32 %v8431_v7 }
 0x8a0   :  { %v19945_v37 = vpack.c.bf16 %v20544_v9, %v20543_v2  ;;  %21134 = vrcp.f32 %v25749_v13 }
 0x8a1   :  { %v25862_v55 = vpop.f32.mrb[164].mxu0  ;;  %21136 = vrcp.f32 %v25801_v8 }
 0x8a2   :  { %v25865_v62 = vpop.xlane.xlu0 %8776  ;;  %v25867_v50 = vpop.f32.mrb[146].mxu1  ;;  %19019 = vmatmul.mubr.msk.f32.vlgmr.msra.gmra.mrb[172].mxu0 %vm7664_vm5, %v9048_v54  ;;  %19946 = vmatprep.subr.bf16.mxu1 %v19945_v37  ;;  %21138 = vpow2.f32 %v8429_v36 }
 0x8a3   :  { %v25870_v56 = vpop.f32.mrb[165].mxu0  ;;  %v25872_v35 = vpop.f32.mrb[147].mxu1  ;;  %19948 = vmatpush3.bf16.msra.mxu1 %v19945_v37  ;;  %19032 = vmatprep.mubr.msk.f32.mxu0 %vm7664_vm5, %v9051_v32  ;;  %21140 = vrcp.f32 %v25797_v15 }
 0x8a4   :  { %21142 = vrcp.f32 %v25851_v42 }
 0x8a5   :  { %20566 = vrot.lane.b32.xlu0 %v27977_v3, %s21246_s3  ;;  %21144 = vrcp.f32 %v25807_v18 }
 0x8a6   :  { %v25879_v52 = vpop.xlane.xlu0 %8779  ;;  %19026 = vmatmul.mubr.msk.f32.vlgmr.msra.gmra.mrb[154].mxu1 %vm7664_vm5, %v9050_v24  ;;  %21146 = vrcp.f32 %v25865_v62 }
 0x8a7   :  { %19039 = vmatprep.mubr.msk.f32.mxu1 %vm7664_vm5, %v9053_v38  ;;  %21148 = vrcp.f32 %v25857_v61 }
 0x8a8   :  { %v25889_v3 = vpop.eup %21130 }
 0x8a9   :  { %v25891_v2 = vpop.eup %21132  ;;  %v8808_v13 = vsel %vm7664_vm5, %v25889_v3, 0.0 }
 0x8aa   :  { %v25885_v37 = vpop.xlane.xlu0 %8782  ;;  %v21135_v7 = vpop.eup %21134  ;;  %v8814_v34 = vsel %vm7664_vm5, %v25891_v2, 0.0 }
 0x8ab   :  { %v21137_v54 = vpop.eup %21136  ;;  %v9052_v8 = vmul.f32 %v21135_v7, %v25548_v6  ;;  %21150 = vrcp.f32 %v25885_v37 }
 0x8ac   :  { %v9055_v12 = vmul.f32 %v21137_v54, %v25619_v17  ;;  %v25901_v1 = vpop.eup %21138  ;;  %21152 = vrcp.f32 %v25879_v52 }
 0x8ad   :  { %v8811_v32 = vsel %vm7664_vm5, %v25901_v1, 0.0  ;;  %v21141_v42 = vpop.eup %21140 }
 0x8ae   :  { %v20547_v22 = vpop.permute.xlu0 %20546  ;;  %v9054_v28 = vmul.f32 %v21141_v42, %v25602_v63 }
 0x8af   :  { %v20549_v58 = vunpack.i.h.bf16 %v20547_v22  ;;  %v20548_v9 = vunpack.i.l.bf16 %v20547_v22 }
 0x8b1   :  { %v19949_v16 = vpack.c.bf16 %v20549_v58, %v20548_v9 }
 0x8b3   :  { %19950 = vmatprep.subr.bf16.mxu0 %v19949_v16  ;;  %8809 = vadd.xlane.f32.xlu1 %v8808_v13 }
 0x8b4   :  { %19952 = vmatpush3.bf16.msra.mxu0 %v19949_v16 }
 0x8b7   :  { %19033 = vmatmul.mubr.msk.f32.vlgmr.msra.gmra.mrb[174].mxu0 %vm7664_vm5, %v9052_v8  ;;  %8815 = vadd.xlane.f32.xlu1 %v8814_v34 }
 0x8b8   :  { %19046 = vmatprep.mubr.msk.f32.mxu0 %vm7664_vm5, %v9055_v12 }
 0x8c4   :  { %8812 = vadd.xlane.f32.xlu0 %v8811_v32 }
 0x8c8   :  { %20571 = vrot.lane.b32.xlu1 %v27981_v60, %s21246_s3 }
 0x8cc   :  { %20581 = vrot.lane.b32.xlu1 %v28020_v29, %s21246_s3 }
 0x8ce   :  { %v25909_v6 = vpop.xlane.xlu1 %8785 }
 0x8d0   :  { %20586 = vrot.lane.b32.xlu1 %v28033_v47, %s21246_s3 }
 0x8d2   :  { %v25915_v17 = vpop.xlane.xlu1 %8791 }
 0x8d4   :  { %20591 = vrot.lane.b32.xlu1 %v28035_v57, %s21246_s3  ;;  %v21143_v57 = vpop.eup %21142 }
 0x8d5   :  { %v21145_v58 = vpop.eup %21144 }
 0x8d6   :  { %v20552_v30 = vpop.permute.xlu1 %20551  ;;  %v25919_v24 = vpop.f32.mrb[166].mxu0 }
 0x8d7   :  { %v20554_v60 = vunpack.i.h.bf16 %v20552_v30  ;;  %v20553_v38 = vunpack.i.l.bf16 %v20552_v30  ;;  %v25921_v29 = vpop.f32.mrb[148].mxu1  ;;  %v25923_v51 = vpop.f32.mrb[167].mxu0 }
 0x8d8   :  { %v25925_v15 = vpop.f32.mrb[149].mxu1  ;;  %20596 = vrot.lane.b32.xlu1 %v28039_v45, %s21246_s3  ;;  %v9057_v45 = vmul.f32 %v21143_v57, %v25696_v59  ;;  %v21147_v9 = vpop.eup %21146 }
 0x8d9   :  { %v19953_v47 = vpack.c.bf16 %v20554_v60, %v20553_v38  ;;  %v9059_v16 = vmul.f32 %v21147_v9, %v25725_v10  ;;  %v21149_v37 = vpop.eup %21148 }
 0x8da   :  { %20576 = vrot.lane.b32.xlu0 %v28015_v11, %s21246_s3  ;;  %v21151_v8 = vpop.eup %21150  ;;  %v9058_v34 = vmul.f32 %v21149_v37, %v25713_v0 }
 0x8db   :  { %19954 = vmatprep.subr.bf16.mxu1 %v19953_v47  ;;  %v9061_v12 = vmul.f32 %v21151_v8, %v25733_v26  ;;  %v21153_v38 = vpop.eup %21152 }
 0x8dc   :  { %14289 = vrot.lane.b32.xlu1 %v25540_v5, %s21248_s1  ;;  %19956 = vmatpush3.bf16.msra.mxu1 %v19953_v47 }
 0x8de   :  { %14417 = vrot.lane.b32.xlu0 %v25675_v21, %s21249_s28 }
 0x8df   :  { %v8789_v22 = vpop.xlane.xlu0 %8788  ;;  %19040 = vmatmul.mubr.msk.f32.vlgmr.msra.gmra.mrb[156].mxu1 %vm7664_vm5, %v9054_v28 }
 0x8e0   :  { %14291 = vrot.lane.b32.xlu1 %v25536_v44, %s21248_s1  ;;  %19053 = vmatprep.mubr.msk.f32.mxu1 %vm7664_vm5, %v9057_v45  ;;  %v9056_v44 = vmul.f32 %v21145_v58, %v25623_v25  ;;  %21154 = vrcp.f32 %v8789_v22  ;;  %v28133_v22 = vld [vmem:[#allocation112_spill] sm:$0xff] }
 0x8e1   :  { %21156 = vrcp.f32 %v25909_v6 }
 0x8e3   :  { %v8795_v11 = vpop.xlane.xlu0 %8794 }
 0x8e4   :  { %14419 = vrot.lane.b32.xlu1 %v25667_v14, %s21249_s28  ;;  %21158 = vrcp.f32 %v8795_v11 }
 0x8e7   :  { %v20557_v5 = vpop.permute.xlu0 %20556 }
 0x8e8   :  { %v20559_v63 = vunpack.i.h.bf16 %v20557_v5  ;;  %v20558_v21 = vunpack.i.l.bf16 %v20557_v5 }
 0x8ea   :  { %v19957_v59 = vpack.c.bf16 %v20559_v63, %v20558_v21  ;;  %v21155_v47 = vpop.eup %21154 }
 0x8eb   :  { %v9063_v0 = vmul.f32 %v21155_v47, %v25783_v20  ;;  %v21157_v5 = vpop.eup %21156  ;;  %v14741_v47 = vld [vmem:[%s27082_s7 + $0x18] sm:$0xff] }
 0x8ec   :  { %19958 = vmatprep.subr.bf16.mxu0 %v19957_v59 }
 0x8ed   :  { %19960 = vmatpush3.bf16.msra.mxu0 %v19957_v59 }
 0x8f0   :  { %19047 = vmatmul.mubr.msk.f32.vlgmr.msra.gmra.mrb[176].mxu0 %vm7664_vm5, %v9056_v44 }
 0x8f1   :  { %19060 = vmatprep.mubr.msk.f32.mxu0 %vm7664_vm5, %v9059_v16 }
 0x907   :  { %v8798_v18 = vpop.xlane.xlu1 %8797 }
 0x908   :  { %21160 = vrcp.f32 %v8798_v18 }
 0x90b   :  { %v25951_v14 = vpop.xlane.xlu1 %8803  ;;  %v25953_v62 = vpop.f32.mrb[168].mxu0 }
 0x90c   :  { %v18999_v7 = vpop.f32.mrb[150].mxu1  ;;  %v25955_v36 = vpop.f32.mrb[169].mxu0 }
 0x90d   :  { %14547 = vrot.lane.b32.xlu1 %v18999_v7, %s21250_s29  ;;  %v13033_v25 = vpop.f32.mrb[151].mxu1  ;;  %v28134_v7 = vld [vmem:[#allocation74_spill] sm:$0xff] }
 0x90e   :  { %14545 = vrot.lane.b32.xlu0 %v13033_v25, %s21250_s29 }
 0x90f   :  { %v20562_v10 = vpop.permute.xlu1 %20561 }
 0x910   :  { %v20564_v13 = vunpack.i.h.bf16 %v20562_v10  ;;  %v20563_v54 = vunpack.i.l.bf16 %v20562_v10 }
 0x911   :  { %14295 = vrot.lane.b32.xlu1 %v25555_v31, %s21248_s1 }
 0x912   :  { %14293 = vrot.lane.b32.xlu0 %v25557_v53, %s21248_s1  ;;  %v19961_v61 = vpack.c.bf16 %v20564_v13, %v20563_v54  ;;  %v14739_v13 = vld [vmem:[%s27082_s7 + $0x8] sm:$0xff] }
 0x914   :  { %19962 = vmatprep.subr.bf16.mxu1 %v19961_v61 }
 0x915   :  { %14423 = vrot.lane.b32.xlu1 %v25677_v41, %s21249_s28  ;;  %19964 = vmatpush3.bf16.msra.mxu1 %v19961_v61 }
 0x916   :  { %14421 = vrot.lane.b32.xlu0 %v25681_v27, %s21249_s28  ;;  %v9060_v27 = vmul.f32 %v21153_v38, %v25729_v33  ;;  %v14740_v38 = vld [vmem:[%s27082_s7 + $0x10] sm:$0xff] }
 0x918   :  { %v8801_v32 = vpop.xlane.xlu0 %8800  ;;  %19054 = vmatmul.mubr.msk.f32.vlgmr.msra.gmra.mrb[158].mxu1 %vm7664_vm5, %v9058_v34 }
 0x919   :  { %19067 = vmatprep.mubr.msk.f32.mxu1 %vm7664_vm5, %v9061_v12  ;;  %v28136_v12 = vld [vmem:[#allocation86_spill] sm:$0xff] }
 0x91c   :  { %v8807_v31 = vpop.xlane.xlu0 %8806 }
 0x91d   :  { %21162 = vrcp.f32 %v8807_v31 }
 0x920   :  { %v20567_v53 = vpop.permute.xlu0 %20566 }
 0x921   :  { %v20569_v30 = vunpack.i.h.bf16 %v20567_v53  ;;  %v20568_v41 = vunpack.i.l.bf16 %v20567_v53 }
 0x923   :  { %v19965_v60 = vpack.c.bf16 %v20569_v30, %v20568_v41 }
 0x925   :  { %19966 = vmatprep.subr.bf16.mxu0 %v19965_v60 }
 0x926   :  { %19968 = vmatpush3.bf16.msra.mxu0 %v19965_v60 }
 0x929   :  { %19061 = vmatmul.mubr.msk.f32.vlgmr.msra.gmra.mrb[178].mxu0 %vm7664_vm5, %v9060_v27 }
 0x92a   :  { %19074 = vmatprep.mubr.msk.f32.mxu0 %vm7664_vm5, %v9063_v0 }
 0x940   :  { %v8810_v26 = vpop.xlane.xlu1 %8809  ;;  %v19006_v52 = vpop.f32.mrb[170].mxu0 }
 0x941   :  { %14551 = vrot.lane.b32.xlu1 %v19006_v52, %s21250_s29  ;;  %v13114_v42 = vpop.f32.mrb[171].mxu0  ;;  %21164 = vrcp.f32 %v8810_v26 }
 0x942   :  { %14549 = vrot.lane.b32.xlu0 %v13114_v42, %s21250_s29  ;;  %21166 = vrcp.f32 %v25915_v17 }
 0x943   :  { %21168 = vrcp.f32 %v8801_v32 }
 0x944   :  { %v8816_v57 = vpop.xlane.xlu1 %8815  ;;  %21170 = vrcp.f32 %v25951_v14 }
 0x945   :  { %14299 = vrot.lane.b32.xlu1 %v25559_v40, %s21248_s1 }
 0x946   :  { %14297 = vrot.lane.b32.xlu0 %v25561_v19, %s21248_s1  ;;  %v21159_v19 = vpop.eup %21158 }
 0x947   :  { %v21161_v58 = vpop.eup %21160  ;;  %v9065_v18 = vmul.f32 %v21159_v19, %v25787_v39  ;;  %v14738_v39 = vld [vmem:[%s27082_s7] sm:$0xff] }
 0x948   :  { %v20572_v33 = vpop.permute.xlu1 %20571  ;;  %v21163_v44 = vpop.eup %21162  ;;  %v9066_v17 = vmul.f32 %v21161_v58, %v25827_v49  ;;  %v19993_v31 = vpack.c.bf16 %v14739_v13, %v14738_v39  ;;  %v28140_v58 = vld [vmem:[#allocation178_spill] sm:$0xff] }
 0x949   :  { %v20574_v20 = vunpack.i.h.bf16 %v20572_v33  ;;  %v20573_v28 = vunpack.i.l.bf16 %v20572_v33  ;;  %v19013_v45 = vpop.f32.mrb[152].mxu1  ;;  %14427 = vrot.lane.b32.xlu1 %v25683_v43, %s21249_s28  ;;  %v9062_v43 = vmul.f32 %v21157_v5, %v25773_v46  ;;  %v28135_v46 = vld [vmem:[#allocation152_spill] sm:$0xff]  ;;  %v9069_v10 = vmul.f32 %v21163_v44, %v25843_v23  ;;  %v28137_v23 = vld [vmem:[#allocation146_spill] sm:$0xff] }
 0x94a   :  { %v13195_v6 = vpop.f32.mrb[153].mxu1  ;;  %14425 = vrot.lane.b32.xlu0 %v28133_v22, %s21249_s28  ;;  %v19997_v33 = vpack.c.bf16 %v14741_v47, %v14740_v38  ;;  %v28153_v47 = vld [vmem:[#allocation141_spill] sm:$0xff] }
 0x94b   :  { %v19969_v11 = vpack.c.bf16 %v20574_v20, %v20573_v28  ;;  %v21165_v53 = vpop.eup %21164 }
 0x94c   :  { %v20582_v63 = vpop.permute.xlu1 %20581  ;;  %v21167_v60 = vpop.eup %21166  ;;  %v9070_v42 = vmul.f32 %v21165_v53, %v25889_v3  ;;  %v28138_v3 = vld [vmem:[#allocation94_spill] sm:$0xff] }
 0x94d   :  { %v20584_v40 = vunpack.i.h.bf16 %v20582_v63  ;;  %v20583_v21 = vunpack.i.l.bf16 %v20582_v63  ;;  %19970 = vmatprep.subr.bf16.mxu1 %v19969_v11  ;;  %14555 = vrot.lane.b32.xlu1 %v19013_v45, %s21250_s29  ;;  %v21169_v27 = vpop.eup %21168 }
 0x94e   :  { %19972 = vmatpush3.bf16.msra.mxu1 %v19969_v11  ;;  %14553 = vrot.lane.b32.xlu0 %v13195_v6, %s21250_s29  ;;  %v21171_v20 = vpop.eup %21170  ;;  %v9067_v28 = vmul.f32 %v21169_v27, %v25839_v48 }
 0x94f   :  { %v19977_v59 = vpack.c.bf16 %v20584_v40, %v20583_v21  ;;  %v9068_v22 = vmul.f32 %v21171_v20, %v28138_v3  ;;  %v28155_v3 = vld [vmem:[#allocation168_spill] sm:$0xff] }
 0x950   :  { %v20587_v9 = vpop.permute.xlu1 %20586 }
 0x951   :  { %v8813_v16 = vpop.xlane.xlu0 %8812  ;;  %19068 = vmatmul.mubr.msk.f32.vlgmr.msra.gmra.mrb[160].mxu1 %vm7664_vm5, %v9062_v43  ;;  %19978 = vmatprep.subr.bf16.mxu1 %v19977_v59  ;;  %v20589_v37 = vunpack.i.h.bf16 %v20587_v9  ;;  %v20588_v8 = vunpack.i.l.bf16 %v20587_v9  ;;  %v28139_v43 = vld [vmem:[#allocation155_spill] sm:$0xff] }
 0x952   :  { %14303 = vrot.lane.b32.xlu1 %v28134_v7, %s21248_s1  ;;  %19980 = vmatpush3.bf16.msra.mxu1 %v19977_v59  ;;  %21172 = vrcp.f32 %v8813_v16  ;;  %v28141_v9 = vld [vmem:[#allocation59_spill] sm:$0xff]  ;;  %v28142_v16 = vld [vmem:[#allocation121_spill] sm:$0xff] }
 0x953   :  { %19081 = vmatprep.mubr.msk.f32.mxu1 %vm7664_vm5, %v9065_v18  ;;  %14301 = vrot.lane.b32.xlu0 %v28135_v46, %s21248_s1  ;;  %21174 = vrcp.f32 %v8816_v57  ;;  %v19981_v52 = vpack.c.bf16 %v20589_v37, %v20588_v8  ;;  %v9064_v57 = vmul.f32 %v21167_v60, %v25779_v4  ;;  %v28143_v7 = vld [vmem:[#allocation87_spill] sm:$0xff] }
 0x954   :  { %v20592_v25 = vpop.permute.xlu1 %20591  ;;  %v28144_v46 = vld [vmem:[#allocation103_spill] sm:$0xff] }
 0x955   :  { %v20594_v14 = vunpack.i.h.bf16 %v20592_v25  ;;  %v20593_v54 = vunpack.i.l.bf16 %v20592_v25  ;;  %v20577_v61 = vpop.permute.xlu0 %20576  ;;  %19082 = vmatmul.mubr.msk.f32.vlgmr.msra.gmra.mrb[162].mxu1 %vm7664_vm5, %v9066_v17  ;;  %v28147_v8 = vld [vmem:[#allocation119_spill] sm:$0xff] }
 0x956   :  { %v20579_v49 = vunpack.i.h.bf16 %v20577_v61  ;;  %v20578_v34 = vunpack.i.l.bf16 %v20577_v61  ;;  %14431 = vrot.lane.b32.xlu1 %v28136_v12, %s21249_s28  ;;  %19095 = vmatprep.mubr.msk.f32.mxu1 %vm7664_vm5, %v9069_v10  ;;  %v28146_v61 = vld [vmem:[#allocation159_spill] sm:$0xff]  ;;  %v28149_v12 = vld [vmem:[#allocation158_spill] sm:$0xff] }
 0x957   :  { %14429 = vrot.lane.b32.xlu0 %v28137_v23, %s21249_s28  ;;  %v19985_v32 = vpack.c.bf16 %v20594_v14, %v20593_v54  ;;  %v28145_v54 = vld [vmem:[#allocation177_spill] sm:$0xff] }
 0x958   :  { %v20597_v30 = vpop.permute.xlu1 %20596  ;;  %v19973_v41 = vpack.c.bf16 %v20579_v49, %v20578_v34  ;;  %v28148_v34 = vld [vmem:[#allocation187_spill] sm:$0xff]  ;;  %v28150_v23 = vld [vmem:[#allocation161_spill] sm:$0xff] }
 0x959   :  { %19986 = vmatprep.subr.bf16.mxu1 %v19985_v32  ;;  %v20599_v0 = vunpack.i.h.bf16 %v20597_v30  ;;  %v20598_v26 = vunpack.i.l.bf16 %v20597_v30 }
 0x95a   :  { %19974 = vmatprep.subr.bf16.mxu0 %v19973_v41  ;;  %19988 = vmatpush3.bf16.msra.mxu1 %v19985_v32  ;;  %v28151_v32 = vld [vmem:[#allocation69_spill] sm:$0xff] }
 0x95b   :  { %19976 = vmatpush3.bf16.msra.mxu0 %v19973_v41  ;;  %19994 = vmatprep.subr.bf16.mxu1 %v19993_v31  ;;  %v19989_v6 = vpack.c.bf16 %v20599_v0, %v20598_v26 }
 0x95c   :  { %19982 = vmatprep.subr.bf16.mxu0 %v19981_v52  ;;  %v21173_v45 = vpop.eup %21172  ;;  %v14290_v5 = vpop.permute.xlu1 %14289 }
 0x95d   :  { %19096 = vmatmul.mubr.msk.f32.vlgmr.msra.gmra.mrb[164].mxu1 %vm7664_vm5, %v9070_v42  ;;  %v21175_v11 = vpop.eup %21174  ;;  %v9071_v4 = vmul.f32 %v21173_v45, %v25901_v1  ;;  %v14641_v44 = vsel %vm2099_vm3, %v28141_v9, %v14290_v5 }
 0x95e   :  { %19075 = vmatmul.mubr.msk.f32.vlgmr.msra.gmra.mrb[180].mxu0 %vm7664_vm5, %v9064_v57  ;;  %19996 = vmatpush3.bf16.msra.mxu1 %v19993_v31  ;;  %v9072_v48 = vmul.f32 %v21175_v11, %v25891_v2  ;;  %v14418_v2 = vpop.permute.xlu0 %14417  ;;  %v28152_v31 = vld [vmem:[#allocation186_spill] sm:$0xff]  ;;  %v28156_v11 = vld [vmem:[#allocation164_spill] sm:$0xff] }
 0x95f   :  { %19984 = vmatpush3.bf16.msra.mxu0 %v19981_v52  ;;  %19088 = vmatprep.mubr.msk.f32.mxu0 %vm7664_vm5, %v9067_v28  ;;  %v14673_v25 = vsel %vm7664_vm5, %v14641_v44, %v14418_v2  ;;  %v28154_v52 = vld [vmem:[#allocation63_spill] sm:$0xff] }
 0x960   :  { %19990 = vmatprep.subr.bf16.mxu0 %v19989_v6  ;;  %19998 = vmatprep.subr.bf16.mxu1 %v19997_v33  ;;  %v14292_v63 = vpop.permute.xlu1 %14291 }
 0x961   :  { %v14642_v17 = vsel %vm2099_vm3, %v28144_v46, %v14292_v63  ;;  %v28158_v63 = vld [vmem:[#allocation89_spill] sm:$0xff]  ;;  %v28162_v46 = vld [vmem:[#allocation79_spill] sm:$0xff] }
 0x962   :  { %19089 = vmatmul.mubr.msk.f32.vlgmr.msra.gmra.mrb[182].mxu0 %vm7664_vm5, %v9068_v22  ;;  %20000 = vmatpush3.bf16.msra.mxu1 %v19997_v33 }
 0x963   :  { %19992 = vmatpush3.bf16.msra.mxu0 %v19989_v6  ;;  %19102 = vmatprep.mubr.msk.f32.mxu0 %vm7664_vm5, %v9071_v4 }
 0x964   :  { %v14420_v59 = vpop.permute.xlu1 %14419 }
 0x965   :  { %v14674_v39 = vsel %vm7664_vm5, %v14642_v17, %v14420_v59  ;;  %v28163_v17 = vld [vmem:[#allocation114_spill] sm:$0xff] }
 0x966   :  { %19103 = vmatmul.mubr.msk.f32.vlgmr.msra.gmra.mrb[184].mxu0 %vm7664_vm5, %v9072_v48  ;;  %v28157_v48 = vld [vmem:[#allocation88_spill] sm:$0xff] }
 0x975   :  { %v19020_v40 = vpop.f32.mrb[172].mxu0 }
 0x976   :  { %14559 = vrot.lane.b32.xlu1 %v19020_v40, %s21250_s29  ;;  %v13276_v21 = vpop.f32.mrb[173].mxu0  ;;  %v28159_v40 = vld [vmem:[#allocation149_spill] sm:$0xff] }
 0x977   :  { %14557 = vrot.lane.b32.xlu0 %v13276_v21, %s21250_s29 }
 0x979   :  { %v19027_v19 = vpop.f32.mrb[154].mxu1 }
 0x97a   :  { %v13357_v1 = vpop.f32.mrb[155].mxu1  ;;  %14307 = vrot.lane.b32.xlu1 %v28139_v43, %s21248_s1 }
 0x97b   :  { %14305 = vrot.lane.b32.xlu0 %v28140_v58, %s21248_s1 }
 0x97e   :  { %14435 = vrot.lane.b32.xlu1 %v28142_v16, %s21249_s28 }
 0x97f   :  { %v14548_v18 = vpop.permute.xlu1 %14547  ;;  %14433 = vrot.lane.b32.xlu0 %v28143_v7, %s21249_s28  ;;  %v28161_v7 = vld [vmem:[#allocation169_spill] sm:$0xff] }
 0x980   :  { %v14546_v10 = vpop.permute.xlu0 %14545  ;;  %v14707_v14 = vsel %vm14705_vm6, %v14674_v39, %v14548_v18 }
 0x981   :  { %v14706_v13 = vsel %vm14705_vm6, %v14673_v25, %v14546_v10  ;;  %v28164_v25 = vld [vmem:[#allocation90_spill] sm:$0xff] }
 0x982   :  { %19113 = vmatprep.mubr.msk.f32.mxu1 %vm403_vm2, %v14706_v13  ;;  %14563 = vrot.lane.b32.xlu1 %v19027_v19, %s21250_s29 }
 0x983   :  { %19114 = vmatmul.mubr.msk.f32.vlgmr.msra.gmra.mrb[166].mxu1 %vm403_vm2, %v14707_v14  ;;  %14561 = vrot.lane.b32.xlu0 %v13357_v1, %s21250_s29  ;;  %v14296_v53 = vpop.permute.xlu1 %14295  ;;  %v28160_v1 = vld [vmem:[#allocation104_spill] sm:$0xff] }
 0x984   :  { %v14294_v30 = vpop.permute.xlu0 %14293  ;;  %v14644_v42 = vsel %vm2099_vm3, %v28154_v52, %v14296_v53 }
 0x985   :  { %v14643_v27 = vsel %vm2099_vm3, %v28153_v47, %v14294_v30  ;;  %v28167_v47 = vld [vmem:[#allocation173_spill] sm:$0xff] }
 0x986   :  { %14311 = vrot.lane.b32.xlu1 %v28145_v54, %s21248_s1  ;;  %v28165_v54 = vld [vmem:[#allocation116_spill] sm:$0xff] }
 0x987   :  { %14309 = vrot.lane.b32.xlu0 %v28146_v61, %s21248_s1  ;;  %v14424_v41 = vpop.permute.xlu1 %14423 }
 0x988   :  { %v14422_v60 = vpop.permute.xlu0 %14421  ;;  %v14676_v20 = vsel %vm7664_vm5, %v14644_v42, %v14424_v41 }
 0x989   :  { %v14675_v57 = vsel %vm7664_vm5, %v14643_v27, %v14422_v60 }
 0x98a   :  { %v19034_v37 = vpop.f32.mrb[174].mxu0  ;;  %14439 = vrot.lane.b32.xlu1 %v28147_v8, %s21249_s28  ;;  %v28166_v8 = vld [vmem:[#allocation76_spill] sm:$0xff] }
 0x98b   :  { %v13438_v49 = vpop.f32.mrb[175].mxu0  ;;  %14437 = vrot.lane.b32.xlu0 %v28148_v34, %s21249_s28 }
 0x98e   :  { %14567 = vrot.lane.b32.xlu1 %v19034_v37, %s21250_s29 }
 0x98f   :  { %14565 = vrot.lane.b32.xlu0 %v13438_v49, %s21250_s29 }
 0x992   :  { %14315 = vrot.lane.b32.xlu1 %v28149_v12, %s21248_s1 }
 0x993   :  { %14313 = vrot.lane.b32.xlu0 %v28150_v23, %s21248_s1 }
 0x996   :  { %14443 = vrot.lane.b32.xlu1 %v28151_v32, %s21249_s28 }
 0x997   :  { %14441 = vrot.lane.b32.xlu0 %v28152_v31, %s21249_s28 }
 0x9b2   :  { %v19041_v38 = vpop.f32.mrb[156].mxu1 }
 0x9b3   :  { %v13519_v0 = vpop.f32.mrb[157].mxu1  ;;  %v14552_v26 = vpop.permute.xlu1 %14551  ;;  %14571 = vrot.lane.b32.xlu1 %v19041_v38, %s21250_s29 }
 0x9b4   :  { %v14550_v33 = vpop.permute.xlu0 %14549  ;;  %14569 = vrot.lane.b32.xlu0 %v13519_v0, %s21250_s29  ;;  %v14709_v45 = vsel %vm14705_vm6, %v14676_v20, %v14552_v26  ;;  %v28168_v0 = vld [vmem:[#allocation172_spill] sm:$0xff]  ;;  %v28169_v26 = vld [vmem:[#allocation113_spill] sm:$0xff] }
 0x9b5   :  { %v14708_v28 = vsel %vm14705_vm6, %v14675_v57, %v14550_v33  ;;  %v28170_v57 = vld [vmem:[#allocation91_spill] sm:$0xff]  ;;  %v28171_v33 = vld [vmem:[#allocation156_spill] sm:$0xff] }
 0x9b6   :  { %19116 = vmatprep.mubr.msk.f32.mxu1 %vm403_vm2, %v14708_v28 }
 0x9b7   :  { %v14300_v6 = vpop.permute.xlu1 %14299  ;;  %19117 = vmatmul.mubr.msk.f32.gmra.mrb[168].mxu1 %vm403_vm2, %v14709_v45  ;;  %14319 = vrot.lane.b32.xlu1 %v28155_v3, %s21248_s1 }
 0x9b8   :  { %v14298_v22 = vpop.permute.xlu0 %14297  ;;  %14317 = vrot.lane.b32.xlu0 %v28156_v11, %s21248_s1  ;;  %v14646_v43 = vsel %vm2099_vm3, %v28160_v1, %v14300_v6  ;;  %v28172_v6 = vld [vmem:[#allocation93_spill] sm:$0xff] }
 0x9b9   :  { %v14645_v21 = vsel %vm2099_vm3, %v28159_v40, %v14298_v22 }
 0x9bb   :  { %v14428_v4 = vpop.permute.xlu1 %14427  ;;  %14447 = vrot.lane.b32.xlu1 %v28157_v48, %s21249_s28 }
 0x9bc   :  { %v14426_v5 = vpop.permute.xlu0 %14425  ;;  %14445 = vrot.lane.b32.xlu0 %v28158_v63, %s21249_s28  ;;  %v14678_v2 = vsel %vm7664_vm5, %v14646_v43, %v14428_v4 }
 0x9bd   :  { %v14677_v59 = vsel %vm7664_vm5, %v14645_v21, %v14426_v5 }
 0x9bf   :  { %v14556_v19 = vpop.permute.xlu1 %14555 }
 0x9c0   :  { %v14554_v58 = vpop.permute.xlu0 %14553  ;;  %v14711_v44 = vsel %vm14705_vm6, %v14678_v2, %v14556_v19  ;;  %v28173_v19 = vld [vmem:[#allocation151_spill] sm:$0xff] }
 0x9c1   :  { %v14710_v9 = vsel %vm14705_vm6, %v14677_v59, %v14554_v58  ;;  %v28174_v59 = vld [vmem:[#allocation57_spill] sm:$0xff] }
 0x9c2   :  { %19119 = vmatprep.mubr.msk.f32.mxu1 %vm403_vm2, %v14710_v9  ;;  %v28175_v9 = vld [vmem:[#allocation185_spill] sm:$0xff] }
 0x9c3   :  { %v19048_v16 = vpop.f32.mrb[176].mxu0  ;;  %19120 = vmatmul.mubr.msk.f32.gmra.mrb[170].mxu1 %vm403_vm2, %v14711_v44 }
 0x9c4   :  { %14575 = vrot.lane.b32.xlu1 %v19048_v16, %s21250_s29  ;;  %v13600_v18 = vpop.f32.mrb[177].mxu0  ;;  %v14304_v10 = vpop.permute.xlu1 %14303 }
 0x9c5   :  { %14573 = vrot.lane.b32.xlu0 %v13600_v18, %s21250_s29  ;;  %v14302_v39 = vpop.permute.xlu0 %14301  ;;  %v14648_v49 = vsel %vm2099_vm3, %v28166_v8, %v14304_v10 }
 0x9c6   :  { %v14647_v61 = vsel %vm2099_vm3, %v28165_v54, %v14302_v39 }
 0x9c8   :  { %14323 = vrot.lane.b32.xlu1 %v28161_v7, %s21248_s1  ;;  %v14432_v13 = vpop.permute.xlu1 %14431  ;;  %v28176_v7 = vld [vmem:[#allocation176_spill] sm:$0xff] }
 0x9c9   :  { %14321 = vrot.lane.b32.xlu0 %v28162_v46, %s21248_s1  ;;  %v14430_v14 = vpop.permute.xlu0 %14429  ;;  %v14680_v23 = vsel %vm7664_vm5, %v14648_v49, %v14432_v13 }
 0x9ca   :  { %v14679_v34 = vsel %vm7664_vm5, %v14647_v61, %v14430_v14  ;;  %v28179_v61 = vld [vmem:[#allocation109_spill] sm:$0xff] }
 0x9cc   :  { %14451 = vrot.lane.b32.xlu1 %v28163_v17, %s21249_s28  ;;  %v28177_v17 = vld [vmem:[#allocation92_spill] sm:$0xff] }
 0x9cd   :  { %14449 = vrot.lane.b32.xlu0 %v28164_v25, %s21249_s28  ;;  %v28178_v25 = vld [vmem:[#allocation51_spill] sm:$0xff] }
 0x9e8   :  { %v14560_v37 = vpop.permute.xlu1 %14559 }
 0x9e9   :  { %v14558_v12 = vpop.permute.xlu0 %14557  ;;  %v14713_v31 = vsel %vm14705_vm6, %v14680_v23, %v14560_v37 }
 0x9ea   :  { %v14712_v32 = vsel %vm14705_vm6, %v14679_v34, %v14558_v12  ;;  %v28180_v34 = vld [vmem:[#allocation108_spill] sm:$0xff] }
 0x9eb   :  { %v19055_v53 = vpop.f32.mrb[158].mxu1  ;;  %19122 = vmatprep.mubr.msk.f32.mxu1 %vm403_vm2, %v14712_v32 }
 0x9ec   :  { %v13681_v30 = vpop.f32.mrb[159].mxu1  ;;  %v14308_v41 = vpop.permute.xlu1 %14307  ;;  %19123 = vmatmul.mubr.msk.f32.gmra.mrb[172].mxu1 %vm403_vm2, %v14713_v31  ;;  %14579 = vrot.lane.b32.xlu1 %v19055_v53, %s21250_s29 }
 0x9ed   :  { %v14306_v60 = vpop.permute.xlu0 %14305  ;;  %14577 = vrot.lane.b32.xlu0 %v13681_v30, %s21250_s29  ;;  %v14650_v20 = vsel %vm2099_vm3, %v28171_v33, %v14308_v41 }
 0x9ee   :  { %v14649_v52 = vsel %vm2099_vm3, %v28169_v26, %v14306_v60 }
 0x9f0   :  { %v14436_v38 = vpop.permute.xlu1 %14435  ;;  %14327 = vrot.lane.b32.xlu1 %v28167_v47, %s21248_s1  ;;  %v28182_v47 = vld [vmem:[#allocation181_spill] sm:$0xff] }
 0x9f1   :  { %v14434_v27 = vpop.permute.xlu0 %14433  ;;  %14325 = vrot.lane.b32.xlu0 %v28168_v0, %s21248_s1  ;;  %v14682_v3 = vsel %vm7664_vm5, %v14650_v20, %v14436_v38  ;;  %v28181_v38 = vld [vmem:[#allocation175_spill] sm:$0xff] }
 0x9f2   :  { %v14681_v28 = vsel %vm7664_vm5, %v14649_v52, %v14434_v27 }
 0x9f4   :  { %v14564_v42 = vpop.permute.xlu1 %14563  ;;  %14455 = vrot.lane.b32.xlu1 %v28170_v57, %s21249_s28 }
 0x9f5   :  { %v14562_v45 = vpop.permute.xlu0 %14561  ;;  %14453 = vrot.lane.b32.xlu0 %v28172_v6, %s21249_s28  ;;  %v14715_v11 = vsel %vm14705_vm6, %v14682_v3, %v14564_v42 }
 0x9f6   :  { %v14714_v22 = vsel %vm14705_vm6, %v14681_v28, %v14562_v45  ;;  %v28183_v45 = vld [vmem:[#allocation37_spill] sm:$0xff] }
 0x9f7   :  { %19125 = vmatprep.mubr.msk.f32.mxu1 %vm403_vm2, %v14714_v22 }
 0x9f8   :  { %v14312_v4 = vpop.permute.xlu1 %14311  ;;  %19126 = vmatmul.mubr.msk.f32.gmra.mrb[174].mxu1 %vm403_vm2, %v14715_v11 }
 0x9f9   :  { %v14310_v48 = vpop.permute.xlu0 %14309  ;;  %v14652_v58 = vsel %vm2099_vm3, %v28174_v59, %v14312_v4  ;;  %v28188_v59 = vld [vmem:[#allocation184_spill] sm:$0xff] }
 0x9fa   :  { %v14651_v1 = vsel %vm2099_vm3, %v28173_v19, %v14310_v48 }
 0x9fc   :  { %v19062_v5 = vpop.f32.mrb[178].mxu0  ;;  %v14440_v63 = vpop.permute.xlu1 %14439 }
 0x9fd   :  { %14583 = vrot.lane.b32.xlu1 %v19062_v5, %s21250_s29  ;;  %v13762_v40 = vpop.f32.mrb[179].mxu0  ;;  %v14438_v21 = vpop.permute.xlu0 %14437  ;;  %v14684_v16 = vsel %vm7664_vm5, %v14652_v58, %v14440_v63  ;;  %v28186_v5 = vld [vmem:[#allocation183_spill] sm:$0xff] }
 0x9fe   :  { %14581 = vrot.lane.b32.xlu0 %v13762_v40, %s21250_s29  ;;  %v14683_v2 = vsel %vm7664_vm5, %v14651_v1, %v14438_v21 }
 0xa00   :  { %v14568_v43 = vpop.permute.xlu1 %14567 }
 0xa01   :  { %14331 = vrot.lane.b32.xlu1 %v28175_v9, %s21248_s1  ;;  %v14566_v44 = vpop.permute.xlu0 %14565  ;;  %v14717_v46 = vsel %vm14705_vm6, %v14684_v16, %v14568_v43  ;;  %v28187_v43 = vld [vmem:[#allocation182_spill] sm:$0xff]  ;;  %v28192_v16 = vld [vmem:[#allocation3_spill] sm:$0xff] }
 0xa02   :  { %v14716_v18 = vsel %vm14705_vm6, %v14683_v2, %v14566_v44  ;;  %14329 = vrot.lane.b32.xlu0 %v28176_v7, %s21248_s1 }
 0xa03   :  { %19128 = vmatprep.mubr.msk.f32.mxu1 %vm403_vm2, %v14716_v18 }
 0xa04   :  { %19129 = vmatmul.mubr.msk.f32.gmra.mrb[176].mxu1 %vm403_vm2, %v14717_v46  ;;  %v14316_v10 = vpop.permute.xlu1 %14315 }
 0xa05   :  { %14459 = vrot.lane.b32.xlu1 %v28177_v17, %s21249_s28  ;;  %v14314_v39 = vpop.permute.xlu0 %14313  ;;  %v14654_v12 = vsel %vm2099_vm3, %v28180_v34, %v14316_v10  ;;  %v28195_v17 = vld [vmem:[#allocation118_spill] sm:$0xff] }
 0xa06   :  { %14457 = vrot.lane.b32.xlu0 %v28178_v25, %s21249_s28  ;;  %v14653_v37 = vsel %vm2099_vm3, %v28179_v61, %v14314_v39  ;;  %v28196_v39 = vld [vmem:[#allocation120_spill] sm:$0xff] }
 0xa08   :  { %v14444_v13 = vpop.permute.xlu1 %14443 }
 0xa09   :  { %v14442_v14 = vpop.permute.xlu0 %14441  ;;  %v14686_v31 = vsel %vm7664_vm5, %v14654_v12, %v14444_v13 }
 0xa0a   :  { %v14685_v23 = vsel %vm7664_vm5, %v14653_v37, %v14442_v14 }
 0xa24   :  { %v19069_v54 = vpop.f32.mrb[160].mxu1 }
 0xa25   :  { %v13843_v8 = vpop.f32.mrb[161].mxu1  ;;  %v14572_v49 = vpop.permute.xlu1 %14571  ;;  %14587 = vrot.lane.b32.xlu1 %v19069_v54, %s21250_s29 }
 0xa26   :  { %v14570_v32 = vpop.permute.xlu0 %14569  ;;  %14585 = vrot.lane.b32.xlu0 %v13843_v8, %s21250_s29  ;;  %v14719_v30 = vsel %vm14705_vm6, %v14686_v31, %v14572_v49  ;;  %v28198_v31 = vld [vmem:[#allocation138_spill] sm:$0xff] }
 0xa27   :  { %v14718_v53 = vsel %vm14705_vm6, %v14685_v23, %v14570_v32 }
 0xa28   :  { %v19083_v41 = vpop.f32.mrb[162].mxu1  ;;  %19131 = vmatprep.mubr.msk.f32.mxu1 %vm403_vm2, %v14718_v53 }
 0xa29   :  { %v14005_v60 = vpop.f32.mrb[163].mxu1  ;;  %19132 = vmatmul.mubr.msk.f32.gmra.mrb[178].mxu1 %vm403_vm2, %v14719_v30  ;;  %14335 = vrot.lane.b32.xlu1 %v28181_v38, %s21248_s1  ;;  %v14320_v27 = vpop.permute.xlu1 %14319 }
 0xa2a   :  { %14333 = vrot.lane.b32.xlu0 %v28182_v47, %s21248_s1  ;;  %v14318_v0 = vpop.permute.xlu0 %14317 }
 0xa2b   :  { %v14655_v6 = vsel %vm2099_vm3, %v28183_v45, %v14318_v0 }
 0xa2d   :  { %14463 = vrot.lane.b32.xlu1 %v25862_v55, %s21249_s28  ;;  %v14448_v57 = vpop.permute.xlu1 %14447  ;;  %v28184_v55 = vld [vmem:[#allocation180_spill] sm:$0xff] }
 0xa2e   :  { %14461 = vrot.lane.b32.xlu0 %v25870_v56, %s21249_s28  ;;  %v14446_v20 = vpop.permute.xlu0 %14445  ;;  %v28185_v56 = vld [vmem:[#allocation71_spill] sm:$0xff] }
 0xa2f   :  { %v14656_v11 = vsel %vm2099_vm3, %v28185_v56, %v14320_v27  ;;  %v14687_v4 = vsel %vm7664_vm5, %v14655_v6, %v14446_v20 }
 0xa30   :  { %v19097_v26 = vpop.f32.mrb[164].mxu1  ;;  %v14688_v63 = vsel %vm7664_vm5, %v14656_v11, %v14448_v57  ;;  %v28201_v11 = vld [vmem:[#allocation166_spill] sm:$0xff] }
 0xa31   :  { %v19076_v52 = vpop.f32.mrb[180].mxu0  ;;  %v14167_v42 = vpop.f32.mrb[165].mxu1 }
 0xa32   :  { %14591 = vrot.lane.b32.xlu1 %v19076_v52, %s21250_s29  ;;  %v13924_v33 = vpop.f32.mrb[181].mxu0  ;;  %v28199_v52 = vld [vmem:[#allocation4_spill] sm:$0xff] }
 0xa33   :  { %14589 = vrot.lane.b32.xlu0 %v13924_v33, %s21250_s29  ;;  %v28200_v33 = vld [vmem:[#allocation5_spill] sm:$0xff] }
 0xa35   :  { %v19090_v28 = vpop.f32.mrb[182].mxu0 }
 0xa36   :  { %v14576_v3 = vpop.permute.xlu1 %14575  ;;  %14339 = vrot.lane.b32.xlu1 %v28184_v55, %s21248_s1  ;;  %v14086_v22 = vpop.f32.mrb[183].mxu0 }
 0xa37   :  { %v14574_v48 = vpop.permute.xlu0 %14573  ;;  %14337 = vrot.lane.b32.xlu0 %v28186_v5, %s21248_s1  ;;  %v14721_v21 = vsel %vm14705_vm6, %v14688_v63, %v14576_v3 }
 0xa38   :  { %v14720_v40 = vsel %vm14705_vm6, %v14687_v4, %v14574_v48  ;;  %v28202_v48 = vld [vmem:[#allocation6_spill] sm:$0xff] }
 0xa39   :  { %v19104_v19 = vpop.f32.mrb[184].mxu0  ;;  %19134 = vmatprep.mubr.msk.f32.mxu1 %vm403_vm2, %v14720_v40 }
 0xa3a   :  { %19135 = vmatmul.mubr.msk.f32.gmra.mrb[180].mxu1 %vm403_vm2, %v14721_v21  ;;  %14467 = vrot.lane.b32.xlu1 %v25867_v50, %s21249_s28  ;;  %v14248_v1 = vpop.f32.mrb[185].mxu0  ;;  %v28189_v50 = vld [vmem:[#allocation41_spill] sm:$0xff]  ;;  %v28203_v21 = vld [vmem:[#allocation134_spill] sm:$0xff] }
 0xa3b   :  { %14465 = vrot.lane.b32.xlu0 %v25872_v35, %s21249_s28  ;;  %v28190_v35 = vld [vmem:[#allocation80_spill] sm:$0xff]  ;;  %v14322_v58 = vpop.permute.xlu0 %14321 }
 0xa3c   :  { %v14657_v25 = vsel %vm2099_vm3, %v28195_v17, %v14322_v58 }
 0xa3e   :  { %14595 = vrot.lane.b32.xlu1 %v19083_v41, %s21250_s29 }
 0xa3f   :  { %14593 = vrot.lane.b32.xlu0 %v14005_v60, %s21250_s29  ;;  %v14450_v46 = vpop.permute.xlu0 %14449 }
 0xa40   :  { %v14689_v14 = vsel %vm7664_vm5, %v14657_v25, %v14450_v46  ;;  %v28205_v46 = vld [vmem:[#allocation136_spill] sm:$0xff]  ;;  %v28206_v25 = vld [vmem:[#allocation170_spill] sm:$0xff] }
 0xa42   :  { %14343 = vrot.lane.b32.xlu1 %v28187_v43, %s21248_s1  ;;  %v28204_v43 = vld [vmem:[#allocation7_spill] sm:$0xff] }
 0xa43   :  { %14341 = vrot.lane.b32.xlu0 %v28188_v59, %s21248_s1 }
 0xa46   :  { %14471 = vrot.lane.b32.xlu1 %v25919_v24, %s21249_s28  ;;  %v14324_v24 = vpop.permute.xlu1 %14323 }
 0xa47   :  { %14469 = vrot.lane.b32.xlu0 %v25923_v51, %s21249_s28  ;;  %v28191_v51 = vld [vmem:[#allocation2_spill] sm:$0xff]  ;;  %v14658_v13 = vsel %vm2099_vm3, %v28196_v39, %v14324_v24 }
 0xa4a   :  { %14599 = vrot.lane.b32.xlu1 %v19090_v28, %s21250_s29  ;;  %v14452_v7 = vpop.permute.xlu1 %14451 }
 0xa4b   :  { %14597 = vrot.lane.b32.xlu0 %v14086_v22, %s21250_s29  ;;  %v14690_v61 = vsel %vm7664_vm5, %v14658_v13, %v14452_v7 }
 0xa4e   :  { %14347 = vrot.lane.b32.xlu1 %v28189_v50, %s21248_s1 }
 0xa4f   :  { %14345 = vrot.lane.b32.xlu0 %v28190_v35, %s21248_s1 }
 0xa52   :  { %14475 = vrot.lane.b32.xlu1 %v25921_v29, %s21249_s28  ;;  %v28193_v29 = vld [vmem:[#allocation82_spill] sm:$0xff] }
 0xa53   :  { %14473 = vrot.lane.b32.xlu0 %v25925_v15, %s21249_s28  ;;  %v28194_v15 = vld [vmem:[#allocation83_spill] sm:$0xff] }
 0xa56   :  { %v19115_v2 = vpop.f32.mrb[166].mxu1  ;;  %14603 = vrot.lane.b32.xlu1 %v19097_v26, %s21250_s29 }
 0xa57   :  { %v26223_v9 = vadd.f32 %v19115_v2, %v28191_v51  ;;  %v14904_v44 = vpop.f32.mrb[167].mxu1  ;;  %14601 = vrot.lane.b32.xlu0 %v14167_v42, %s21250_s29 }
 0xa58   :  { %v26227_v18 = vadd.f32 %v14904_v44, %v28192_v16 }
 0xa59   :  { %v15098_v0 = vsel %vm403_vm2, %v26223_v9, 0.0 }
 0xa5a   :  { %14351 = vrot.lane.b32.xlu1 %v28193_v29, %s21248_s1  ;;  %v15095_v27 = vsel %vm403_vm2, %v26227_v18, 0.0 }
 0xa5b   :  { %14349 = vrot.lane.b32.xlu0 %v28194_v15, %s21248_s1 }
 0xa5e   :  { %14479 = vrot.lane.b32.xlu1 %v25953_v62, %s21249_s28  ;;  %v14580_v10 = vpop.permute.xlu1 %14579 }
 0xa5f   :  { %14477 = vrot.lane.b32.xlu0 %v25955_v36, %s21249_s28  ;;  %v14578_v54 = vpop.permute.xlu0 %14577  ;;  %v14723_v8 = vsel %vm14705_vm6, %v14690_v61, %v14580_v10  ;;  %v28197_v36 = vld [vmem:[#allocation171_spill] sm:$0xff] }
 0xa60   :  { %v14722_v37 = vsel %vm14705_vm6, %v14689_v14, %v14578_v54 }
 0xa61   :  { %19137 = vmatprep.mubr.msk.f32.mxu1 %vm403_vm2, %v14722_v37 }
 0xa62   :  { %14607 = vrot.lane.b32.xlu1 %v19104_v19, %s21250_s29  ;;  %19138 = vmatmul.mubr.msk.f32.gmra.mrb[182].mxu1 %vm403_vm2, %v14723_v8  ;;  %v14328_v62 = vpop.permute.xlu1 %14327 }
 0xa63   :  { %14605 = vrot.lane.b32.xlu0 %v14248_v1, %s21250_s29  ;;  %v14326_v49 = vpop.permute.xlu0 %14325  ;;  %v14660_v53 = vsel %vm2099_vm3, %v28198_v31, %v14328_v62 }
 0xa64   :  { %v14659_v23 = vsel %vm2099_vm3, %v28197_v36, %v14326_v49 }
 0xa66   :  { %v14456_v34 = vpop.permute.xlu1 %14455 }
 0xa67   :  { %v14454_v12 = vpop.permute.xlu0 %14453  ;;  %v14692_v60 = vsel %vm7664_vm5, %v14660_v53, %v14456_v34  ;;  %v28207_v34 = vld [vmem:[#allocation162_spill] sm:$0xff] }
 0xa68   :  { %v14691_v30 = vsel %vm7664_vm5, %v14659_v23, %v14454_v12  ;;  %v28208_v23 = vld [vmem:[#allocation128_spill] sm:$0xff] }
 0xa6f   :  { %v14584_v32 = vpop.permute.xlu1 %14583 }
 0xa70   :  { %v14582_v41 = vpop.permute.xlu0 %14581  ;;  %v14725_v47 = vsel %vm14705_vm6, %v14692_v60, %v14584_v32 }
 0xa71   :  { %v14724_v38 = vsel %vm14705_vm6, %v14691_v30, %v14582_v41 }
 0xa72   :  { %19140 = vmatprep.mubr.msk.f32.mxu1 %vm403_vm2, %v14724_v38 }
 0xa73   :  { %19141 = vmatmul.mubr.msk.f32.gmra.mrb[184].mxu1 %vm403_vm2, %v14725_v47  ;;  %v14332_v28 = vpop.permute.xlu1 %14331 }
 0xa74   :  { %v14330_v45 = vpop.permute.xlu0 %14329  ;;  %v14662_v19 = vsel %vm2099_vm3, %v28203_v21, %v14332_v28 }
 0xa75   :  { %v14661_v4 = vsel %vm2099_vm3, %v28201_v11, %v14330_v45  ;;  %v28211_v11 = vld [vmem:[#allocation8_spill] sm:$0xff] }
 0xa77   :  { %v14460_v55 = vpop.permute.xlu1 %14459 }
 0xa78   :  { %v14458_v22 = vpop.permute.xlu0 %14457  ;;  %v14694_v35 = vsel %vm7664_vm5, %v14662_v19, %v14460_v55 }
 0xa79   :  { %v14693_v1 = vsel %vm7664_vm5, %v14661_v4, %v14458_v22 }
 0xa82   :  { %15096 = vadd.xlane.f32.xlu0 %v15095_v27 }
 0xa86   :  { %15099 = vadd.xlane.f32.xlu1 %v15098_v0 }
 0xa8a   :  { %v19118_v26 = vpop.f32.mrb[168].mxu1 }
 0xa8b   :  { %v26264_v42 = vadd.f32 %v19118_v26, %v28199_v52  ;;  %v14914_v57 = vpop.f32.mrb[169].mxu1  ;;  %v28209_v26 = vld [vmem:[#allocation148_spill] sm:$0xff] }
 0xa8c   :  { %v26267_v20 = vadd.f32 %v14914_v57, %v28200_v33  ;;  %v28210_v33 = vld [vmem:[#allocation144_spill] sm:$0xff] }
 0xa8d   :  { %v15104_v3 = vsel %vm403_vm2, %v26264_v42, 0.0 }
 0xa8e   :  { %v15101_v6 = vsel %vm403_vm2, %v26267_v20, 0.0 }
 0xa8f   :  { %15102 = vadd.xlane.f32.xlu0 %v15101_v6 }
 0xa93   :  { %15105 = vadd.xlane.f32.xlu0 %v15104_v3 }
 0xa96   :  { %v19121_v56 = vpop.f32.mrb[170].mxu1 }
 0xa97   :  { %v26276_v5 = vadd.f32 %v19121_v56, %v28202_v48  ;;  %v14924_v63 = vpop.f32.mrb[171].mxu1  ;;  %v14588_v40 = vpop.permute.xlu1 %14587 }
 0xa98   :  { %v26282_v59 = vadd.f32 %v14924_v63, %v28204_v43  ;;  %v14586_v50 = vpop.permute.xlu0 %14585  ;;  %v14727_v2 = vsel %vm14705_vm6, %v14694_v35, %v14588_v40  ;;  %v28212_v40 = vld [vmem:[#allocation9_spill] sm:$0xff] }
 0xa99   :  { %v14726_v24 = vsel %vm14705_vm6, %v14693_v1, %v14586_v50  ;;  %v15110_v58 = vsel %vm403_vm2, %v26276_v5, 0.0 }
 0xa9a   :  { %19143 = vmatprep.mubr.msk.f32.mxu1 %vm403_vm2, %v14726_v24  ;;  %15111 = vadd.xlane.f32.xlu1 %v15110_v58  ;;  %v15107_v51 = vsel %vm403_vm2, %v26282_v59, 0.0  ;;  %v28213_v24 = vld [vmem:[#allocation39_spill] sm:$0xff] }
 0xa9b   :  { %v14336_v44 = vpop.permute.xlu1 %14335  ;;  %19144 = vmatmul.mubr.msk.f32.gmra.mrb[186].mxu1 %vm403_vm2, %v14727_v2  ;;  %15108 = vadd.xlane.f32.xlu0 %v15107_v51  ;;  %v28214_v51 = vld [vmem:[#allocation61_spill] sm:$0xff] }
 0xa9c   :  { %v14334_v16 = vpop.permute.xlu0 %14333  ;;  %v14664_v10 = vsel %vm2099_vm3, %v28206_v25, %v14336_v44  ;;  %v28215_v25 = vld [vmem:[#allocation10_spill] sm:$0xff] }
 0xa9d   :  { %v14663_v15 = vsel %vm2099_vm3, %v28205_v46, %v14334_v16 }
 0xa9f   :  { %v14464_v7 = vpop.permute.xlu1 %14463 }
 0xaa0   :  { %v14462_v29 = vpop.permute.xlu0 %14461  ;;  %v14696_v14 = vsel %vm7664_vm5, %v14664_v10, %v14464_v7 }
 0xaa1   :  { %v14695_v39 = vsel %vm7664_vm5, %v14663_v15, %v14462_v29 }
 0xaa4   :  { %v14592_v17 = vpop.permute.xlu1 %14591 }
 0xaa5   :  { %v14590_v13 = vpop.permute.xlu0 %14589  ;;  %v14729_v61 = vsel %vm14705_vm6, %v14696_v14, %v14592_v17  ;;  %v28216_v14 = vld [vmem:[#allocation11_spill] sm:$0xff] }
 0xaa6   :  { %v14728_v54 = vsel %vm14705_vm6, %v14695_v39, %v14590_v13 }
 0xaa7   :  { %19146 = vmatprep.mubr.msk.f32.mxu1 %vm403_vm2, %v14728_v54 }
 0xaa8   :  { %v14340_v37 = vpop.permute.xlu1 %14339  ;;  %19147 = vmatmul.mubr.msk.f32.gmra.mrb[188].mxu1 %vm403_vm2, %v14729_v61 }
 0xaa9   :  { %v14338_v8 = vpop.permute.xlu0 %14337  ;;  %v14666_v32 = vsel %vm2099_vm3, %v28208_v23, %v14340_v37  ;;  %v28218_v23 = vld [vmem:[#allocation65_spill] sm:$0xff] }
 0xaaa   :  { %v14665_v12 = vsel %vm2099_vm3, %v28207_v34, %v14338_v8  ;;  %v28217_v34 = vld [vmem:[#allocation147_spill] sm:$0xff] }
 0xaac   :  { %v14468_v62 = vpop.permute.xlu1 %14467 }
 0xaad   :  { %v14466_v49 = vpop.permute.xlu0 %14465  ;;  %v14698_v30 = vsel %vm7664_vm5, %v14666_v32, %v14468_v62 }
 0xaae   :  { %v14697_v31 = vsel %vm7664_vm5, %v14665_v12, %v14466_v49 }
 0xab0   :  { %v14596_v36 = vpop.permute.xlu1 %14595 }
 0xab1   :  { %v14594_v53 = vpop.permute.xlu0 %14593  ;;  %v14731_v60 = vsel %vm14705_vm6, %v14698_v30, %v14596_v36 }
 0xab2   :  { %v14730_v41 = vsel %vm14705_vm6, %v14697_v31, %v14594_v53 }
 0xab3   :  { %19149 = vmatprep.mubr.msk.f32.mxu1 %vm403_vm2, %v14730_v41 }
 0xab4   :  { %v14344_v38 = vpop.permute.xlu1 %14343  ;;  %19150 = vmatmul.mubr.msk.f32.gmra.mrb[190].mxu1 %vm403_vm2, %v14731_v60 }
 0xab5   :  { %v14342_v47 = vpop.permute.xlu0 %14341  ;;  %v14668_v28 = vsel %vm2099_vm3, %v28210_v33, %v14344_v38 }
 0xab6   :  { %v14667_v52 = vsel %vm2099_vm3, %v28209_v26, %v14342_v47  ;;  %v28219_v47 = vld [vmem:[#allocation12_spill] sm:$0xff]  ;;  %v28220_v26 = vld [vmem:[#allocation13_spill] sm:$0xff] }
 0xab8   :  { %v14472_v27 = vpop.permute.xlu1 %14471 }
 0xab9   :  { %v14470_v0 = vpop.permute.xlu0 %14469  ;;  %v14700_v3 = vsel %vm7664_vm5, %v14668_v28, %v14472_v27 }
 0xaba   :  { %v14699_v45 = vsel %vm7664_vm5, %v14667_v52, %v14470_v0 }
 0xabc   :  { %v14600_v57 = vpop.permute.xlu1 %14599 }
 0xabd   :  { %v14598_v6 = vpop.permute.xlu0 %14597  ;;  %v14733_v22 = vsel %vm14705_vm6, %v14700_v3, %v14600_v57 }
 0xabe   :  { %v14732_v55 = vsel %vm14705_vm6, %v14699_v45, %v14598_v6  ;;  %v28221_v45 = vld [vmem:[#allocation14_spill] sm:$0xff] }
 0xabf   :  { %19152 = vmatprep.mubr.msk.f32.mxu1 %vm403_vm2, %v14732_v55  ;;  %v19124_v56 = vpop.f32.mrb[172].mxu1  ;;  %v28222_v55 = vld [vmem:[#allocation15_spill] sm:$0xff] }
 0xac0   :  { %v26323_v4 = vadd.f32 %v19124_v56, %v28211_v11  ;;  %v14348_v48 = vpop.permute.xlu1 %14347  ;;  %19153 = vmatmul.mubr.msk.f32.gmra.mrb[192].mxu1 %vm403_vm2, %v14733_v22  ;;  %v14934_v63 = vpop.f32.mrb[173].mxu1 }
 0xac1   :  { %v26327_v21 = vadd.f32 %v14934_v63, %v28212_v40  ;;  %v14346_v19 = vpop.permute.xlu0 %14345  ;;  %v14670_v44 = vsel %vm2099_vm3, %v28214_v51, %v14348_v48  ;;  %v28223_v63 = vld [vmem:[#allocation16_spill] sm:$0xff] }
 0xac2   :  { %v15116_v1 = vsel %vm403_vm2, %v26323_v4, 0.0  ;;  %v14669_v58 = vsel %vm2099_vm3, %v28213_v24, %v14346_v19 }
 0xac3   :  { %15117 = vadd.xlane.f32.xlu1 %v15116_v1  ;;  %v15113_v43 = vsel %vm403_vm2, %v26327_v21, 0.0  ;;  %v28225_v1 = vld [vmem:[#allocation17_spill] sm:$0xff] }
 0xac4   :  { %v14476_v50 = vpop.permute.xlu1 %14475  ;;  %15114 = vadd.xlane.f32.xlu0 %v15113_v43 }
 0xac5   :  { %v14474_v35 = vpop.permute.xlu0 %14473  ;;  %v14702_v29 = vsel %vm7664_vm5, %v14670_v44, %v14476_v50  ;;  %v28229_v44 = vld [vmem:[#allocation19_spill] sm:$0xff] }
 0xac6   :  { %v14701_v16 = vsel %vm7664_vm5, %v14669_v58, %v14474_v35  ;;  %v28227_v58 = vld [vmem:[#allocation18_spill] sm:$0xff] }
 0xac8   :  { %v14604_v2 = vpop.permute.xlu1 %14603 }
 0xac9   :  { %v14602_v7 = vpop.permute.xlu0 %14601  ;;  %v14735_v15 = vsel %vm14705_vm6, %v14702_v29, %v14604_v2 }
 0xaca   :  { %v14734_v46 = vsel %vm14705_vm6, %v14701_v16, %v14602_v7 }
 0xacb   :  { %19155 = vmatprep.mubr.msk.f32.mxu1 %vm403_vm2, %v14734_v46  ;;  %v19127_v17 = vpop.f32.mrb[174].mxu1 }
 0xacc   :  { %v26343_v10 = vadd.f32 %v19127_v17, %v28215_v25  ;;  %v14352_v39 = vpop.permute.xlu1 %14351  ;;  %19156 = vmatmul.mubr.msk.f32.gmra.mrb[194].mxu1 %vm403_vm2, %v14735_v15  ;;  %v14944_v13 = vpop.f32.mrb[175].mxu1  ;;  %v28231_v15 = vld [vmem:[#allocation20_spill] sm:$0xff] }
 0xacd   :  { %v26347_v54 = vadd.f32 %v14944_v13, %v28216_v14  ;;  %v14350_v61 = vpop.permute.xlu0 %14349  ;;  %v14672_v32 = vsel %vm2099_vm3, %v28218_v23, %v14352_v39  ;;  %v28233_v39 = vld [vmem:[#allocation21_spill] sm:$0xff] }
 0xace   :  { %v15122_v37 = vsel %vm403_vm2, %v26343_v10, 0.0  ;;  %v14671_v12 = vsel %vm2099_vm3, %v28217_v34, %v14350_v61  ;;  %v28237_v34 = vld [vmem:[#allocation23_spill] sm:$0xff] }
 0xacf   :  { %15123 = vadd.xlane.f32.xlu1 %v15122_v37  ;;  %v15119_v8 = vsel %vm403_vm2, %v26347_v54, 0.0 }
 0xad0   :  { %v14480_v62 = vpop.permute.xlu1 %14479  ;;  %15120 = vadd.xlane.f32.xlu0 %v15119_v8  ;;  %v28235_v8 = vld [vmem:[#allocation22_spill] sm:$0xff] }
 0xad1   :  { %v14478_v49 = vpop.permute.xlu0 %14477  ;;  %v14704_v30 = vsel %vm7664_vm5, %v14672_v32, %v14480_v62 }
 0xad2   :  { %v14703_v31 = vsel %vm7664_vm5, %v14671_v12, %v14478_v49 }
 0xad4   :  { %v14608_v36 = vpop.permute.xlu1 %14607 }
 0xad5   :  { %v14606_v53 = vpop.permute.xlu0 %14605  ;;  %v14737_v60 = vsel %vm14705_vm6, %v14704_v30, %v14608_v36 }
 0xad6   :  { %v14736_v41 = vsel %vm14705_vm6, %v14703_v31, %v14606_v53  ;;  %v28239_v31 = vld [vmem:[#allocation24_spill] sm:$0xff] }
 0xad7   :  { %19158 = vmatprep.mubr.msk.f32.mxu1 %vm403_vm2, %v14736_v41  ;;  %v19130_v38 = vpop.f32.mrb[176].mxu1  ;;  %v28241_v41 = vld [vmem:[#allocation25_spill] sm:$0xff] }
 0xad8   :  { %v26363_v27 = vadd.f32 %v19130_v38, %v28219_v47  ;;  %19159 = vmatmul.mubr.msk.f32.gmra.mrb[196].mxu1 %vm403_vm2, %v14737_v60  ;;  %v14954_v0 = vpop.f32.mrb[177].mxu1 }
 0xad9   :  { %v26367_v52 = vadd.f32 %v14954_v0, %v28220_v26  ;;  %v28243_v26 = vld [vmem:[#allocation26_spill] sm:$0xff] }
 0xada   :  { %v15128_v57 = vsel %vm403_vm2, %v26363_v27, 0.0 }
 0xadb   :  { %15129 = vadd.xlane.f32.xlu1 %v15128_v57  ;;  %v15125_v33 = vsel %vm403_vm2, %v26367_v52, 0.0 }
 0xadc   :  { %15126 = vadd.xlane.f32.xlu0 %v15125_v33 }
 0xafc   :  { %v19133_v28 = vpop.f32.mrb[178].mxu1 }
 0xafd   :  { %v26374_v6 = vadd.f32 %v19133_v28, %v28221_v45  ;;  %v14964_v3 = vpop.f32.mrb[179].mxu1  ;;  %v28245_v28 = vld [vmem:[#allocation27_spill] sm:$0xff] }
 0xafe   :  { %v26377_v22 = vadd.f32 %v14964_v3, %v28222_v55 }
 0xaff   :  { %v15134_v56 = vsel %vm403_vm2, %v26374_v6, 0.0 }
 0xb00   :  { %15135 = vadd.xlane.f32.xlu1 %v15134_v56  ;;  %v15131_v11 = vsel %vm403_vm2, %v26377_v22, 0.0 }
 0xb01   :  { %15132 = vadd.xlane.f32.xlu0 %v15131_v11  ;;  %v28247_v11 = vld [vmem:[#allocation28_spill] sm:$0xff] }
 0xb0d   :  { %v19136_v48 = vpop.f32.mrb[180].mxu1 }
 0xb0e   :  { %v26384_v40 = vadd.f32 %v19136_v48, %v28223_v63  ;;  %v14974_v19 = vpop.f32.mrb[181].mxu1 }
 0xb0f   :  { %v26387_v43 = vadd.f32 %v14974_v19, %v28225_v1  ;;  %v28249_v19 = vld [vmem:[#allocation29_spill] sm:$0xff] }
 0xb10   :  { %28224 = vst [vmem:[#allocation52_spill] sm:$0xff] %v26384_v40  ;;  %v15140_v50 = vsel %vm403_vm2, %v26384_v40, 0.0 }
 0xb11   :  { %28226 = vst [vmem:[#allocation70_spill] sm:$0xff] %v26387_v43  ;;  %15141 = vadd.xlane.f32.xlu1 %v15140_v50  ;;  %v15137_v35 = vsel %vm403_vm2, %v26387_v43, 0.0 }
 0xb12   :  { %15138 = vadd.xlane.f32.xlu0 %v15137_v35 }
 0xb35   :  { %v19139_v24 = vpop.f32.mrb[182].mxu1 }
 0xb36   :  { %v26394_v2 = vadd.f32 %v19139_v24, %v28227_v58  ;;  %v14984_v51 = vpop.f32.mrb[183].mxu1  ;;  %v15097_v24 = vpop.xlane.xlu0 %15096 }
 0xb37   :  { %v26397_v16 = vadd.f32 %v14984_v51, %v28229_v44  ;;  %v28251_v51 = vld [vmem:[#allocation30_spill] sm:$0xff] }
 0xb38   :  { %28228 = vst [vmem:[#allocation54_spill] sm:$0xff] %v26394_v2  ;;  %v15146_v7 = vsel %vm403_vm2, %v26394_v2, 0.0 }
 0xb39   :  { %28230 = vst [vmem:[#allocation73_spill] sm:$0xff] %v26397_v16  ;;  %15147 = vadd.xlane.f32.xlu1 %v15146_v7  ;;  %v15143_v29 = vsel %vm403_vm2, %v26397_v16, 0.0 }
 0xb3a   :  { %15144 = vadd.xlane.f32.xlu0 %v15143_v29  ;;  %v15103_v29 = vpop.xlane.xlu0 %15102 }
 0xb46   :  { %v19142_v46 = vpop.f32.mrb[184].mxu1 }
 0xb47   :  { %v26404_v17 = vadd.f32 %v19142_v46, %v28231_v15  ;;  %v14994_v25 = vpop.f32.mrb[185].mxu1  ;;  %v28253_v46 = vld [vmem:[#allocation31_spill] sm:$0xff] }
 0xb48   :  { %v26407_v13 = vadd.f32 %v14994_v25, %v28233_v39  ;;  %v15100_v39 = vpop.xlane.xlu1 %15099 }
 0xb49   :  { %28232 = vst [vmem:[#allocation77_spill] sm:$0xff] %v26404_v17  ;;  %v15152_v14 = vsel %vm403_vm2, %v26404_v17, 0.0 }
 0xb4a   :  { %28234 = vst [vmem:[#allocation157_spill] sm:$0xff] %v26407_v13  ;;  %15153 = vadd.xlane.f32.xlu1 %v15152_v14  ;;  %v15149_v61 = vsel %vm403_vm2, %v26407_v13, 0.0 }
 0xb4b   :  { %15150 = vadd.xlane.f32.xlu0 %v15149_v61  ;;  %v15192_v61 = vmul.f32 0.03125, %v15100_v39 }
 0xb6e   :  { %v19145_v37 = vpop.f32.mrb[186].mxu1 }
 0xb6f   :  { %v26414_v62 = vadd.f32 %v19145_v37, %v28235_v8  ;;  %v15004_v49 = vpop.f32.mrb[187].mxu1  ;;  %v15191_v37 = vmul.f32 0.03125, %v15097_v24  ;;  %v15106_v8 = vpop.xlane.xlu0 %15105 }
 0xb70   :  { %v26417_v12 = vadd.f32 %v15004_v49, %v28237_v34  ;;  %v26464_v49 = vsub.f32 %v26223_v9, %v15192_v61  ;;  %v15194_v34 = vmul.f32 0.03125, %v15106_v8 }
 0xb71   :  { %28236 = vst [vmem:[#allocation78_spill] sm:$0xff] %v26414_v62  ;;  %v15158_v36 = vsel %vm403_vm2, %v26414_v62, 0.0 }
 0xb72   :  { %28238 = vst [vmem:[#allocation189_spill] sm:$0xff] %v26417_v12  ;;  %15159 = vadd.xlane.f32.xlu1 %v15158_v36  ;;  %v15155_v23 = vsel %vm403_vm2, %v26417_v12, 0.0  ;;  %v26467_v36 = vsub.f32 %v26227_v18, %v15191_v37 }
 0xb73   :  { %15156 = vadd.xlane.f32.xlu0 %v15155_v23  ;;  %v15193_v23 = vmul.f32 0.03125, %v15103_v29 }
 0xb7b   :  { %v19148_v32 = vpop.f32.mrb[188].mxu1 }
 0xb7c   :  { %v26424_v53 = vadd.f32 %v19148_v32, %v28239_v31  ;;  %v15014_v30 = vpop.f32.mrb[189].mxu1  ;;  %v15112_v32 = vpop.xlane.xlu1 %15111 }
 0xb7d   :  { %v26427_v60 = vadd.f32 %v15014_v30, %v28241_v41  ;;  %v15109_v30 = vpop.xlane.xlu0 %15108  ;;  %v28255_v41 = vld [vmem:[#allocation32_spill] sm:$0xff] }
 0xb7e   :  { %28240 = vst [vmem:[#allocation127_spill] sm:$0xff] %v26424_v53  ;;  %v15164_v38 = vsel %vm403_vm2, %v26424_v53, 0.0 }
 0xb7f   :  { %28242 = vst [vmem:[#allocation81_spill] sm:$0xff] %v26427_v60  ;;  %15165 = vadd.xlane.f32.xlu1 %v15164_v38  ;;  %v15161_v47 = vsel %vm403_vm2, %v26427_v60, 0.0 }
 0xb80   :  { %15162 = vadd.xlane.f32.xlu0 %v15161_v47 }
 0xb87   :  { %v19151_v0 = vpop.f32.mrb[190].mxu1 }
 0xb88   :  { %v26434_v57 = vadd.f32 %v19151_v0, %v28243_v26  ;;  %v15024_v33 = vpop.f32.mrb[191].mxu1  ;;  %v28257_v0 = vld [vmem:[#allocation33_spill] sm:$0xff] }
 0xb89   :  { %v26437_v45 = vadd.f32 %v15024_v33, %v28245_v28  ;;  %v26476_v33 = vsub.f32 %v26264_v42, %v15194_v34  ;;  %v15196_v28 = vmul.f32 0.03125, %v15112_v32 }
 0xb8a   :  { %28244 = vst [vmem:[#allocation188_spill] sm:$0xff] %v26434_v57  ;;  %v15170_v3 = vsel %vm403_vm2, %v26434_v57, 0.0 }
 0xb8b   :  { %28246 = vst [vmem:[#allocation68_spill] sm:$0xff] %v26437_v45  ;;  %15171 = vadd.xlane.f32.xlu1 %v15170_v3  ;;  %v15167_v55 = vsel %vm403_vm2, %v26437_v45, 0.0  ;;  %v26490_v24 = vsub.f32 %v26276_v5, %v15196_v28 }
 0xb8c   :  { %15168 = vadd.xlane.f32.xlu0 %v15167_v55  ;;  %v15256_v55 = vmul.f32 %v26464_v49, %v26464_v49 }
 0xb93   :  { %v19154_v56 = vpop.f32.mrb[192].mxu1 }
 0xb94   :  { %v26444_v48 = vadd.f32 %v19154_v56, %v28247_v11  ;;  %v15034_v63 = vpop.f32.mrb[193].mxu1  ;;  %v26483_v56 = vsub.f32 %v26267_v20, %v15193_v23  ;;  %v15195_v11 = vmul.f32 0.03125, %v15109_v30  ;;  %v15260_v23 = vmul.f32 %v26490_v24, %v26490_v24 }
 0xb95   :  { %v26447_v1 = vadd.f32 %v15034_v63, %v28249_v19  ;;  %v15118_v63 = vpop.xlane.xlu1 %15117 }
 0xb96   :  { %28248 = vst [vmem:[#allocation163_spill] sm:$0xff] %v26444_v48  ;;  %v15176_v50 = vsel %vm403_vm2, %v26444_v48, 0.0  ;;  %v26496_v29 = vsub.f32 %v26282_v59, %v15195_v11 }
 0xb97   :  { %28250 = vst [vmem:[#allocation84_spill] sm:$0xff] %v26447_v1  ;;  %15177 = vadd.xlane.f32.xlu1 %v15176_v50  ;;  %v15173_v35 = vsel %vm403_vm2, %v26447_v1, 0.0  ;;  %v15255_v50 = vmul.f32 %v26467_v36, %v26467_v36 }
 0xb98   :  { %15174 = vadd.xlane.f32.xlu0 %v15173_v35  ;;  %v15115_v35 = vpop.xlane.xlu0 %15114 }
 0xb99   :  { %v15287_v39 = vsel %vm403_vm2, %v15255_v50, 0.0 }
 0xb9c   :  { %v15121_v61 = vpop.xlane.xlu0 %15120 }
 0xb9f   :  { %v19157_v58 = vpop.f32.mrb[194].mxu1 }
 0xba0   :  { %v26454_v44 = vadd.f32 %v19157_v58, %v28251_v51  ;;  %v15044_v7 = vpop.f32.mrb[195].mxu1  ;;  %v15198_v58 = vmul.f32 0.03125, %v15118_v63  ;;  %v15290_v51 = vsel %vm403_vm2, %v15256_v55, 0.0  ;;  %v15302_v55 = vsel %vm403_vm2, %v15260_v23, 0.0 }
 0xba1   :  { %v26457_v15 = vadd.f32 %v15044_v7, %v28253_v46  ;;  %v15258_v7 = vmul.f32 %v26476_v33, %v26476_v33  ;;  %v15197_v46 = vmul.f32 0.03125, %v15115_v35 }
 0xba2   :  { %28252 = vst [vmem:[#allocation160_spill] sm:$0xff] %v26454_v44  ;;  %v15182_v25 = vsel %vm403_vm2, %v26454_v44, 0.0  ;;  %v26502_v37 = vsub.f32 %v26323_v4, %v15198_v58 }
 0xba3   :  { %28254 = vst [vmem:[#allocation85_spill] sm:$0xff] %v26457_v15  ;;  %15183 = vadd.xlane.f32.xlu1 %v15182_v25  ;;  %v15179_v14 = vsel %vm403_vm2, %v26457_v15, 0.0  ;;  %v15124_v25 = vpop.xlane.xlu1 %15123  ;;  %v15296_v34 = vsel %vm403_vm2, %v15258_v7, 0.0  ;;  %v26508_v32 = vsub.f32 %v26327_v21, %v15197_v46 }
 0xba4   :  { %15180 = vadd.xlane.f32.xlu0 %v15179_v14  ;;  %v15257_v14 = vmul.f32 %v26483_v56, %v26483_v56  ;;  %v15200_v8 = vmul.f32 0.03125, %v15124_v25  ;;  %v15262_v11 = vmul.f32 %v26502_v37, %v26502_v37 }
 0xba5   :  { %v15261_v58 = vmul.f32 %v26508_v32, %v26508_v32 }
 0xba6   :  { %v26514_v28 = vsub.f32 %v26343_v10, %v15200_v8  ;;  %v15308_v25 = vsel %vm403_vm2, %v15262_v11, 0.0 }
 0xba7   :  { %v15130_v30 = vpop.xlane.xlu1 %15129 }
 0xbab   :  { %v19160_v31 = vpop.f32.mrb[196].mxu1  ;;  %v15136_v50 = vpop.xlane.xlu1 %15135 }
 0xbac   :  { %v26470_v38 = vadd.f32 %v19160_v31, %v28255_v41  ;;  %v15054_v47 = vpop.f32.mrb[197].mxu1  ;;  %v15199_v31 = vmul.f32 0.03125, %v15121_v61  ;;  %v15293_v41 = vsel %vm403_vm2, %v15257_v14, 0.0  ;;  %v15204_v46 = vmul.f32 0.03125, %v15136_v50 }
 0xbad   :  { %v26473_v26 = vadd.f32 %v15054_v47, %v28257_v0  ;;  %v15259_v47 = vmul.f32 %v26496_v29, %v26496_v29  ;;  %v15127_v0 = vpop.xlane.xlu0 %15126 }
 0xbae   :  { %28256 = vst [vmem:[#allocation139_spill] sm:$0xff] %v26470_v38  ;;  %v15188_v3 = vsel %vm403_vm2, %v26470_v38, 0.0  ;;  %v26520_v63 = vsub.f32 %v26347_v54, %v15199_v31 }
 0xbaf   :  { %28258 = vst [vmem:[#allocation133_spill] sm:$0xff] %v26473_v26  ;;  %15189 = vadd.xlane.f32.xlu1 %v15188_v3  ;;  %v15185_v19 = vsel %vm403_vm2, %v26473_v26, 0.0  ;;  %v15202_v3 = vmul.f32 0.03125, %v15130_v30  ;;  %v15299_v35 = vsel %vm403_vm2, %v15259_v47, 0.0  ;;  %v15142_v8 = vpop.xlane.xlu1 %15141  ;;  %v26538_v30 = vsub.f32 %v26374_v6, %v15204_v46 }
 0xbb0   :  { %15186 = vadd.xlane.f32.xlu0 %v15185_v19  ;;  %v15201_v19 = vmul.f32 0.03125, %v15127_v0  ;;  %v15263_v23 = vmul.f32 %v26520_v63, %v26520_v63 }
 0xbb1   :  { %v26526_v7 = vsub.f32 %v26363_v27, %v15202_v3 }
 0xbb2   :  { %v26532_v14 = vsub.f32 %v26367_v52, %v15201_v19  ;;  %v15311_v11 = vsel %vm403_vm2, %v15263_v23, 0.0 }
 0xbb3   :  { %15291 = vadd.xlane.f32.xlu1 %v15290_v51  ;;  %v15133_v51 = vpop.xlane.xlu0 %15132  ;;  %v15266_v0 = vmul.f32 %v26526_v7, %v26526_v7 }
 0xbb4   :  { %15288 = vadd.xlane.f32.xlu0 %v15287_v39  ;;  %v15264_v39 = vmul.f32 %v26514_v28, %v26514_v28  ;;  %v15203_v61 = vmul.f32 0.03125, %v15133_v51  ;;  %v15265_v19 = vmul.f32 %v26532_v14, %v26532_v14  ;;  %v15268_v51 = vmul.f32 %v26538_v30, %v26538_v30 }
 0xbb6   :  { %v15314_v47 = vsel %vm403_vm2, %v15264_v39, 0.0  ;;  %v26544_v3 = vsub.f32 %v26377_v22, %v15203_v61  ;;  %v15317_v39 = vsel %vm403_vm2, %v15265_v19, 0.0 }
 0xbb7   :  { %15297 = vadd.xlane.f32.xlu1 %v15296_v34  ;;  %v15305_v34 = vsel %vm403_vm2, %v15261_v58, 0.0  ;;  %v15139_v31 = vpop.xlane.xlu0 %15138  ;;  %v15320_v58 = vsel %vm403_vm2, %v15266_v0, 0.0 }
 0xbb8   :  { %15294 = vadd.xlane.f32.xlu0 %v15293_v41  ;;  %v15206_v41 = vmul.f32 0.03125, %v15142_v8  ;;  %v15267_v8 = vmul.f32 %v26544_v3, %v26544_v3 }
 0xbba   :  { %v26550_v50 = vsub.f32 %v26384_v40, %v15206_v41  ;;  %v15323_v0 = vsel %vm403_vm2, %v15267_v8, 0.0 }
 0xbbb   :  { %15303 = vadd.xlane.f32.xlu1 %v15302_v55  ;;  %v15205_v55 = vmul.f32 0.03125, %v15139_v31  ;;  %v15326_v31 = vsel %vm403_vm2, %v15268_v51, 0.0  ;;  %v15589_v51 = vld [vmem:[%s27083_s10] sm:$0xff] }
 0xbbc   :  { %15300 = vadd.xlane.f32.xlu0 %v15299_v35  ;;  %v15270_v41 = vmul.f32 %v26550_v50, %v26550_v50 }
 0xbbd   :  { %v26556_v46 = vsub.f32 %v26387_v43, %v15205_v55 }
 0xbbf   :  { %15309 = vadd.xlane.f32.xlu1 %v15308_v25  ;;  %v15269_v55 = vmul.f32 %v26556_v46, %v26556_v46 }
 0xbc0   :  { %15306 = vadd.xlane.f32.xlu0 %v15305_v34 }
 0xbc3   :  { %15315 = vadd.xlane.f32.xlu1 %v15314_v47 }
 0xbc4   :  { %15312 = vadd.xlane.f32.xlu0 %v15311_v11  ;;  %v15332_v11 = vsel %vm403_vm2, %v15270_v41, 0.0 }
 0xbc6   :  { %v15148_v35 = vpop.xlane.xlu1 %15147 }
 0xbc7   :  { %v15208_v25 = vmul.f32 0.03125, %v15148_v35  ;;  %15321 = vadd.xlane.f32.xlu1 %v15320_v58  ;;  %v15145_v61 = vpop.xlane.xlu0 %15144  ;;  %v15329_v35 = vsel %vm403_vm2, %v15269_v55, 0.0 }
 0xbc8   :  { %15318 = vadd.xlane.f32.xlu0 %v15317_v39  ;;  %v15207_v34 = vmul.f32 0.03125, %v15145_v61 }
 0xbc9   :  { %v26562_v23 = vsub.f32 %v26394_v2, %v15208_v25  ;;  %v15590_v25 = vld [vmem:[%s27083_s10 + $0x8] sm:$0xff] }
 0xbca   :  { %v26568_v47 = vsub.f32 %v26397_v16, %v15207_v34  ;;  %v20001_v39 = vpack.c.bf16 %v15590_v25, %v15589_v51  ;;  %v15591_v34 = vld [vmem:[%s27083_s10 + $0x10] sm:$0xff] }
 0xbcb   :  { %15327 = vadd.xlane.f32.xlu1 %v15326_v31  ;;  %v15272_v19 = vmul.f32 %v26562_v23, %v26562_v23  ;;  %v15592_v31 = vld [vmem:[%s27083_s10 + $0x18] sm:$0xff] }
 0xbcc   :  { %15324 = vadd.xlane.f32.xlu0 %v15323_v0  ;;  %v15271_v58 = vmul.f32 %v26568_v47, %v26568_v47  ;;  %20002 = vmatprep.subr.bf16.mxu0 %v20001_v39  ;;  %v20005_v41 = vpack.c.bf16 %v15592_v31, %v15591_v34 }
 0xbcd   :  { %v15338_v61 = vsel %vm403_vm2, %v15272_v19, 0.0  ;;  %20004 = vmatpush3.bf16.msra.mxu0 %v20001_v39 }
 0xbce   :  { %v15335_v8 = vsel %vm403_vm2, %v15271_v58, 0.0  ;;  %20006 = vmatprep.subr.bf16.mxu0 %v20005_v41 }
 0xbcf   :  { %15333 = vadd.xlane.f32.xlu1 %v15332_v11 }
 0xbd0   :  { %15330 = vadd.xlane.f32.xlu0 %v15329_v35 }
 0xbd1   :  { %20008 = vmatpush3.bf16.msra.mxu0 %v20005_v41 }
 0xbd3   :  { %15339 = vadd.xlane.f32.xlu1 %v15338_v61 }
 0xbd4   :  { %15336 = vadd.xlane.f32.xlu0 %v15335_v8 }
 0xbd7   :  { %v15154_v0 = vpop.xlane.xlu1 %15153 }
 0xbd8   :  { %v15210_v55 = vmul.f32 0.03125, %v15154_v0  ;;  %v15151_v11 = vpop.xlane.xlu0 %15150 }
 0xbd9   :  { %v15209_v19 = vmul.f32 0.03125, %v15151_v11 }
 0xbda   :  { %v26594_v35 = vsub.f32 %v26404_v17, %v15210_v55 }
 0xbdb   :  { %v26597_v58 = vsub.f32 %v26407_v13, %v15209_v19 }
 0xbdc   :  { %v15274_v51 = vmul.f32 %v26594_v35, %v26594_v35 }
 0xbdd   :  { %v15273_v25 = vmul.f32 %v26597_v58, %v26597_v58 }
 0xbde   :  { %v15344_v39 = vsel %vm403_vm2, %v15274_v51, 0.0 }
 0xbdf   :  { %15345 = vadd.xlane.f32.xlu1 %v15344_v39  ;;  %v15341_v61 = vsel %vm403_vm2, %v15273_v25, 0.0 }
 0xbe0   :  { %15342 = vadd.xlane.f32.xlu0 %v15341_v61 }
 0xbff   :  { %v15160_v8 = vpop.xlane.xlu1 %15159 }
 0xc00   :  { %v15212_v34 = vmul.f32 0.03125, %v15160_v8  ;;  %v15157_v31 = vpop.xlane.xlu0 %15156 }
 0xc01   :  { %v15211_v41 = vmul.f32 0.03125, %v15157_v31 }
 0xc02   :  { %v26606_v0 = vsub.f32 %v26414_v62, %v15212_v34 }
 0xc03   :  { %v26609_v55 = vsub.f32 %v26417_v12, %v15211_v41 }
 0xc04   :  { %v15276_v11 = vmul.f32 %v26606_v0, %v26606_v0 }
 0xc05   :  { %v15275_v19 = vmul.f32 %v26609_v55, %v26609_v55 }
 0xc06   :  { %v15350_v51 = vsel %vm403_vm2, %v15276_v11, 0.0 }
 0xc07   :  { %15351 = vadd.xlane.f32.xlu1 %v15350_v51  ;;  %v15347_v25 = vsel %vm403_vm2, %v15275_v19, 0.0 }
 0xc08   :  { %15348 = vadd.xlane.f32.xlu0 %v15347_v25 }
 0xc0c   :  { %v15166_v39 = vpop.xlane.xlu1 %15165 }
 0xc0d   :  { %v15214_v61 = vmul.f32 0.03125, %v15166_v39  ;;  %v15163_v8 = vpop.xlane.xlu0 %15162 }
 0xc0e   :  { %v15213_v34 = vmul.f32 0.03125, %v15163_v8 }
 0xc0f   :  { %v26618_v31 = vsub.f32 %v26424_v53, %v15214_v61 }
 0xc10   :  { %v26621_v41 = vsub.f32 %v26427_v60, %v15213_v34 }
 0xc11   :  { %v15278_v62 = vmul.f32 %v26618_v31, %v26618_v31 }
 0xc12   :  { %v15277_v11 = vmul.f32 %v26621_v41, %v26621_v41 }
 0xc13   :  { %v15356_v51 = vsel %vm403_vm2, %v15278_v62, 0.0 }
 0xc14   :  { %15357 = vadd.xlane.f32.xlu1 %v15356_v51  ;;  %v15353_v19 = vsel %vm403_vm2, %v15277_v11, 0.0 }
 0xc15   :  { %15354 = vadd.xlane.f32.xlu0 %v15353_v19 }
 0xc18   :  { %v15172_v25 = vpop.xlane.xlu1 %15171 }
 0xc19   :  { %v15216_v39 = vmul.f32 0.03125, %v15172_v25  ;;  %v15169_v8 = vpop.xlane.xlu0 %15168 }
 0xc1a   :  { %v15215_v61 = vmul.f32 0.03125, %v15169_v8 }
 0xc1b   :  { %v26630_v53 = vsub.f32 %v26434_v57, %v15216_v39 }
 0xc1c   :  { %v26633_v34 = vsub.f32 %v26437_v45, %v15215_v61 }
 0xc1d   :  { %v15280_v60 = vmul.f32 %v26630_v53, %v26630_v53 }
 0xc1e   :  { %v15279_v62 = vmul.f32 %v26633_v34, %v26633_v34 }
 0xc1f   :  { %v15362_v51 = vsel %vm403_vm2, %v15280_v60, 0.0 }
 0xc20   :  { %15363 = vadd.xlane.f32.xlu1 %v15362_v51  ;;  %v15359_v11 = vsel %vm403_vm2, %v15279_v62, 0.0 }
 0xc21   :  { %15360 = vadd.xlane.f32.xlu0 %v15359_v11 }
 0xc24   :  { %v15178_v19 = vpop.xlane.xlu1 %15177 }
 0xc25   :  { %v15218_v25 = vmul.f32 0.03125, %v15178_v19  ;;  %v15175_v8 = vpop.xlane.xlu0 %15174 }
 0xc26   :  { %v15217_v39 = vmul.f32 0.03125, %v15175_v8 }
 0xc27   :  { %v26642_v57 = vsub.f32 %v26444_v48, %v15218_v25 }
 0xc28   :  { %v26645_v61 = vsub.f32 %v26447_v1, %v15217_v39 }
 0xc29   :  { %v15282_v45 = vmul.f32 %v26642_v57, %v26642_v57 }
 0xc2a   :  { %v15281_v60 = vmul.f32 %v26645_v61, %v26645_v61 }
 0xc2b   :  { %v15368_v51 = vsel %vm403_vm2, %v15282_v45, 0.0 }
 0xc2c   :  { %15369 = vadd.xlane.f32.xlu1 %v15368_v51  ;;  %v15365_v62 = vsel %vm403_vm2, %v15281_v60, 0.0 }
 0xc2d   :  { %15366 = vadd.xlane.f32.xlu0 %v15365_v62 }
 0xc30   :  { %v15184_v11 = vpop.xlane.xlu1 %15183 }
 0xc31   :  { %v15220_v19 = vmul.f32 0.03125, %v15184_v11  ;;  %v15181_v8 = vpop.xlane.xlu0 %15180 }
 0xc32   :  { %v15219_v25 = vmul.f32 0.03125, %v15181_v8 }
 0xc33   :  { %v26654_v48 = vsub.f32 %v26454_v44, %v15220_v19 }
 0xc34   :  { %v26657_v39 = vsub.f32 %v26457_v15, %v15219_v25 }
 0xc35   :  { %v15284_v1 = vmul.f32 %v26654_v48, %v26654_v48 }
 0xc36   :  { %v15283_v45 = vmul.f32 %v26657_v39, %v26657_v39 }
 0xc37   :  { %v15374_v51 = vsel %vm403_vm2, %v15284_v1, 0.0 }
 0xc38   :  { %15375 = vadd.xlane.f32.xlu1 %v15374_v51  ;;  %v15371_v60 = vsel %vm403_vm2, %v15283_v45, 0.0 }
 0xc39   :  { %15372 = vadd.xlane.f32.xlu0 %v15371_v60 }
 0xc3c   :  { %v15190_v62 = vpop.xlane.xlu1 %15189 }
 0xc3d   :  { %v15222_v11 = vmul.f32 0.03125, %v15190_v62  ;;  %v15187_v8 = vpop.xlane.xlu0 %15186 }
 0xc3e   :  { %v15221_v19 = vmul.f32 0.03125, %v15187_v8 }
 0xc3f   :  { %v26666_v44 = vsub.f32 %v26470_v38, %v15222_v11 }
 0xc40   :  { %v26669_v25 = vsub.f32 %v26473_v26, %v15221_v19  ;;  %v15292_v15 = vpop.xlane.xlu1 %15291 }
 0xc41   :  { %v15384_v12 = vmul.f32 0.03125, %v15292_v15  ;;  %v15289_v17 = vpop.xlane.xlu0 %15288  ;;  %v15286_v1 = vmul.f32 %v26666_v44, %v26666_v44 }
 0xc42   :  { %v15383_v51 = vmul.f32 0.03125, %v15289_v17  ;;  %v15285_v45 = vmul.f32 %v26669_v25, %v26669_v25 }
 0xc43   :  { %v15416_v60 = vadd.f32 1e-05, %v15384_v12  ;;  %v15380_v62 = vsel %vm403_vm2, %v15286_v1, 0.0 }
 0xc44   :  { %v15415_v8 = vadd.f32 1e-05, %v15383_v51  ;;  %15381 = vadd.xlane.f32.xlu1 %v15380_v62  ;;  %v15298_v11 = vpop.xlane.xlu1 %15297  ;;  %v15377_v38 = vsel %vm403_vm2, %v15285_v45, 0.0 }
 0xc45   :  { %21176 = vrsqrt.f32 %v15416_v60  ;;  %v15386_v19 = vmul.f32 0.03125, %v15298_v11  ;;  %15378 = vadd.xlane.f32.xlu0 %v15377_v38  ;;  %v15295_v15 = vpop.xlane.xlu0 %15294 }
 0xc46   :  { %21178 = vrsqrt.f32 %v15415_v8  ;;  %v15385_v26 = vmul.f32 0.03125, %v15295_v15 }
 0xc47   :  { %v15418_v13 = vadd.f32 1e-05, %v15386_v19 }
 0xc48   :  { %v15417_v2 = vadd.f32 1e-05, %v15385_v26  ;;  %v15304_v17 = vpop.xlane.xlu1 %15303  ;;  %v26680_v26 = vld [vmem:[%s27084_s8] ss:$0 sm:$0xff] }
 0xc49   :  { %21180 = vrsqrt.f32 %v15418_v13  ;;  %v15388_v16 = vmul.f32 0.03125, %v15304_v17  ;;  %v15301_v40 = vpop.xlane.xlu0 %15300 }
 0xc4a   :  { %21182 = vrsqrt.f32 %v15417_v2  ;;  %v15387_v12 = vmul.f32 0.03125, %v15301_v40 }
 0xc4b   :  { %v15420_v1 = vadd.f32 1e-05, %v15388_v16 }
 0xc4c   :  { %v15419_v51 = vadd.f32 1e-05, %v15387_v12  ;;  %v15310_v62 = vpop.xlane.xlu1 %15309 }
 0xc4d   :  { %21184 = vrsqrt.f32 %v15420_v1  ;;  %v15390_v43 = vmul.f32 0.03125, %v15310_v62  ;;  %v15307_v45 = vpop.xlane.xlu0 %15306 }
 0xc4e   :  { %21186 = vrsqrt.f32 %v15419_v51  ;;  %v15389_v60 = vmul.f32 0.03125, %v15307_v45 }
 0xc4f   :  { %v21177_v38 = vpop.eup %21176  ;;  %v15422_v11 = vadd.f32 1e-05, %v15390_v43  ;;  %v26687_v43 = vld [vmem:[%s27085_s9] ss:$0 sm:$0xff] }
 0xc50   :  { %v21179_v13 = vpop.eup %21178  ;;  %v15480_v8 = vmul.f32 %v21177_v38, %v26464_v49  ;;  %v15421_v2 = vadd.f32 1e-05, %v15389_v60  ;;  %v15316_v40 = vpop.xlane.xlu1 %15315 }
 0xc51   :  { %21188 = vrsqrt.f32 %v15422_v11  ;;  %v15392_v16 = vmul.f32 0.03125, %v15316_v40  ;;  %v15313_v19 = vpop.xlane.xlu0 %15312  ;;  %v15479_v15 = vmul.f32 %v21179_v13, %v26467_v36 }
 0xc52   :  { %21190 = vrsqrt.f32 %v15421_v2  ;;  %v15391_v17 = vmul.f32 0.03125, %v15313_v19  ;;  %v15519_v12 = vmul.f32 %v26680_v26, %v15480_v8 }
 0xc53   :  { %v21181_v1 = vpop.eup %21180  ;;  %v15424_v51 = vadd.f32 1e-05, %v15392_v16  ;;  %v15518_v49 = vmul.f32 %v26680_v26, %v15479_v15 }
 0xc54   :  { %v21183_v62 = vpop.eup %21182  ;;  %v15423_v45 = vadd.f32 1e-05, %v15391_v17  ;;  %v15322_v60 = vpop.xlane.xlu1 %15321  ;;  %v15482_v38 = vmul.f32 %v21181_v1, %v26476_v33  ;;  %v15558_v8 = vadd.f32 %v26687_v43, %v15519_v12 }
 0xc55   :  { %21192 = vrsqrt.f32 %v15424_v51  ;;  %v15394_v36 = vmul.f32 0.03125, %v15322_v60  ;;  %v15319_v11 = vpop.xlane.xlu0 %15318  ;;  %v15557_v13 = vadd.f32 %v26687_v43, %v15518_v49  ;;  %v15481_v2 = vmul.f32 %v21183_v62, %v26483_v56 }
 0xc56   :  { %21194 = vrsqrt.f32 %v15423_v45  ;;  %v15393_v40 = vmul.f32 0.03125, %v15319_v11  ;;  %v15521_v16 = vmul.f32 %v26680_v26, %v15482_v38 }
 0xc57   :  { %v21185_v19 = vpop.eup %21184  ;;  %v15426_v15 = vadd.f32 1e-05, %v15394_v36  ;;  %19169 = vmatprep.mubr.msk.f32.mxu0 %vm403_vm2, %v15557_v13  ;;  %v15520_v17 = vmul.f32 %v26680_v26, %v15481_v2 }
 0xc58   :  { %v21187_v33 = vpop.eup %21186  ;;  %v15425_v1 = vadd.f32 1e-05, %v15393_v40  ;;  %v15328_v51 = vpop.xlane.xlu1 %15327  ;;  %19170 = vmatmul.mubr.msk.f32.vlgmr.msra.gmra.mrb[186].mxu0 %vm403_vm2, %v15558_v8  ;;  %v15484_v49 = vmul.f32 %v21185_v19, %v26490_v24  ;;  %v15560_v38 = vadd.f32 %v26687_v43, %v15521_v16 }
 0xc59   :  { %21196 = vrsqrt.f32 %v15426_v15  ;;  %v15396_v56 = vmul.f32 0.03125, %v15328_v51  ;;  %v15325_v62 = vpop.xlane.xlu0 %15324  ;;  %v15559_v12 = vadd.f32 %v26687_v43, %v15520_v17  ;;  %v15483_v45 = vmul.f32 %v21187_v33, %v26496_v29 }
 0xc5a   :  { %21198 = vrsqrt.f32 %v15425_v1  ;;  %v15395_v60 = vmul.f32 0.03125, %v15325_v62  ;;  %v15523_v36 = vmul.f32 %v26680_v26, %v15484_v49 }
 0xc5b   :  { %v21189_v11 = vpop.eup %21188  ;;  %v15428_v13 = vadd.f32 1e-05, %v15396_v56  ;;  %19172 = vmatprep.mubr.msk.f32.mxu0 %vm403_vm2, %v15559_v12  ;;  %v15522_v2 = vmul.f32 %v26680_v26, %v15483_v45 }
 0xc5c   :  { %v21191_v24 = vpop.eup %21190  ;;  %v15427_v40 = vadd.f32 1e-05, %v15395_v60  ;;  %v15334_v8 = vpop.xlane.xlu1 %15333  ;;  %19173 = vmatmul.mubr.msk.f32.gmra.mrb[188].mxu0 %vm403_vm2, %v15560_v38  ;;  %v15486_v19 = vmul.f32 %v21189_v11, %v26502_v37  ;;  %v15562_v1 = vadd.f32 %v26687_v43, %v15523_v36 }
 0xc5d   :  { %21200 = vrsqrt.f32 %v15428_v13  ;;  %v15398_v29 = vmul.f32 0.03125, %v15334_v8  ;;  %v15331_v15 = vpop.xlane.xlu0 %15330  ;;  %v15561_v16 = vadd.f32 %v26687_v43, %v15522_v2  ;;  %v15485_v17 = vmul.f32 %v21191_v24, %v26508_v32 }
 0xc5e   :  { %21202 = vrsqrt.f32 %v15427_v40  ;;  %v15397_v33 = vmul.f32 0.03125, %v15331_v15  ;;  %v15525_v51 = vmul.f32 %v26680_v26, %v15486_v19 }
 0xc5f   :  { %v21193_v49 = vpop.eup %21192  ;;  %v15430_v56 = vadd.f32 1e-05, %v15398_v29  ;;  %19175 = vmatprep.mubr.msk.f32.mxu0 %vm403_vm2, %v15561_v16  ;;  %v15524_v62 = vmul.f32 %v26680_v26, %v15485_v17 }
 0xc60   :  { %v21195_v37 = vpop.eup %21194  ;;  %v15429_v12 = vadd.f32 1e-05, %v15397_v33  ;;  %v15340_v45 = vpop.xlane.xlu1 %15339  ;;  %19176 = vmatmul.mubr.msk.f32.gmra.mrb[190].mxu0 %vm403_vm2, %v15562_v1  ;;  %v15488_v60 = vmul.f32 %v21193_v49, %v26514_v28  ;;  %v15564_v2 = vadd.f32 %v26687_v43, %v15525_v51 }
 0xc61   :  { %21204 = vrsqrt.f32 %v15430_v56  ;;  %v15400_v32 = vmul.f32 0.03125, %v15340_v45  ;;  %v15337_v38 = vpop.xlane.xlu0 %15336  ;;  %v15563_v36 = vadd.f32 %v26687_v43, %v15524_v62  ;;  %v15487_v11 = vmul.f32 %v21195_v37, %v26520_v63  ;;  %v15947_v45 = vld [vmem:[%s27086_s11 + $0x8] sm:$0xff] }
 0xc62   :  { %21206 = vrsqrt.f32 %v15429_v12  ;;  %v15399_v13 = vmul.f32 0.03125, %v15337_v38  ;;  %v15527_v24 = vmul.f32 %v26680_v26, %v15488_v60  ;;  %v15946_v12 = vld [vmem:[%s27086_s11] sm:$0xff]  ;;  %v15949_v38 = vld [vmem:[%s27086_s11 + $0x18] sm:$0xff] }
 0xc63   :  { %v21197_v40 = vpop.eup %21196  ;;  %v15432_v8 = vadd.f32 1e-05, %v15400_v32  ;;  %19178 = vmatprep.mubr.msk.f32.mxu0 %vm403_vm2, %v15563_v36  ;;  %v15526_v19 = vmul.f32 %v26680_v26, %v15487_v11  ;;  %v20009_v32 = vpack.c.bf16 %v15947_v45, %v15946_v12 }
 0xc64   :  { %v21199_v28 = vpop.eup %21198  ;;  %v15431_v29 = vadd.f32 1e-05, %v15399_v13  ;;  %19179 = vmatmul.mubr.msk.f32.gmra.mrb[192].mxu0 %vm403_vm2, %v15564_v2  ;;  %v15490_v15 = vmul.f32 %v21197_v40, %v26526_v7  ;;  %v15566_v17 = vadd.f32 %v26687_v43, %v15527_v24  ;;  %v15950_v24 = vld [vmem:[%s27086_s11 + $0x20] sm:$0xff]  ;;  %v15951_v40 = vld [vmem:[%s27086_s11 + $0x28] sm:$0xff] }
 0xc65   :  { %21208 = vrsqrt.f32 %v15432_v8  ;;  %v15565_v63 = vadd.f32 %v26687_v43, %v15526_v19  ;;  %v15489_v16 = vmul.f32 %v21199_v28, %v26532_v14  ;;  %20010 = vmatprep.subr.bf16.mxu1 %v20009_v32 }
 0xc66   :  { %21210 = vrsqrt.f32 %v15431_v29  ;;  %v15529_v33 = vmul.f32 %v26680_v26, %v15490_v15  ;;  %20012 = vmatpush3.bf16.msra.mxu1 %v20009_v32 }
 0xc67   :  { %v21201_v1 = vpop.eup %21200  ;;  %19181 = vmatprep.mubr.msk.f32.mxu0 %vm403_vm2, %v15565_v63  ;;  %v15528_v51 = vmul.f32 %v26680_v26, %v15489_v16 }
 0xc68   :  { %v21203_v49 = vpop.eup %21202  ;;  %19182 = vmatmul.mubr.msk.f32.gmra.mrb[194].mxu0 %vm403_vm2, %v15566_v17  ;;  %v15492_v7 = vmul.f32 %v21201_v1, %v26538_v30  ;;  %v15568_v14 = vadd.f32 %v26687_v43, %v15529_v33  ;;  %v15948_v30 = vld [vmem:[%s27086_s11 + $0x10] sm:$0xff]  ;;  %v20017_v1 = vpack.c.bf16 %v15951_v40, %v15950_v24 }
 0xc69   :  { %v15567_v56 = vadd.f32 %v26687_v43, %v15528_v51  ;;  %v15491_v62 = vmul.f32 %v21203_v49, %v26544_v3  ;;  %v20013_v2 = vpack.c.bf16 %v15949_v38, %v15948_v30 }
 0xc6a   :  { %v15531_v37 = vmul.f32 %v26680_v26, %v15492_v7 }
 0xc6b   :  { %v21205_v60 = vpop.eup %21204  ;;  %19184 = vmatprep.mubr.msk.f32.mxu0 %vm403_vm2, %v15567_v56  ;;  %v15530_v3 = vmul.f32 %v26680_v26, %v15491_v62  ;;  %20014 = vmatprep.subr.bf16.mxu1 %v20013_v2 }
 0xc6c   :  { %v21207_v36 = vpop.eup %21206  ;;  %v15346_v11 = vpop.xlane.xlu1 %15345  ;;  %19185 = vmatmul.mubr.msk.f32.gmra.mrb[196].mxu0 %vm403_vm2, %v15568_v14  ;;  %v15494_v13 = vmul.f32 %v21205_v60, %v26550_v50  ;;  %v15570_v63 = vadd.f32 %v26687_v43, %v15531_v37  ;;  %20016 = vmatpush3.bf16.msra.mxu1 %v20013_v2 }
 0xc6d   :  { %v15402_v8 = vmul.f32 0.03125, %v15346_v11  ;;  %v15343_v19 = vpop.xlane.xlu0 %15342  ;;  %v15569_v28 = vadd.f32 %v26687_v43, %v15530_v3  ;;  %v15493_v29 = vmul.f32 %v21207_v36, %v26556_v46  ;;  %20018 = vmatprep.subr.bf16.mxu1 %v20017_v1 }
 0xc6e   :  { %v15401_v15 = vmul.f32 0.03125, %v15343_v19  ;;  %v15533_v50 = vmul.f32 %v26680_v26, %v15494_v13 }
 0xc6f   :  { %v21209_v16 = vpop.eup %21208  ;;  %v15434_v17 = vadd.f32 1e-05, %v15402_v8  ;;  %19187 = vmatprep.mubr.msk.f32.mxu0 %vm403_vm2, %v15569_v28  ;;  %v15532_v33 = vmul.f32 %v26680_v26, %v15493_v29 }
 0xc70   :  { %v21211_v51 = vpop.eup %21210  ;;  %v15433_v49 = vadd.f32 1e-05, %v15401_v15  ;;  %19188 = vmatmul.mubr.msk.f32.gmra.mrb[198].mxu0 %vm403_vm2, %v15570_v63  ;;  %v15496_v46 = vmul.f32 %v21209_v16, %v26562_v23  ;;  %v15572_v62 = vadd.f32 %v26687_v43, %v15533_v50  ;;  %20020 = vmatpush3.bf16.msra.mxu1 %v20017_v1 }
 0xc71   :  { %21212 = vrsqrt.f32 %v15434_v17  ;;  %v15571_v7 = vadd.f32 %v26687_v43, %v15532_v33  ;;  %v15495_v56 = vmul.f32 %v21211_v51, %v26568_v47 }
 0xc72   :  { %21214 = vrsqrt.f32 %v15433_v49  ;;  %v15535_v14 = vmul.f32 %v26680_v26, %v15496_v46 }
 0xc73   :  { %19190 = vmatprep.mubr.msk.f32.mxu0 %vm403_vm2, %v15571_v7  ;;  %v15534_v37 = vmul.f32 %v26680_v26, %v15495_v56 }
 0xc74   :  { %19191 = vmatmul.mubr.msk.f32.gmra.mrb[200].mxu0 %vm403_vm2, %v15572_v62  ;;  %v15574_v12 = vadd.f32 %v26687_v43, %v15535_v14 }
 0xc75   :  { %v15573_v23 = vadd.f32 %v26687_v43, %v15534_v37 }
 0xc77   :  { %19193 = vmatprep.mubr.msk.f32.mxu0 %vm403_vm2, %v15573_v23 }
 0xc78   :  { %19194 = vmatmul.mubr.msk.f32.gmra.mrb[202].mxu0 %vm403_vm2, %v15574_v12 }
 0xc7b   :  { %v21213_v47 = vpop.eup %21212 }
 0xc7c   :  { %v21215_v45 = vpop.eup %21214  ;;  %v15498_v30 = vmul.f32 %v21213_v47, %v26594_v35 }
 0xc7d   :  { %v15497_v60 = vmul.f32 %v21215_v45, %v26597_v58 }
 0xc7e   :  { %v15537_v3 = vmul.f32 %v26680_v26, %v15498_v30 }
 0xc7f   :  { %v15536_v32 = vmul.f32 %v26680_v26, %v15497_v60 }
 0xc80   :  { %v15576_v36 = vadd.f32 %v26687_v43, %v15537_v3 }
 0xc81   :  { %v15575_v38 = vadd.f32 %v26687_v43, %v15536_v32 }
 0xc83   :  { %19196 = vmatprep.mubr.msk.f32.mxu0 %vm403_vm2, %v15575_v38 }
 0xc84   :  { %19197 = vmatmul.mubr.msk.f32.gmra.mrb[204].mxu0 %vm403_vm2, %v15576_v36 }
 0xc94   :  { %v15352_v11 = vpop.xlane.xlu1 %15351 }
 0xc95   :  { %v15404_v13 = vmul.f32 0.03125, %v15352_v11  ;;  %v15349_v2 = vpop.xlane.xlu0 %15348 }
 0xc96   :  { %v15403_v24 = vmul.f32 0.03125, %v15349_v2 }
 0xc97   :  { %v15436_v40 = vadd.f32 1e-05, %v15404_v13 }
 0xc98   :  { %v15435_v35 = vadd.f32 1e-05, %v15403_v24 }
 0xc99   :  { %21216 = vrsqrt.f32 %v15436_v40 }
 0xc9a   :  { %21218 = vrsqrt.f32 %v15435_v35 }
 0xca1   :  { %v15358_v58 = vpop.xlane.xlu1 %15357 }
 0xca2   :  { %v15406_v8 = vmul.f32 0.03125, %v15358_v58  ;;  %v15355_v19 = vpop.xlane.xlu0 %15354 }
 0xca3   :  { %v21217_v28 = vpop.eup %21216  ;;  %v15405_v29 = vmul.f32 0.03125, %v15355_v19 }
 0xca4   :  { %v21219_v15 = vpop.eup %21218  ;;  %v15438_v63 = vadd.f32 1e-05, %v15406_v8  ;;  %v15500_v50 = vmul.f32 %v21217_v28, %v26606_v0  ;;  %v15952_v0 = vld [vmem:[%s27086_s11 + $0x30] sm:$0xff] }
 0xca5   :  { %v15437_v16 = vadd.f32 1e-05, %v15405_v29  ;;  %v15499_v17 = vmul.f32 %v21219_v15, %v26609_v55  ;;  %v15953_v55 = vld [vmem:[%s27086_s11 + $0x38] sm:$0xff] }
 0xca6   :  { %21220 = vrsqrt.f32 %v15438_v63  ;;  %v15539_v33 = vmul.f32 %v26680_v26, %v15500_v50  ;;  %v20021_v7 = vpack.c.bf16 %v15953_v55, %v15952_v0 }
 0xca7   :  { %21222 = vrsqrt.f32 %v15437_v16  ;;  %v15538_v1 = vmul.f32 %v26680_v26, %v15499_v17 }
 0xca8   :  { %v15578_v49 = vadd.f32 %v26687_v43, %v15539_v33  ;;  %20022 = vmatprep.subr.bf16.mxu1 %v20021_v7 }
 0xca9   :  { %v15577_v51 = vadd.f32 %v26687_v43, %v15538_v1  ;;  %20024 = vmatpush3.bf16.msra.mxu1 %v20021_v7 }
 0xcab   :  { %19199 = vmatprep.mubr.msk.f32.mxu0 %vm403_vm2, %v15577_v51 }
 0xcac   :  { %19200 = vmatmul.mubr.msk.f32.gmra.mrb[206].mxu0 %vm403_vm2, %v15578_v49 }
 0xcad   :  { %v15364_v46 = vpop.xlane.xlu1 %15363 }
 0xcae   :  { %v15408_v56 = vmul.f32 0.03125, %v15364_v46  ;;  %v15361_v62 = vpop.xlane.xlu0 %15360 }
 0xcaf   :  { %v15407_v14 = vmul.f32 0.03125, %v15361_v62 }
 0xcb0   :  { %v21221_v37 = vpop.eup %21220  ;;  %v15440_v23 = vadd.f32 1e-05, %v15408_v56 }
 0xcb1   :  { %v21223_v12 = vpop.eup %21222  ;;  %v15439_v47 = vadd.f32 1e-05, %v15407_v14  ;;  %v15502_v45 = vmul.f32 %v21221_v37, %v26618_v31 }
 0xcb2   :  { %21224 = vrsqrt.f32 %v15440_v23  ;;  %v15501_v30 = vmul.f32 %v21223_v12, %v26621_v41 }
 0xcb3   :  { %21226 = vrsqrt.f32 %v15439_v47  ;;  %v15541_v60 = vmul.f32 %v26680_v26, %v15502_v45 }
 0xcb4   :  { %v15540_v3 = vmul.f32 %v26680_v26, %v15501_v30 }
 0xcb5   :  { %v15580_v38 = vadd.f32 %v26687_v43, %v15541_v60 }
 0xcb6   :  { %v15579_v32 = vadd.f32 %v26687_v43, %v15540_v3 }
 0xcb8   :  { %19202 = vmatprep.mubr.msk.f32.mxu0 %vm403_vm2, %v15579_v32 }
 0xcb9   :  { %v15370_v36 = vpop.xlane.xlu1 %15369  ;;  %19203 = vmatmul.mubr.msk.f32.gmra.mrb[208].mxu0 %vm403_vm2, %v15580_v38 }
 0xcba   :  { %v15410_v11 = vmul.f32 0.03125, %v15370_v36  ;;  %v15367_v13 = vpop.xlane.xlu0 %15366 }
 0xcbb   :  { %v15409_v31 = vmul.f32 0.03125, %v15367_v13 }
 0xcbc   :  { %v21225_v2 = vpop.eup %21224  ;;  %v15442_v24 = vadd.f32 1e-05, %v15410_v11 }
 0xcbd   :  { %v21227_v41 = vpop.eup %21226  ;;  %v15441_v40 = vadd.f32 1e-05, %v15409_v31  ;;  %v15504_v35 = vmul.f32 %v21225_v2, %v26630_v53 }
 0xcbe   :  { %21228 = vrsqrt.f32 %v15442_v24  ;;  %v15503_v58 = vmul.f32 %v21227_v41, %v26633_v34 }
 0xcbf   :  { %21230 = vrsqrt.f32 %v15441_v40  ;;  %v15543_v8 = vmul.f32 %v26680_v26, %v15504_v35 }
 0xcc0   :  { %v15542_v19 = vmul.f32 %v26680_v26, %v15503_v58 }
 0xcc1   :  { %v15582_v29 = vadd.f32 %v26687_v43, %v15543_v8 }
 0xcc2   :  { %v15581_v28 = vadd.f32 %v26687_v43, %v15542_v19 }
 0xcc4   :  { %19205 = vmatprep.mubr.msk.f32.mxu0 %vm403_vm2, %v15581_v28 }
 0xcc5   :  { %v15376_v15 = vpop.xlane.xlu1 %15375  ;;  %19206 = vmatmul.mubr.msk.f32.gmra.mrb[210].mxu0 %vm403_vm2, %v15582_v29 }
 0xcc6   :  { %v15412_v63 = vmul.f32 0.03125, %v15376_v15  ;;  %v15373_v50 = vpop.xlane.xlu0 %15372 }
 0xcc7   :  { %v15411_v53 = vmul.f32 0.03125, %v15373_v50 }
 0xcc8   :  { %v21229_v16 = vpop.eup %21228  ;;  %v15444_v17 = vadd.f32 1e-05, %v15412_v63 }
 0xcc9   :  { %v21231_v34 = vpop.eup %21230  ;;  %v15443_v33 = vadd.f32 1e-05, %v15411_v53  ;;  %v15506_v1 = vmul.f32 %v21229_v16, %v26642_v57 }
 0xcca   :  { %21232 = vrsqrt.f32 %v15444_v17  ;;  %v15505_v51 = vmul.f32 %v21231_v34, %v26645_v61 }
 0xccb   :  { %21234 = vrsqrt.f32 %v15443_v33  ;;  %v15545_v49 = vmul.f32 %v26680_v26, %v15506_v1 }
 0xccc   :  { %v15544_v0 = vmul.f32 %v26680_v26, %v15505_v51 }
 0xccd   :  { %v15584_v46 = vadd.f32 %v26687_v43, %v15545_v49  ;;  %v16308_v49 = vld [vmem:[%s27087_s12] sm:$0xff] }
 0xcce   :  { %v15583_v55 = vadd.f32 %v26687_v43, %v15544_v0  ;;  %v16309_v0 = vld [vmem:[%s27087_s12 + $0x8] sm:$0xff] }
 0xcd0   :  { %19208 = vmatprep.mubr.msk.f32.mxu0 %vm403_vm2, %v15583_v55 }
 0xcd1   :  { %v15382_v7 = vpop.xlane.xlu1 %15381  ;;  %19209 = vmatmul.mubr.msk.f32.gmra.mrb[212].mxu0 %vm403_vm2, %v15584_v46  ;;  %v20025_v46 = vpack.c.bf16 %v16309_v0, %v16308_v49 }
 0xcd2   :  { %v15414_v56 = vmul.f32 0.03125, %v15382_v7  ;;  %v15379_v62 = vpop.xlane.xlu0 %15378 }
 0xcd3   :  { %v15413_v57 = vmul.f32 0.03125, %v15379_v62  ;;  %20026 = vmatprep.subr.bf16.mxu0 %v20025_v46 }
 0xcd4   :  { %v21233_v14 = vpop.eup %21232  ;;  %v15446_v37 = vadd.f32 1e-05, %v15414_v56  ;;  %20028 = vmatpush3.bf16.msra.mxu0 %v20025_v46 }
 0xcd5   :  { %v21235_v61 = vpop.eup %21234  ;;  %v15445_v23 = vadd.f32 1e-05, %v15413_v57  ;;  %v15508_v12 = vmul.f32 %v21233_v14, %v26654_v48 }
 0xcd6   :  { %21236 = vrsqrt.f32 %v15446_v37  ;;  %v15507_v47 = vmul.f32 %v21235_v61, %v26657_v39 }
 0xcd7   :  { %21238 = vrsqrt.f32 %v15445_v23  ;;  %v15547_v45 = vmul.f32 %v26680_v26, %v15508_v12 }
 0xcd8   :  { %v15546_v30 = vmul.f32 %v26680_v26, %v15507_v47 }
 0xcd9   :  { %v15586_v3 = vadd.f32 %v26687_v43, %v15547_v45 }
 0xcda   :  { %v15585_v60 = vadd.f32 %v26687_v43, %v15546_v30 }
 0xcdc   :  { %19211 = vmatprep.mubr.msk.f32.mxu0 %vm403_vm2, %v15585_v60 }
 0xcdd   :  { %19212 = vmatmul.mubr.msk.f32.gmra.mrb[214].mxu0 %vm403_vm2, %v15586_v3 }
 0xce0   :  { %v21237_v32 = vpop.eup %21236 }
 0xce1   :  { %v21239_v38 = vpop.eup %21238  ;;  %v15510_v48 = vmul.f32 %v21237_v32, %v26666_v44 }
 0xce2   :  { %v15509_v36 = vmul.f32 %v21239_v38, %v26669_v25 }
 0xce3   :  { %v15549_v39 = vmul.f32 %v26680_v26, %v15510_v48 }
 0xce4   :  { %v15548_v11 = vmul.f32 %v26680_v26, %v15509_v36 }
 0xce5   :  { %v15588_v31 = vadd.f32 %v26687_v43, %v15549_v39 }
 0xce6   :  { %v15587_v13 = vadd.f32 %v26687_v43, %v15548_v11  ;;  %v16310_v11 = vld [vmem:[%s27087_s12 + $0x10] sm:$0xff] }
 0xce8   :  { %19214 = vmatprep.mubr.msk.f32.mxu0 %vm403_vm2, %v15587_v13  ;;  %v16311_v13 = vld [vmem:[%s27087_s12 + $0x18] sm:$0xff] }
 0xce9   :  { %19215 = vmatmul.mubr.msk.f32.gmra.mrb[216].mxu0 %vm403_vm2, %v15588_v31  ;;  %v20029_v31 = vpack.c.bf16 %v16311_v13, %v16310_v11  ;;  %v28263_v13 = vld [vmem:[#allocation157_spill] sm:$0xff] }
 0xceb   :  { %20030 = vmatprep.subr.bf16.mxu0 %v20029_v31 }
 0xcec   :  { %20032 = vmatpush3.bf16.msra.mxu0 %v20029_v31 }
 0xd2b   :  { %v19171_v2 = vpop.f32.mrb[186].mxu0 }
 0xd2c   :  { %v15755_v24 = vpop.f32.mrb[187].mxu0  ;;  %v15915_v40 = vmax.f32 %v19171_v2, 0.0 }
 0xd2d   :  { %v15914_v41 = vmax.f32 %v15755_v24, 0.0 }
 0xd2f   :  { %v19174_v44 = vpop.f32.mrb[188].mxu0  ;;  %19233 = vmatprep.mubr.msk.f32.mxu1 %vm15954_vm7, %v15914_v41 }
 0xd30   :  { %v15765_v25 = vpop.f32.mrb[189].mxu0  ;;  %19234 = vmatmul.mubr.msk.f32.vlgmr.msra.gmra.mrb[198].mxu1 %vm15954_vm7, %v15915_v40  ;;  %v15917_v35 = vmax.f32 %v19174_v44, 0.0 }
 0xd31   :  { %v15916_v26 = vmax.f32 %v15765_v25, 0.0 }
 0xd33   :  { %v19177_v58 = vpop.f32.mrb[190].mxu0  ;;  %19236 = vmatprep.mubr.msk.f32.mxu1 %vm15954_vm7, %v15916_v26 }
 0xd34   :  { %v15775_v43 = vpop.f32.mrb[191].mxu0  ;;  %19237 = vmatmul.mubr.msk.f32.gmra.mrb[200].mxu1 %vm15954_vm7, %v15917_v35  ;;  %v15919_v19 = vmax.f32 %v19177_v58, 0.0 }
 0xd35   :  { %v15918_v8 = vmax.f32 %v15775_v43, 0.0 }
 0xd37   :  { %v19180_v28 = vpop.f32.mrb[192].mxu0  ;;  %19239 = vmatprep.mubr.msk.f32.mxu1 %vm15954_vm7, %v15918_v8 }
 0xd38   :  { %v15785_v29 = vpop.f32.mrb[193].mxu0  ;;  %19240 = vmatmul.mubr.msk.f32.gmra.mrb[202].mxu1 %vm15954_vm7, %v15919_v19  ;;  %v15921_v63 = vmax.f32 %v19180_v28, 0.0 }
 0xd39   :  { %v15920_v15 = vmax.f32 %v15785_v29, 0.0 }
 0xd3b   :  { %v19183_v50 = vpop.f32.mrb[194].mxu0  ;;  %19242 = vmatprep.mubr.msk.f32.mxu1 %vm15954_vm7, %v15920_v15 }
 0xd3c   :  { %v15795_v53 = vpop.f32.mrb[195].mxu0  ;;  %19243 = vmatmul.mubr.msk.f32.gmra.mrb[204].mxu1 %vm15954_vm7, %v15921_v63  ;;  %v15923_v17 = vmax.f32 %v19183_v50, 0.0 }
 0xd3d   :  { %v15922_v16 = vmax.f32 %v15795_v53, 0.0 }
 0xd3f   :  { %v19186_v34 = vpop.f32.mrb[196].mxu0  ;;  %19245 = vmatprep.mubr.msk.f32.mxu1 %vm15954_vm7, %v15922_v16 }
 0xd40   :  { %v15805_v33 = vpop.f32.mrb[197].mxu0  ;;  %19246 = vmatmul.mubr.msk.f32.gmra.mrb[206].mxu1 %vm15954_vm7, %v15923_v17  ;;  %v15925_v51 = vmax.f32 %v19186_v34, 0.0 }
 0xd41   :  { %v15924_v1 = vmax.f32 %v15805_v33, 0.0 }
 0xd43   :  { %v19189_v55 = vpop.f32.mrb[198].mxu0  ;;  %19248 = vmatprep.mubr.msk.f32.mxu1 %vm15954_vm7, %v15924_v1 }
 0xd44   :  { %v15815_v7 = vpop.f32.mrb[199].mxu0  ;;  %19249 = vmatmul.mubr.msk.f32.gmra.mrb[208].mxu1 %vm15954_vm7, %v15925_v51  ;;  %v15927_v62 = vmax.f32 %v19189_v55, 0.0 }
 0xd45   :  { %v15926_v56 = vmax.f32 %v15815_v7, 0.0 }
 0xd47   :  { %v19192_v57 = vpop.f32.mrb[200].mxu0  ;;  %19251 = vmatprep.mubr.msk.f32.mxu1 %vm15954_vm7, %v15926_v56 }
 0xd48   :  { %v15825_v14 = vpop.f32.mrb[201].mxu0  ;;  %19252 = vmatmul.mubr.msk.f32.gmra.mrb[210].mxu1 %vm15954_vm7, %v15927_v62  ;;  %v15929_v61 = vmax.f32 %v19192_v57, 0.0 }
 0xd49   :  { %v15928_v37 = vmax.f32 %v15825_v14, 0.0 }
 0xd4b   :  { %v19195_v23 = vpop.f32.mrb[202].mxu0  ;;  %19254 = vmatprep.mubr.msk.f32.mxu1 %vm15954_vm7, %v15928_v37 }
 0xd4c   :  { %v15835_v12 = vpop.f32.mrb[203].mxu0  ;;  %19255 = vmatmul.mubr.msk.f32.gmra.mrb[212].mxu1 %vm15954_vm7, %v15929_v61  ;;  %v15931_v45 = vmax.f32 %v19195_v23, 0.0 }
 0xd4d   :  { %v15930_v47 = vmax.f32 %v15835_v12, 0.0 }
 0xd4f   :  { %19257 = vmatprep.mubr.msk.f32.mxu1 %vm15954_vm7, %v15930_v47 }
 0xd50   :  { %19258 = vmatmul.mubr.msk.f32.gmra.mrb[214].mxu1 %vm15954_vm7, %v15931_v45 }
 0xd57   :  { %v19198_v30 = vpop.f32.mrb[204].mxu0 }
 0xd58   :  { %v15845_v60 = vpop.f32.mrb[205].mxu0  ;;  %v15933_v32 = vmax.f32 %v19198_v30, 0.0 }
 0xd59   :  { %v15932_v3 = vmax.f32 %v15845_v60, 0.0  ;;  %v28259_v60 = vld [vmem:[#allocation70_spill] sm:$0xff] }
 0xd5b   :  { %19260 = vmatprep.mubr.msk.f32.mxu1 %vm15954_vm7, %v15932_v3  ;;  %v28260_v3 = vld [vmem:[#allocation52_spill] sm:$0xff] }
 0xd5c   :  { %19261 = vmatmul.mubr.msk.f32.gmra.mrb[216].mxu1 %vm15954_vm7, %v15933_v32 }
 0xd7f   :  { %v19201_v38 = vpop.f32.mrb[206].mxu0 }
 0xd80   :  { %v15855_v48 = vpop.f32.mrb[207].mxu0  ;;  %v15935_v39 = vmax.f32 %v19201_v38, 0.0 }
 0xd81   :  { %v15934_v36 = vmax.f32 %v15855_v48, 0.0  ;;  %v28261_v48 = vld [vmem:[#allocation73_spill] sm:$0xff] }
 0xd83   :  { %19263 = vmatprep.mubr.msk.f32.mxu1 %vm15954_vm7, %v15934_v36  ;;  %v28262_v36 = vld [vmem:[#allocation54_spill] sm:$0xff] }
 0xd84   :  { %19264 = vmatmul.mubr.msk.f32.gmra.mrb[218].mxu1 %vm15954_vm7, %v15935_v39 }
 0xd8c   :  { %v19204_v2 = vpop.f32.mrb[208].mxu0 }
 0xd8d   :  { %v15865_v24 = vpop.f32.mrb[209].mxu0  ;;  %v15937_v40 = vmax.f32 %v19204_v2, 0.0  ;;  %v28264_v2 = vld [vmem:[#allocation77_spill] sm:$0xff] }
 0xd8e   :  { %v15936_v41 = vmax.f32 %v15865_v24, 0.0 }
 0xd90   :  { %19266 = vmatprep.mubr.msk.f32.mxu1 %vm15954_vm7, %v15936_v41 }
 0xd91   :  { %19267 = vmatmul.mubr.msk.f32.gmra.mrb[220].mxu1 %vm15954_vm7, %v15937_v40 }
 0xd98   :  { %v19207_v44 = vpop.f32.mrb[210].mxu0 }
 0xd99   :  { %v15875_v25 = vpop.f32.mrb[211].mxu0  ;;  %v15939_v35 = vmax.f32 %v19207_v44, 0.0  ;;  %v28265_v44 = vld [vmem:[#allocation189_spill] sm:$0xff] }
 0xd9a   :  { %v15938_v26 = vmax.f32 %v15875_v25, 0.0 }
 0xd9c   :  { %19269 = vmatprep.mubr.msk.f32.mxu1 %vm15954_vm7, %v15938_v26  ;;  %v28266_v26 = vld [vmem:[#allocation78_spill] sm:$0xff] }
 0xd9d   :  { %19270 = vmatmul.mubr.msk.f32.gmra.mrb[222].mxu1 %vm15954_vm7, %v15939_v35 }
 0xda4   :  { %v19210_v58 = vpop.f32.mrb[212].mxu0 }
 0xda5   :  { %v15885_v43 = vpop.f32.mrb[213].mxu0  ;;  %v15941_v19 = vmax.f32 %v19210_v58, 0.0 }
 0xda6   :  { %v15940_v8 = vmax.f32 %v15885_v43, 0.0 }
 0xda8   :  { %19272 = vmatprep.mubr.msk.f32.mxu1 %vm15954_vm7, %v15940_v8  ;;  %v28267_v8 = vld [vmem:[#allocation81_spill] sm:$0xff] }
 0xda9   :  { %19273 = vmatmul.mubr.msk.f32.gmra.mrb[224].mxu1 %vm15954_vm7, %v15941_v19 }
 0xdb0   :  { %v19213_v28 = vpop.f32.mrb[214].mxu0 }
 0xdb1   :  { %v15895_v29 = vpop.f32.mrb[215].mxu0  ;;  %v15943_v63 = vmax.f32 %v19213_v28, 0.0  ;;  %v28268_v28 = vld [vmem:[#allocation127_spill] sm:$0xff] }
 0xdb2   :  { %v15942_v15 = vmax.f32 %v15895_v29, 0.0 }
 0xdb4   :  { %19275 = vmatprep.mubr.msk.f32.mxu1 %vm15954_vm7, %v15942_v15 }
 0xdb5   :  { %19276 = vmatmul.mubr.msk.f32.gmra.mrb[226].mxu1 %vm15954_vm7, %v15943_v63 }
 0xdbc   :  { %v19216_v50 = vpop.f32.mrb[216].mxu0 }
 0xdbd   :  { %v15905_v53 = vpop.f32.mrb[217].mxu0  ;;  %v15945_v17 = vmax.f32 %v19216_v50, 0.0  ;;  %v28269_v50 = vld [vmem:[#allocation68_spill] sm:$0xff] }
 0xdbe   :  { %v15944_v16 = vmax.f32 %v15905_v53, 0.0 }
 0xdc0   :  { %19278 = vmatprep.mubr.msk.f32.mxu1 %vm15954_vm7, %v15944_v16  ;;  %v28270_v16 = vld [vmem:[#allocation188_spill] sm:$0xff] }
 0xdc1   :  { %19279 = vmatmul.mubr.msk.f32.gmra.mrb[228].mxu1 %vm15954_vm7, %v15945_v17 }
 0xe03   :  { %v19235_v34 = vpop.f32.mrb[198].mxu1 }
 0xe04   :  { %v16117_v33 = vpop.f32.mrb[199].mxu1  ;;  %v16277_v51 = vadd.f32 %v19235_v34, %v26223_v9 }
 0xe05   :  { %v16276_v1 = vadd.f32 %v16117_v33, %v26227_v18 }
 0xe07   :  { %v19238_v49 = vpop.f32.mrb[200].mxu1  ;;  %19289 = vmatprep.mubr.msk.f32.mxu0 %vm403_vm2, %v16276_v1  ;;  %v28271_v1 = vld [vmem:[#allocation84_spill] sm:$0xff] }
 0xe08   :  { %v16127_v0 = vpop.f32.mrb[201].mxu1  ;;  %19290 = vmatmul.mubr.msk.f32.vlgmr.msra.gmra.mrb[218].mxu0 %vm403_vm2, %v16277_v51  ;;  %v16279_v46 = vadd.f32 %v19238_v49, %v26264_v42  ;;  %v28272_v49 = vld [vmem:[#allocation163_spill] sm:$0xff] }
 0xe09   :  { %v16278_v55 = vadd.f32 %v16127_v0, %v26267_v20 }
 0xe0b   :  { %v19241_v7 = vpop.f32.mrb[202].mxu1  ;;  %19292 = vmatprep.mubr.msk.f32.mxu0 %vm403_vm2, %v16278_v55 }
 0xe0c   :  { %v16137_v56 = vpop.f32.mrb[203].mxu1  ;;  %19293 = vmatmul.mubr.msk.f32.gmra.mrb[220].mxu0 %vm403_vm2, %v16279_v46  ;;  %v16281_v9 = vadd.f32 %v19241_v7, %v26276_v5  ;;  %v28273_v7 = vld [vmem:[#allocation85_spill] sm:$0xff] }
 0xe0d   :  { %v16280_v18 = vadd.f32 %v16137_v56, %v26282_v59 }
 0xe0f   :  { %v19244_v62 = vpop.f32.mrb[204].mxu1  ;;  %19295 = vmatprep.mubr.msk.f32.mxu0 %vm403_vm2, %v16280_v18  ;;  %v28274_v18 = vld [vmem:[#allocation160_spill] sm:$0xff] }
 0xe10   :  { %v16147_v57 = vpop.f32.mrb[205].mxu1  ;;  %19296 = vmatmul.mubr.msk.f32.gmra.mrb[222].mxu0 %vm403_vm2, %v16281_v9  ;;  %v16283_v42 = vadd.f32 %v19244_v62, %v26323_v4 }
 0xe11   :  { %v16282_v20 = vadd.f32 %v16147_v57, %v26327_v21 }
 0xe13   :  { %v19247_v14 = vpop.f32.mrb[206].mxu1  ;;  %19298 = vmatprep.mubr.msk.f32.mxu0 %vm403_vm2, %v16282_v20  ;;  %v28275_v20 = vld [vmem:[#allocation133_spill] sm:$0xff] }
 0xe14   :  { %v16157_v37 = vpop.f32.mrb[207].mxu1  ;;  %19299 = vmatmul.mubr.msk.f32.gmra.mrb[224].mxu0 %vm403_vm2, %v16283_v42  ;;  %v16285_v5 = vadd.f32 %v19247_v14, %v26343_v10  ;;  %v28276_v14 = vld [vmem:[#allocation139_spill] sm:$0xff] }
 0xe15   :  { %v16284_v59 = vadd.f32 %v16157_v37, %v26347_v54 }
 0xe17   :  { %v19250_v61 = vpop.f32.mrb[208].mxu1  ;;  %19301 = vmatprep.mubr.msk.f32.mxu0 %vm403_vm2, %v16284_v59 }
 0xe18   :  { %v16167_v23 = vpop.f32.mrb[209].mxu1  ;;  %19302 = vmatmul.mubr.msk.f32.gmra.mrb[226].mxu0 %vm403_vm2, %v16285_v5  ;;  %v16287_v4 = vadd.f32 %v19250_v61, %v26363_v27 }
 0xe19   :  { %v16286_v21 = vadd.f32 %v16167_v23, %v26367_v52 }
 0xe1b   :  { %v19253_v12 = vpop.f32.mrb[210].mxu1  ;;  %19304 = vmatprep.mubr.msk.f32.mxu0 %vm403_vm2, %v16286_v21 }
 0xe1c   :  { %v16177_v47 = vpop.f32.mrb[211].mxu1  ;;  %19305 = vmatmul.mubr.msk.f32.gmra.mrb[228].mxu0 %vm403_vm2, %v16287_v4  ;;  %v16289_v10 = vadd.f32 %v19253_v12, %v26374_v6 }
 0xe1d   :  { %v16288_v54 = vadd.f32 %v16177_v47, %v26377_v22 }
 0xe1f   :  { %v19256_v45 = vpop.f32.mrb[212].mxu1  ;;  %19307 = vmatprep.mubr.msk.f32.mxu0 %vm403_vm2, %v16288_v54 }
 0xe20   :  { %v16187_v30 = vpop.f32.mrb[213].mxu1  ;;  %19308 = vmatmul.mubr.msk.f32.gmra.mrb[230].mxu0 %vm403_vm2, %v16289_v10  ;;  %v16291_v27 = vadd.f32 %v19256_v45, %v28260_v3 }
 0xe21   :  { %v16290_v52 = vadd.f32 %v16187_v30, %v28259_v60 }
 0xe23   :  { %v19259_v32 = vpop.f32.mrb[214].mxu1  ;;  %19310 = vmatprep.mubr.msk.f32.mxu0 %vm403_vm2, %v16290_v52 }
 0xe24   :  { %v16197_v38 = vpop.f32.mrb[215].mxu1  ;;  %19311 = vmatmul.mubr.msk.f32.gmra.mrb[232].mxu0 %vm403_vm2, %v16291_v27  ;;  %v16293_v6 = vadd.f32 %v19259_v32, %v28262_v36 }
 0xe25   :  { %v16292_v22 = vadd.f32 %v16197_v38, %v28261_v48 }
 0xe27   :  { %19313 = vmatprep.mubr.msk.f32.mxu0 %vm403_vm2, %v16292_v22 }
 0xe28   :  { %19314 = vmatmul.mubr.msk.f32.gmra.mrb[234].mxu0 %vm403_vm2, %v16293_v6 }
 0xe2f   :  { %v19262_v39 = vpop.f32.mrb[216].mxu1 }
 0xe30   :  { %v16207_v11 = vpop.f32.mrb[217].mxu1  ;;  %v16295_v24 = vadd.f32 %v19262_v39, %v28264_v2 }
 0xe31   :  { %v16294_v31 = vadd.f32 %v16207_v11, %v28263_v13 }
 0xe33   :  { %19316 = vmatprep.mubr.msk.f32.mxu0 %vm403_vm2, %v16294_v31 }
 0xe34   :  { %19317 = vmatmul.mubr.msk.f32.gmra.mrb[236].mxu0 %vm403_vm2, %v16295_v24 }
 0xe57   :  { %v19265_v41 = vpop.f32.mrb[218].mxu1 }
 0xe58   :  { %v16217_v40 = vpop.f32.mrb[219].mxu1  ;;  %v16297_v35 = vadd.f32 %v19265_v41, %v28266_v26 }
 0xe59   :  { %v16296_v25 = vadd.f32 %v16217_v40, %v28265_v44 }
 0xe5b   :  { %19319 = vmatprep.mubr.msk.f32.mxu0 %vm403_vm2, %v16296_v25 }
 0xe5c   :  { %19320 = vmatmul.mubr.msk.f32.gmra.mrb[238].mxu0 %vm403_vm2, %v16297_v35 }
 0xe64   :  { %v19268_v58 = vpop.f32.mrb[220].mxu1 }
 0xe65   :  { %v16227_v43 = vpop.f32.mrb[221].mxu1  ;;  %v16299_v29 = vadd.f32 %v19268_v58, %v28268_v28 }
 0xe66   :  { %v16298_v19 = vadd.f32 %v16227_v43, %v28267_v8 }
 0xe68   :  { %19322 = vmatprep.mubr.msk.f32.mxu0 %vm403_vm2, %v16298_v19 }
 0xe69   :  { %19323 = vmatmul.mubr.msk.f32.gmra.mrb[240].mxu0 %vm403_vm2, %v16299_v29 }
 0xe70   :  { %v19271_v15 = vpop.f32.mrb[222].mxu1 }
 0xe71   :  { %v16237_v63 = vpop.f32.mrb[223].mxu1  ;;  %v16301_v17 = vadd.f32 %v19271_v15, %v28270_v16 }
 0xe72   :  { %v16300_v53 = vadd.f32 %v16237_v63, %v28269_v50 }
 0xe74   :  { %19325 = vmatprep.mubr.msk.f32.mxu0 %vm403_vm2, %v16300_v53 }
 0xe75   :  { %19326 = vmatmul.mubr.msk.f32.gmra.mrb[242].mxu0 %vm403_vm2, %v16301_v17 }
 0xe7c   :  { %v19274_v34 = vpop.f32.mrb[224].mxu1 }
 0xe7d   :  { %v16247_v33 = vpop.f32.mrb[225].mxu1  ;;  %v16303_v0 = vadd.f32 %v19274_v34, %v28272_v49 }
 0xe7e   :  { %v16302_v51 = vadd.f32 %v16247_v33, %v28271_v1 }
 0xe80   :  { %19328 = vmatprep.mubr.msk.f32.mxu0 %vm403_vm2, %v16302_v51 }
 0xe81   :  { %19329 = vmatmul.mubr.msk.f32.gmra.mrb[244].mxu0 %vm403_vm2, %v16303_v0 }
 0xe88   :  { %v19277_v55 = vpop.f32.mrb[226].mxu1 }
 0xe89   :  { %v16257_v46 = vpop.f32.mrb[227].mxu1  ;;  %v16305_v9 = vadd.f32 %v19277_v55, %v28274_v18 }
 0xe8a   :  { %v16304_v56 = vadd.f32 %v16257_v46, %v28273_v7 }
 0xe8c   :  { %19331 = vmatprep.mubr.msk.f32.mxu0 %vm403_vm2, %v16304_v56 }
 0xe8d   :  { %19332 = vmatmul.mubr.msk.f32.gmra.mrb[246].mxu0 %vm403_vm2, %v16305_v9 }
 0xe94   :  { %v19280_v62 = vpop.f32.mrb[228].mxu1 }
 0xe95   :  { %v16267_v57 = vpop.f32.mrb[229].mxu1  ;;  %v16307_v37 = vadd.f32 %v19280_v62, %v28276_v14 }
 0xe96   :  { %v16306_v42 = vadd.f32 %v16267_v57, %v28275_v20 }
 0xe98   :  { %19334 = vmatprep.mubr.msk.f32.mxu0 %vm403_vm2, %v16306_v42 }
 0xe99   :  { %19335 = vmatmul.mubr.msk.f32.gmra.mrb[248].mxu0 %vm403_vm2, %v16307_v37 }
 0xedb   :  { %v19291_v59 = vpop.f32.mrb[218].mxu0 }
 0xedc   :  { %16634 = vst.msk [vmem:[%s27088_s13 + $0x8] sm:$0xff] %vm77_vm1, %v19291_v59  ;;  %v16474_v5 = vpop.f32.mrb[219].mxu0 }
 0xedd   :  { %16633 = vst.msk [vmem:[%s27088_s13] sm:$0xff] %vm77_vm1, %v16474_v5 }
 0xedf   :  { %v19294_v61 = vpop.f32.mrb[220].mxu0 }
 0xee0   :  { %16636 = vst.msk [vmem:[%s27088_s13 + $0x18] sm:$0xff] %vm77_vm1, %v19294_v61  ;;  %v16484_v23 = vpop.f32.mrb[221].mxu0 }
 0xee1   :  { %16635 = vst.msk [vmem:[%s27088_s13 + $0x10] sm:$0xff] %vm77_vm1, %v16484_v23 }
 0xee3   :  { %v19297_v21 = vpop.f32.mrb[222].mxu0 }
 0xee4   :  { %16638 = vst.msk [vmem:[%s27088_s13 + $0x28] sm:$0xff] %vm77_vm1, %v19297_v21  ;;  %v16494_v4 = vpop.f32.mrb[223].mxu0 }
 0xee5   :  { %16637 = vst.msk [vmem:[%s27088_s13 + $0x20] sm:$0xff] %vm77_vm1, %v16494_v4 }
 0xee7   :  { %v19300_v12 = vpop.f32.mrb[224].mxu0 }
 0xee8   :  { %16640 = vst.msk [vmem:[%s27088_s13 + $0x38] sm:$0xff] %vm77_vm1, %v19300_v12  ;;  %v16504_v47 = vpop.f32.mrb[225].mxu0 }
 0xee9   :  { %16639 = vst.msk [vmem:[%s27088_s13 + $0x30] sm:$0xff] %vm77_vm1, %v16504_v47 }
 0xeeb   :  { %v19303_v54 = vpop.f32.mrb[226].mxu0 }
 0xeec   :  { %16642 = vst.msk [vmem:[%s27088_s13 + $0x48] sm:$0xff] %vm77_vm1, %v19303_v54  ;;  %v16514_v10 = vpop.f32.mrb[227].mxu0 }
 0xeed   :  { %16641 = vst.msk [vmem:[%s27088_s13 + $0x40] sm:$0xff] %vm77_vm1, %v16514_v10 }
 0xeef   :  { %v19306_v45 = vpop.f32.mrb[228].mxu0 }
 0xef0   :  { %16644 = vst.msk [vmem:[%s27088_s13 + $0x58] sm:$0xff] %vm77_vm1, %v19306_v45  ;;  %v16524_v30 = vpop.f32.mrb[229].mxu0 }
 0xef1   :  { %16643 = vst.msk [vmem:[%s27088_s13 + $0x50] sm:$0xff] %vm77_vm1, %v16524_v30 }
 0xef3   :  { %v19309_v60 = vpop.f32.mrb[230].mxu0 }
 0xef4   :  { %16646 = vst.msk [vmem:[%s27088_s13 + $0x68] sm:$0xff] %vm77_vm1, %v19309_v60  ;;  %v16534_v52 = vpop.f32.mrb[231].mxu0 }
 0xef5   :  { %16645 = vst.msk [vmem:[%s27088_s13 + $0x60] sm:$0xff] %vm77_vm1, %v16534_v52 }
 0xef7   :  { %v19312_v3 = vpop.f32.mrb[232].mxu0 }
 0xef8   :  { %16648 = vst.msk [vmem:[%s27088_s13 + $0x78] sm:$0xff] %vm77_vm1, %v19312_v3  ;;  %v16544_v27 = vpop.f32.mrb[233].mxu0 }
 0xef9   :  { %16647 = vst.msk [vmem:[%s27088_s13 + $0x70] sm:$0xff] %vm77_vm1, %v16544_v27 }
 0xefb   :  { %v19315_v32 = vpop.f32.mrb[234].mxu0 }
 0xefc   :  { %16650 = vst.msk [vmem:[%s27088_s13 + $0x88] sm:$0xff] %vm77_vm1, %v19315_v32  ;;  %v16554_v38 = vpop.f32.mrb[235].mxu0 }
 0xefd   :  { %16649 = vst.msk [vmem:[%s27088_s13 + $0x80] sm:$0xff] %vm77_vm1, %v16554_v38 }
 0xf07   :  { %v19318_v48 = vpop.f32.mrb[236].mxu0 }
 0xf08   :  { %16652 = vst.msk [vmem:[%s27088_s13 + $0x98] sm:$0xff] %vm77_vm1, %v19318_v48  ;;  %v16564_v22 = vpop.f32.mrb[237].mxu0 }
 0xf09   :  { %16651 = vst.msk [vmem:[%s27088_s13 + $0x90] sm:$0xff] %vm77_vm1, %v16564_v22 }
 0xf2f   :  { %v19321_v36 = vpop.f32.mrb[238].mxu0 }
 0xf30   :  { %16654 = vst.msk [vmem:[%s27088_s13 + $0xa8] sm:$0xff] %vm77_vm1, %v19321_v36  ;;  %v16574_v6 = vpop.f32.mrb[239].mxu0 }
 0xf31   :  { %16653 = vst.msk [vmem:[%s27088_s13 + $0xa0] sm:$0xff] %vm77_vm1, %v16574_v6 }
 0xf3c   :  { %v19324_v39 = vpop.f32.mrb[240].mxu0 }
 0xf3d   :  { %16656 = vst.msk [vmem:[%s27088_s13 + $0xb8] sm:$0xff] %vm77_vm1, %v19324_v39  ;;  %v16584_v11 = vpop.f32.mrb[241].mxu0 }
 0xf3e   :  { %16655 = vst.msk [vmem:[%s27088_s13 + $0xb0] sm:$0xff] %vm77_vm1, %v16584_v11 }
 0xf48   :  { %v19327_v13 = vpop.f32.mrb[242].mxu0 }
 0xf49   :  { %16658 = vst.msk [vmem:[%s27088_s13 + $0xc8] sm:$0xff] %vm77_vm1, %v19327_v13  ;;  %v16594_v31 = vpop.f32.mrb[243].mxu0 }
 0xf4a   :  { %16657 = vst.msk [vmem:[%s27088_s13 + $0xc0] sm:$0xff] %vm77_vm1, %v16594_v31 }
 0xf54   :  { %v19330_v2 = vpop.f32.mrb[244].mxu0 }
 0xf55   :  { %16660 = vst.msk [vmem:[%s27088_s13 + $0xd8] sm:$0xff] %vm77_vm1, %v19330_v2  ;;  %v16604_v24 = vpop.f32.mrb[245].mxu0 }
 0xf56   :  { %16659 = vst.msk [vmem:[%s27088_s13 + $0xd0] sm:$0xff] %vm77_vm1, %v16604_v24 }
 0xf60   :  { %v19333_v41 = vpop.f32.mrb[246].mxu0 }
 0xf61   :  { %16662 = vst.msk [vmem:[%s27088_s13 + $0xe8] sm:$0xff] %vm77_vm1, %v19333_v41  ;;  %v16614_v40 = vpop.f32.mrb[247].mxu0 }
 0xf62   :  { %16661 = vst.msk [vmem:[%s27088_s13 + $0xe0] sm:$0xff] %vm77_vm1, %v16614_v40 }
 0xf6c   :  { %v19336_v44 = vpop.f32.mrb[248].mxu0 }
 0xf6d   :  { %16664 = vst.msk [vmem:[%s27088_s13 + $0xf8] sm:$0xff] %vm77_vm1, %v19336_v44  ;;  %v16624_v25 = vpop.f32.mrb[249].mxu0 }
 0xf6e   :  { %16663 = vst.msk [vmem:[%s27088_s13 + $0xf0] sm:$0xff] %vm77_vm1, %v16624_v25 }

</bundles_post_ra>
